<compile_context>
chip_gen: v7x
topology: tpu7x:2x2x1
jax: 0.10.0
libtpu: 0.0.40
codegen_flags: <defaults>
</compile_context>

<pallas_src>
import functools

import jax
import jax.numpy as jnp
from jax.experimental import pallas as pl
from jax.experimental.pallas import tpu as pltpu

TM = 256        # GEMM row tile (output-position axis)
TM_EW = 512     # row tile for the element-wise BN-affine/ReLU kernel
M_ALIGN = 512   # rows padded to a multiple of this (divisible by TM and TM_EW)
TK_MAX = 2048   # K tile when the reduction axis is large


def _round_up(x, m):
    return (x + m - 1) // m * m


# ---------------------------------------------------------------------------
# Pallas kernels
# ---------------------------------------------------------------------------
def _gemm_stats_kernel(a_ref, b_ref, y_ref, sum_ref, sq_ref):
    """(TM,tk) @ (tk,N) accumulated into y (f32); per-channel sum / sum-sq
    fused into the epilogue on the last K step."""
    i = pl.program_id(0)
    k = pl.program_id(1)

    @pl.when(k == 0)
    def _():
        y_ref[...] = jnp.zeros_like(y_ref)

    @pl.when((i == 0) & (k == 0))
    def _():
        sum_ref[...] = jnp.zeros_like(sum_ref)
        sq_ref[...] = jnp.zeros_like(sq_ref)

    y_ref[...] += jnp.dot(a_ref[...], b_ref[...],
                          preferred_element_type=jnp.float32)

    @pl.when(k == pl.num_programs(1) - 1)
    def _():
        y = y_ref[...]
        sum_ref[...] += jnp.sum(y, axis=0, keepdims=True)
        sq_ref[...] += jnp.sum(y * y, axis=0, keepdims=True)


def _gemm_bias_act_kernel(a_ref, b_ref, bias_ref, y_ref, acc_ref, *, act):
    """GEMM with bias + activation fused into the epilogue (no BN)."""
    k = pl.program_id(1)

    @pl.when(k == 0)
    def _():
        acc_ref[...] = jnp.zeros_like(acc_ref)

    acc_ref[...] += jnp.dot(a_ref[...], b_ref[...],
                            preferred_element_type=jnp.float32)

    @pl.when(k == pl.num_programs(1) - 1)
    def _():
        y = acc_ref[...] + bias_ref[...]
        if act == "relu":
            y = jnp.maximum(y, 0.0)
        y_ref[...] = y.astype(y_ref.dtype)


def _affine_act_kernel(y_ref, scale_ref, shift_ref, o_ref, *, act):
    """BN affine (y*scale + shift) + activation.  Math in f32; store may be bf16."""
    y = y_ref[...] * scale_ref[...] + shift_ref[...]
    if act == "relu":
        y = jnp.maximum(y, 0.0)
    o_ref[...] = y.astype(o_ref.dtype)


# ---------------------------------------------------------------------------
# pallas_call wrappers
# ---------------------------------------------------------------------------
def _pallas_gemm_stats(a, b, tk):
    M_pad, K_pad = a.shape
    N_pad = b.shape[1]
    return pl.pallas_call(
        _gemm_stats_kernel,
        out_shape=(jax.ShapeDtypeStruct((M_pad, N_pad), jnp.float32),
                   jax.ShapeDtypeStruct((1, N_pad), jnp.float32),
                   jax.ShapeDtypeStruct((1, N_pad), jnp.float32)),
        grid=(M_pad // TM, K_pad // tk),
        in_specs=[pl.BlockSpec((TM, tk), lambda i, k: (i, k)),
                  pl.BlockSpec((tk, N_pad), lambda i, k: (k, 0))],
        out_specs=(pl.BlockSpec((TM, N_pad), lambda i, k: (i, 0)),
                   pl.BlockSpec((1, N_pad), lambda i, k: (0, 0)),
                   pl.BlockSpec((1, N_pad), lambda i, k: (0, 0))),
        compiler_params=pltpu.CompilerParams(
            dimension_semantics=("arbitrary", "arbitrary")),
    )(a, b)


def _pallas_gemm_bias_act(a, b, bias, act, tk, out_dtype):
    M_pad, K_pad = a.shape
    N_pad = b.shape[1]
    return pl.pallas_call(
        functools.partial(_gemm_bias_act_kernel, act=act),
        out_shape=jax.ShapeDtypeStruct((M_pad, N_pad), out_dtype),
        grid=(M_pad // TM, K_pad // tk),
        in_specs=[pl.BlockSpec((TM, tk), lambda i, k: (i, k)),
                  pl.BlockSpec((tk, N_pad), lambda i, k: (k, 0)),
                  pl.BlockSpec((1, N_pad), lambda i, k: (0, 0))],
        out_specs=pl.BlockSpec((TM, N_pad), lambda i, k: (i, 0)),
        scratch_shapes=[pltpu.VMEM((TM, N_pad), jnp.float32)],
        compiler_params=pltpu.CompilerParams(
            dimension_semantics=("parallel", "arbitrary")),
    )(a, b, bias)


def _pallas_affine_act(y, scale, shift, act, out_dtype):
    M_pad, N_pad = y.shape
    return pl.pallas_call(
        functools.partial(_affine_act_kernel, act=act),
        out_shape=jax.ShapeDtypeStruct((M_pad, N_pad), out_dtype),
        grid=(M_pad // TM_EW,),
        in_specs=[pl.BlockSpec((TM_EW, N_pad), lambda i: (i, 0)),
                  pl.BlockSpec((1, N_pad), lambda i: (0, 0)),
                  pl.BlockSpec((1, N_pad), lambda i: (0, 0))],
        out_specs=pl.BlockSpec((TM_EW, N_pad), lambda i: (i, 0)),
        compiler_params=pltpu.CompilerParams(
            dimension_semantics=("parallel",)),
    )(y, scale, shift)


# ---------------------------------------------------------------------------
# Plain-JAX glue: im2col, pooling, resize
# ---------------------------------------------------------------------------
def _im2col_2d(x, k, pad):
    """x: (N,C,H,W) -> patches (N*Ho*Wo, C*k*k), columns ordered (C, kh, kw)."""
    N, C, H, W = x.shape
    xp = jnp.pad(x, ((0, 0), (0, 0), (pad, pad), (pad, pad))) if pad else x
    Ho = H + 2 * pad - k + 1
    Wo = W + 2 * pad - k + 1
    slabs = []
    for kh in range(k):
        for kw in range(k):
            slabs.append(xp[:, :, kh:kh + Ho, kw:kw + Wo])
    p = jnp.stack(slabs, axis=2)             # (N, C, k*k, Ho, Wo)
    p = p.transpose(0, 3, 4, 1, 2)           # (N, Ho, Wo, C, k*k)
    return p.reshape(N * Ho * Wo, C * k * k), (N, Ho, Wo)


def _gemm_dims(M, K, Cout):
    M_pad = _round_up(M, M_ALIGN)
    K_pad = _round_up(K, 128)
    if K_pad > TK_MAX:
        K_pad = _round_up(K_pad, TK_MAX)
        tk = TK_MAX
    else:
        tk = K_pad
    N_pad = _round_up(Cout, 128)
    return M_pad, K_pad, tk, N_pad


def _avg_pool2(x):
    # F.interpolate(scale_factor=0.5, mode='bilinear', align_corners=False)
    # at exact factor 0.5 == 2x2 average pooling.
    N, C, H, W = x.shape
    return x.reshape(N, C, H // 2, 2, W // 2, 2).mean(axis=(3, 5))


def _max_pool(x, f):
    N, C, H, W = x.shape
    return x.reshape(N, C, H // f, f, W // f, f).max(axis=(3, 5))


def _up(x, f):
    # TODO(synk): the exact upsampling in the top_* / up_final parts is not in
    # the spec; bilinear (align_corners=False) is assumed.
    N, C, H, W = x.shape
    y = jax.image.resize(x.astype(jnp.float32), (N, C, H * f, W * f),
                         method="bilinear")
    return y.astype(x.dtype)


# ---------------------------------------------------------------------------
# Conv blocks
# ---------------------------------------------------------------------------
def _conv_bn_relu(x, w, gamma, beta, out_dtype=jnp.bfloat16):
    """Conv2d(k, pad=(k-1)//2) + training-mode BatchNorm2d + ReLU.

    The conv bias (if any) is omitted: with batch-stat BN it cancels exactly
    in the forward pass.
    TODO(synk): running_mean/running_var momentum updates are a training-only
    side effect and are not modeled (no effect on the forward output).
    """
    Cout = w.shape[0]
    k = w.shape[2]
    pad = (k - 1) // 2
    patches, (N, Ho, Wo) = _im2col_2d(x, k, pad)
    M, K = patches.shape
    M_pad, K_pad, tk, N_pad = _gemm_dims(M, K, Cout)

    a = jnp.pad(patches.astype(jnp.bfloat16), ((0, M_pad - M), (0, K_pad - K)))
    b = jnp.pad(w.reshape(Cout, -1).T.astype(jnp.bfloat16),
                ((0, K_pad - K), (0, N_pad - Cout)))

    y, s, sq = _pallas_gemm_stats(a, b, tk)          # padded rows contribute 0

    # Batch statistics over all N*Ho*Wo positions (biased variance), f32.
    mean = s / M
    var = jnp.maximum(sq / M - mean * mean, 0.0)
    inv = jax.lax.rsqrt(var + 1e-5)
    gamma_p = jnp.pad(gamma, (0, N_pad - Cout)).reshape(1, N_pad)
    beta_p = jnp.pad(beta, (0, N_pad - Cout)).reshape(1, N_pad)
    scale = gamma_p * inv                            # pad lanes: gamma=0 -> 0
    shift = beta_p - mean * scale

    out = _pallas_affine_act(y, scale, shift, "relu", out_dtype)
    out = out[:M, :Cout].reshape(N, Ho, Wo, Cout).transpose(0, 3, 1, 2)
    return out


def _conv_bias_act(x, w, bias, act, out_dtype=jnp.float32):
    """Conv2d with bias and optional activation, no BN (fully fused GEMM)."""
    Cout = w.shape[0]
    k = w.shape[2]
    pad = (k - 1) // 2
    patches, (N, Ho, Wo) = _im2col_2d(x, k, pad)
    M, K = patches.shape
    M_pad, K_pad, tk, N_pad = _gemm_dims(M, K, Cout)

    a = jnp.pad(patches.astype(jnp.bfloat16), ((0, M_pad - M), (0, K_pad - K)))
    b = jnp.pad(w.reshape(Cout, -1).T.astype(jnp.bfloat16),
                ((0, K_pad - K), (0, N_pad - Cout)))
    bias_p = jnp.pad(bias.astype(jnp.float32), (0, N_pad - Cout)).reshape(1, N_pad)

    y = _pallas_gemm_bias_act(a, b, bias_p, act, tk, out_dtype)
    out = y[:M, :Cout].reshape(N, Ho, Wo, Cout).transpose(0, 3, 1, 2)
    return out


def _double_conv(x, p, name):
    # TODO(synk): unet_parts definitions are not in the spec; the standard
    # (Conv -> BN -> ReLU) x 2 block is assumed for every part.
    x = _conv_bn_relu(x, p[f"{name}_w1"], p[f"{name}_g1"], p[f"{name}_b1"])
    x = _conv_bn_relu(x, p[f"{name}_w2"], p[f"{name}_g2"], p[f"{name}_b2"])
    return x


# ---------------------------------------------------------------------------
# UNet_HRPXP forward
# ---------------------------------------------------------------------------
def unet_hrpxp_forward(x_init, params):
    p = params

    # Full-resolution guidance branch (1x1 double conv, inconv_k1).
    x1_g1 = _double_conv(x_init, p, "inc_g1")

    # x_init_d2 = F.interpolate(x_init, scale_factor=0.5, mode='bilinear')
    x_init_d2 = _avg_pool2(x_init)

    x1 = _double_conv(x_init_d2, p, "inc")                       # L1, n
    x1_2 = _double_conv(x1, p, "top1_2")                         # L1, n
    x2 = _double_conv(_max_pool(x1, 2), p, "down2")              # L2, 2n

    x1_3 = _double_conv(
        jnp.concatenate([x1_2, _up(x2, 2)], axis=1), p, "top1_3")          # L1, n
    x2_3 = _double_conv(
        jnp.concatenate([x2, _max_pool(x1_2, 2)], axis=1), p, "down2_3")   # L2, 2n
    x3 = _double_conv(
        jnp.concatenate([_max_pool(x2, 2), _max_pool(x1_2, 4)], axis=1),
        p, "down3")                                                        # L3, 4n

    x1_4 = _double_conv(
        jnp.concatenate([x1_3, _up(x2_3, 2), _up(x3, 4)], axis=1),
        p, "top1_4")                                                       # L1, n
    x2_4 = _double_conv(
        jnp.concatenate([x2_3, _max_pool(x1_3, 2), _up(x3, 2)], axis=1),
        p, "down2_4")                                                      # L2, 2n
    x3_4 = _double_conv(
        jnp.concatenate([x3, _max_pool(x2_3, 2), _max_pool(x1_3, 4)], axis=1),
        p, "down3_4")                                                      # L3, 4n
    x4 = _double_conv(
        jnp.concatenate([_max_pool(x3, 2), _max_pool(x2_3, 4),
                         _max_pool(x1_3, 8)], axis=1), p, "down4")         # L4, 8n

    xo = _double_conv(
        jnp.concatenate([x1_4, _up(x2_4, 2), _up(x3_4, 4), _up(x4, 8)], axis=1),
        p, "outc")                                                         # L1, n
    x_g2 = jnp.maximum(xo, 0).astype(jnp.bfloat16)               # F.relu(outc(...))

    # up_final_no: upsample to full resolution, fuse the full-resolution
    # guidance features, 3x3 conv -> 1 channel, no activation.
    # TODO(synk): exact up_final_no wiring (concat vs residual add of x1_g1)
    # is not in the spec; a residual add is assumed here.
    x_full = _up(x_g2, 2) + x1_g1
    x = _conv_bias_act(x_full, p["upfinal_w"], p["upfinal_b"], act="none")

    f32 = lambda t: t.astype(jnp.float32)
    return (f32(x), f32(x_g2), f32(x4), f32(x3_4), f32(x2_4), f32(x1_4))


# ---------------------------------------------------------------------------
# Parameter init
# ---------------------------------------------------------------------------
def init_params(key, n_channels, n_init):
    n = n_init
    specs = {
        "inc_g1": (n_channels, n, 1),
        "inc": (n_channels, n, 3),
        "top1_2": (n, n, 3),
        "down2": (n, 2 * n, 3),
        "top1_3": (3 * n, n, 3),
        "down2_3": (3 * n, 2 * n, 3),
        "down3": (3 * n, 4 * n, 3),
        "top1_4": (7 * n, n, 3),
        "down2_4": (7 * n, 2 * n, 3),
        "down3_4": (7 * n, 4 * n, 3),
        "down4": (7 * n, 8 * n, 3),
        "outc": (15 * n, n, 3),
    }
    keys = jax.random.split(key, 2 * len(specs) + 1)
    params = {}
    i = 0
    for name, (cin, cout, k) in specs.items():
        params[f"{name}_w1"] = 0.1 * jax.random.normal(
            keys[i], (cout, cin, k, k), jnp.float32); i += 1
        params[f"{name}_g1"] = jnp.ones((cout,), jnp.float32)
        params[f"{name}_b1"] = jnp.zeros((cout,), jnp.float32)
        params[f"{name}_w2"] = 0.1 * jax.random.normal(
            keys[i], (cout, cout, k, k), jnp.float32); i += 1
        params[f"{name}_g2"] = jnp.ones((cout,), jnp.float32)
        params[f"{name}_b2"] = jnp.zeros((cout,), jnp.float32)
    params["upfinal_w"] = 0.1 * jax.random.normal(
        keys[i], (1, n, 3, 3), jnp.float32)
    params["upfinal_b"] = jnp.zeros((1,), jnp.float32)
    return params


if __name__ == "__main__":
    n_channels, n_init = 1, 8
    N, H, W = 2, 32, 32

    key = jax.random.PRNGKey(0)
    k_p, k_x = jax.random.split(key)
    params = init_params(k_p, n_channels, n_init)
    x_init = jax.random.normal(k_x, (N, n_channels, H, W), jnp.float32)

    fwd = jax.jit(unet_hrpxp_forward)
    outs = jax.block_until_ready(fwd(x_init, params))
    x, x_g2, x4, x3_4, x2_4, x1_4 = outs

    assert x.shape == (N, 1, H, W), x.shape
    assert x_g2.shape == (N, n_init, H // 2, W // 2), x_g2.shape
    assert x4.shape == (N, n_init * 8, H // 16, W // 16), x4.shape
    assert x3_4.shape == (N, n_init * 4, H // 8, W // 8), x3_4.shape
    assert x2_4.shape == (N, n_init * 2, H // 4, W // 4), x2_4.shape
    assert x1_4.shape == (N, n_init, H // 2, W // 2), x1_4.shape
    for t in outs:
        assert bool(jnp.all(jnp.isfinite(t)))
    print("KERNEL_OK")
</pallas_src>

<mosaic_0001>
module attributes {stable_mosaic.version = 11 : i64} {
  func.func @_gemm_stats_kernel(%arg0: i32, %arg1: i32, %arg2: memref<256x128xbf16, #tpu.memory_space<vmem>>, %arg3: memref<128x128xbf16, #tpu.memory_space<vmem>>, %arg4: memref<256x128xf32, #tpu.memory_space<vmem>>, %arg5: memref<1x128xf32, #tpu.memory_space<vmem>>, %arg6: memref<1x128xf32, #tpu.memory_space<vmem>>) attributes {dimension_semantics = [#tpu.dimension_semantics<arbitrary>, #tpu.dimension_semantics<arbitrary>], iteration_bounds = array<i64: 2, 1>, scalar_prefetch = 0 : i64, scratch_operands = 0 : i64, tpu.core_type = #tpu.core_type<tc>, window_params = [{transform_indices = @transform_0, window_bounds = array<i64: 256, 128>}, {transform_indices = @transform_1, window_bounds = array<i64: 128, 128>}, {transform_indices = @transform_2, window_bounds = array<i64: 256, 128>}, {pipeline_mode = #tpu.pipeline_mode<synchronous>, transform_indices = @transform_3, window_bounds = array<i64: 1, 128>}, {pipeline_mode = #tpu.pipeline_mode<synchronous>, transform_indices = @transform_4, window_bounds = array<i64: 1, 128>}]} {
    %c0_i32 = arith.constant 0 : i32
    %0 = arith.cmpi eq, %arg1, %c0_i32 : i32
    %1 = arith.extui %0 : i1 to i32
    %c0_i32_0 = arith.constant 0 : i32
    %2 = arith.cmpi ne, %1, %c0_i32_0 : i32
    scf.if %2 {
      %cst_13 = arith.constant 0.000000e+00 : f32
      %17 = vector.broadcast %cst_13 : f32 to vector<256x128xf32>
      %c0_14 = arith.constant 0 : index
      %c0_15 = arith.constant 0 : index
      %18 = vector.load %arg4[%c0_14, %c0_15] : memref<256x128xf32, #tpu.memory_space<vmem>>, vector<256x128xf32>
      tpu.vector_store %arg4[%c0_14, %c0_15], %17 {strides = array<i32>} : memref<256x128xf32, #tpu.memory_space<vmem>>, vector<256x128xf32>,
    } else {
    }
    %c0_i32_1 = arith.constant 0 : i32
    %3 = arith.cmpi eq, %arg0, %c0_i32_1 : i32
    %c0_i32_2 = arith.constant 0 : i32
    %4 = arith.cmpi eq, %arg1, %c0_i32_2 : i32
    %5 = arith.andi %3, %4 : i1
    %6 = arith.extui %5 : i1 to i32
    %c0_i32_3 = arith.constant 0 : i32
    %7 = arith.cmpi ne, %6, %c0_i32_3 : i32
    scf.if %7 {
      %cst_13 = arith.constant 0.000000e+00 : f32
      %17 = vector.broadcast %cst_13 : f32 to vector<1x128xf32>
      %c0_14 = arith.constant 0 : index
      %c0_15 = arith.constant 0 : index
      %18 = vector.load %arg5[%c0_14, %c0_15] : memref<1x128xf32, #tpu.memory_space<vmem>>, vector<1x128xf32>
      tpu.vector_store %arg5[%c0_14, %c0_15], %17 {strides = array<i32>} : memref<1x128xf32, #tpu.memory_space<vmem>>, vector<1x128xf32>,
      %cst_16 = arith.constant 0.000000e+00 : f32
      %19 = vector.broadcast %cst_16 : f32 to vector<1x128xf32>
      %c0_17 = arith.constant 0 : index
      %c0_18 = arith.constant 0 : index
      %20 = vector.load %arg6[%c0_17, %c0_18] : memref<1x128xf32, #tpu.memory_space<vmem>>, vector<1x128xf32>
      tpu.vector_store %arg6[%c0_17, %c0_18], %19 {strides = array<i32>} : memref<1x128xf32, #tpu.memory_space<vmem>>, vector<1x128xf32>,
    } else {
    }
    %c0 = arith.constant 0 : index
    %c0_4 = arith.constant 0 : index
    %8 = vector.load %arg4[%c0, %c0_4] : memref<256x128xf32, #tpu.memory_space<vmem>>, vector<256x128xf32>
    %c0_5 = arith.constant 0 : index
    %c0_6 = arith.constant 0 : index
    %9 = vector.load %arg2[%c0_5, %c0_6] : memref<256x128xbf16, #tpu.memory_space<vmem>>, vector<256x128xbf16>
    %c0_7 = arith.constant 0 : index
    %c0_8 = arith.constant 0 : index
    %10 = vector.load %arg3[%c0_7, %c0_8] : memref<128x128xbf16, #tpu.memory_space<vmem>>, vector<128x128xbf16>
    %cst = arith.constant dense<0.000000e+00> : vector<256x128xf32>
    %11 = tpu.matmul %9, %10, %cst {dimension_numbers = #tpu.dot_dimension_numbers<[1], [0], [0], [1], [0, 0, 1, 1], [], []>} : vector<256x128xbf16>, vector<128x128xbf16>, vector<256x128xf32> -> vector<256x128xf32>
    %12 = arith.addf %8, %11 : vector<256x128xf32>
    %c0_9 = arith.constant 0 : index
    %c0_10 = arith.constant 0 : index
    %13 = vector.load %arg4[%c0_9, %c0_10] : memref<256x128xf32, #tpu.memory_space<vmem>>, vector<256x128xf32>
    tpu.vector_store %arg4[%c0_9, %c0_10], %12 {strides = array<i32>} : memref<256x128xf32, #tpu.memory_space<vmem>>, vector<256x128xf32>,
    %c0_i32_11 = arith.constant 0 : i32
    %14 = arith.cmpi eq, %arg1, %c0_i32_11 : i32
    %15 = arith.extui %14 : i1 to i32
    %c0_i32_12 = arith.constant 0 : i32
    %16 = arith.cmpi ne, %15, %c0_i32_12 : i32
    scf.if %16 {
      %c0_13 = arith.constant 0 : index
      %c0_14 = arith.constant 0 : index
      %17 = vector.load %arg4[%c0_13, %c0_14] : memref<256x128xf32, #tpu.memory_space<vmem>>, vector<256x128xf32>
      %c0_15 = arith.constant 0 : index
      %c0_16 = arith.constant 0 : index
      %18 = vector.load %arg5[%c0_15, %c0_16] : memref<1x128xf32, #tpu.memory_space<vmem>>, vector<1x128xf32>
      %cst_17 = arith.constant dense<0.000000e+00> : vector<128xf32>
      %19 = vector.multi_reduction <add>, %17, %cst_17 [0] : vector<256x128xf32> to vector<128xf32>
      %20 = vector.shape_cast %19 : vector<128xf32> to vector<1x128xf32>
      %21 = arith.addf %18, %20 : vector<1x128xf32>
      %c0_18 = arith.constant 0 : index
      %c0_19 = arith.constant 0 : index
      %22 = vector.load %arg5[%c0_18, %c0_19] : memref<1x128xf32, #tpu.memory_space<vmem>>, vector<1x128xf32>
      tpu.vector_store %arg5[%c0_18, %c0_19], %21 {strides = array<i32>} : memref<1x128xf32, #tpu.memory_space<vmem>>, vector<1x128xf32>,
      %c0_20 = arith.constant 0 : index
      %c0_21 = arith.constant 0 : index
      %23 = vector.load %arg6[%c0_20, %c0_21] : memref<1x128xf32, #tpu.memory_space<vmem>>, vector<1x128xf32>
      %24 = arith.mulf %17, %17 : vector<256x128xf32>
      %cst_22 = arith.constant dense<0.000000e+00> : vector<128xf32>
      %25 = vector.multi_reduction <add>, %24, %cst_22 [0] : vector<256x128xf32> to vector<128xf32>
      %26 = vector.shape_cast %25 : vector<128xf32> to vector<1x128xf32>
      %27 = arith.addf %23, %26 : vector<1x128xf32>
      %c0_23 = arith.constant 0 : index
      %c0_24 = arith.constant 0 : index
      %28 = vector.load %arg6[%c0_23, %c0_24] : memref<1x128xf32, #tpu.memory_space<vmem>>, vector<1x128xf32>
      tpu.vector_store %arg6[%c0_23, %c0_24], %27 {strides = array<i32>} : memref<1x128xf32, #tpu.memory_space<vmem>>, vector<1x128xf32>,
    } else {
    }
    return
  }
  func.func @transform_0(%arg0: i32, %arg1: i32) -> (i32, i32) {
    %c0_i32 = arith.constant 0 : i32
    return %arg0, %arg1 : i32, i32
  }
  func.func @transform_1(%arg0: i32, %arg1: i32) -> (i32, i32) {
    %c0_i32 = arith.constant 0 : i32
    %c0_i32_0 = arith.constant 0 : i32
    return %arg1, %c0_i32 : i32, i32
  }
  func.func @transform_2(%arg0: i32, %arg1: i32) -> (i32, i32) {
    %c0_i32 = arith.constant 0 : i32
    %c0_i32_0 = arith.constant 0 : i32
    return %arg0, %c0_i32 : i32, i32
  }
  func.func @transform_3(%arg0: i32, %arg1: i32) -> (i32, i32) {
    %c0_i32 = arith.constant 0 : i32
    %c0_i32_0 = arith.constant 0 : i32
    %c0_i32_1 = arith.constant 0 : i32
    return %c0_i32, %c0_i32_0 : i32, i32
  }
  func.func @transform_4(%arg0: i32, %arg1: i32) -> (i32, i32) {
    %c0_i32 = arith.constant 0 : i32
    %c0_i32_0 = arith.constant 0 : i32
    %c0_i32_1 = arith.constant 0 : i32
    return %c0_i32, %c0_i32_0 : i32, i32
  }
}

module attributes {stable_mosaic.version = 11 : i64} {
  func.func @_affine_act_kernel(%arg0: i32, %arg1: memref<512x128xf32, #tpu.memory_space<vmem>>, %arg2: memref<1x128xf32, #tpu.memory_space<vmem>>, %arg3: memref<1x128xf32, #tpu.memory_space<vmem>>, %arg4: memref<512x128xbf16, #tpu.memory_space<vmem>>) attributes {dimension_semantics = [#tpu.dimension_semantics<parallel>], iteration_bounds = array<i64: 1>, scalar_prefetch = 0 : i64, scratch_operands = 0 : i64, tpu.core_type = #tpu.core_type<tc>, window_params = [{transform_indices = @transform_0, window_bounds = array<i64: 512, 128>}, {pipeline_mode = #tpu.pipeline_mode<synchronous>, transform_indices = @transform_1, window_bounds = array<i64: 1, 128>}, {pipeline_mode = #tpu.pipeline_mode<synchronous>, transform_indices = @transform_2, window_bounds = array<i64: 1, 128>}, {transform_indices = @transform_3, window_bounds = array<i64: 512, 128>}]} {
    %c0 = arith.constant 0 : index
    %c0_0 = arith.constant 0 : index
    %0 = vector.load %arg1[%c0, %c0_0] : memref<512x128xf32, #tpu.memory_space<vmem>>, vector<512x128xf32>
    %c0_1 = arith.constant 0 : index
    %c0_2 = arith.constant 0 : index
    %1 = vector.load %arg2[%c0_1, %c0_2] : memref<1x128xf32, #tpu.memory_space<vmem>>, vector<1x128xf32>
    %2 = vector.broadcast %1 : vector<1x128xf32> to vector<512x128xf32>
    %3 = arith.mulf %0, %2 : vector<512x128xf32>
    %c0_3 = arith.constant 0 : index
    %c0_4 = arith.constant 0 : index
    %4 = vector.load %arg3[%c0_3, %c0_4] : memref<1x128xf32, #tpu.memory_space<vmem>>, vector<1x128xf32>
    %5 = vector.broadcast %4 : vector<1x128xf32> to vector<512x128xf32>
    %6 = arith.addf %3, %5 : vector<512x128xf32>
    %cst = arith.constant 0.000000e+00 : f32
    %7 = vector.broadcast %cst : f32 to vector<512x128xf32>
    %8 = arith.maximumf %6, %7 : vector<512x128xf32>
    %9 = arith.truncf %8 : vector<512x128xf32> to vector<512x128xbf16>
    %c0_5 = arith.constant 0 : index
    %c0_6 = arith.constant 0 : index
    %10 = vector.load %arg4[%c0_5, %c0_6] : memref<512x128xbf16, #tpu.memory_space<vmem>>, vector<512x128xbf16>
    tpu.vector_store %arg4[%c0_5, %c0_6], %9 {strides = array<i32>} : memref<512x128xbf16, #tpu.memory_space<vmem>>, vector<512x128xbf16>,
    return
  }
  func.func @transform_0(%arg0: i32) -> (i32, i32) {
    %c0_i32 = arith.constant 0 : i32
    %c0_i32_0 = arith.constant 0 : i32
    return %arg0, %c0_i32 : i32, i32
  }
  func.func @transform_1(%arg0: i32) -> (i32, i32) {
    %c0_i32 = arith.constant 0 : i32
    %c0_i32_0 = arith.constant 0 : i32
    %c0_i32_1 = arith.constant 0 : i32
    return %c0_i32, %c0_i32_0 : i32, i32
  }
  func.func @transform_2(%arg0: i32) -> (i32, i32) {
    %c0_i32 = arith.constant 0 : i32
    %c0_i32_0 = arith.constant 0 : i32
    %c0_i32_1 = arith.constant 0 : i32
    return %c0_i32, %c0_i32_0 : i32, i32
  }
  func.func @transform_3(%arg0: i32) -> (i32, i32) {
    %c0_i32 = arith.constant 0 : i32
    %c0_i32_0 = arith.constant 0 : i32
    return %arg0, %c0_i32 : i32, i32
  }
}

module attributes {stable_mosaic.version = 11 : i64} {
  func.func @_gemm_stats_kernel(%arg0: i32, %arg1: i32, %arg2: memref<256x256xbf16, #tpu.memory_space<vmem>>, %arg3: memref<256x128xbf16, #tpu.memory_space<vmem>>, %arg4: memref<256x128xf32, #tpu.memory_space<vmem>>, %arg5: memref<1x128xf32, #tpu.memory_space<vmem>>, %arg6: memref<1x128xf32, #tpu.memory_space<vmem>>) attributes {dimension_semantics = [#tpu.dimension_semantics<arbitrary>, #tpu.dimension_semantics<arbitrary>], iteration_bounds = array<i64: 2, 1>, scalar_prefetch = 0 : i64, scratch_operands = 0 : i64, tpu.core_type = #tpu.core_type<tc>, window_params = [{transform_indices = @transform_0, window_bounds = array<i64: 256, 256>}, {transform_indices = @transform_1, window_bounds = array<i64: 256, 128>}, {transform_indices = @transform_2, window_bounds = array<i64: 256, 128>}, {pipeline_mode = #tpu.pipeline_mode<synchronous>, transform_indices = @transform_3, window_bounds = array<i64: 1, 128>}, {pipeline_mode = #tpu.pipeline_mode<synchronous>, transform_indices = @transform_4, window_bounds = array<i64: 1, 128>}]} {
    %c0_i32 = arith.constant 0 : i32
    %0 = arith.cmpi eq, %arg1, %c0_i32 : i32
    %1 = arith.extui %0 : i1 to i32
    %c0_i32_0 = arith.constant 0 : i32
    %2 = arith.cmpi ne, %1, %c0_i32_0 : i32
    scf.if %2 {
      %cst_13 = arith.constant 0.000000e+00 : f32
      %17 = vector.broadcast %cst_13 : f32 to vector<256x128xf32>
      %c0_14 = arith.constant 0 : index
      %c0_15 = arith.constant 0 : index
      %18 = vector.load %arg4[%c0_14, %c0_15] : memref<256x128xf32, #tpu.memory_space<vmem>>, vector<256x128xf32>
      tpu.vector_store %arg4[%c0_14, %c0_15], %17 {strides = array<i32>} : memref<256x128xf32, #tpu.memory_space<vmem>>, vector<256x128xf32>,
    } else {
    }
    %c0_i32_1 = arith.constant 0 : i32
    %3 = arith.cmpi eq, %arg0, %c0_i32_1 : i32
    %c0_i32_2 = arith.constant 0 : i32
    %4 = arith.cmpi eq, %arg1, %c0_i32_2 : i32
    %5 = arith.andi %3, %4 : i1
    %6 = arith.extui %5 : i1 to i32
    %c0_i32_3 = arith.constant 0 : i32
    %7 = arith.cmpi ne, %6, %c0_i32_3 : i32
    scf.if %7 {
      %cst_13 = arith.constant 0.000000e+00 : f32
      %17 = vector.broadcast %cst_13 : f32 to vector<1x128xf32>
      %c0_14 = arith.constant 0 : index
      %c0_15 = arith.constant 0 : index
      %18 = vector.load %arg5[%c0_14, %c0_15] : memref<1x128xf32, #tpu.memory_space<vmem>>, vector<1x128xf32>
      tpu.vector_store %arg5[%c0_14, %c0_15], %17 {strides = array<i32>} : memref<1x128xf32, #tpu.memory_space<vmem>>, vector<1x128xf32>,
      %cst_16 = arith.constant 0.000000e+00 : f32
      %19 = vector.broadcast %cst_16 : f32 to vector<1x128xf32>
      %c0_17 = arith.constant 0 : index
      %c0_18 = arith.constant 0 : index
      %20 = vector.load %arg6[%c0_17, %c0_18] : memref<1x128xf32, #tpu.memory_space<vmem>>, vector<1x128xf32>
      tpu.vector_store %arg6[%c0_17, %c0_18], %19 {strides = array<i32>} : memref<1x128xf32, #tpu.memory_space<vmem>>, vector<1x128xf32>,
    } else {
    }
    %c0 = arith.constant 0 : index
    %c0_4 = arith.constant 0 : index
    %8 = vector.load %arg4[%c0, %c0_4] : memref<256x128xf32, #tpu.memory_space<vmem>>, vector<256x128xf32>
    %c0_5 = arith.constant 0 : index
    %c0_6 = arith.constant 0 : index
    %9 = vector.load %arg2[%c0_5, %c0_6] : memref<256x256xbf16, #tpu.memory_space<vmem>>, vector<256x256xbf16>
    %c0_7 = arith.constant 0 : index
    %c0_8 = arith.constant 0 : index
    %10 = vector.load %arg3[%c0_7, %c0_8] : memref<256x128xbf16, #tpu.memory_space<vmem>>, vector<256x128xbf16>
    %cst = arith.constant dense<0.000000e+00> : vector<256x128xf32>
    %11 = tpu.matmul %9, %10, %cst {dimension_numbers = #tpu.dot_dimension_numbers<[1], [0], [0], [1], [0, 0, 1, 1], [], []>} : vector<256x256xbf16>, vector<256x128xbf16>, vector<256x128xf32> -> vector<256x128xf32>
    %12 = arith.addf %8, %11 : vector<256x128xf32>
    %c0_9 = arith.constant 0 : index
    %c0_10 = arith.constant 0 : index
    %13 = vector.load %arg4[%c0_9, %c0_10] : memref<256x128xf32, #tpu.memory_space<vmem>>, vector<256x128xf32>
    tpu.vector_store %arg4[%c0_9, %c0_10], %12 {strides = array<i32>} : memref<256x128xf32, #tpu.memory_space<vmem>>, vector<256x128xf32>,
    %c0_i32_11 = arith.constant 0 : i32
    %14 = arith.cmpi eq, %arg1, %c0_i32_11 : i32
    %15 = arith.extui %14 : i1 to i32
    %c0_i32_12 = arith.constant 0 : i32
    %16 = arith.cmpi ne, %15, %c0_i32_12 : i32
    scf.if %16 {
      %c0_13 = arith.constant 0 : index
      %c0_14 = arith.constant 0 : index
      %17 = vector.load %arg4[%c0_13, %c0_14] : memref<256x128xf32, #tpu.memory_space<vmem>>, vector<256x128xf32>
      %c0_15 = arith.constant 0 : index
      %c0_16 = arith.constant 0 : index
      %18 = vector.load %arg5[%c0_15, %c0_16] : memref<1x128xf32, #tpu.memory_space<vmem>>, vector<1x128xf32>
      %cst_17 = arith.constant dense<0.000000e+00> : vector<128xf32>
      %19 = vector.multi_reduction <add>, %17, %cst_17 [0] : vector<256x128xf32> to vector<128xf32>
      %20 = vector.shape_cast %19 : vector<128xf32> to vector<1x128xf32>
      %21 = arith.addf %18, %20 : vector<1x128xf32>
      %c0_18 = arith.constant 0 : index
      %c0_19 = arith.constant 0 : index
      %22 = vector.load %arg5[%c0_18, %c0_19] : memref<1x128xf32, #tpu.memory_space<vmem>>, vector<1x128xf32>
      tpu.vector_store %arg5[%c0_18, %c0_19], %21 {strides = array<i32>} : memref<1x128xf32, #tpu.memory_space<vmem>>, vector<1x128xf32>,
      %c0_20 = arith.constant 0 : index
      %c0_21 = arith.constant 0 : index
      %23 = vector.load %arg6[%c0_20, %c0_21] : memref<1x128xf32, #tpu.memory_space<vmem>>, vector<1x128xf32>
      %24 = arith.mulf %17, %17 : vector<256x128xf32>
      %cst_22 = arith.constant dense<0.000000e+00> : vector<128xf32>
      %25 = vector.multi_reduction <add>, %24, %cst_22 [0] : vector<256x128xf32> to vector<128xf32>
      %26 = vector.shape_cast %25 : vector<128xf32> to vector<1x128xf32>
      %27 = arith.addf %23, %26 : vector<1x128xf32>
      %c0_23 = arith.constant 0 : index
      %c0_24 = arith.constant 0 : index
      %28 = vector.load %arg6[%c0_23, %c0_24] : memref<1x128xf32, #tpu.memory_space<vmem>>, vector<1x128xf32>
      tpu.vector_store %arg6[%c0_23, %c0_24], %27 {strides = array<i32>} : memref<1x128xf32, #tpu.memory_space<vmem>>, vector<1x128xf32>,
    } else {
    }
    return
  }
  func.func @transform_0(%arg0: i32, %arg1: i32) -> (i32, i32) {
    %c0_i32 = arith.constant 0 : i32
    return %arg0, %arg1 : i32, i32
  }
  func.func @transform_1(%arg0: i32, %arg1: i32) -> (i32, i32) {
    %c0_i32 = arith.constant 0 : i32
    %c0_i32_0 = arith.constant 0 : i32
    return %arg1, %c0_i32 : i32, i32
  }
  func.func @transform_2(%arg0: i32, %arg1: i32) -> (i32, i32) {
    %c0_i32 = arith.constant 0 : i32
    %c0_i32_0 = arith.constant 0 : i32
    return %arg0, %c0_i32 : i32, i32
  }
  func.func @transform_3(%arg0: i32, %arg1: i32) -> (i32, i32) {
    %c0_i32 = arith.constant 0 : i32
    %c0_i32_0 = arith.constant 0 : i32
    %c0_i32_1 = arith.constant 0 : i32
    return %c0_i32, %c0_i32_0 : i32, i32
  }
  func.func @transform_4(%arg0: i32, %arg1: i32) -> (i32, i32) {
    %c0_i32 = arith.constant 0 : i32
    %c0_i32_0 = arith.constant 0 : i32
    %c0_i32_1 = arith.constant 0 : i32
    return %c0_i32, %c0_i32_0 : i32, i32
  }
}

module attributes {stable_mosaic.version = 11 : i64} {
  func.func @_gemm_stats_kernel(%arg0: i32, %arg1: i32, %arg2: memref<256x384xbf16, #tpu.memory_space<vmem>>, %arg3: memref<384x128xbf16, #tpu.memory_space<vmem>>, %arg4: memref<256x128xf32, #tpu.memory_space<vmem>>, %arg5: memref<1x128xf32, #tpu.memory_space<vmem>>, %arg6: memref<1x128xf32, #tpu.memory_space<vmem>>) attributes {dimension_semantics = [#tpu.dimension_semantics<arbitrary>, #tpu.dimension_semantics<arbitrary>], iteration_bounds = array<i64: 2, 1>, scalar_prefetch = 0 : i64, scratch_operands = 0 : i64, tpu.core_type = #tpu.core_type<tc>, window_params = [{transform_indices = @transform_0, window_bounds = array<i64: 256, 384>}, {transform_indices = @transform_1, window_bounds = array<i64: 384, 128>}, {transform_indices = @transform_2, window_bounds = array<i64: 256, 128>}, {pipeline_mode = #tpu.pipeline_mode<synchronous>, transform_indices = @transform_3, window_bounds = array<i64: 1, 128>}, {pipeline_mode = #tpu.pipeline_mode<synchronous>, transform_indices = @transform_4, window_bounds = array<i64: 1, 128>}]} {
    %c0_i32 = arith.constant 0 : i32
    %0 = arith.cmpi eq, %arg1, %c0_i32 : i32
    %1 = arith.extui %0 : i1 to i32
    %c0_i32_0 = arith.constant 0 : i32
    %2 = arith.cmpi ne, %1, %c0_i32_0 : i32
    scf.if %2 {
      %cst_13 = arith.constant 0.000000e+00 : f32
      %17 = vector.broadcast %cst_13 : f32 to vector<256x128xf32>
      %c0_14 = arith.constant 0 : index
      %c0_15 = arith.constant 0 : index
      %18 = vector.load %arg4[%c0_14, %c0_15] : memref<256x128xf32, #tpu.memory_space<vmem>>, vector<256x128xf32>
      tpu.vector_store %arg4[%c0_14, %c0_15], %17 {strides = array<i32>} : memref<256x128xf32, #tpu.memory_space<vmem>>, vector<256x128xf32>,
    } else {
    }
    %c0_i32_1 = arith.constant 0 : i32
    %3 = arith.cmpi eq, %arg0, %c0_i32_1 : i32
    %c0_i32_2 = arith.constant 0 : i32
    %4 = arith.cmpi eq, %arg1, %c0_i32_2 : i32
    %5 = arith.andi %3, %4 : i1
    %6 = arith.extui %5 : i1 to i32
    %c0_i32_3 = arith.constant 0 : i32
    %7 = arith.cmpi ne, %6, %c0_i32_3 : i32
    scf.if %7 {
      %cst_13 = arith.constant 0.000000e+00 : f32
      %17 = vector.broadcast %cst_13 : f32 to vector<1x128xf32>
      %c0_14 = arith.constant 0 : index
      %c0_15 = arith.constant 0 : index
      %18 = vector.load %arg5[%c0_14, %c0_15] : memref<1x128xf32, #tpu.memory_space<vmem>>, vector<1x128xf32>
      tpu.vector_store %arg5[%c0_14, %c0_15], %17 {strides = array<i32>} : memref<1x128xf32, #tpu.memory_space<vmem>>, vector<1x128xf32>,
      %cst_16 = arith.constant 0.000000e+00 : f32
      %19 = vector.broadcast %cst_16 : f32 to vector<1x128xf32>
      %c0_17 = arith.constant 0 : index
      %c0_18 = arith.constant 0 : index
      %20 = vector.load %arg6[%c0_17, %c0_18] : memref<1x128xf32, #tpu.memory_space<vmem>>, vector<1x128xf32>
      tpu.vector_store %arg6[%c0_17, %c0_18], %19 {strides = array<i32>} : memref<1x128xf32, #tpu.memory_space<vmem>>, vector<1x128xf32>,
    } else {
    }
    %c0 = arith.constant 0 : index
    %c0_4 = arith.constant 0 : index
    %8 = vector.load %arg4[%c0, %c0_4] : memref<256x128xf32, #tpu.memory_space<vmem>>, vector<256x128xf32>
    %c0_5 = arith.constant 0 : index
    %c0_6 = arith.constant 0 : index
    %9 = vector.load %arg2[%c0_5, %c0_6] : memref<256x384xbf16, #tpu.memory_space<vmem>>, vector<256x384xbf16>
    %c0_7 = arith.constant 0 : index
    %c0_8 = arith.constant 0 : index
    %10 = vector.load %arg3[%c0_7, %c0_8] : memref<384x128xbf16, #tpu.memory_space<vmem>>, vector<384x128xbf16>
    %cst = arith.constant dense<0.000000e+00> : vector<256x128xf32>
    %11 = tpu.matmul %9, %10, %cst {dimension_numbers = #tpu.dot_dimension_numbers<[1], [0], [0], [1], [0, 0, 1, 1], [], []>} : vector<256x384xbf16>, vector<384x128xbf16>, vector<256x128xf32> -> vector<256x128xf32>
    %12 = arith.addf %8, %11 : vector<256x128xf32>
    %c0_9 = arith.constant 0 : index
    %c0_10 = arith.constant 0 : index
    %13 = vector.load %arg4[%c0_9, %c0_10] : memref<256x128xf32, #tpu.memory_space<vmem>>, vector<256x128xf32>
    tpu.vector_store %arg4[%c0_9, %c0_10], %12 {strides = array<i32>} : memref<256x128xf32, #tpu.memory_space<vmem>>, vector<256x128xf32>,
    %c0_i32_11 = arith.constant 0 : i32
    %14 = arith.cmpi eq, %arg1, %c0_i32_11 : i32
    %15 = arith.extui %14 : i1 to i32
    %c0_i32_12 = arith.constant 0 : i32
    %16 = arith.cmpi ne, %15, %c0_i32_12 : i32
    scf.if %16 {
      %c0_13 = arith.constant 0 : index
      %c0_14 = arith.constant 0 : index
      %17 = vector.load %arg4[%c0_13, %c0_14] : memref<256x128xf32, #tpu.memory_space<vmem>>, vector<256x128xf32>
      %c0_15 = arith.constant 0 : index
      %c0_16 = arith.constant 0 : index
      %18 = vector.load %arg5[%c0_15, %c0_16] : memref<1x128xf32, #tpu.memory_space<vmem>>, vector<1x128xf32>
      %cst_17 = arith.constant dense<0.000000e+00> : vector<128xf32>
      %19 = vector.multi_reduction <add>, %17, %cst_17 [0] : vector<256x128xf32> to vector<128xf32>
      %20 = vector.shape_cast %19 : vector<128xf32> to vector<1x128xf32>
      %21 = arith.addf %18, %20 : vector<1x128xf32>
      %c0_18 = arith.constant 0 : index
      %c0_19 = arith.constant 0 : index
      %22 = vector.load %arg5[%c0_18, %c0_19] : memref<1x128xf32, #tpu.memory_space<vmem>>, vector<1x128xf32>
      tpu.vector_store %arg5[%c0_18, %c0_19], %21 {strides = array<i32>} : memref<1x128xf32, #tpu.memory_space<vmem>>, vector<1x128xf32>,
      %c0_20 = arith.constant 0 : index
      %c0_21 = arith.constant 0 : index
      %23 = vector.load %arg6[%c0_20, %c0_21] : memref<1x128xf32, #tpu.memory_space<vmem>>, vector<1x128xf32>
      %24 = arith.mulf %17, %17 : vector<256x128xf32>
      %cst_22 = arith.constant dense<0.000000e+00> : vector<128xf32>
      %25 = vector.multi_reduction <add>, %24, %cst_22 [0] : vector<256x128xf32> to vector<128xf32>
      %26 = vector.shape_cast %25 : vector<128xf32> to vector<1x128xf32>
      %27 = arith.addf %23, %26 : vector<1x128xf32>
      %c0_23 = arith.constant 0 : index
      %c0_24 = arith.constant 0 : index
      %28 = vector.load %arg6[%c0_23, %c0_24] : memref<1x128xf32, #tpu.memory_space<vmem>>, vector<1x128xf32>
      tpu.vector_store %arg6[%c0_23, %c0_24], %27 {strides = array<i32>} : memref<1x128xf32, #tpu.memory_space<vmem>>, vector<1x128xf32>,
    } else {
    }
    return
  }
  func.func @transform_0(%arg0: i32, %arg1: i32) -> (i32, i32) {
    %c0_i32 = arith.constant 0 : i32
    return %arg0, %arg1 : i32, i32
  }
  func.func @transform_1(%arg0: i32, %arg1: i32) -> (i32, i32) {
    %c0_i32 = arith.constant 0 : i32
    %c0_i32_0 = arith.constant 0 : i32
    return %arg1, %c0_i32 : i32, i32
  }
  func.func @transform_2(%arg0: i32, %arg1: i32) -> (i32, i32) {
    %c0_i32 = arith.constant 0 : i32
    %c0_i32_0 = arith.constant 0 : i32
    return %arg0, %c0_i32 : i32, i32
  }
  func.func @transform_3(%arg0: i32, %arg1: i32) -> (i32, i32) {
    %c0_i32 = arith.constant 0 : i32
    %c0_i32_0 = arith.constant 0 : i32
    %c0_i32_1 = arith.constant 0 : i32
    return %c0_i32, %c0_i32_0 : i32, i32
  }
  func.func @transform_4(%arg0: i32, %arg1: i32) -> (i32, i32) {
    %c0_i32 = arith.constant 0 : i32
    %c0_i32_0 = arith.constant 0 : i32
    %c0_i32_1 = arith.constant 0 : i32
    return %c0_i32, %c0_i32_0 : i32, i32
  }
}

module attributes {stable_mosaic.version = 11 : i64} {
  func.func @_gemm_stats_kernel(%arg0: i32, %arg1: i32, %arg2: memref<256x512xbf16, #tpu.memory_space<vmem>>, %arg3: memref<512x128xbf16, #tpu.memory_space<vmem>>, %arg4: memref<256x128xf32, #tpu.memory_space<vmem>>, %arg5: memref<1x128xf32, #tpu.memory_space<vmem>>, %arg6: memref<1x128xf32, #tpu.memory_space<vmem>>) attributes {dimension_semantics = [#tpu.dimension_semantics<arbitrary>, #tpu.dimension_semantics<arbitrary>], iteration_bounds = array<i64: 2, 1>, scalar_prefetch = 0 : i64, scratch_operands = 0 : i64, tpu.core_type = #tpu.core_type<tc>, window_params = [{transform_indices = @transform_0, window_bounds = array<i64: 256, 512>}, {transform_indices = @transform_1, window_bounds = array<i64: 512, 128>}, {transform_indices = @transform_2, window_bounds = array<i64: 256, 128>}, {pipeline_mode = #tpu.pipeline_mode<synchronous>, transform_indices = @transform_3, window_bounds = array<i64: 1, 128>}, {pipeline_mode = #tpu.pipeline_mode<synchronous>, transform_indices = @transform_4, window_bounds = array<i64: 1, 128>}]} {
    %c0_i32 = arith.constant 0 : i32
    %0 = arith.cmpi eq, %arg1, %c0_i32 : i32
    %1 = arith.extui %0 : i1 to i32
    %c0_i32_0 = arith.constant 0 : i32
    %2 = arith.cmpi ne, %1, %c0_i32_0 : i32
    scf.if %2 {
      %cst_13 = arith.constant 0.000000e+00 : f32
      %17 = vector.broadcast %cst_13 : f32 to vector<256x128xf32>
      %c0_14 = arith.constant 0 : index
      %c0_15 = arith.constant 0 : index
      %18 = vector.load %arg4[%c0_14, %c0_15] : memref<256x128xf32, #tpu.memory_space<vmem>>, vector<256x128xf32>
      tpu.vector_store %arg4[%c0_14, %c0_15], %17 {strides = array<i32>} : memref<256x128xf32, #tpu.memory_space<vmem>>, vector<256x128xf32>,
    } else {
    }
    %c0_i32_1 = arith.constant 0 : i32
    %3 = arith.cmpi eq, %arg0, %c0_i32_1 : i32
    %c0_i32_2 = arith.constant 0 : i32
    %4 = arith.cmpi eq, %arg1, %c0_i32_2 : i32
    %5 = arith.andi %3, %4 : i1
    %6 = arith.extui %5 : i1 to i32
    %c0_i32_3 = arith.constant 0 : i32
    %7 = arith.cmpi ne, %6, %c0_i32_3 : i32
    scf.if %7 {
      %cst_13 = arith.constant 0.000000e+00 : f32
      %17 = vector.broadcast %cst_13 : f32 to vector<1x128xf32>
      %c0_14 = arith.constant 0 : index
      %c0_15 = arith.constant 0 : index
      %18 = vector.load %arg5[%c0_14, %c0_15] : memref<1x128xf32, #tpu.memory_space<vmem>>, vector<1x128xf32>
      tpu.vector_store %arg5[%c0_14, %c0_15], %17 {strides = array<i32>} : memref<1x128xf32, #tpu.memory_space<vmem>>, vector<1x128xf32>,
      %cst_16 = arith.constant 0.000000e+00 : f32
      %19 = vector.broadcast %cst_16 : f32 to vector<1x128xf32>
      %c0_17 = arith.constant 0 : index
      %c0_18 = arith.constant 0 : index
      %20 = vector.load %arg6[%c0_17, %c0_18] : memref<1x128xf32, #tpu.memory_space<vmem>>, vector<1x128xf32>
      tpu.vector_store %arg6[%c0_17, %c0_18], %19 {strides = array<i32>} : memref<1x128xf32, #tpu.memory_space<vmem>>, vector<1x128xf32>,
    } else {
    }
    %c0 = arith.constant 0 : index
    %c0_4 = arith.constant 0 : index
    %8 = vector.load %arg4[%c0, %c0_4] : memref<256x128xf32, #tpu.memory_space<vmem>>, vector<256x128xf32>
    %c0_5 = arith.constant 0 : index
    %c0_6 = arith.constant 0 : index
    %9 = vector.load %arg2[%c0_5, %c0_6] : memref<256x512xbf16, #tpu.memory_space<vmem>>, vector<256x512xbf16>
    %c0_7 = arith.constant 0 : index
    %c0_8 = arith.constant 0 : index
    %10 = vector.load %arg3[%c0_7, %c0_8] : memref<512x128xbf16, #tpu.memory_space<vmem>>, vector<512x128xbf16>
    %cst = arith.constant dense<0.000000e+00> : vector<256x128xf32>
    %11 = tpu.matmul %9, %10, %cst {dimension_numbers = #tpu.dot_dimension_numbers<[1], [0], [0], [1], [0, 0, 1, 1], [], []>} : vector<256x512xbf16>, vector<512x128xbf16>, vector<256x128xf32> -> vector<256x128xf32>
    %12 = arith.addf %8, %11 : vector<256x128xf32>
    %c0_9 = arith.constant 0 : index
    %c0_10 = arith.constant 0 : index
    %13 = vector.load %arg4[%c0_9, %c0_10] : memref<256x128xf32, #tpu.memory_space<vmem>>, vector<256x128xf32>
    tpu.vector_store %arg4[%c0_9, %c0_10], %12 {strides = array<i32>} : memref<256x128xf32, #tpu.memory_space<vmem>>, vector<256x128xf32>,
    %c0_i32_11 = arith.constant 0 : i32
    %14 = arith.cmpi eq, %arg1, %c0_i32_11 : i32
    %15 = arith.extui %14 : i1 to i32
    %c0_i32_12 = arith.constant 0 : i32
    %16 = arith.cmpi ne, %15, %c0_i32_12 : i32
    scf.if %16 {
      %c0_13 = arith.constant 0 : index
      %c0_14 = arith.constant 0 : index
      %17 = vector.load %arg4[%c0_13, %c0_14] : memref<256x128xf32, #tpu.memory_space<vmem>>, vector<256x128xf32>
      %c0_15 = arith.constant 0 : index
      %c0_16 = arith.constant 0 : index
      %18 = vector.load %arg5[%c0_15, %c0_16] : memref<1x128xf32, #tpu.memory_space<vmem>>, vector<1x128xf32>
      %cst_17 = arith.constant dense<0.000000e+00> : vector<128xf32>
      %19 = vector.multi_reduction <add>, %17, %cst_17 [0] : vector<256x128xf32> to vector<128xf32>
      %20 = vector.shape_cast %19 : vector<128xf32> to vector<1x128xf32>
      %21 = arith.addf %18, %20 : vector<1x128xf32>
      %c0_18 = arith.constant 0 : index
      %c0_19 = arith.constant 0 : index
      %22 = vector.load %arg5[%c0_18, %c0_19] : memref<1x128xf32, #tpu.memory_space<vmem>>, vector<1x128xf32>
      tpu.vector_store %arg5[%c0_18, %c0_19], %21 {strides = array<i32>} : memref<1x128xf32, #tpu.memory_space<vmem>>, vector<1x128xf32>,
      %c0_20 = arith.constant 0 : index
      %c0_21 = arith.constant 0 : index
      %23 = vector.load %arg6[%c0_20, %c0_21] : memref<1x128xf32, #tpu.memory_space<vmem>>, vector<1x128xf32>
      %24 = arith.mulf %17, %17 : vector<256x128xf32>
      %cst_22 = arith.constant dense<0.000000e+00> : vector<128xf32>
      %25 = vector.multi_reduction <add>, %24, %cst_22 [0] : vector<256x128xf32> to vector<128xf32>
      %26 = vector.shape_cast %25 : vector<128xf32> to vector<1x128xf32>
      %27 = arith.addf %23, %26 : vector<1x128xf32>
      %c0_23 = arith.constant 0 : index
      %c0_24 = arith.constant 0 : index
      %28 = vector.load %arg6[%c0_23, %c0_24] : memref<1x128xf32, #tpu.memory_space<vmem>>, vector<1x128xf32>
      tpu.vector_store %arg6[%c0_23, %c0_24], %27 {strides = array<i32>} : memref<1x128xf32, #tpu.memory_space<vmem>>, vector<1x128xf32>,
    } else {
    }
    return
  }
  func.func @transform_0(%arg0: i32, %arg1: i32) -> (i32, i32) {
    %c0_i32 = arith.constant 0 : i32
    return %arg0, %arg1 : i32, i32
  }
  func.func @transform_1(%arg0: i32, %arg1: i32) -> (i32, i32) {
    %c0_i32 = arith.constant 0 : i32
    %c0_i32_0 = arith.constant 0 : i32
    return %arg1, %c0_i32 : i32, i32
  }
  func.func @transform_2(%arg0: i32, %arg1: i32) -> (i32, i32) {
    %c0_i32 = arith.constant 0 : i32
    %c0_i32_0 = arith.constant 0 : i32
    return %arg0, %c0_i32 : i32, i32
  }
  func.func @transform_3(%arg0: i32, %arg1: i32) -> (i32, i32) {
    %c0_i32 = arith.constant 0 : i32
    %c0_i32_0 = arith.constant 0 : i32
    %c0_i32_1 = arith.constant 0 : i32
    return %c0_i32, %c0_i32_0 : i32, i32
  }
  func.func @transform_4(%arg0: i32, %arg1: i32) -> (i32, i32) {
    %c0_i32 = arith.constant 0 : i32
    %c0_i32_0 = arith.constant 0 : i32
    %c0_i32_1 = arith.constant 0 : i32
    return %c0_i32, %c0_i32_0 : i32, i32
  }
}

module attributes {stable_mosaic.version = 11 : i64} {
  func.func @_gemm_stats_kernel(%arg0: i32, %arg1: i32, %arg2: memref<256x640xbf16, #tpu.memory_space<vmem>>, %arg3: memref<640x128xbf16, #tpu.memory_space<vmem>>, %arg4: memref<256x128xf32, #tpu.memory_space<vmem>>, %arg5: memref<1x128xf32, #tpu.memory_space<vmem>>, %arg6: memref<1x128xf32, #tpu.memory_space<vmem>>) attributes {dimension_semantics = [#tpu.dimension_semantics<arbitrary>, #tpu.dimension_semantics<arbitrary>], iteration_bounds = array<i64: 2, 1>, scalar_prefetch = 0 : i64, scratch_operands = 0 : i64, tpu.core_type = #tpu.core_type<tc>, window_params = [{transform_indices = @transform_0, window_bounds = array<i64: 256, 640>}, {transform_indices = @transform_1, window_bounds = array<i64: 640, 128>}, {transform_indices = @transform_2, window_bounds = array<i64: 256, 128>}, {pipeline_mode = #tpu.pipeline_mode<synchronous>, transform_indices = @transform_3, window_bounds = array<i64: 1, 128>}, {pipeline_mode = #tpu.pipeline_mode<synchronous>, transform_indices = @transform_4, window_bounds = array<i64: 1, 128>}]} {
    %c0_i32 = arith.constant 0 : i32
    %0 = arith.cmpi eq, %arg1, %c0_i32 : i32
    %1 = arith.extui %0 : i1 to i32
    %c0_i32_0 = arith.constant 0 : i32
    %2 = arith.cmpi ne, %1, %c0_i32_0 : i32
    scf.if %2 {
      %cst_13 = arith.constant 0.000000e+00 : f32
      %17 = vector.broadcast %cst_13 : f32 to vector<256x128xf32>
      %c0_14 = arith.constant 0 : index
      %c0_15 = arith.constant 0 : index
      %18 = vector.load %arg4[%c0_14, %c0_15] : memref<256x128xf32, #tpu.memory_space<vmem>>, vector<256x128xf32>
      tpu.vector_store %arg4[%c0_14, %c0_15], %17 {strides = array<i32>} : memref<256x128xf32, #tpu.memory_space<vmem>>, vector<256x128xf32>,
    } else {
    }
    %c0_i32_1 = arith.constant 0 : i32
    %3 = arith.cmpi eq, %arg0, %c0_i32_1 : i32
    %c0_i32_2 = arith.constant 0 : i32
    %4 = arith.cmpi eq, %arg1, %c0_i32_2 : i32
    %5 = arith.andi %3, %4 : i1
    %6 = arith.extui %5 : i1 to i32
    %c0_i32_3 = arith.constant 0 : i32
    %7 = arith.cmpi ne, %6, %c0_i32_3 : i32
    scf.if %7 {
      %cst_13 = arith.constant 0.000000e+00 : f32
      %17 = vector.broadcast %cst_13 : f32 to vector<1x128xf32>
      %c0_14 = arith.constant 0 : index
      %c0_15 = arith.constant 0 : index
      %18 = vector.load %arg5[%c0_14, %c0_15] : memref<1x128xf32, #tpu.memory_space<vmem>>, vector<1x128xf32>
      tpu.vector_store %arg5[%c0_14, %c0_15], %17 {strides = array<i32>} : memref<1x128xf32, #tpu.memory_space<vmem>>, vector<1x128xf32>,
      %cst_16 = arith.constant 0.000000e+00 : f32
      %19 = vector.broadcast %cst_16 : f32 to vector<1x128xf32>
      %c0_17 = arith.constant 0 : index
      %c0_18 = arith.constant 0 : index
      %20 = vector.load %arg6[%c0_17, %c0_18] : memref<1x128xf32, #tpu.memory_space<vmem>>, vector<1x128xf32>
      tpu.vector_store %arg6[%c0_17, %c0_18], %19 {strides = array<i32>} : memref<1x128xf32, #tpu.memory_space<vmem>>, vector<1x128xf32>,
    } else {
    }
    %c0 = arith.constant 0 : index
    %c0_4 = arith.constant 0 : index
    %8 = vector.load %arg4[%c0, %c0_4] : memref<256x128xf32, #tpu.memory_space<vmem>>, vector<256x128xf32>
    %c0_5 = arith.constant 0 : index
    %c0_6 = arith.constant 0 : index
    %9 = vector.load %arg2[%c0_5, %c0_6] : memref<256x640xbf16, #tpu.memory_space<vmem>>, vector<256x640xbf16>
    %c0_7 = arith.constant 0 : index
    %c0_8 = arith.constant 0 : index
    %10 = vector.load %arg3[%c0_7, %c0_8] : memref<640x128xbf16, #tpu.memory_space<vmem>>, vector<640x128xbf16>
    %cst = arith.constant dense<0.000000e+00> : vector<256x128xf32>
    %11 = tpu.matmul %9, %10, %cst {dimension_numbers = #tpu.dot_dimension_numbers<[1], [0], [0], [1], [0, 0, 1, 1], [], []>} : vector<256x640xbf16>, vector<640x128xbf16>, vector<256x128xf32> -> vector<256x128xf32>
    %12 = arith.addf %8, %11 : vector<256x128xf32>
    %c0_9 = arith.constant 0 : index
    %c0_10 = arith.constant 0 : index
    %13 = vector.load %arg4[%c0_9, %c0_10] : memref<256x128xf32, #tpu.memory_space<vmem>>, vector<256x128xf32>
    tpu.vector_store %arg4[%c0_9, %c0_10], %12 {strides = array<i32>} : memref<256x128xf32, #tpu.memory_space<vmem>>, vector<256x128xf32>,
    %c0_i32_11 = arith.constant 0 : i32
    %14 = arith.cmpi eq, %arg1, %c0_i32_11 : i32
    %15 = arith.extui %14 : i1 to i32
    %c0_i32_12 = arith.constant 0 : i32
    %16 = arith.cmpi ne, %15, %c0_i32_12 : i32
    scf.if %16 {
      %c0_13 = arith.constant 0 : index
      %c0_14 = arith.constant 0 : index
      %17 = vector.load %arg4[%c0_13, %c0_14] : memref<256x128xf32, #tpu.memory_space<vmem>>, vector<256x128xf32>
      %c0_15 = arith.constant 0 : index
      %c0_16 = arith.constant 0 : index
      %18 = vector.load %arg5[%c0_15, %c0_16] : memref<1x128xf32, #tpu.memory_space<vmem>>, vector<1x128xf32>
      %cst_17 = arith.constant dense<0.000000e+00> : vector<128xf32>
      %19 = vector.multi_reduction <add>, %17, %cst_17 [0] : vector<256x128xf32> to vector<128xf32>
      %20 = vector.shape_cast %19 : vector<128xf32> to vector<1x128xf32>
      %21 = arith.addf %18, %20 : vector<1x128xf32>
      %c0_18 = arith.constant 0 : index
      %c0_19 = arith.constant 0 : index
      %22 = vector.load %arg5[%c0_18, %c0_19] : memref<1x128xf32, #tpu.memory_space<vmem>>, vector<1x128xf32>
      tpu.vector_store %arg5[%c0_18, %c0_19], %21 {strides = array<i32>} : memref<1x128xf32, #tpu.memory_space<vmem>>, vector<1x128xf32>,
      %c0_20 = arith.constant 0 : index
      %c0_21 = arith.constant 0 : index
      %23 = vector.load %arg6[%c0_20, %c0_21] : memref<1x128xf32, #tpu.memory_space<vmem>>, vector<1x128xf32>
      %24 = arith.mulf %17, %17 : vector<256x128xf32>
      %cst_22 = arith.constant dense<0.000000e+00> : vector<128xf32>
      %25 = vector.multi_reduction <add>, %24, %cst_22 [0] : vector<256x128xf32> to vector<128xf32>
      %26 = vector.shape_cast %25 : vector<128xf32> to vector<1x128xf32>
      %27 = arith.addf %23, %26 : vector<1x128xf32>
      %c0_23 = arith.constant 0 : index
      %c0_24 = arith.constant 0 : index
      %28 = vector.load %arg6[%c0_23, %c0_24] : memref<1x128xf32, #tpu.memory_space<vmem>>, vector<1x128xf32>
      tpu.vector_store %arg6[%c0_23, %c0_24], %27 {strides = array<i32>} : memref<1x128xf32, #tpu.memory_space<vmem>>, vector<1x128xf32>,
    } else {
    }
    return
  }
  func.func @transform_0(%arg0: i32, %arg1: i32) -> (i32, i32) {
    %c0_i32 = arith.constant 0 : i32
    return %arg0, %arg1 : i32, i32
  }
  func.func @transform_1(%arg0: i32, %arg1: i32) -> (i32, i32) {
    %c0_i32 = arith.constant 0 : i32
    %c0_i32_0 = arith.constant 0 : i32
    return %arg1, %c0_i32 : i32, i32
  }
  func.func @transform_2(%arg0: i32, %arg1: i32) -> (i32, i32) {
    %c0_i32 = arith.constant 0 : i32
    %c0_i32_0 = arith.constant 0 : i32
    return %arg0, %c0_i32 : i32, i32
  }
  func.func @transform_3(%arg0: i32, %arg1: i32) -> (i32, i32) {
    %c0_i32 = arith.constant 0 : i32
    %c0_i32_0 = arith.constant 0 : i32
    %c0_i32_1 = arith.constant 0 : i32
    return %c0_i32, %c0_i32_0 : i32, i32
  }
  func.func @transform_4(%arg0: i32, %arg1: i32) -> (i32, i32) {
    %c0_i32 = arith.constant 0 : i32
    %c0_i32_0 = arith.constant 0 : i32
    %c0_i32_1 = arith.constant 0 : i32
    return %c0_i32, %c0_i32_0 : i32, i32
  }
}

module attributes {stable_mosaic.version = 11 : i64} {
  func.func @_gemm_stats_kernel(%arg0: i32, %arg1: i32, %arg2: memref<256x1152xbf16, #tpu.memory_space<vmem>>, %arg3: memref<1152x128xbf16, #tpu.memory_space<vmem>>, %arg4: memref<256x128xf32, #tpu.memory_space<vmem>>, %arg5: memref<1x128xf32, #tpu.memory_space<vmem>>, %arg6: memref<1x128xf32, #tpu.memory_space<vmem>>) attributes {dimension_semantics = [#tpu.dimension_semantics<arbitrary>, #tpu.dimension_semantics<arbitrary>], iteration_bounds = array<i64: 2, 1>, scalar_prefetch = 0 : i64, scratch_operands = 0 : i64, tpu.core_type = #tpu.core_type<tc>, window_params = [{transform_indices = @transform_0, window_bounds = array<i64: 256, 1152>}, {transform_indices = @transform_1, window_bounds = array<i64: 1152, 128>}, {transform_indices = @transform_2, window_bounds = array<i64: 256, 128>}, {pipeline_mode = #tpu.pipeline_mode<synchronous>, transform_indices = @transform_3, window_bounds = array<i64: 1, 128>}, {pipeline_mode = #tpu.pipeline_mode<synchronous>, transform_indices = @transform_4, window_bounds = array<i64: 1, 128>}]} {
    %c0_i32 = arith.constant 0 : i32
    %0 = arith.cmpi eq, %arg1, %c0_i32 : i32
    %1 = arith.extui %0 : i1 to i32
    %c0_i32_0 = arith.constant 0 : i32
    %2 = arith.cmpi ne, %1, %c0_i32_0 : i32
    scf.if %2 {
      %cst_13 = arith.constant 0.000000e+00 : f32
      %17 = vector.broadcast %cst_13 : f32 to vector<256x128xf32>
      %c0_14 = arith.constant 0 : index
      %c0_15 = arith.constant 0 : index
      %18 = vector.load %arg4[%c0_14, %c0_15] : memref<256x128xf32, #tpu.memory_space<vmem>>, vector<256x128xf32>
      tpu.vector_store %arg4[%c0_14, %c0_15], %17 {strides = array<i32>} : memref<256x128xf32, #tpu.memory_space<vmem>>, vector<256x128xf32>,
    } else {
    }
    %c0_i32_1 = arith.constant 0 : i32
    %3 = arith.cmpi eq, %arg0, %c0_i32_1 : i32
    %c0_i32_2 = arith.constant 0 : i32
    %4 = arith.cmpi eq, %arg1, %c0_i32_2 : i32
    %5 = arith.andi %3, %4 : i1
    %6 = arith.extui %5 : i1 to i32
    %c0_i32_3 = arith.constant 0 : i32
    %7 = arith.cmpi ne, %6, %c0_i32_3 : i32
    scf.if %7 {
      %cst_13 = arith.constant 0.000000e+00 : f32
      %17 = vector.broadcast %cst_13 : f32 to vector<1x128xf32>
      %c0_14 = arith.constant 0 : index
      %c0_15 = arith.constant 0 : index
      %18 = vector.load %arg5[%c0_14, %c0_15] : memref<1x128xf32, #tpu.memory_space<vmem>>, vector<1x128xf32>
      tpu.vector_store %arg5[%c0_14, %c0_15], %17 {strides = array<i32>} : memref<1x128xf32, #tpu.memory_space<vmem>>, vector<1x128xf32>,
      %cst_16 = arith.constant 0.000000e+00 : f32
      %19 = vector.broadcast %cst_16 : f32 to vector<1x128xf32>
      %c0_17 = arith.constant 0 : index
      %c0_18 = arith.constant 0 : index
      %20 = vector.load %arg6[%c0_17, %c0_18] : memref<1x128xf32, #tpu.memory_space<vmem>>, vector<1x128xf32>
      tpu.vector_store %arg6[%c0_17, %c0_18], %19 {strides = array<i32>} : memref<1x128xf32, #tpu.memory_space<vmem>>, vector<1x128xf32>,
    } else {
    }
    %c0 = arith.constant 0 : index
    %c0_4 = arith.constant 0 : index
    %8 = vector.load %arg4[%c0, %c0_4] : memref<256x128xf32, #tpu.memory_space<vmem>>, vector<256x128xf32>
    %c0_5 = arith.constant 0 : index
    %c0_6 = arith.constant 0 : index
    %9 = vector.load %arg2[%c0_5, %c0_6] : memref<256x1152xbf16, #tpu.memory_space<vmem>>, vector<256x1152xbf16>
    %c0_7 = arith.constant 0 : index
    %c0_8 = arith.constant 0 : index
    %10 = vector.load %arg3[%c0_7, %c0_8] : memref<1152x128xbf16, #tpu.memory_space<vmem>>, vector<1152x128xbf16>
    %cst = arith.constant dense<0.000000e+00> : vector<256x128xf32>
    %11 = tpu.matmul %9, %10, %cst {dimension_numbers = #tpu.dot_dimension_numbers<[1], [0], [0], [1], [0, 0, 1, 1], [], []>} : vector<256x1152xbf16>, vector<1152x128xbf16>, vector<256x128xf32> -> vector<256x128xf32>
    %12 = arith.addf %8, %11 : vector<256x128xf32>
    %c0_9 = arith.constant 0 : index
    %c0_10 = arith.constant 0 : index
    %13 = vector.load %arg4[%c0_9, %c0_10] : memref<256x128xf32, #tpu.memory_space<vmem>>, vector<256x128xf32>
    tpu.vector_store %arg4[%c0_9, %c0_10], %12 {strides = array<i32>} : memref<256x128xf32, #tpu.memory_space<vmem>>, vector<256x128xf32>,
    %c0_i32_11 = arith.constant 0 : i32
    %14 = arith.cmpi eq, %arg1, %c0_i32_11 : i32
    %15 = arith.extui %14 : i1 to i32
    %c0_i32_12 = arith.constant 0 : i32
    %16 = arith.cmpi ne, %15, %c0_i32_12 : i32
    scf.if %16 {
      %c0_13 = arith.constant 0 : index
      %c0_14 = arith.constant 0 : index
      %17 = vector.load %arg4[%c0_13, %c0_14] : memref<256x128xf32, #tpu.memory_space<vmem>>, vector<256x128xf32>
      %c0_15 = arith.constant 0 : index
      %c0_16 = arith.constant 0 : index
      %18 = vector.load %arg5[%c0_15, %c0_16] : memref<1x128xf32, #tpu.memory_space<vmem>>, vector<1x128xf32>
      %cst_17 = arith.constant dense<0.000000e+00> : vector<128xf32>
      %19 = vector.multi_reduction <add>, %17, %cst_17 [0] : vector<256x128xf32> to vector<128xf32>
      %20 = vector.shape_cast %19 : vector<128xf32> to vector<1x128xf32>
      %21 = arith.addf %18, %20 : vector<1x128xf32>
      %c0_18 = arith.constant 0 : index
      %c0_19 = arith.constant 0 : index
      %22 = vector.load %arg5[%c0_18, %c0_19] : memref<1x128xf32, #tpu.memory_space<vmem>>, vector<1x128xf32>
      tpu.vector_store %arg5[%c0_18, %c0_19], %21 {strides = array<i32>} : memref<1x128xf32, #tpu.memory_space<vmem>>, vector<1x128xf32>,
      %c0_20 = arith.constant 0 : index
      %c0_21 = arith.constant 0 : index
      %23 = vector.load %arg6[%c0_20, %c0_21] : memref<1x128xf32, #tpu.memory_space<vmem>>, vector<1x128xf32>
      %24 = arith.mulf %17, %17 : vector<256x128xf32>
      %cst_22 = arith.constant dense<0.000000e+00> : vector<128xf32>
      %25 = vector.multi_reduction <add>, %24, %cst_22 [0] : vector<256x128xf32> to vector<128xf32>
      %26 = vector.shape_cast %25 : vector<128xf32> to vector<1x128xf32>
      %27 = arith.addf %23, %26 : vector<1x128xf32>
      %c0_23 = arith.constant 0 : index
      %c0_24 = arith.constant 0 : index
      %28 = vector.load %arg6[%c0_23, %c0_24] : memref<1x128xf32, #tpu.memory_space<vmem>>, vector<1x128xf32>
      tpu.vector_store %arg6[%c0_23, %c0_24], %27 {strides = array<i32>} : memref<1x128xf32, #tpu.memory_space<vmem>>, vector<1x128xf32>,
    } else {
    }
    return
  }
  func.func @transform_0(%arg0: i32, %arg1: i32) -> (i32, i32) {
    %c0_i32 = arith.constant 0 : i32
    return %arg0, %arg1 : i32, i32
  }
  func.func @transform_1(%arg0: i32, %arg1: i32) -> (i32, i32) {
    %c0_i32 = arith.constant 0 : i32
    %c0_i32_0 = arith.constant 0 : i32
    return %arg1, %c0_i32 : i32, i32
  }
  func.func @transform_2(%arg0: i32, %arg1: i32) -> (i32, i32) {
    %c0_i32 = arith.constant 0 : i32
    %c0_i32_0 = arith.constant 0 : i32
    return %arg0, %c0_i32 : i32, i32
  }
  func.func @transform_3(%arg0: i32, %arg1: i32) -> (i32, i32) {
    %c0_i32 = arith.constant 0 : i32
    %c0_i32_0 = arith.constant 0 : i32
    %c0_i32_1 = arith.constant 0 : i32
    return %c0_i32, %c0_i32_0 : i32, i32
  }
  func.func @transform_4(%arg0: i32, %arg1: i32) -> (i32, i32) {
    %c0_i32 = arith.constant 0 : i32
    %c0_i32_0 = arith.constant 0 : i32
    %c0_i32_1 = arith.constant 0 : i32
    return %c0_i32, %c0_i32_0 : i32, i32
  }
}

module attributes {stable_mosaic.version = 11 : i64} {
  func.func @_affine_act_kernel(%arg0: i32, %arg1: memref<512x128xf32, #tpu.memory_space<vmem>>, %arg2: memref<1x128xf32, #tpu.memory_space<vmem>>, %arg3: memref<1x128xf32, #tpu.memory_space<vmem>>, %arg4: memref<512x128xbf16, #tpu.memory_space<vmem>>) attributes {dimension_semantics = [#tpu.dimension_semantics<parallel>], iteration_bounds = array<i64: 1>, scalar_prefetch = 0 : i64, scratch_operands = 0 : i64, tpu.core_type = #tpu.core_type<tc>, window_params = [{transform_indices = @transform_0, window_bounds = array<i64: 512, 128>}, {pipeline_mode = #tpu.pipeline_mode<synchronous>, transform_indices = @transform_1, window_bounds = array<i64: 1, 128>}, {pipeline_mode = #tpu.pipeline_mode<synchronous>, transform_indices = @transform_2, window_bounds = array<i64: 1, 128>}, {transform_indices = @transform_3, window_bounds = array<i64: 512, 128>}]} {
    %c0 = arith.constant 0 : index
    %c0_0 = arith.constant 0 : index
    %0 = vector.load %arg1[%c0, %c0_0] : memref<512x128xf32, #tpu.memory_space<vmem>>, vector<512x128xf32>
    %c0_1 = arith.constant 0 : index
    %c0_2 = arith.constant 0 : index
    %1 = vector.load %arg2[%c0_1, %c0_2] : memref<1x128xf32, #tpu.memory_space<vmem>>, vector<1x128xf32>
    %2 = vector.broadcast %1 : vector<1x128xf32> to vector<512x128xf32>
    %3 = arith.mulf %0, %2 : vector<512x128xf32>
    %c0_3 = arith.constant 0 : index
    %c0_4 = arith.constant 0 : index
    %4 = vector.load %arg3[%c0_3, %c0_4] : memref<1x128xf32, #tpu.memory_space<vmem>>, vector<1x128xf32>
    %5 = vector.broadcast %4 : vector<1x128xf32> to vector<512x128xf32>
    %6 = arith.addf %3, %5 : vector<512x128xf32>
    %cst = arith.constant 0.000000e+00 : f32
    %7 = vector.broadcast %cst : f32 to vector<512x128xf32>
    %8 = arith.maximumf %6, %7 : vector<512x128xf32>
    %9 = arith.truncf %8 : vector<512x128xf32> to vector<512x128xbf16>
    %c0_5 = arith.constant 0 : index
    %c0_6 = arith.constant 0 : index
    %10 = vector.load %arg4[%c0_5, %c0_6] : memref<512x128xbf16, #tpu.memory_space<vmem>>, vector<512x128xbf16>
    tpu.vector_store %arg4[%c0_5, %c0_6], %9 {strides = array<i32>} : memref<512x128xbf16, #tpu.memory_space<vmem>>, vector<512x128xbf16>,
    return
  }
  func.func @transform_0(%arg0: i32) -> (i32, i32) {
    %c0_i32 = arith.constant 0 : i32
    %c0_i32_0 = arith.constant 0 : i32
    return %arg0, %c0_i32 : i32, i32
  }
  func.func @transform_1(%arg0: i32) -> (i32, i32) {
    %c0_i32 = arith.constant 0 : i32
    %c0_i32_0 = arith.constant 0 : i32
    %c0_i32_1 = arith.constant 0 : i32
    return %c0_i32, %c0_i32_0 : i32, i32
  }
  func.func @transform_2(%arg0: i32) -> (i32, i32) {
    %c0_i32 = arith.constant 0 : i32
    %c0_i32_0 = arith.constant 0 : i32
    %c0_i32_1 = arith.constant 0 : i32
    return %c0_i32, %c0_i32_0 : i32, i32
  }
  func.func @transform_3(%arg0: i32) -> (i32, i32) {
    %c0_i32 = arith.constant 0 : i32
    %c0_i32_0 = arith.constant 0 : i32
    return %arg0, %c0_i32 : i32, i32
  }
}

module attributes {stable_mosaic.version = 11 : i64} {
  func.func @_gemm_stats_kernel(%arg0: i32, %arg1: i32, %arg2: memref<256x128xbf16, #tpu.memory_space<vmem>>, %arg3: memref<128x128xbf16, #tpu.memory_space<vmem>>, %arg4: memref<256x128xf32, #tpu.memory_space<vmem>>, %arg5: memref<1x128xf32, #tpu.memory_space<vmem>>, %arg6: memref<1x128xf32, #tpu.memory_space<vmem>>) attributes {dimension_semantics = [#tpu.dimension_semantics<arbitrary>, #tpu.dimension_semantics<arbitrary>], iteration_bounds = array<i64: 8, 1>, scalar_prefetch = 0 : i64, scratch_operands = 0 : i64, tpu.core_type = #tpu.core_type<tc>, window_params = [{transform_indices = @transform_0, window_bounds = array<i64: 256, 128>}, {transform_indices = @transform_1, window_bounds = array<i64: 128, 128>}, {transform_indices = @transform_2, window_bounds = array<i64: 256, 128>}, {pipeline_mode = #tpu.pipeline_mode<synchronous>, transform_indices = @transform_3, window_bounds = array<i64: 1, 128>}, {pipeline_mode = #tpu.pipeline_mode<synchronous>, transform_indices = @transform_4, window_bounds = array<i64: 1, 128>}]} {
    %c0_i32 = arith.constant 0 : i32
    %0 = arith.cmpi eq, %arg1, %c0_i32 : i32
    %1 = arith.extui %0 : i1 to i32
    %c0_i32_0 = arith.constant 0 : i32
    %2 = arith.cmpi ne, %1, %c0_i32_0 : i32
    scf.if %2 {
      %cst_13 = arith.constant 0.000000e+00 : f32
      %17 = vector.broadcast %cst_13 : f32 to vector<256x128xf32>
      %c0_14 = arith.constant 0 : index
      %c0_15 = arith.constant 0 : index
      %18 = vector.load %arg4[%c0_14, %c0_15] : memref<256x128xf32, #tpu.memory_space<vmem>>, vector<256x128xf32>
      tpu.vector_store %arg4[%c0_14, %c0_15], %17 {strides = array<i32>} : memref<256x128xf32, #tpu.memory_space<vmem>>, vector<256x128xf32>,
    } else {
    }
    %c0_i32_1 = arith.constant 0 : i32
    %3 = arith.cmpi eq, %arg0, %c0_i32_1 : i32
    %c0_i32_2 = arith.constant 0 : i32
    %4 = arith.cmpi eq, %arg1, %c0_i32_2 : i32
    %5 = arith.andi %3, %4 : i1
    %6 = arith.extui %5 : i1 to i32
    %c0_i32_3 = arith.constant 0 : i32
    %7 = arith.cmpi ne, %6, %c0_i32_3 : i32
    scf.if %7 {
      %cst_13 = arith.constant 0.000000e+00 : f32
      %17 = vector.broadcast %cst_13 : f32 to vector<1x128xf32>
      %c0_14 = arith.constant 0 : index
      %c0_15 = arith.constant 0 : index
      %18 = vector.load %arg5[%c0_14, %c0_15] : memref<1x128xf32, #tpu.memory_space<vmem>>, vector<1x128xf32>
      tpu.vector_store %arg5[%c0_14, %c0_15], %17 {strides = array<i32>} : memref<1x128xf32, #tpu.memory_space<vmem>>, vector<1x128xf32>,
      %cst_16 = arith.constant 0.000000e+00 : f32
      %19 = vector.broadcast %cst_16 : f32 to vector<1x128xf32>
      %c0_17 = arith.constant 0 : index
      %c0_18 = arith.constant 0 : index
      %20 = vector.load %arg6[%c0_17, %c0_18] : memref<1x128xf32, #tpu.memory_space<vmem>>, vector<1x128xf32>
      tpu.vector_store %arg6[%c0_17, %c0_18], %19 {strides = array<i32>} : memref<1x128xf32, #tpu.memory_space<vmem>>, vector<1x128xf32>,
    } else {
    }
    %c0 = arith.constant 0 : index
    %c0_4 = arith.constant 0 : index
    %8 = vector.load %arg4[%c0, %c0_4] : memref<256x128xf32, #tpu.memory_space<vmem>>, vector<256x128xf32>
    %c0_5 = arith.constant 0 : index
    %c0_6 = arith.constant 0 : index
    %9 = vector.load %arg2[%c0_5, %c0_6] : memref<256x128xbf16, #tpu.memory_space<vmem>>, vector<256x128xbf16>
    %c0_7 = arith.constant 0 : index
    %c0_8 = arith.constant 0 : index
    %10 = vector.load %arg3[%c0_7, %c0_8] : memref<128x128xbf16, #tpu.memory_space<vmem>>, vector<128x128xbf16>
    %cst = arith.constant dense<0.000000e+00> : vector<256x128xf32>
    %11 = tpu.matmul %9, %10, %cst {dimension_numbers = #tpu.dot_dimension_numbers<[1], [0], [0], [1], [0, 0, 1, 1], [], []>} : vector<256x128xbf16>, vector<128x128xbf16>, vector<256x128xf32> -> vector<256x128xf32>
    %12 = arith.addf %8, %11 : vector<256x128xf32>
    %c0_9 = arith.constant 0 : index
    %c0_10 = arith.constant 0 : index
    %13 = vector.load %arg4[%c0_9, %c0_10] : memref<256x128xf32, #tpu.memory_space<vmem>>, vector<256x128xf32>
    tpu.vector_store %arg4[%c0_9, %c0_10], %12 {strides = array<i32>} : memref<256x128xf32, #tpu.memory_space<vmem>>, vector<256x128xf32>,
    %c0_i32_11 = arith.constant 0 : i32
    %14 = arith.cmpi eq, %arg1, %c0_i32_11 : i32
    %15 = arith.extui %14 : i1 to i32
    %c0_i32_12 = arith.constant 0 : i32
    %16 = arith.cmpi ne, %15, %c0_i32_12 : i32
    scf.if %16 {
      %c0_13 = arith.constant 0 : index
      %c0_14 = arith.constant 0 : index
      %17 = vector.load %arg4[%c0_13, %c0_14] : memref<256x128xf32, #tpu.memory_space<vmem>>, vector<256x128xf32>
      %c0_15 = arith.constant 0 : index
      %c0_16 = arith.constant 0 : index
      %18 = vector.load %arg5[%c0_15, %c0_16] : memref<1x128xf32, #tpu.memory_space<vmem>>, vector<1x128xf32>
      %cst_17 = arith.constant dense<0.000000e+00> : vector<128xf32>
      %19 = vector.multi_reduction <add>, %17, %cst_17 [0] : vector<256x128xf32> to vector<128xf32>
      %20 = vector.shape_cast %19 : vector<128xf32> to vector<1x128xf32>
      %21 = arith.addf %18, %20 : vector<1x128xf32>
      %c0_18 = arith.constant 0 : index
      %c0_19 = arith.constant 0 : index
      %22 = vector.load %arg5[%c0_18, %c0_19] : memref<1x128xf32, #tpu.memory_space<vmem>>, vector<1x128xf32>
      tpu.vector_store %arg5[%c0_18, %c0_19], %21 {strides = array<i32>} : memref<1x128xf32, #tpu.memory_space<vmem>>, vector<1x128xf32>,
      %c0_20 = arith.constant 0 : index
      %c0_21 = arith.constant 0 : index
      %23 = vector.load %arg6[%c0_20, %c0_21] : memref<1x128xf32, #tpu.memory_space<vmem>>, vector<1x128xf32>
      %24 = arith.mulf %17, %17 : vector<256x128xf32>
      %cst_22 = arith.constant dense<0.000000e+00> : vector<128xf32>
      %25 = vector.multi_reduction <add>, %24, %cst_22 [0] : vector<256x128xf32> to vector<128xf32>
      %26 = vector.shape_cast %25 : vector<128xf32> to vector<1x128xf32>
      %27 = arith.addf %23, %26 : vector<1x128xf32>
      %c0_23 = arith.constant 0 : index
      %c0_24 = arith.constant 0 : index
      %28 = vector.load %arg6[%c0_23, %c0_24] : memref<1x128xf32, #tpu.memory_space<vmem>>, vector<1x128xf32>
      tpu.vector_store %arg6[%c0_23, %c0_24], %27 {strides = array<i32>} : memref<1x128xf32, #tpu.memory_space<vmem>>, vector<1x128xf32>,
    } else {
    }
    return
  }
  func.func @transform_0(%arg0: i32, %arg1: i32) -> (i32, i32) {
    %c0_i32 = arith.constant 0 : i32
    return %arg0, %arg1 : i32, i32
  }
  func.func @transform_1(%arg0: i32, %arg1: i32) -> (i32, i32) {
    %c0_i32 = arith.constant 0 : i32
    %c0_i32_0 = arith.constant 0 : i32
    return %arg1, %c0_i32 : i32, i32
  }
  func.func @transform_2(%arg0: i32, %arg1: i32) -> (i32, i32) {
    %c0_i32 = arith.constant 0 : i32
    %c0_i32_0 = arith.constant 0 : i32
    return %arg0, %c0_i32 : i32, i32
  }
  func.func @transform_3(%arg0: i32, %arg1: i32) -> (i32, i32) {
    %c0_i32 = arith.constant 0 : i32
    %c0_i32_0 = arith.constant 0 : i32
    %c0_i32_1 = arith.constant 0 : i32
    return %c0_i32, %c0_i32_0 : i32, i32
  }
  func.func @transform_4(%arg0: i32, %arg1: i32) -> (i32, i32) {
    %c0_i32 = arith.constant 0 : i32
    %c0_i32_0 = arith.constant 0 : i32
    %c0_i32_1 = arith.constant 0 : i32
    return %c0_i32, %c0_i32_0 : i32, i32
  }
}

module attributes {stable_mosaic.version = 11 : i64} {
  func.func @_affine_act_kernel(%arg0: i32, %arg1: memref<512x128xf32, #tpu.memory_space<vmem>>, %arg2: memref<1x128xf32, #tpu.memory_space<vmem>>, %arg3: memref<1x128xf32, #tpu.memory_space<vmem>>, %arg4: memref<512x128xbf16, #tpu.memory_space<vmem>>) attributes {dimension_semantics = [#tpu.dimension_semantics<parallel>], iteration_bounds = array<i64: 4>, scalar_prefetch = 0 : i64, scratch_operands = 0 : i64, tpu.core_type = #tpu.core_type<tc>, window_params = [{transform_indices = @transform_0, window_bounds = array<i64: 512, 128>}, {pipeline_mode = #tpu.pipeline_mode<synchronous>, transform_indices = @transform_1, window_bounds = array<i64: 1, 128>}, {pipeline_mode = #tpu.pipeline_mode<synchronous>, transform_indices = @transform_2, window_bounds = array<i64: 1, 128>}, {transform_indices = @transform_3, window_bounds = array<i64: 512, 128>}]} {
    %c0 = arith.constant 0 : index
    %c0_0 = arith.constant 0 : index
    %0 = vector.load %arg1[%c0, %c0_0] : memref<512x128xf32, #tpu.memory_space<vmem>>, vector<512x128xf32>
    %c0_1 = arith.constant 0 : index
    %c0_2 = arith.constant 0 : index
    %1 = vector.load %arg2[%c0_1, %c0_2] : memref<1x128xf32, #tpu.memory_space<vmem>>, vector<1x128xf32>
    %2 = vector.broadcast %1 : vector<1x128xf32> to vector<512x128xf32>
    %3 = arith.mulf %0, %2 : vector<512x128xf32>
    %c0_3 = arith.constant 0 : index
    %c0_4 = arith.constant 0 : index
    %4 = vector.load %arg3[%c0_3, %c0_4] : memref<1x128xf32, #tpu.memory_space<vmem>>, vector<1x128xf32>
    %5 = vector.broadcast %4 : vector<1x128xf32> to vector<512x128xf32>
    %6 = arith.addf %3, %5 : vector<512x128xf32>
    %cst = arith.constant 0.000000e+00 : f32
    %7 = vector.broadcast %cst : f32 to vector<512x128xf32>
    %8 = arith.maximumf %6, %7 : vector<512x128xf32>
    %9 = arith.truncf %8 : vector<512x128xf32> to vector<512x128xbf16>
    %c0_5 = arith.constant 0 : index
    %c0_6 = arith.constant 0 : index
    %10 = vector.load %arg4[%c0_5, %c0_6] : memref<512x128xbf16, #tpu.memory_space<vmem>>, vector<512x128xbf16>
    tpu.vector_store %arg4[%c0_5, %c0_6], %9 {strides = array<i32>} : memref<512x128xbf16, #tpu.memory_space<vmem>>, vector<512x128xbf16>,
    return
  }
  func.func @transform_0(%arg0: i32) -> (i32, i32) {
    %c0_i32 = arith.constant 0 : i32
    %c0_i32_0 = arith.constant 0 : i32
    return %arg0, %c0_i32 : i32, i32
  }
  func.func @transform_1(%arg0: i32) -> (i32, i32) {
    %c0_i32 = arith.constant 0 : i32
    %c0_i32_0 = arith.constant 0 : i32
    %c0_i32_1 = arith.constant 0 : i32
    return %c0_i32, %c0_i32_0 : i32, i32
  }
  func.func @transform_2(%arg0: i32) -> (i32, i32) {
    %c0_i32 = arith.constant 0 : i32
    %c0_i32_0 = arith.constant 0 : i32
    %c0_i32_1 = arith.constant 0 : i32
    return %c0_i32, %c0_i32_0 : i32, i32
  }
  func.func @transform_3(%arg0: i32) -> (i32, i32) {
    %c0_i32 = arith.constant 0 : i32
    %c0_i32_0 = arith.constant 0 : i32
    return %arg0, %c0_i32 : i32, i32
  }
}

module attributes {stable_mosaic.version = 11 : i64} {
  func.func @_affine_act_kernel(%arg0: i32, %arg1: memref<512x128xf32, #tpu.memory_space<vmem>>, %arg2: memref<1x128xf32, #tpu.memory_space<vmem>>, %arg3: memref<1x128xf32, #tpu.memory_space<vmem>>, %arg4: memref<512x128xbf16, #tpu.memory_space<vmem>>) attributes {dimension_semantics = [#tpu.dimension_semantics<parallel>], iteration_bounds = array<i64: 4>, scalar_prefetch = 0 : i64, scratch_operands = 0 : i64, tpu.core_type = #tpu.core_type<tc>, window_params = [{transform_indices = @transform_0, window_bounds = array<i64: 512, 128>}, {pipeline_mode = #tpu.pipeline_mode<synchronous>, transform_indices = @transform_1, window_bounds = array<i64: 1, 128>}, {pipeline_mode = #tpu.pipeline_mode<synchronous>, transform_indices = @transform_2, window_bounds = array<i64: 1, 128>}, {transform_indices = @transform_3, window_bounds = array<i64: 512, 128>}]} {
    %c0 = arith.constant 0 : index
    %c0_0 = arith.constant 0 : index
    %0 = vector.load %arg1[%c0, %c0_0] : memref<512x128xf32, #tpu.memory_space<vmem>>, vector<512x128xf32>
    %c0_1 = arith.constant 0 : index
    %c0_2 = arith.constant 0 : index
    %1 = vector.load %arg2[%c0_1, %c0_2] : memref<1x128xf32, #tpu.memory_space<vmem>>, vector<1x128xf32>
    %2 = vector.broadcast %1 : vector<1x128xf32> to vector<512x128xf32>
    %3 = arith.mulf %0, %2 : vector<512x128xf32>
    %c0_3 = arith.constant 0 : index
    %c0_4 = arith.constant 0 : index
    %4 = vector.load %arg3[%c0_3, %c0_4] : memref<1x128xf32, #tpu.memory_space<vmem>>, vector<1x128xf32>
    %5 = vector.broadcast %4 : vector<1x128xf32> to vector<512x128xf32>
    %6 = arith.addf %3, %5 : vector<512x128xf32>
    %cst = arith.constant 0.000000e+00 : f32
    %7 = vector.broadcast %cst : f32 to vector<512x128xf32>
    %8 = arith.maximumf %6, %7 : vector<512x128xf32>
    %9 = arith.truncf %8 : vector<512x128xf32> to vector<512x128xbf16>
    %c0_5 = arith.constant 0 : index
    %c0_6 = arith.constant 0 : index
    %10 = vector.load %arg4[%c0_5, %c0_6] : memref<512x128xbf16, #tpu.memory_space<vmem>>, vector<512x128xbf16>
    tpu.vector_store %arg4[%c0_5, %c0_6], %9 {strides = array<i32>} : memref<512x128xbf16, #tpu.memory_space<vmem>>, vector<512x128xbf16>,
    return
  }
  func.func @transform_0(%arg0: i32) -> (i32, i32) {
    %c0_i32 = arith.constant 0 : i32
    %c0_i32_0 = arith.constant 0 : i32
    return %arg0, %c0_i32 : i32, i32
  }
  func.func @transform_1(%arg0: i32) -> (i32, i32) {
    %c0_i32 = arith.constant 0 : i32
    %c0_i32_0 = arith.constant 0 : i32
    %c0_i32_1 = arith.constant 0 : i32
    return %c0_i32, %c0_i32_0 : i32, i32
  }
  func.func @transform_2(%arg0: i32) -> (i32, i32) {
    %c0_i32 = arith.constant 0 : i32
    %c0_i32_0 = arith.constant 0 : i32
    %c0_i32_1 = arith.constant 0 : i32
    return %c0_i32, %c0_i32_0 : i32, i32
  }
  func.func @transform_3(%arg0: i32) -> (i32, i32) {
    %c0_i32 = arith.constant 0 : i32
    %c0_i32_0 = arith.constant 0 : i32
    return %arg0, %c0_i32 : i32, i32
  }
}

module attributes {stable_mosaic.version = 11 : i64} {
  func.func @_gemm_bias_act_kernel(%arg0: i32, %arg1: i32, %arg2: memref<256x128xbf16, #tpu.memory_space<vmem>>, %arg3: memref<128x128xbf16, #tpu.memory_space<vmem>>, %arg4: memref<1x128xf32, #tpu.memory_space<vmem>>, %arg5: memref<256x128xf32, #tpu.memory_space<vmem>>, %arg6: memref<256x128xf32, #tpu.memory_space<vmem>>) attributes {dimension_semantics = [#tpu.dimension_semantics<parallel>, #tpu.dimension_semantics<arbitrary>], iteration_bounds = array<i64: 8, 1>, scalar_prefetch = 0 : i64, scratch_operands = 1 : i64, tpu.core_type = #tpu.core_type<tc>, window_params = [{transform_indices = @transform_0, window_bounds = array<i64: 256, 128>}, {transform_indices = @transform_1, window_bounds = array<i64: 128, 128>}, {pipeline_mode = #tpu.pipeline_mode<synchronous>, transform_indices = @transform_2, window_bounds = array<i64: 1, 128>}, {transform_indices = @transform_3, window_bounds = array<i64: 256, 128>}]} {
    %c0_i32 = arith.constant 0 : i32
    %0 = arith.cmpi eq, %arg1, %c0_i32 : i32
    %1 = arith.extui %0 : i1 to i32
    %c0_i32_0 = arith.constant 0 : i32
    %2 = arith.cmpi ne, %1, %c0_i32_0 : i32
    scf.if %2 {
      %cst_10 = arith.constant 0.000000e+00 : f32
      %12 = vector.broadcast %cst_10 : f32 to vector<256x128xf32>
      %c0_11 = arith.constant 0 : index
      %c0_12 = arith.constant 0 : index
      %13 = vector.load %arg6[%c0_11, %c0_12] : memref<256x128xf32, #tpu.memory_space<vmem>>, vector<256x128xf32>
      tpu.vector_store %arg6[%c0_11, %c0_12], %12 {strides = array<i32>} : memref<256x128xf32, #tpu.memory_space<vmem>>, vector<256x128xf32>,
    } else {
    }
    %c0 = arith.constant 0 : index
    %c0_1 = arith.constant 0 : index
    %3 = vector.load %arg6[%c0, %c0_1] : memref<256x128xf32, #tpu.memory_space<vmem>>, vector<256x128xf32>
    %c0_2 = arith.constant 0 : index
    %c0_3 = arith.constant 0 : index
    %4 = vector.load %arg2[%c0_2, %c0_3] : memref<256x128xbf16, #tpu.memory_space<vmem>>, vector<256x128xbf16>
    %c0_4 = arith.constant 0 : index
    %c0_5 = arith.constant 0 : index
    %5 = vector.load %arg3[%c0_4, %c0_5] : memref<128x128xbf16, #tpu.memory_space<vmem>>, vector<128x128xbf16>
    %cst = arith.constant dense<0.000000e+00> : vector<256x128xf32>
    %6 = tpu.matmul %4, %5, %cst {dimension_numbers = #tpu.dot_dimension_numbers<[1], [0], [0], [1], [0, 0, 1, 1], [], []>} : vector<256x128xbf16>, vector<128x128xbf16>, vector<256x128xf32> -> vector<256x128xf32>
    %7 = arith.addf %3, %6 : vector<256x128xf32>
    %c0_6 = arith.constant 0 : index
    %c0_7 = arith.constant 0 : index
    %8 = vector.load %arg6[%c0_6, %c0_7] : memref<256x128xf32, #tpu.memory_space<vmem>>, vector<256x128xf32>
    tpu.vector_store %arg6[%c0_6, %c0_7], %7 {strides = array<i32>} : memref<256x128xf32, #tpu.memory_space<vmem>>, vector<256x128xf32>,
    %c0_i32_8 = arith.constant 0 : i32
    %9 = arith.cmpi eq, %arg1, %c0_i32_8 : i32
    %10 = arith.extui %9 : i1 to i32
    %c0_i32_9 = arith.constant 0 : i32
    %11 = arith.cmpi ne, %10, %c0_i32_9 : i32
    scf.if %11 {
      %c0_10 = arith.constant 0 : index
      %c0_11 = arith.constant 0 : index
      %12 = vector.load %arg6[%c0_10, %c0_11] : memref<256x128xf32, #tpu.memory_space<vmem>>, vector<256x128xf32>
      %c0_12 = arith.constant 0 : index
      %c0_13 = arith.constant 0 : index
      %13 = vector.load %arg4[%c0_12, %c0_13] : memref<1x128xf32, #tpu.memory_space<vmem>>, vector<1x128xf32>
      %14 = vector.broadcast %13 : vector<1x128xf32> to vector<256x128xf32>
      %15 = arith.addf %12, %14 : vector<256x128xf32>
      %c0_14 = arith.constant 0 : index
      %c0_15 = arith.constant 0 : index
      %16 = vector.load %arg5[%c0_14, %c0_15] : memref<256x128xf32, #tpu.memory_space<vmem>>, vector<256x128xf32>
      tpu.vector_store %arg5[%c0_14, %c0_15], %15 {strides = array<i32>} : memref<256x128xf32, #tpu.memory_space<vmem>>, vector<256x128xf32>,
    } else {
    }
    return
  }
  func.func @transform_0(%arg0: i32, %arg1: i32) -> (i32, i32) {
    %c0_i32 = arith.constant 0 : i32
    return %arg0, %arg1 : i32, i32
  }
  func.func @transform_1(%arg0: i32, %arg1: i32) -> (i32, i32) {
    %c0_i32 = arith.constant 0 : i32
    %c0_i32_0 = arith.constant 0 : i32
    return %arg1, %c0_i32 : i32, i32
  }
  func.func @transform_2(%arg0: i32, %arg1: i32) -> (i32, i32) {
    %c0_i32 = arith.constant 0 : i32
    %c0_i32_0 = arith.constant 0 : i32
    %c0_i32_1 = arith.constant 0 : i32
    return %c0_i32, %c0_i32_0 : i32, i32
  }
  func.func @transform_3(%arg0: i32, %arg1: i32) -> (i32, i32) {
    %c0_i32 = arith.constant 0 : i32
    %c0_i32_0 = arith.constant 0 : i32
    return %arg0, %c0_i32 : i32, i32
  }
}

</mosaic_0001>

<bundles_post_ra>
// kernel: unet_hrpxp_forward.54
= control target key start
LH: loop header
LB: loop body
LE: loop exit
PB: predicated region body
PF: predicated region fallthrough
CT: control target
= control target key end

     0   :  { %s1375_s0 = inlined_call_operand.vmem [shape: f32[512,128], index: 0, kind: input, shape index: {}]   ;;  %s1376_s1 = inlined_call_operand.vmem [shape: f32[1,128], index: 1, kind: input, shape index: {}]   ;;  %s1377_s2 = inlined_call_operand.vmem [shape: f32[1,128], index: 2, kind: input, shape index: {}]   ;;  %s1378_s3 = inlined_call_operand.vmem [shape: bf16[512,128], index: 3, kind: output, shape index: {}]  }
   0x1   :  { %v14_v0 = vld [vmem:[%s1375_s0] sm:$0xff]  ;;  %v15_v1 = vld [vmem:[%s1375_s0 + $0x8] sm:$0xff]  ;;  %v16_v6 = vld [vmem:[%s1375_s0 + $0x10] sm:$0xff] }
   0x2   :  { %v958_v2 = vld [vmem:[%s1376_s1] ss:$0 sm:$0xff]  ;;  %v17_v7 = vld [vmem:[%s1375_s0 + $0x18] sm:$0xff]  ;;  %v19_v11 = vld [vmem:[%s1375_s0 + $0x28] sm:$0xff] }
   0x3   :  { %v85_v3 = vmul.f32 %v958_v2, %v14_v0  ;;  %v86_v4 = vmul.f32 %v958_v2, %v15_v1  ;;  %v965_v5 = vld [vmem:[%s1377_s2] ss:$0 sm:$0xff]  ;;  %v87_v8 = vmul.f32 %v958_v2, %v16_v6  ;;  %v88_v9 = vmul.f32 %v958_v2, %v17_v7  ;;  %v20_v12 = vld [vmem:[%s1375_s0 + $0x30] sm:$0xff]  ;;  %v21_v17 = vld [vmem:[%s1375_s0 + $0x38] sm:$0xff] }
   0x4   :  { %v18_v10 = vld [vmem:[%s1375_s0 + $0x20] sm:$0xff]  ;;  %v90_v16 = vmul.f32 %v958_v2, %v19_v11  ;;  %v91_v20 = vmul.f32 %v958_v2, %v20_v12  ;;  %v92_v21 = vmul.f32 %v958_v2, %v21_v17  ;;  %v23_v27 = vld [vmem:[%s1375_s0 + $0x48] sm:$0xff]  ;;  %v24_v32 = vld [vmem:[%s1375_s0 + $0x50] sm:$0xff] }
   0x5   :  { %v156_v13 = vadd.f32 %v965_v5, %v85_v3  ;;  %v157_v14 = vadd.f32 %v965_v5, %v86_v4  ;;  %v89_v15 = vmul.f32 %v958_v2, %v18_v10  ;;  %v158_v18 = vadd.f32 %v965_v5, %v87_v8  ;;  %v22_v22 = vld [vmem:[%s1375_s0 + $0x40] sm:$0xff]  ;;  %v25_v33 = vld [vmem:[%s1375_s0 + $0x58] sm:$0xff]  ;;  %v27_v39 = vld [vmem:[%s1375_s0 + $0x68] sm:$0xff] }
   0x6   :  { %v159_v19 = vadd.f32 %v965_v5, %v88_v9  ;;  %v161_v26 = vadd.f32 %v965_v5, %v90_v16  ;;  %v162_v30 = vadd.f32 %v965_v5, %v91_v20  ;;  %v163_v31 = vadd.f32 %v965_v5, %v92_v21  ;;  %v26_v38 = vld [vmem:[%s1375_s0 + $0x60] sm:$0xff]  ;;  %v28_v44 = vld [vmem:[%s1375_s0 + $0x70] sm:$0xff]  ;;  %v29_v49 = vld [vmem:[%s1375_s0 + $0x78] sm:$0xff] }
   0x7   :  { %v220_v23 = vmax.f32 %v156_v13, 0.0  ;;  %v221_v24 = vmax.f32 %v157_v14, 0.0  ;;  %v160_v25 = vadd.f32 %v965_v5, %v89_v15  ;;  %v222_v28 = vmax.f32 %v158_v18, 0.0  ;;  %v30_v54 = vld [vmem:[%s1375_s0 + $0x80] sm:$0xff]  ;;  %v31_v63 = vld [vmem:[%s1375_s0 + $0x88] sm:$0xff]  ;;  %v32_v6 = vld [vmem:[%s1375_s0 + $0x90] sm:$0xff] }
   0x8   :  { %v223_v29 = vmax.f32 %v159_v19, 0.0  ;;  %v225_v36 = vmax.f32 %v161_v26, 0.0  ;;  %v93_v37 = vmul.f32 %v958_v2, %v22_v22  ;;  %v226_v41 = vmax.f32 %v162_v30, 0.0  ;;  %v33_v7 = vld [vmem:[%s1375_s0 + $0x98] sm:$0xff]  ;;  %v34_v12 = vld [vmem:[%s1375_s0 + $0xa0] sm:$0xff]  ;;  %v35_v13 = vld [vmem:[%s1375_s0 + $0xa8] sm:$0xff] }
   0x9   :  { %v741_v34 = vpack.c.bf16 %v221_v24, %v220_v23  ;;  %v224_v35 = vmax.f32 %v160_v25, 0.0  ;;  %v227_v42 = vmax.f32 %v163_v31, 0.0  ;;  %v94_v43 = vmul.f32 %v958_v2, %v23_v27  ;;  %v36_v18 = vld [vmem:[%s1375_s0 + $0xb0] sm:$0xff]  ;;  %v37_v23 = vld [vmem:[%s1375_s0 + $0xb8] sm:$0xff] }
   0xa   :  { %v746_v40 = vpack.c.bf16 %v223_v29, %v222_v28  ;;  %v164_v46 = vadd.f32 %v965_v5, %v93_v37  ;;  %v95_v47 = vmul.f32 %v958_v2, %v24_v32  ;;  %v96_v48 = vmul.f32 %v958_v2, %v25_v33  ;;  %v38_v28 = vld [vmem:[%s1375_s0 + $0xc0] sm:$0xff]  ;;  %v39_v37 = vld [vmem:[%s1375_s0 + $0xc8] sm:$0xff] }
   0xb   :  { %742 = vst [vmem:[%s1378_s3] sm:$0xff] %v741_v34   ;;  %v751_v45 = vpack.c.bf16 %v225_v36, %v224_v35  ;;  %v756_v50 = vpack.c.bf16 %v227_v42, %v226_v41  ;;  %v165_v51 = vadd.f32 %v965_v5, %v94_v43  ;;  %v97_v52 = vmul.f32 %v958_v2, %v26_v38  ;;  %v40_v42 = vld [vmem:[%s1375_s0 + $0xd0] sm:$0xff]  ;;  %v41_v43 = vld [vmem:[%s1375_s0 + $0xd8] sm:$0xff] }
   0xc   :  { %898 = vst [vmem:[%s1378_s3 + $0x8] sm:$0xff] %v746_v40   ;;  %v98_v53 = vmul.f32 %v958_v2, %v27_v39  ;;  %v228_v55 = vmax.f32 %v164_v46, 0.0  ;;  %v166_v56 = vadd.f32 %v965_v5, %v95_v47  ;;  %v167_v57 = vadd.f32 %v965_v5, %v96_v48  ;;  %v42_v48 = vld [vmem:[%s1375_s0 + $0xe0] sm:$0xff] }
   0xd   :  { %899 = vst [vmem:[%s1378_s3 + $0x10] sm:$0xff] %v751_v45   ;;  %v99_v58 = vmul.f32 %v958_v2, %v28_v44  ;;  %900 = vst [vmem:[%s1378_s3 + $0x18] sm:$0xff] %v756_v50   ;;  %v229_v59 = vmax.f32 %v165_v51, 0.0  ;;  %v168_v60 = vadd.f32 %v965_v5, %v97_v52  ;;  %v100_v62 = vmul.f32 %v958_v2, %v29_v49  ;;  %v43_v49 = vld [vmem:[%s1375_s0 + $0xe8] sm:$0xff] }
   0xe   :  { %v169_v61 = vadd.f32 %v965_v5, %v98_v53  ;;  %v230_v0 = vmax.f32 %v166_v56, 0.0  ;;  %v231_v1 = vmax.f32 %v167_v57, 0.0  ;;  %v101_v4 = vmul.f32 %v958_v2, %v30_v54  ;;  %v44_v54 = vld [vmem:[%s1375_s0 + $0xf0] sm:$0xff] }
   0xf   :  { %v170_v3 = vadd.f32 %v965_v5, %v99_v58  ;;  %v761_v8 = vpack.c.bf16 %v229_v59, %v228_v55  ;;  %v232_v9 = vmax.f32 %v168_v60, 0.0  ;;  %v171_v11 = vadd.f32 %v965_v5, %v100_v62  ;;  %v45_v59 = vld [vmem:[%s1375_s0 + $0xf8] sm:$0xff] }
  0x10   :  { %v233_v10 = vmax.f32 %v169_v61, 0.0  ;;  %v766_v14 = vpack.c.bf16 %v231_v1, %v230_v0  ;;  %v102_v16 = vmul.f32 %v958_v2, %v31_v63  ;;  %v172_v17 = vadd.f32 %v965_v5, %v101_v4  ;;  %v46_v0 = vld [vmem:[%s1375_s0 + $0x100] sm:$0xff] }
  0x11   :  { %v234_v15 = vmax.f32 %v170_v3, 0.0  ;;  %901 = vst [vmem:[%s1378_s3 + $0x20] sm:$0xff] %v761_v8   ;;  %v235_v20 = vmax.f32 %v171_v11, 0.0  ;;  %v103_v21 = vmul.f32 %v958_v2, %v32_v6  ;;  %v104_v22 = vmul.f32 %v958_v2, %v33_v7  ;;  %v47_v11 = vld [vmem:[%s1375_s0 + $0x108] sm:$0xff] }
  0x12   :  { %v771_v19 = vpack.c.bf16 %v233_v10, %v232_v9  ;;  %902 = vst [vmem:[%s1378_s3 + $0x28] sm:$0xff] %v766_v14   ;;  %v173_v24 = vadd.f32 %v965_v5, %v102_v16  ;;  %v236_v25 = vmax.f32 %v172_v17, 0.0  ;;  %v105_v26 = vmul.f32 %v958_v2, %v34_v12  ;;  %v48_v16 = vld [vmem:[%s1375_s0 + $0x110] sm:$0xff]  ;;  %v49_v17 = vld [vmem:[%s1375_s0 + $0x118] sm:$0xff] }
  0x13   :  { %v106_v27 = vmul.f32 %v958_v2, %v35_v13  ;;  %v776_v29 = vpack.c.bf16 %v235_v20, %v234_v15  ;;  %v174_v30 = vadd.f32 %v965_v5, %v103_v21  ;;  %v175_v31 = vadd.f32 %v965_v5, %v104_v22  ;;  %v50_v22 = vld [vmem:[%s1375_s0 + $0x120] sm:$0xff] }
  0x14   :  { %903 = vst [vmem:[%s1378_s3 + $0x30] sm:$0xff] %v771_v19   ;;  %v107_v32 = vmul.f32 %v958_v2, %v36_v18  ;;  %v237_v33 = vmax.f32 %v173_v24, 0.0  ;;  %v176_v34 = vadd.f32 %v965_v5, %v105_v26  ;;  %v108_v36 = vmul.f32 %v958_v2, %v37_v23  ;;  %v51_v23 = vld [vmem:[%s1375_s0 + $0x128] sm:$0xff] }
  0x15   :  { %v177_v35 = vadd.f32 %v965_v5, %v106_v27  ;;  %904 = vst [vmem:[%s1378_s3 + $0x38] sm:$0xff] %v776_v29   ;;  %v238_v38 = vmax.f32 %v174_v30, 0.0  ;;  %v239_v39 = vmax.f32 %v175_v31, 0.0  ;;  %v109_v41 = vmul.f32 %v958_v2, %v38_v28  ;;  %v52_v28 = vld [vmem:[%s1375_s0 + $0x130] sm:$0xff] }
  0x16   :  { %v178_v40 = vadd.f32 %v965_v5, %v107_v32  ;;  %v781_v44 = vpack.c.bf16 %v237_v33, %v236_v25  ;;  %v240_v45 = vmax.f32 %v176_v34, 0.0  ;;  %v179_v47 = vadd.f32 %v965_v5, %v108_v36  ;;  %v53_v33 = vld [vmem:[%s1375_s0 + $0x138] sm:$0xff] }
  0x17   :  { %v241_v46 = vmax.f32 %v177_v35, 0.0  ;;  %v786_v50 = vpack.c.bf16 %v239_v39, %v238_v38  ;;  %v110_v52 = vmul.f32 %v958_v2, %v39_v37  ;;  %v180_v53 = vadd.f32 %v965_v5, %v109_v41  ;;  %v54_v38 = vld [vmem:[%s1375_s0 + $0x140] sm:$0xff] }
  0x18   :  { %v242_v51 = vmax.f32 %v178_v40, 0.0  ;;  %905 = vst [vmem:[%s1378_s3 + $0x40] sm:$0xff] %v781_v44   ;;  %v243_v56 = vmax.f32 %v179_v47, 0.0  ;;  %v111_v57 = vmul.f32 %v958_v2, %v40_v42  ;;  %v112_v58 = vmul.f32 %v958_v2, %v41_v43  ;;  %v55_v47 = vld [vmem:[%s1375_s0 + $0x148] sm:$0xff] }
  0x19   :  { %v791_v55 = vpack.c.bf16 %v241_v46, %v240_v45  ;;  %906 = vst [vmem:[%s1378_s3 + $0x48] sm:$0xff] %v786_v50   ;;  %v181_v60 = vadd.f32 %v965_v5, %v110_v52  ;;  %v244_v61 = vmax.f32 %v180_v53, 0.0  ;;  %v113_v62 = vmul.f32 %v958_v2, %v42_v48  ;;  %v56_v52 = vld [vmem:[%s1375_s0 + $0x150] sm:$0xff]  ;;  %v57_v53 = vld [vmem:[%s1375_s0 + $0x158] sm:$0xff] }
  0x1a   :  { %v114_v63 = vmul.f32 %v958_v2, %v43_v49  ;;  %v796_v1 = vpack.c.bf16 %v243_v56, %v242_v51  ;;  %v182_v3 = vadd.f32 %v965_v5, %v111_v57  ;;  %v183_v4 = vadd.f32 %v965_v5, %v112_v58  ;;  %v58_v58 = vld [vmem:[%s1375_s0 + $0x160] sm:$0xff] }
  0x1b   :  { %907 = vst [vmem:[%s1378_s3 + $0x50] sm:$0xff] %v791_v55   ;;  %v115_v6 = vmul.f32 %v958_v2, %v44_v54  ;;  %v245_v7 = vmax.f32 %v181_v60, 0.0  ;;  %v184_v8 = vadd.f32 %v965_v5, %v113_v62  ;;  %v116_v10 = vmul.f32 %v958_v2, %v45_v59  ;;  %v59_v59 = vld [vmem:[%s1375_s0 + $0x168] sm:$0xff] }
  0x1c   :  { %v185_v9 = vadd.f32 %v965_v5, %v114_v63  ;;  %908 = vst [vmem:[%s1378_s3 + $0x58] sm:$0xff] %v796_v1   ;;  %v246_v12 = vmax.f32 %v182_v3, 0.0  ;;  %v247_v13 = vmax.f32 %v183_v4, 0.0  ;;  %v117_v15 = vmul.f32 %v958_v2, %v46_v0  ;;  %v60_v0 = vld [vmem:[%s1375_s0 + $0x170] sm:$0xff] }
  0x1d   :  { %v186_v14 = vadd.f32 %v965_v5, %v115_v6  ;;  %v801_v18 = vpack.c.bf16 %v245_v7, %v244_v61  ;;  %v248_v19 = vmax.f32 %v184_v8, 0.0  ;;  %v187_v21 = vadd.f32 %v965_v5, %v116_v10  ;;  %v61_v7 = vld [vmem:[%s1375_s0 + $0x178] sm:$0xff] }
  0x1e   :  { %v249_v20 = vmax.f32 %v185_v9, 0.0  ;;  %v806_v24 = vpack.c.bf16 %v247_v13, %v246_v12  ;;  %v118_v26 = vmul.f32 %v958_v2, %v47_v11  ;;  %v188_v27 = vadd.f32 %v965_v5, %v117_v15  ;;  %v62_v12 = vld [vmem:[%s1375_s0 + $0x180] sm:$0xff] }
  0x1f   :  { %v250_v25 = vmax.f32 %v186_v14, 0.0  ;;  %909 = vst [vmem:[%s1378_s3 + $0x60] sm:$0xff] %v801_v18   ;;  %v251_v30 = vmax.f32 %v187_v21, 0.0  ;;  %v119_v31 = vmul.f32 %v958_v2, %v48_v16  ;;  %v120_v32 = vmul.f32 %v958_v2, %v49_v17  ;;  %v63_v21 = vld [vmem:[%s1375_s0 + $0x188] sm:$0xff] }
  0x20   :  { %v811_v29 = vpack.c.bf16 %v249_v20, %v248_v19  ;;  %910 = vst [vmem:[%s1378_s3 + $0x68] sm:$0xff] %v806_v24   ;;  %v189_v34 = vadd.f32 %v965_v5, %v118_v26  ;;  %v252_v35 = vmax.f32 %v188_v27, 0.0  ;;  %v121_v36 = vmul.f32 %v958_v2, %v50_v22  ;;  %v64_v26 = vld [vmem:[%s1375_s0 + $0x190] sm:$0xff]  ;;  %v65_v27 = vld [vmem:[%s1375_s0 + $0x198] sm:$0xff] }
  0x21   :  { %v122_v37 = vmul.f32 %v958_v2, %v51_v23  ;;  %v816_v39 = vpack.c.bf16 %v251_v30, %v250_v25  ;;  %v190_v40 = vadd.f32 %v965_v5, %v119_v31  ;;  %v191_v41 = vadd.f32 %v965_v5, %v120_v32  ;;  %v66_v32 = vld [vmem:[%s1375_s0 + $0x1a0] sm:$0xff] }
  0x22   :  { %911 = vst [vmem:[%s1378_s3 + $0x70] sm:$0xff] %v811_v29   ;;  %v123_v42 = vmul.f32 %v958_v2, %v52_v28  ;;  %v253_v43 = vmax.f32 %v189_v34, 0.0  ;;  %v192_v44 = vadd.f32 %v965_v5, %v121_v36  ;;  %v124_v46 = vmul.f32 %v958_v2, %v53_v33  ;;  %v67_v33 = vld [vmem:[%s1375_s0 + $0x1a8] sm:$0xff] }
  0x23   :  { %v193_v45 = vadd.f32 %v965_v5, %v122_v37  ;;  %912 = vst [vmem:[%s1378_s3 + $0x78] sm:$0xff] %v816_v39   ;;  %v254_v48 = vmax.f32 %v190_v40, 0.0  ;;  %v255_v49 = vmax.f32 %v191_v41, 0.0  ;;  %v125_v51 = vmul.f32 %v958_v2, %v54_v38  ;;  %v68_v38 = vld [vmem:[%s1375_s0 + $0x1b0] sm:$0xff] }
  0x24   :  { %v194_v50 = vadd.f32 %v965_v5, %v123_v42  ;;  %v821_v54 = vpack.c.bf16 %v253_v43, %v252_v35  ;;  %v256_v55 = vmax.f32 %v192_v44, 0.0  ;;  %v195_v57 = vadd.f32 %v965_v5, %v124_v46  ;;  %v69_v43 = vld [vmem:[%s1375_s0 + $0x1b8] sm:$0xff] }
  0x25   :  { %v257_v56 = vmax.f32 %v193_v45, 0.0  ;;  %v826_v60 = vpack.c.bf16 %v255_v49, %v254_v48  ;;  %v126_v62 = vmul.f32 %v958_v2, %v55_v47  ;;  %v196_v63 = vadd.f32 %v965_v5, %v125_v51  ;;  %v70_v48 = vld [vmem:[%s1375_s0 + $0x1c0] sm:$0xff] }
  0x26   :  { %v258_v61 = vmax.f32 %v194_v50, 0.0  ;;  %913 = vst [vmem:[%s1378_s3 + $0x80] sm:$0xff] %v821_v54   ;;  %v259_v3 = vmax.f32 %v195_v57, 0.0  ;;  %v127_v4 = vmul.f32 %v958_v2, %v56_v52  ;;  %v128_v6 = vmul.f32 %v958_v2, %v57_v53  ;;  %v71_v57 = vld [vmem:[%s1375_s0 + $0x1c8] sm:$0xff] }
  0x27   :  { %v831_v1 = vpack.c.bf16 %v257_v56, %v256_v55  ;;  %914 = vst [vmem:[%s1378_s3 + $0x88] sm:$0xff] %v826_v60   ;;  %v197_v8 = vadd.f32 %v965_v5, %v126_v62  ;;  %v260_v9 = vmax.f32 %v196_v63, 0.0  ;;  %v129_v10 = vmul.f32 %v958_v2, %v58_v58  ;;  %v72_v62 = vld [vmem:[%s1375_s0 + $0x1d0] sm:$0xff]  ;;  %v73_v63 = vld [vmem:[%s1375_s0 + $0x1d8] sm:$0xff] }
  0x28   :  { %v130_v11 = vmul.f32 %v958_v2, %v59_v59  ;;  %v836_v13 = vpack.c.bf16 %v259_v3, %v258_v61  ;;  %v198_v14 = vadd.f32 %v965_v5, %v127_v4  ;;  %v199_v15 = vadd.f32 %v965_v5, %v128_v6  ;;  %v74_v6 = vld [vmem:[%s1375_s0 + $0x1e0] sm:$0xff] }
  0x29   :  { %915 = vst [vmem:[%s1378_s3 + $0x90] sm:$0xff] %v831_v1   ;;  %v131_v16 = vmul.f32 %v958_v2, %v60_v0  ;;  %v261_v17 = vmax.f32 %v197_v8, 0.0  ;;  %v200_v18 = vadd.f32 %v965_v5, %v129_v10  ;;  %v132_v20 = vmul.f32 %v958_v2, %v61_v7  ;;  %v75_v7 = vld [vmem:[%s1375_s0 + $0x1e8] sm:$0xff] }
  0x2a   :  { %v201_v19 = vadd.f32 %v965_v5, %v130_v11  ;;  %916 = vst [vmem:[%s1378_s3 + $0x98] sm:$0xff] %v836_v13   ;;  %v262_v22 = vmax.f32 %v198_v14, 0.0  ;;  %v263_v23 = vmax.f32 %v199_v15, 0.0  ;;  %v133_v25 = vmul.f32 %v958_v2, %v62_v12  ;;  %v76_v12 = vld [vmem:[%s1375_s0 + $0x1f0] sm:$0xff] }
  0x2b   :  { %v202_v24 = vadd.f32 %v965_v5, %v131_v16  ;;  %v841_v28 = vpack.c.bf16 %v261_v17, %v260_v9  ;;  %v264_v29 = vmax.f32 %v200_v18, 0.0  ;;  %v203_v31 = vadd.f32 %v965_v5, %v132_v20  ;;  %v77_v17 = vld [vmem:[%s1375_s0 + $0x1f8] sm:$0xff] }
  0x2c   :  { %v265_v30 = vmax.f32 %v201_v19, 0.0  ;;  %v846_v34 = vpack.c.bf16 %v263_v23, %v262_v22  ;;  %v134_v36 = vmul.f32 %v958_v2, %v63_v21  ;;  %v204_v37 = vadd.f32 %v965_v5, %v133_v25 }
  0x2d   :  { %v266_v35 = vmax.f32 %v202_v24, 0.0  ;;  %917 = vst [vmem:[%s1378_s3 + $0xa0] sm:$0xff] %v841_v28   ;;  %v267_v40 = vmax.f32 %v203_v31, 0.0  ;;  %v135_v41 = vmul.f32 %v958_v2, %v64_v26  ;;  %v136_v42 = vmul.f32 %v958_v2, %v65_v27 }
  0x2e   :  { %v851_v39 = vpack.c.bf16 %v265_v30, %v264_v29  ;;  %918 = vst [vmem:[%s1378_s3 + $0xa8] sm:$0xff] %v846_v34   ;;  %v205_v44 = vadd.f32 %v965_v5, %v134_v36  ;;  %v268_v45 = vmax.f32 %v204_v37, 0.0  ;;  %v137_v46 = vmul.f32 %v958_v2, %v66_v32 }
  0x2f   :  { %v138_v47 = vmul.f32 %v958_v2, %v67_v33  ;;  %v856_v49 = vpack.c.bf16 %v267_v40, %v266_v35  ;;  %v206_v50 = vadd.f32 %v965_v5, %v135_v41  ;;  %v207_v51 = vadd.f32 %v965_v5, %v136_v42 }
  0x30   :  { %919 = vst [vmem:[%s1378_s3 + $0xb0] sm:$0xff] %v851_v39   ;;  %v139_v52 = vmul.f32 %v958_v2, %v68_v38  ;;  %v269_v53 = vmax.f32 %v205_v44, 0.0  ;;  %v208_v54 = vadd.f32 %v965_v5, %v137_v46  ;;  %v140_v56 = vmul.f32 %v958_v2, %v69_v43 }
  0x31   :  { %v209_v55 = vadd.f32 %v965_v5, %v138_v47  ;;  %920 = vst [vmem:[%s1378_s3 + $0xb8] sm:$0xff] %v856_v49   ;;  %v270_v58 = vmax.f32 %v206_v50, 0.0  ;;  %v271_v59 = vmax.f32 %v207_v51, 0.0  ;;  %v141_v61 = vmul.f32 %v958_v2, %v70_v48 }
  0x32   :  { %v210_v60 = vadd.f32 %v965_v5, %v139_v52  ;;  %v861_v0 = vpack.c.bf16 %v269_v53, %v268_v45  ;;  %v272_v1 = vmax.f32 %v208_v54, 0.0  ;;  %v211_v4 = vadd.f32 %v965_v5, %v140_v56 }
  0x33   :  { %v273_v3 = vmax.f32 %v209_v55, 0.0  ;;  %v866_v8 = vpack.c.bf16 %v271_v59, %v270_v58  ;;  %v142_v10 = vmul.f32 %v958_v2, %v71_v57  ;;  %v212_v11 = vadd.f32 %v965_v5, %v141_v61 }
  0x34   :  { %v274_v9 = vmax.f32 %v210_v60, 0.0  ;;  %921 = vst [vmem:[%s1378_s3 + $0xc0] sm:$0xff] %v861_v0   ;;  %v275_v14 = vmax.f32 %v211_v4, 0.0  ;;  %v143_v15 = vmul.f32 %v958_v2, %v72_v62  ;;  %v144_v16 = vmul.f32 %v958_v2, %v73_v63 }
  0x35   :  { %v871_v13 = vpack.c.bf16 %v273_v3, %v272_v1  ;;  %922 = vst [vmem:[%s1378_s3 + $0xc8] sm:$0xff] %v866_v8   ;;  %v213_v18 = vadd.f32 %v965_v5, %v142_v10  ;;  %v276_v19 = vmax.f32 %v212_v11, 0.0  ;;  %v145_v20 = vmul.f32 %v958_v2, %v74_v6 }
  0x36   :  { %v146_v21 = vmul.f32 %v958_v2, %v75_v7  ;;  %v876_v22 = vpack.c.bf16 %v275_v14, %v274_v9  ;;  %v214_v23 = vadd.f32 %v965_v5, %v143_v15  ;;  %v215_v24 = vadd.f32 %v965_v5, %v144_v16 }
  0x37   :  { %923 = vst [vmem:[%s1378_s3 + $0xd0] sm:$0xff] %v871_v13   ;;  %v147_v25 = vmul.f32 %v958_v2, %v76_v12  ;;  %v277_v26 = vmax.f32 %v213_v18, 0.0  ;;  %v216_v27 = vadd.f32 %v965_v5, %v145_v20  ;;  %v148_v29 = vmul.f32 %v958_v2, %v77_v17 }
  0x38   :  { %v217_v28 = vadd.f32 %v965_v5, %v146_v21  ;;  %924 = vst [vmem:[%s1378_s3 + $0xd8] sm:$0xff] %v876_v22   ;;  %v278_v30 = vmax.f32 %v214_v23, 0.0  ;;  %v279_v31 = vmax.f32 %v215_v24, 0.0 }
  0x39   :  { %v218_v32 = vadd.f32 %v965_v5, %v147_v25  ;;  %v881_v33 = vpack.c.bf16 %v277_v26, %v276_v19  ;;  %v280_v34 = vmax.f32 %v216_v27, 0.0  ;;  %v219_v36 = vadd.f32 %v965_v5, %v148_v29 }
  0x3a   :  { %v281_v35 = vmax.f32 %v217_v28, 0.0  ;;  %v886_v37 = vpack.c.bf16 %v279_v31, %v278_v30 }
  0x3b   :  { %v282_v38 = vmax.f32 %v218_v32, 0.0  ;;  %925 = vst [vmem:[%s1378_s3 + $0xe0] sm:$0xff] %v881_v33   ;;  %v283_v39 = vmax.f32 %v219_v36, 0.0 }
  0x3c   :  { %v891_v2 = vpack.c.bf16 %v281_v35, %v280_v34  ;;  %926 = vst [vmem:[%s1378_s3 + $0xe8] sm:$0xff] %v886_v37  }
  0x3d   :  { %v896_v40 = vpack.c.bf16 %v283_v39, %v282_v38 }
  0x3e   :  { %927 = vst [vmem:[%s1378_s3 + $0xf0] sm:$0xff] %v891_v2  }
  0x3f   :  { %928 = vst [vmem:[%s1378_s3 + $0xf8] sm:$0xff] %v896_v40  }

// kernel: unet_hrpxp_forward.53
= control target key start
LH: loop header
LB: loop body
LE: loop exit
PB: predicated region body
PF: predicated region fallthrough
CT: control target
= control target key end

     0   :  { %s1203_s15 = smov 0   ;;  %s1205_s16 = smov 0   ;;  %s1490_s0 = inlined_call_operand.vmem [shape: bf16[512,128], index: 0, kind: input, shape index: {}]   ;;  %s1491_s1 = inlined_call_operand.vmem [shape: bf16[128,128], index: 1, kind: input, shape index: {}]   ;;  %s1492_s2 = inlined_call_operand.vmem [shape: f32[512,128], index: 2, kind: output, shape index: {0}]   ;;  %s1493_s3 = inlined_call_operand.vmem [shape: f32[1,128], index: 3, kind: output, shape index: {1}]   ;;  %s1494_s4 = inlined_call_operand.vmem [shape: f32[1,128], index: 4, kind: output, shape index: {2}]  }
   0x1   :  { %s1207_s17 = smov 0  }
   0x2 LB: > { %s27_s18 = sadd.s32 1, %s1170_s16  ;;  %p981_p0 = scmp.ge.s32.totalorder %s1174_s17, 1  ;;  %s1174_s17 = sphi %s1207_s17, %s15_s17   ;;  %s1170_s16 = sphi %s1205_s16, %s1496_s16   ;;  %s1166_s15 = sphi %s1203_s15, %s1495_s15  }
   0x3   : > { %p29_p1 = scmp.ge.s32.totalorder %s27_s18, 2  ;;  %p186_p2 = scmp.lt.s32.totalorder %s1174_s17, 3 }
   0x5   : > { %s1498_s18 = smov (%p29_p1, %s27_s18), 0  ;;  %p187_p3 = pnand %p981_p0, %p186_p2 }
   0x6   : > { %s982_s19 = sshll.u32 (!%p187_p3), %s1166_s15, 5  ;;  %p278_p4 = scmp.eq.s32.totalorder (!%p187_p3), %s1166_s15, 0  ;;  %v1176_v0 = vmov (!%p187_p3), 0.0  }
   0x7   : > { %190 = sbr.rel (%p187_p3) target bundleno = 362 (0x16a), region = 28  ;;  %p221_p5 = scmp.lt.s32.totalorder (!%p187_p3), %s982_s19, 63 }
   0xe   : > { %s1500_s19 = smov (!%p221_p5, %s982_s19), 63  ;;  %v1177_v1 = vmov (%p278_p4), 0.0  }
   0xf   : > { %s983_s20 = sshll.u32 %s1500_s19, 2  ;;  %s985_s21 = sshll.u32 %s1500_s19, 3  ;;  %283 = vst [vmem:[%s1493_s3] sm:$0x1] (%p278_p4), %v1177_v1  ;;  %284 = vst [vmem:[%s1494_s4] sm:$0x1] (%p278_p4), %v1177_v1 }
  0x10   : > { %s1228_s24 = scalar_lea.vmem %s1490_s0, %s983_s20  ;;  %s1233_s27 = scalar_lea.vmem %s1492_s2, %s985_s21 }
  0x11   : > { %246 = vst [vmem:[%s1233_s27] sm:$0xff] %v1176_v0  ;;  %247 = vst [vmem:[%s1233_s27 + $0x8] sm:$0xff] %v1176_v0 }
  0x12   : > { %248 = vst [vmem:[%s1233_s27 + $0x10] sm:$0xff] %v1176_v0  ;;  %249 = vst [vmem:[%s1233_s27 + $0x18] sm:$0xff] %v1176_v0 }
  0x13   : > { %250 = vst [vmem:[%s1233_s27 + $0x20] sm:$0xff] %v1176_v0  ;;  %251 = vst [vmem:[%s1233_s27 + $0x28] sm:$0xff] %v1176_v0 }
  0x14   : > { %252 = vst [vmem:[%s1233_s27 + $0x30] sm:$0xff] %v1176_v0  ;;  %253 = vst [vmem:[%s1233_s27 + $0x38] sm:$0xff] %v1176_v0 }
  0x15   : > { %254 = vst [vmem:[%s1233_s27 + $0x40] sm:$0xff] %v1176_v0  ;;  %255 = vst [vmem:[%s1233_s27 + $0x48] sm:$0xff] %v1176_v0 }
  0x16   : > { %256 = vst [vmem:[%s1233_s27 + $0x50] sm:$0xff] %v1176_v0  ;;  %257 = vst [vmem:[%s1233_s27 + $0x58] sm:$0xff] %v1176_v0 }
  0x17   : > { %258 = vst [vmem:[%s1233_s27 + $0x60] sm:$0xff] %v1176_v0  ;;  %259 = vst [vmem:[%s1233_s27 + $0x68] sm:$0xff] %v1176_v0 }
  0x18   : > { %260 = vst [vmem:[%s1233_s27 + $0x70] sm:$0xff] %v1176_v0  ;;  %261 = vst [vmem:[%s1233_s27 + $0x78] sm:$0xff] %v1176_v0 }
  0x19   : > { %262 = vst [vmem:[%s1233_s27 + $0x80] sm:$0xff] %v1176_v0  ;;  %263 = vst [vmem:[%s1233_s27 + $0x88] sm:$0xff] %v1176_v0 }
  0x1a   : > { %264 = vst [vmem:[%s1233_s27 + $0x90] sm:$0xff] %v1176_v0  ;;  %265 = vst [vmem:[%s1233_s27 + $0x98] sm:$0xff] %v1176_v0  ;;  %282 = sbr.rel (!%p278_p4) target bundleno = 33 (0x21), region = 36 }
  0x1b   : > { %266 = vst [vmem:[%s1233_s27 + $0xa0] sm:$0xff] %v1176_v0  ;;  %267 = vst [vmem:[%s1233_s27 + $0xa8] sm:$0xff] %v1176_v0 }
  0x1c   : > { %268 = vst [vmem:[%s1233_s27 + $0xb0] sm:$0xff] %v1176_v0  ;;  %269 = vst [vmem:[%s1233_s27 + $0xb8] sm:$0xff] %v1176_v0 }
  0x1d   : > { %270 = vst [vmem:[%s1233_s27 + $0xc0] sm:$0xff] %v1176_v0  ;;  %271 = vst [vmem:[%s1233_s27 + $0xc8] sm:$0xff] %v1176_v0 }
  0x1e   : > { %272 = vst [vmem:[%s1233_s27 + $0xd0] sm:$0xff] %v1176_v0  ;;  %273 = vst [vmem:[%s1233_s27 + $0xd8] sm:$0xff] %v1176_v0 }
  0x1f   : > { %274 = vst [vmem:[%s1233_s27 + $0xe0] sm:$0xff] %v1176_v0  ;;  %275 = vst [vmem:[%s1233_s27 + $0xe8] sm:$0xff] %v1176_v0 }
  0x20   : > { %276 = vst [vmem:[%s1233_s27 + $0xf0] sm:$0xff] %v1176_v0  ;;  %277 = vst [vmem:[%s1233_s27 + $0xf8] sm:$0xff] %v1176_v0 }
  0x21 PF: > { %v1128_v2 = vld [vmem:[%s1491_s1] sm:$0xff]   ;;  %v1129_v3 = vld [vmem:[%s1491_s1 + $0x8] sm:$0xff]   ;;  %v1130_v4 = vld [vmem:[%s1491_s1 + $0x10] sm:$0xff]  }
  0x22   : > { %1038 = vmatprep.subr.bf16.mxu0 %v1128_v2  ;;  %1086 = vmatprep.subr.bf16.mxu1 %v1128_v2  ;;  %v1131_v5 = vld [vmem:[%s1491_s1 + $0x18] sm:$0xff]   ;;  %v1136_v6 = vld [vmem:[%s1228_s24] sm:$0xff]   ;;  %v1133_v8 = vld [vmem:[%s1491_s1 + $0x28] sm:$0xff]  }
  0x23   : > { %1039 = vmatpush3.bf16.msra.mxu0 %v1128_v2  ;;  %1094 = vmatpush3.bf16.msra.mxu1 %v1128_v2  ;;  %v1132_v7 = vld [vmem:[%s1491_s1 + $0x20] sm:$0xff]   ;;  %v1134_v10 = vld [vmem:[%s1491_s1 + $0x30] sm:$0xff]   ;;  %v1135_v11 = vld [vmem:[%s1491_s1 + $0x38] sm:$0xff]  }
  0x24   : > { %1040 = vmatprep.subr.bf16.mxu0 %v1129_v3  ;;  %1087 = vmatprep.subr.bf16.mxu1 %v1129_v3  ;;  %v1144_v9 = vld [vmem:[%s1228_s24 + $0x40] sm:$0xff]   ;;  %v1137_v12 = vld [vmem:[%s1228_s24 + $0x8] sm:$0xff]   ;;  %v1138_v14 = vld [vmem:[%s1228_s24 + $0x10] sm:$0xff]  }
  0x25   : > { %1054 = vmatprep.mubr.bf16.mxu0 %v1136_v6  ;;  %1070 = vmatprep.mubr.bf16.mxu1 %v1144_v9  ;;  %v1145_v13 = vld [vmem:[%s1228_s24 + $0x48] sm:$0xff]   ;;  %v1146_v15 = vld [vmem:[%s1228_s24 + $0x50] sm:$0xff]   ;;  %v1139_v16 = vld [vmem:[%s1228_s24 + $0x18] sm:$0xff]  }
  0x26   : > { %v1147_v17 = vld [vmem:[%s1228_s24 + $0x58] sm:$0xff]   ;;  %v1140_v18 = vld [vmem:[%s1228_s24 + $0x20] sm:$0xff]   ;;  %v1141_v20 = vld [vmem:[%s1228_s24 + $0x28] sm:$0xff]  }
  0x27   : > { %1041 = vmatpush3.bf16.msra.mxu0 %v1129_v3  ;;  %1095 = vmatpush3.bf16.msra.mxu1 %v1129_v3  ;;  %v1148_v19 = vld [vmem:[%s1228_s24 + $0x60] sm:$0xff]   ;;  %v1149_v21 = vld [vmem:[%s1228_s24 + $0x68] sm:$0xff]   ;;  %v1142_v22 = vld [vmem:[%s1228_s24 + $0x30] sm:$0xff]  }
  0x28   : > { %1042 = vmatprep.subr.bf16.mxu0 %v1130_v4  ;;  %1088 = vmatprep.subr.bf16.mxu1 %v1130_v4  ;;  %v1150_v23 = vld [vmem:[%s1228_s24 + $0x70] sm:$0xff]   ;;  %v1143_v24 = vld [vmem:[%s1228_s24 + $0x38] sm:$0xff]   ;;  %v285_v28 = vld [vmem:[%s1233_s27] sm:$0xff] }
  0x29   : > { %v1151_v25 = vld [vmem:[%s1228_s24 + $0x78] sm:$0xff]   ;;  %v287_v26 = vld [vmem:[%s1233_s27 + $0x10] sm:$0xff]  ;;  %v301_v29 = vld [vmem:[%s1233_s27 + $0x80] sm:$0xff] }
  0x2a   : > { %v303_v27 = vld [vmem:[%s1233_s27 + $0x90] sm:$0xff]  ;;  %v288_v31 = vld [vmem:[%s1233_s27 + $0x18] sm:$0xff]  ;;  %v286_v36 = vld [vmem:[%s1233_s27 + $0x8] sm:$0xff] }
  0x2b   : > { %1043 = vmatpush3.bf16.msra.mxu0 %v1130_v4  ;;  %1096 = vmatpush3.bf16.msra.mxu1 %v1130_v4  ;;  %v304_v33 = vld [vmem:[%s1233_s27 + $0x98] sm:$0xff]  ;;  %v302_v39 = vld [vmem:[%s1233_s27 + $0x88] sm:$0xff]  ;;  %v291_v53 = vld [vmem:[%s1233_s27 + $0x30] sm:$0xff] }
  0x2c   : > { %1044 = vmatprep.subr.bf16.mxu0 %v1131_v5  ;;  %1089 = vmatprep.subr.bf16.mxu1 %v1131_v5  ;;  %v307_v54 = vld [vmem:[%s1233_s27 + $0xb0] sm:$0xff]  ;;  %v289_v55 = vld [vmem:[%s1233_s27 + $0x20] sm:$0xff]  ;;  %v292_v61 = vld [vmem:[%s1233_s27 + $0x38] sm:$0xff] }
  0x2d   : > { %v305_v56 = vld [vmem:[%s1233_s27 + $0xa0] sm:$0xff]  ;;  %v308_v63 = vld [vmem:[%s1233_s27 + $0xb8] sm:$0xff]  ;;  %v290_v3 = vld [vmem:[%s1233_s27 + $0x28] sm:$0xff] }
  0x2f   : > { %1045 = vmatpush3.bf16.msra.mxu0 %v1131_v5  ;;  %1097 = vmatpush3.bf16.msra.mxu1 %v1131_v5 }
  0x30   : > { %1046 = vmatprep.subr.bf16.mxu0 %v1132_v7  ;;  %1090 = vmatprep.subr.bf16.mxu1 %v1132_v7 }
  0x33   : > { %1047 = vmatpush3.bf16.msra.mxu0 %v1132_v7  ;;  %1098 = vmatpush3.bf16.msra.mxu1 %v1132_v7 }
  0x34   : > { %1048 = vmatprep.subr.bf16.mxu0 %v1133_v8  ;;  %1091 = vmatprep.subr.bf16.mxu1 %v1133_v8 }
  0x37   : > { %1049 = vmatpush3.bf16.msra.mxu0 %v1133_v8  ;;  %1099 = vmatpush3.bf16.msra.mxu1 %v1133_v8 }
  0x38   : > { %1050 = vmatprep.subr.bf16.mxu0 %v1134_v10  ;;  %1092 = vmatprep.subr.bf16.mxu1 %v1134_v10 }
  0x3b   : > { %1051 = vmatpush3.bf16.msra.mxu0 %v1134_v10  ;;  %1100 = vmatpush3.bf16.msra.mxu1 %v1134_v10 }
  0x3c   : > { %1052 = vmatprep.subr.bf16.mxu0 %v1135_v11  ;;  %1093 = vmatprep.subr.bf16.mxu1 %v1135_v11 }
  0x3f   : > { %1053 = vmatpush3.bf16.msra.mxu0 %v1135_v11  ;;  %1101 = vmatpush3.bf16.msra.mxu1 %v1135_v11 }
  0x42   : > { %1055 = vmatmul.mubr.bf16.vlgmr.msra.gmra.mrb[0].mxu0 %v1137_v12  ;;  %1071 = vmatmul.mubr.bf16.vlgmr.msra.gmra.mrb[0].mxu1 %v1145_v13  ;;  %v306_v12 = vld [vmem:[%s1233_s27 + $0xa8] sm:$0xff] }
  0x43   : > { %1058 = vmatprep.mubr.bf16.mxu0 %v1138_v14  ;;  %1074 = vmatprep.mubr.bf16.mxu1 %v1146_v15 }
  0x4a   : > { %1059 = vmatmul.mubr.bf16.gmra.mrb[4].mxu0 %v1139_v16  ;;  %1075 = vmatmul.mubr.bf16.gmra.mrb[4].mxu1 %v1147_v17 }
  0x4b   : > { %1062 = vmatprep.mubr.bf16.mxu0 %v1140_v18  ;;  %1078 = vmatprep.mubr.bf16.mxu1 %v1148_v19 }
  0x52   : > { %1063 = vmatmul.mubr.bf16.gmra.mrb[8].mxu0 %v1141_v20  ;;  %1079 = vmatmul.mubr.bf16.gmra.mrb[8].mxu1 %v1149_v21 }
  0x53   : > { %1066 = vmatprep.mubr.bf16.mxu0 %v1142_v22  ;;  %1082 = vmatprep.mubr.bf16.mxu1 %v1150_v23 }
  0x5a   : > { %1067 = vmatmul.mubr.bf16.gmra.mrb[12].mxu0 %v1143_v24  ;;  %1083 = vmatmul.mubr.bf16.gmra.mrb[12].mxu1 %v1151_v25  ;;  %v295_v25 = vld [vmem:[%s1233_s27 + $0x50] sm:$0xff] }
 0x115   : > { %v1056_v30 = vpop.f32.mrb[0].mxu0  ;;  %v1072_v32 = vpop.f32.mrb[0].mxu1 }
 0x116   : > { %v672_v34 = vadd.f32 %v1056_v30, %v287_v26  ;;  %v543_v35 = vpop.f32.mrb[1].mxu0  ;;  %v1322_v37 = vadd.f32 %v1072_v32, %v303_v27  ;;  %v607_v38 = vpop.f32.mrb[1].mxu1  ;;  %v311_v26 = vld [vmem:[%s1233_s27 + $0xd0] sm:$0xff]  ;;  %v293_v27 = vld [vmem:[%s1233_s27 + $0x40] sm:$0xff] }
 0x117   : > { %v670_v40 = vadd.f32 %v543_v35, %v285_v28  ;;  %v1057_v41 = vpop.f32.mrb[2].mxu0  ;;  %v1325_v42 = vadd.f32 %v607_v38, %v301_v29  ;;  %v1073_v43 = vpop.f32.mrb[2].mxu1  ;;  %v309_v28 = vld [vmem:[%s1233_s27 + $0xc0] sm:$0xff]  ;;  %v312_v35 = vld [vmem:[%s1233_s27 + $0xd8] sm:$0xff] }
 0x118   : > { %704 = vst [vmem:[%s1233_s27 + $0x10] sm:$0xff] %v672_v34  ;;  %v673_v44 = vadd.f32 %v1057_v41, %v288_v31  ;;  %v546_v45 = vpop.f32.mrb[3].mxu0  ;;  %720 = vst [vmem:[%s1233_s27 + $0x90] sm:$0xff] %v1322_v37  ;;  %v1330_v46 = vadd.f32 %v1073_v43, %v304_v33  ;;  %v610_v47 = vpop.f32.mrb[3].mxu1  ;;  %v812_v57 = vmul.f32 %v672_v34, %v672_v34  ;;  %v296_v33 = vld [vmem:[%s1233_s27 + $0x58] sm:$0xff] }
 0x119   : > { %702 = vst [vmem:[%s1233_s27] sm:$0xff] %v670_v40  ;;  %v671_v48 = vadd.f32 %v546_v45, %v286_v36  ;;  %718 = vst [vmem:[%s1233_s27 + $0x80] sm:$0xff] %v1325_v42  ;;  %v1335_v49 = vadd.f32 %v610_v47, %v302_v39  ;;  %v810_v50 = vmul.f32 %v670_v40, %v670_v40 }
 0x11a   : > { %705 = vst [vmem:[%s1233_s27 + $0x18] sm:$0xff] %v673_v44  ;;  %721 = vst [vmem:[%s1233_s27 + $0x98] sm:$0xff] %v1330_v46  ;;  %v813_v0 = vmul.f32 %v673_v44, %v673_v44 }
 0x11b   : > { %703 = vst [vmem:[%s1233_s27 + $0x8] sm:$0xff] %v671_v48  ;;  %v770_v51 = vadd.f32 %v671_v48, %v670_v40  ;;  %v811_v52 = vmul.f32 %v671_v48, %v671_v48  ;;  %719 = vst [vmem:[%s1233_s27 + $0x88] sm:$0xff] %v1335_v49  ;;  %v294_v40 = vld [vmem:[%s1233_s27 + $0x48] sm:$0xff] }
 0x11d   : > { %v771_v58 = vadd.f32 %v770_v51, %v672_v34  ;;  %v842_v59 = vadd.f32 %v811_v52, %v810_v50  ;;  %v1060_v60 = vpop.f32.mrb[4].mxu0  ;;  %v1076_v62 = vpop.f32.mrb[4].mxu1  ;;  %v310_v52 = vld [vmem:[%s1233_s27 + $0xc8] sm:$0xff] }
 0x11e   : > { %v676_v1 = vadd.f32 %v1060_v60, %v291_v53  ;;  %v559_v2 = vpop.f32.mrb[5].mxu0  ;;  %v1350_v4 = vadd.f32 %v1076_v62, %v307_v54  ;;  %v623_v5 = vpop.f32.mrb[5].mxu1 }
 0x11f   : > { %v843_v6 = vadd.f32 %v842_v59, %v812_v57  ;;  %v674_v7 = vadd.f32 %v559_v2, %v289_v55  ;;  %v772_v8 = vadd.f32 %v771_v58, %v673_v44  ;;  %v1061_v9 = vpop.f32.mrb[6].mxu0  ;;  %v1352_v10 = vadd.f32 %v623_v5, %v305_v56  ;;  %v1077_v11 = vpop.f32.mrb[6].mxu1  ;;  %v315_v2 = vld [vmem:[%s1233_s27 + $0xf0] sm:$0xff]  ;;  %v313_v5 = vld [vmem:[%s1233_s27 + $0xe0] sm:$0xff] }
 0x120   : > { %708 = vst [vmem:[%s1233_s27 + $0x30] sm:$0xff] %v676_v1  ;;  %v677_v13 = vadd.f32 %v1061_v9, %v292_v61  ;;  %v562_v14 = vpop.f32.mrb[7].mxu0  ;;  %724 = vst [vmem:[%s1233_s27 + $0xb0] sm:$0xff] %v1350_v4  ;;  %v1358_v15 = vadd.f32 %v1077_v11, %v308_v63  ;;  %v626_v16 = vpop.f32.mrb[7].mxu1  ;;  %v816_v29 = vmul.f32 %v676_v1, %v676_v1  ;;  %v300_v11 = vld [vmem:[%s1233_s27 + $0x78] sm:$0xff] }
 0x121   : > { %706 = vst [vmem:[%s1233_s27 + $0x20] sm:$0xff] %v674_v7  ;;  %v773_v17 = vadd.f32 %v772_v8, %v674_v7  ;;  %v814_v18 = vmul.f32 %v674_v7, %v674_v7  ;;  %v844_v19 = vadd.f32 %v843_v6, %v813_v0  ;;  %v675_v20 = vadd.f32 %v562_v14, %v290_v3  ;;  %v297_v3 = vld [vmem:[%s1233_s27 + $0x60] sm:$0xff] }
 0x122   : > { %722 = vst [vmem:[%s1233_s27 + $0xa0] sm:$0xff] %v1352_v10  ;;  %709 = vst [vmem:[%s1233_s27 + $0x38] sm:$0xff] %v677_v13  ;;  %v1366_v21 = vadd.f32 %v626_v16, %v306_v12  ;;  %v817_v36 = vmul.f32 %v677_v13, %v677_v13 }
 0x123   : > { %725 = vst [vmem:[%s1233_s27 + $0xb8] sm:$0xff] %v1358_v15  ;;  %v845_v22 = vadd.f32 %v844_v19, %v814_v18  ;;  %707 = vst [vmem:[%s1233_s27 + $0x28] sm:$0xff] %v675_v20  ;;  %v774_v23 = vadd.f32 %v773_v17, %v675_v20  ;;  %v815_v24 = vmul.f32 %v675_v20, %v675_v20  ;;  %v298_v18 = vld [vmem:[%s1233_s27 + $0x68] sm:$0xff] }
 0x124   : > { %723 = vst [vmem:[%s1233_s27 + $0xa8] sm:$0xff] %v1366_v21 }
 0x125   : > { %v775_v30 = vadd.f32 %v774_v23, %v676_v1  ;;  %v846_v31 = vadd.f32 %v845_v22, %v815_v24  ;;  %v1064_v32 = vpop.f32.mrb[8].mxu0  ;;  %v1080_v34 = vpop.f32.mrb[8].mxu1  ;;  %v299_v1 = vld [vmem:[%s1233_s27 + $0x70] sm:$0xff] }
 0x126   : > { %v680_v38 = vadd.f32 %v1064_v32, %v295_v25  ;;  %v575_v39 = vpop.f32.mrb[9].mxu0  ;;  %v1378_v41 = vadd.f32 %v1080_v34, %v311_v26  ;;  %v639_v43 = vpop.f32.mrb[9].mxu1 }
 0x127   : > { %v847_v44 = vadd.f32 %v846_v31, %v816_v29  ;;  %v678_v45 = vadd.f32 %v575_v39, %v293_v27  ;;  %v776_v47 = vadd.f32 %v775_v30, %v677_v13  ;;  %v1065_v48 = vpop.f32.mrb[10].mxu0  ;;  %v1380_v50 = vadd.f32 %v639_v43, %v309_v28  ;;  %v1081_v51 = vpop.f32.mrb[10].mxu1  ;;  %v316_v13 = vld [vmem:[%s1233_s27 + $0xf8] sm:$0xff]  ;;  %v314_v28 = vld [vmem:[%s1233_s27 + $0xe8] sm:$0xff] }
 0x128   : > { %712 = vst [vmem:[%s1233_s27 + $0x50] sm:$0xff] %v680_v38  ;;  %v681_v53 = vadd.f32 %v1065_v48, %v296_v33  ;;  %v578_v54 = vpop.f32.mrb[11].mxu0  ;;  %728 = vst [vmem:[%s1233_s27 + $0xd0] sm:$0xff] %v1378_v41  ;;  %v1386_v55 = vadd.f32 %v1081_v51, %v312_v35  ;;  %v642_v56 = vpop.f32.mrb[11].mxu1  ;;  %v820_v6 = vmul.f32 %v680_v38, %v680_v38 }
 0x129   : > { %710 = vst [vmem:[%s1233_s27 + $0x40] sm:$0xff] %v678_v45  ;;  %v777_v57 = vadd.f32 %v776_v47, %v678_v45  ;;  %v818_v58 = vmul.f32 %v678_v45, %v678_v45  ;;  %v848_v59 = vadd.f32 %v847_v44, %v817_v36  ;;  %v679_v60 = vadd.f32 %v578_v54, %v294_v40 }
 0x12a   : > { %726 = vst [vmem:[%s1233_s27 + $0xc0] sm:$0xff] %v1380_v50  ;;  %713 = vst [vmem:[%s1233_s27 + $0x58] sm:$0xff] %v681_v53  ;;  %v1394_v61 = vadd.f32 %v642_v56, %v310_v52  ;;  %v821_v14 = vmul.f32 %v681_v53, %v681_v53 }
 0x12b   : > { %729 = vst [vmem:[%s1233_s27 + $0xd8] sm:$0xff] %v1386_v55  ;;  %v849_v62 = vadd.f32 %v848_v59, %v818_v58  ;;  %711 = vst [vmem:[%s1233_s27 + $0x48] sm:$0xff] %v679_v60  ;;  %v778_v63 = vadd.f32 %v777_v57, %v679_v60  ;;  %v819_v0 = vmul.f32 %v679_v60, %v679_v60 }
 0x12c   : > { %727 = vst [vmem:[%s1233_s27 + $0xc8] sm:$0xff] %v1394_v61  ;;  %v827_v59 = vmul.f32 %v1335_v49, %v1335_v49  ;;  %v828_v60 = vmul.f32 %v1322_v37, %v1322_v37 }
 0x12d   : > { %v779_v7 = vadd.f32 %v778_v63, %v680_v38  ;;  %v850_v8 = vadd.f32 %v849_v62, %v819_v0  ;;  %v1068_v9 = vpop.f32.mrb[12].mxu0  ;;  %v1084_v12 = vpop.f32.mrb[12].mxu1  ;;  %v829_v0 = vmul.f32 %v1330_v46, %v1330_v46 }
 0x12e   : > { %v684_v16 = vadd.f32 %v1068_v9, %v299_v1  ;;  %v591_v17 = vpop.f32.mrb[13].mxu0  ;;  %v1406_v19 = vadd.f32 %v1084_v12, %v315_v2  ;;  %v655_v20 = vpop.f32.mrb[13].mxu1 }
 0x12f   : > { %v851_v22 = vadd.f32 %v850_v8, %v820_v6  ;;  %v682_v23 = vadd.f32 %v591_v17, %v297_v3  ;;  %v780_v24 = vadd.f32 %v779_v7, %v681_v53  ;;  %v1069_v25 = vpop.f32.mrb[14].mxu0  ;;  %v1408_v26 = vadd.f32 %v655_v20, %v313_v5  ;;  %v1085_v27 = vpop.f32.mrb[14].mxu1 }
 0x130   : > { %716 = vst [vmem:[%s1233_s27 + $0x70] sm:$0xff] %v684_v16  ;;  %v685_v29 = vadd.f32 %v1069_v25, %v300_v11  ;;  %v594_v30 = vpop.f32.mrb[15].mxu0  ;;  %732 = vst [vmem:[%s1233_s27 + $0xf0] sm:$0xff] %v1406_v19  ;;  %v1414_v31 = vadd.f32 %v1085_v27, %v316_v13  ;;  %v658_v32 = vpop.f32.mrb[15].mxu1  ;;  %v824_v44 = vmul.f32 %v684_v16, %v684_v16 }
 0x131   : > { %714 = vst [vmem:[%s1233_s27 + $0x60] sm:$0xff] %v682_v23  ;;  %v781_v33 = vadd.f32 %v780_v24, %v682_v23  ;;  %v822_v34 = vmul.f32 %v682_v23, %v682_v23  ;;  %v852_v35 = vadd.f32 %v851_v22, %v821_v14  ;;  %v683_v36 = vadd.f32 %v594_v30, %v298_v18 }
 0x132   : > { %730 = vst [vmem:[%s1233_s27 + $0xe0] sm:$0xff] %v1408_v26  ;;  %717 = vst [vmem:[%s1233_s27 + $0x78] sm:$0xff] %v685_v29  ;;  %v699_v38 = vadd.f32 %v658_v32, %v314_v28  ;;  %v825_v48 = vmul.f32 %v685_v29, %v685_v29  ;;  %v826_v53 = vmul.f32 %v1325_v42, %v1325_v42 }
 0x133   : > { %733 = vst [vmem:[%s1233_s27 + $0xf8] sm:$0xff] %v1414_v31  ;;  %v853_v39 = vadd.f32 %v852_v35, %v822_v34  ;;  %715 = vst [vmem:[%s1233_s27 + $0x68] sm:$0xff] %v683_v36  ;;  %v782_v40 = vadd.f32 %v781_v33, %v683_v36  ;;  %v823_v43 = vmul.f32 %v683_v36, %v683_v36 }
 0x134   : > { %731 = vst [vmem:[%s1233_s27 + $0xe8] sm:$0xff] %v699_v38  ;;  %v831_v7 = vmul.f32 %v1366_v21, %v1366_v21  ;;  %v835_v17 = vmul.f32 %v1394_v61, %v1394_v61  ;;  %v839_v28 = vmul.f32 %v699_v38, %v699_v38  ;;  %v841_v32 = vmul.f32 %v1414_v31, %v1414_v31 }
 0x135   : > { %v783_v45 = vadd.f32 %v782_v40, %v684_v16  ;;  %v854_v47 = vadd.f32 %v853_v39, %v823_v43 }
 0x137   : > { %v855_v51 = vadd.f32 %v854_v47, %v824_v44  ;;  %v784_v52 = vadd.f32 %v783_v45, %v685_v29  ;;  %v840_v29 = vmul.f32 %v1406_v19, %v1406_v19 }
 0x139   : > { %v785_v54 = vadd.f32 %v784_v52, %v1325_v42  ;;  %v856_v56 = vadd.f32 %v855_v51, %v825_v48  ;;  %v830_v42 = vmul.f32 %v1352_v10, %v1352_v10 }
 0x13b   : > { %v857_v57 = vadd.f32 %v856_v56, %v826_v53  ;;  %v786_v58 = vadd.f32 %v785_v54, %v1335_v49 }
 0x13d   : > { %v787_v62 = vadd.f32 %v786_v58, %v1322_v37  ;;  %v858_v63 = vadd.f32 %v857_v57, %v827_v59  ;;  %v832_v37 = vmul.f32 %v1350_v4, %v1350_v4 }
 0x13f   : > { %v859_v1 = vadd.f32 %v858_v63, %v828_v60  ;;  %v788_v2 = vadd.f32 %v787_v62, %v1330_v46  ;;  %v833_v46 = vmul.f32 %v1358_v15, %v1358_v15 }
 0x141   : > { %v789_v3 = vadd.f32 %v788_v2, %v1352_v10  ;;  %v860_v5 = vadd.f32 %v859_v1, %v829_v0  ;;  %v834_v10 = vmul.f32 %v1380_v50, %v1380_v50 }
 0x143   : > { %v861_v6 = vadd.f32 %v860_v5, %v830_v42  ;;  %v790_v49 = vadd.f32 %v789_v3, %v1366_v21 }
 0x145   : > { %v791_v8 = vadd.f32 %v790_v49, %v1350_v4  ;;  %v862_v9 = vadd.f32 %v861_v6, %v831_v7  ;;  %v836_v4 = vmul.f32 %v1378_v41, %v1378_v41 }
 0x147   : > { %v863_v11 = vadd.f32 %v862_v9, %v832_v37  ;;  %v792_v12 = vadd.f32 %v791_v8, %v1358_v15  ;;  %v837_v15 = vmul.f32 %v1386_v55, %v1386_v55 }
 0x149   : > { %v793_v13 = vadd.f32 %v792_v12, %v1380_v50  ;;  %v864_v14 = vadd.f32 %v863_v11, %v833_v46  ;;  %v838_v50 = vmul.f32 %v1408_v26, %v1408_v26 }
 0x14b   : > { %v865_v16 = vadd.f32 %v864_v14, %v834_v10  ;;  %v794_v21 = vadd.f32 %v793_v13, %v1394_v61 }
 0x14d   : > { %v795_v18 = vadd.f32 %v794_v21, %v1378_v41  ;;  %v866_v20 = vadd.f32 %v865_v16, %v835_v17 }
 0x14f   : > { %v867_v22 = vadd.f32 %v866_v20, %v836_v4  ;;  %v796_v23 = vadd.f32 %v795_v18, %v1386_v55 }
 0x151   : > { %v797_v24 = vadd.f32 %v796_v23, %v1408_v26  ;;  %v868_v25 = vadd.f32 %v867_v22, %v837_v15 }
 0x153   : > { %v869_v27 = vadd.f32 %v868_v25, %v838_v50  ;;  %v798_v61 = vadd.f32 %v797_v24, %v699_v38 }
 0x155   : > { %v799_v41 = vadd.f32 %v798_v61, %v1406_v19  ;;  %v870_v30 = vadd.f32 %v869_v27, %v839_v28  ;;  %v769_v19 = vld [vmem:[%s1493_s3] sm:$0x1] }
 0x157   : > { %v800_v55 = vadd.f32 %v799_v41, %v1414_v31  ;;  %v871_v33 = vadd.f32 %v870_v30, %v840_v29  ;;  %v809_v31 = vld [vmem:[%s1494_s4] sm:$0x1] }
 0x159   : > { %v801_v34 = vrot.slane %v800_v55, 4  ;;  %v872_v35 = vadd.f32 %v871_v33, %v841_v32 }
 0x15b   : > { %v802_v36 = vadd.f32 %v801_v34, %v800_v55  ;;  %v873_v26 = vrot.slane %v872_v35, 4 }
 0x15d   : > { %v803_v39 = vrot.slane %v802_v36, 2  ;;  %v874_v40 = vadd.f32 %v873_v26, %v872_v35 }
 0x15f   : > { %v804_v43 = vadd.f32 %v803_v39, %v802_v36  ;;  %v875_v38 = vrot.slane %v874_v40, 2 }
 0x161   : > { %v805_v44 = vrot.slane %v804_v43, 1  ;;  %v876_v45 = vadd.f32 %v875_v38, %v874_v40 }
 0x163   : > { %v806_v47 = vadd.f32 %v805_v44, %v804_v43  ;;  %v877_v48 = vrot.slane %v876_v45, 1 }
 0x165   : > { %v807_v51 = vadd.f32 %v806_v47, %v769_v19  ;;  %v878_v52 = vadd.f32 %v877_v48, %v876_v45 }
 0x167   : > { %808 = vst [vmem:[%s1493_s3] sm:$0x1] %v807_v51  ;;  %v879_v53 = vadd.f32 %v878_v52, %v809_v31 }
 0x169   : > { %880 = vst [vmem:[%s1494_s4] sm:$0x1] %v879_v53 }
 0x16a PF: > { %s15_s17 = sadd.s32 1, %s1174_s17   ;;  %s1495_s15 = smov %s1170_s16 }
 0x16b   : > { %p12_p6 = scmp.ge.s32.totalorder %s15_s17, 4   ;;  %s1496_s16 = smov %s1498_s18 }
 0x16d   :  { %14 = sbr.rel (!%p12_p6) target bundleno = 2 (0x2), region = 89 }

// kernel: unet_hrpxp_forward.63
= control target key start
LH: loop header
LB: loop body
LE: loop exit
PB: predicated region body
PF: predicated region fallthrough
CT: control target
= control target key end

     0   :  { %s1448_s15 = smov 0   ;;  %s1450_s16 = smov 0   ;;  %s1769_s0 = inlined_call_operand.vmem [shape: bf16[512,256], index: 0, kind: input, shape index: {}]   ;;  %s1770_s1 = inlined_call_operand.vmem [shape: bf16[256,128], index: 1, kind: input, shape index: {}]   ;;  %s1771_s2 = inlined_call_operand.vmem [shape: f32[512,128], index: 2, kind: output, shape index: {0}]   ;;  %s1772_s3 = inlined_call_operand.vmem [shape: f32[1,128], index: 3, kind: output, shape index: {1}]   ;;  %s1773_s4 = inlined_call_operand.vmem [shape: f32[1,128], index: 4, kind: output, shape index: {2}]  }
   0x1   :  { %s1452_s17 = smov 0  }
   0x2 LB: > { %s27_s18 = sadd.s32 1, %s1415_s16  ;;  %p1120_p0 = scmp.ge.s32.totalorder %s1419_s17, 1  ;;  %s1419_s17 = sphi %s1452_s17, %s15_s17   ;;  %s1415_s16 = sphi %s1450_s16, %s1775_s16   ;;  %s1411_s15 = sphi %s1448_s15, %s1774_s15  }
   0x3   : > { %p29_p1 = scmp.ge.s32.totalorder %s27_s18, 2  ;;  %p189_p2 = scmp.lt.s32.totalorder %s1419_s17, 3 }
   0x5   : > { %s1777_s18 = smov (%p29_p1, %s27_s18), 0  ;;  %p190_p3 = pnand %p1120_p0, %p189_p2 }
   0x6   : > { %s1121_s19 = sshll.u32 (!%p190_p3), %s1411_s15, 5  ;;  %p286_p4 = scmp.eq.s32.totalorder (!%p190_p3), %s1411_s15, 0  ;;  %v1421_v0 = vmov (!%p190_p3), 0.0  }
   0x7   : > { %193 = sbr.rel (%p190_p3) target bundleno = 392 (0x188), region = 28  ;;  %p227_p5 = scmp.lt.s32.totalorder (!%p190_p3), %s1121_s19, 63 }
   0xe   : > { %s1779_s19 = smov (!%p227_p5, %s1121_s19), 63  ;;  %v1422_v1 = vmov (%p286_p4), 0.0  }
   0xf   : > { %s1177_s20 = sshll.u32 %s1779_s19, 3  ;;  %291 = vst [vmem:[%s1772_s3] sm:$0x1] (%p286_p4), %v1422_v1  ;;  %292 = vst [vmem:[%s1773_s4] sm:$0x1] (%p286_p4), %v1422_v1 }
  0x10   : > { %s1473_s23 = scalar_lea.vmem %s1769_s0, %s1177_s20  ;;  %s1478_s26 = scalar_lea.vmem %s1771_s2, %s1177_s20 }
  0x11   : > { %254 = vst [vmem:[%s1478_s26] sm:$0xff] %v1421_v0  ;;  %255 = vst [vmem:[%s1478_s26 + $0x8] sm:$0xff] %v1421_v0 }
  0x12   : > { %256 = vst [vmem:[%s1478_s26 + $0x10] sm:$0xff] %v1421_v0  ;;  %257 = vst [vmem:[%s1478_s26 + $0x18] sm:$0xff] %v1421_v0 }
  0x13   : > { %258 = vst [vmem:[%s1478_s26 + $0x20] sm:$0xff] %v1421_v0  ;;  %259 = vst [vmem:[%s1478_s26 + $0x28] sm:$0xff] %v1421_v0 }
  0x14   : > { %260 = vst [vmem:[%s1478_s26 + $0x30] sm:$0xff] %v1421_v0  ;;  %261 = vst [vmem:[%s1478_s26 + $0x38] sm:$0xff] %v1421_v0 }
  0x15   : > { %262 = vst [vmem:[%s1478_s26 + $0x40] sm:$0xff] %v1421_v0  ;;  %263 = vst [vmem:[%s1478_s26 + $0x48] sm:$0xff] %v1421_v0 }
  0x16   : > { %264 = vst [vmem:[%s1478_s26 + $0x50] sm:$0xff] %v1421_v0  ;;  %265 = vst [vmem:[%s1478_s26 + $0x58] sm:$0xff] %v1421_v0 }
  0x17   : > { %266 = vst [vmem:[%s1478_s26 + $0x60] sm:$0xff] %v1421_v0  ;;  %267 = vst [vmem:[%s1478_s26 + $0x68] sm:$0xff] %v1421_v0 }
  0x18   : > { %268 = vst [vmem:[%s1478_s26 + $0x70] sm:$0xff] %v1421_v0  ;;  %269 = vst [vmem:[%s1478_s26 + $0x78] sm:$0xff] %v1421_v0 }
  0x19   : > { %270 = vst [vmem:[%s1478_s26 + $0x80] sm:$0xff] %v1421_v0  ;;  %271 = vst [vmem:[%s1478_s26 + $0x88] sm:$0xff] %v1421_v0 }
  0x1a   : > { %272 = vst [vmem:[%s1478_s26 + $0x90] sm:$0xff] %v1421_v0  ;;  %273 = vst [vmem:[%s1478_s26 + $0x98] sm:$0xff] %v1421_v0  ;;  %290 = sbr.rel (!%p286_p4) target bundleno = 33 (0x21), region = 36 }
  0x1b   : > { %274 = vst [vmem:[%s1478_s26 + $0xa0] sm:$0xff] %v1421_v0  ;;  %275 = vst [vmem:[%s1478_s26 + $0xa8] sm:$0xff] %v1421_v0 }
  0x1c   : > { %276 = vst [vmem:[%s1478_s26 + $0xb0] sm:$0xff] %v1421_v0  ;;  %277 = vst [vmem:[%s1478_s26 + $0xb8] sm:$0xff] %v1421_v0 }
  0x1d   : > { %278 = vst [vmem:[%s1478_s26 + $0xc0] sm:$0xff] %v1421_v0  ;;  %279 = vst [vmem:[%s1478_s26 + $0xc8] sm:$0xff] %v1421_v0 }
  0x1e   : > { %280 = vst [vmem:[%s1478_s26 + $0xd0] sm:$0xff] %v1421_v0  ;;  %281 = vst [vmem:[%s1478_s26 + $0xd8] sm:$0xff] %v1421_v0 }
  0x1f   : > { %282 = vst [vmem:[%s1478_s26 + $0xe0] sm:$0xff] %v1421_v0  ;;  %283 = vst [vmem:[%s1478_s26 + $0xe8] sm:$0xff] %v1421_v0 }
  0x20   : > { %284 = vst [vmem:[%s1478_s26 + $0xf0] sm:$0xff] %v1421_v0  ;;  %285 = vst [vmem:[%s1478_s26 + $0xf8] sm:$0xff] %v1421_v0 }
  0x21 PF: > { %v1333_v2 = vld [vmem:[%s1770_s1 + $0x40] sm:$0xff]   ;;  %v1335_v4 = vld [vmem:[%s1770_s1 + $0x48] sm:$0xff]   ;;  %v1337_v6 = vld [vmem:[%s1770_s1 + $0x50] sm:$0xff]  }
  0x22   : > { %v1334_v3 = vld [vmem:[%s1770_s1] sm:$0xff]   ;;  %1179 = vmatprep.subr.bf16.mxu0 %v1333_v2  ;;  %1291 = vmatprep.subr.bf16.mxu1 %v1333_v2  ;;  %v1336_v5 = vld [vmem:[%s1770_s1 + $0x8] sm:$0xff]   ;;  %v1338_v7 = vld [vmem:[%s1770_s1 + $0x10] sm:$0xff]  }
  0x23   : > { %1180 = vmatpush3.bf16.msra.mxu0 %v1334_v3  ;;  %1299 = vmatpush3.bf16.msra.mxu1 %v1334_v3  ;;  %v1339_v8 = vld [vmem:[%s1770_s1 + $0x58] sm:$0xff]   ;;  %v1341_v10 = vld [vmem:[%s1770_s1 + $0x60] sm:$0xff]   ;;  %v1343_v12 = vld [vmem:[%s1770_s1 + $0x68] sm:$0xff]  }
  0x24   : > { %1181 = vmatprep.subr.bf16.mxu0 %v1335_v4  ;;  %1292 = vmatprep.subr.bf16.mxu1 %v1335_v4  ;;  %v1340_v9 = vld [vmem:[%s1770_s1 + $0x18] sm:$0xff]   ;;  %v1342_v11 = vld [vmem:[%s1770_s1 + $0x20] sm:$0xff]   ;;  %v1344_v14 = vld [vmem:[%s1770_s1 + $0x28] sm:$0xff]  }
  0x25   : > { %v1351_v13 = vld [vmem:[%s1473_s23 + $0x4] ss:$8 sps:$4 sm:$0xff]   ;;  %v1345_v15 = vld [vmem:[%s1770_s1 + $0x70] sm:$0xff]   ;;  %v1347_v18 = vld [vmem:[%s1770_s1 + $0x78] sm:$0xff]  }
  0x26   : > { %677 = vmatprep.mubr.bf16.mxu0 %v1351_v13  ;;  %v1363_v16 = vld [vmem:[%s1473_s23 + $0x84] ss:$8 sps:$4 sm:$0xff]   ;;  %v1346_v17 = vld [vmem:[%s1770_s1 + $0x30] sm:$0xff]   ;;  %v1348_v19 = vld [vmem:[%s1770_s1 + $0x38] sm:$0xff]  }
  0x27   : > { %1182 = vmatpush3.bf16.msra.mxu0 %v1336_v5  ;;  %1300 = vmatpush3.bf16.msra.mxu1 %v1336_v5  ;;  %v1349_v20 = vld [vmem:[%s1473_s23] ss:$8 sps:$4 sm:$0xff]   ;;  %v1352_v21 = vld [vmem:[%s1473_s23 + $0x14] ss:$8 sps:$4 sm:$0xff]   ;;  %v1354_v24 = vld [vmem:[%s1473_s23 + $0x10] ss:$8 sps:$4 sm:$0xff]  }
  0x28   : > { %1183 = vmatprep.subr.bf16.mxu0 %v1337_v6  ;;  %1293 = vmatprep.subr.bf16.mxu1 %v1337_v6  ;;  %v1361_v22 = vld [vmem:[%s1473_s23 + $0x80] ss:$8 sps:$4 sm:$0xff]   ;;  %v1367_v23 = vld [vmem:[%s1473_s23 + $0x94] ss:$8 sps:$4 sm:$0xff]   ;;  %v1355_v25 = vld [vmem:[%s1473_s23 + $0x24] ss:$8 sps:$4 sm:$0xff]  }
  0x29   : > { %741 = vmatprep.mubr.bf16.mxu1 %v1363_v16  ;;  %v1369_v26 = vld [vmem:[%s1473_s23 + $0x90] ss:$8 sps:$4 sm:$0xff]   ;;  %v1373_v27 = vld [vmem:[%s1473_s23 + $0xa4] ss:$8 sps:$4 sm:$0xff]   ;;  %v1357_v28 = vld [vmem:[%s1473_s23 + $0x20] ss:$8 sps:$4 sm:$0xff]  }
  0x2a   : > { %v1358_v29 = vld [vmem:[%s1473_s23 + $0x34] ss:$8 sps:$4 sm:$0xff]   ;;  %v1375_v30 = vld [vmem:[%s1473_s23 + $0xa0] ss:$8 sps:$4 sm:$0xff]   ;;  %v1360_v32 = vld [vmem:[%s1473_s23 + $0x30] ss:$8 sps:$4 sm:$0xff]  }
  0x2b   : > { %1184 = vmatpush3.bf16.msra.mxu0 %v1338_v7  ;;  %1301 = vmatpush3.bf16.msra.mxu1 %v1338_v7  ;;  %v1379_v31 = vld [vmem:[%s1473_s23 + $0xb4] ss:$8 sps:$4 sm:$0xff]   ;;  %v1364_v33 = vld [vmem:[%s1473_s23 + $0x44] ss:$8 sps:$4 sm:$0xff]   ;;  %v1381_v34 = vld [vmem:[%s1473_s23 + $0xb0] ss:$8 sps:$4 sm:$0xff]  }
  0x2c   : > { %1185 = vmatprep.subr.bf16.mxu0 %v1339_v8  ;;  %1294 = vmatprep.subr.bf16.mxu1 %v1339_v8  ;;  %v1385_v35 = vld [vmem:[%s1473_s23 + $0xc4] ss:$8 sps:$4 sm:$0xff]   ;;  %v1366_v36 = vld [vmem:[%s1473_s23 + $0x40] ss:$8 sps:$4 sm:$0xff]   ;;  %v1370_v37 = vld [vmem:[%s1473_s23 + $0x54] ss:$8 sps:$4 sm:$0xff]  }
  0x2d   : > { %v1387_v38 = vld [vmem:[%s1473_s23 + $0xc0] ss:$8 sps:$4 sm:$0xff]   ;;  %v1388_v39 = vld [vmem:[%s1473_s23 + $0xd4] ss:$8 sps:$4 sm:$0xff]   ;;  %v1372_v40 = vld [vmem:[%s1473_s23 + $0x50] ss:$8 sps:$4 sm:$0xff]  }
  0x2e   : > { %v1376_v41 = vld [vmem:[%s1473_s23 + $0x64] ss:$8 sps:$4 sm:$0xff]   ;;  %v1390_v42 = vld [vmem:[%s1473_s23 + $0xd0] ss:$8 sps:$4 sm:$0xff]   ;;  %v1378_v44 = vld [vmem:[%s1473_s23 + $0x60] ss:$8 sps:$4 sm:$0xff]  }
  0x2f   : > { %1186 = vmatpush3.bf16.msra.mxu0 %v1340_v9  ;;  %1302 = vmatpush3.bf16.msra.mxu1 %v1340_v9  ;;  %v1391_v43 = vld [vmem:[%s1473_s23 + $0xe4] ss:$8 sps:$4 sm:$0xff]   ;;  %v1382_v45 = vld [vmem:[%s1473_s23 + $0x74] ss:$8 sps:$4 sm:$0xff]   ;;  %v1393_v46 = vld [vmem:[%s1473_s23 + $0xe0] ss:$8 sps:$4 sm:$0xff]  }
  0x30   : > { %1187 = vmatprep.subr.bf16.mxu0 %v1341_v10  ;;  %1295 = vmatprep.subr.bf16.mxu1 %v1341_v10  ;;  %v1394_v47 = vld [vmem:[%s1473_s23 + $0xf4] ss:$8 sps:$4 sm:$0xff]   ;;  %v1384_v48 = vld [vmem:[%s1473_s23 + $0x70] ss:$8 sps:$4 sm:$0xff]   ;;  %v293_v51 = vld [vmem:[%s1478_s26] sm:$0xff] }
  0x31   : > { %v1396_v49 = vld [vmem:[%s1473_s23 + $0xf0] ss:$8 sps:$4 sm:$0xff]   ;;  %v309_v56 = vld [vmem:[%s1478_s26 + $0x80] sm:$0xff]  ;;  %v294_v58 = vld [vmem:[%s1478_s26 + $0x8] sm:$0xff] }
  0x32   : > { %v310_v0 = vld [vmem:[%s1478_s26 + $0x88] sm:$0xff]  ;;  %v295_v10 = vld [vmem:[%s1478_s26 + $0x10] sm:$0xff] }
  0x33   : > { %1188 = vmatpush3.bf16.msra.mxu0 %v1342_v11  ;;  %1303 = vmatpush3.bf16.msra.mxu1 %v1342_v11  ;;  %v311_v16 = vld [vmem:[%s1478_s26 + $0x90] sm:$0xff] }
  0x34   : > { %1189 = vmatprep.subr.bf16.mxu0 %v1343_v12  ;;  %1296 = vmatprep.subr.bf16.mxu1 %v1343_v12 }
  0x37   : > { %1190 = vmatpush3.bf16.msra.mxu0 %v1344_v14  ;;  %1304 = vmatpush3.bf16.msra.mxu1 %v1344_v14 }
  0x38   : > { %1191 = vmatprep.subr.bf16.mxu0 %v1345_v15  ;;  %1297 = vmatprep.subr.bf16.mxu1 %v1345_v15 }
  0x3b   : > { %1192 = vmatpush3.bf16.msra.mxu0 %v1346_v17  ;;  %1305 = vmatpush3.bf16.msra.mxu1 %v1346_v17 }
  0x3c   : > { %1193 = vmatprep.subr.bf16.mxu0 %v1347_v18  ;;  %1298 = vmatprep.subr.bf16.mxu1 %v1347_v18  ;;  %v296_v18 = vld [vmem:[%s1478_s26 + $0x18] sm:$0xff] }
  0x3f   : > { %1194 = vmatpush3.bf16.msra.mxu0 %v1348_v19  ;;  %1306 = vmatpush3.bf16.msra.mxu1 %v1348_v19 }
  0x42   : > { %678 = vmatmul.mubr.bf16.vlgmr.msra.gmra.mrb[0].mxu0 %v1349_v20  ;;  %742 = vmatmul.mubr.bf16.vlgmr.msra.gmra.mrb[0].mxu1 %v1361_v22 }
  0x43   : > { %685 = vmatprep.mubr.bf16.mxu0 %v1352_v21  ;;  %749 = vmatprep.mubr.bf16.mxu1 %v1367_v23 }
  0x4a   : > { %686 = vmatmul.mubr.bf16.gmra.mrb[4].mxu0 %v1354_v24  ;;  %750 = vmatmul.mubr.bf16.gmra.mrb[4].mxu1 %v1369_v26  ;;  %v312_v24 = vld [vmem:[%s1478_s26 + $0x98] sm:$0xff] }
  0x4b   : > { %693 = vmatprep.mubr.bf16.mxu0 %v1355_v25  ;;  %757 = vmatprep.mubr.bf16.mxu1 %v1373_v27 }
  0x52   : > { %694 = vmatmul.mubr.bf16.gmra.mrb[8].mxu0 %v1357_v28  ;;  %758 = vmatmul.mubr.bf16.gmra.mrb[8].mxu1 %v1375_v30 }
  0x53   : > { %701 = vmatprep.mubr.bf16.mxu0 %v1358_v29  ;;  %765 = vmatprep.mubr.bf16.mxu1 %v1379_v31 }
  0x5a   : > { %702 = vmatmul.mubr.bf16.gmra.mrb[12].mxu0 %v1360_v32  ;;  %766 = vmatmul.mubr.bf16.gmra.mrb[12].mxu1 %v1381_v34 }
  0x5b   : > { %709 = vmatprep.mubr.bf16.mxu0 %v1364_v33  ;;  %773 = vmatprep.mubr.bf16.mxu1 %v1385_v35 }
  0x62   : > { %710 = vmatmul.mubr.bf16.gmra.mrb[16].mxu0 %v1366_v36  ;;  %774 = vmatmul.mubr.bf16.gmra.mrb[16].mxu1 %v1387_v38  ;;  %v297_v36 = vld [vmem:[%s1478_s26 + $0x20] sm:$0xff] }
  0x63   : > { %717 = vmatprep.mubr.bf16.mxu0 %v1370_v37  ;;  %781 = vmatprep.mubr.bf16.mxu1 %v1388_v39 }
  0x6a   : > { %718 = vmatmul.mubr.bf16.gmra.mrb[20].mxu0 %v1372_v40  ;;  %782 = vmatmul.mubr.bf16.gmra.mrb[20].mxu1 %v1390_v42  ;;  %v313_v42 = vld [vmem:[%s1478_s26 + $0xa0] sm:$0xff] }
  0x6b   : > { %725 = vmatprep.mubr.bf16.mxu0 %v1376_v41  ;;  %789 = vmatprep.mubr.bf16.mxu1 %v1391_v43 }
  0x72   : > { %726 = vmatmul.mubr.bf16.gmra.mrb[24].mxu0 %v1378_v44  ;;  %790 = vmatmul.mubr.bf16.gmra.mrb[24].mxu1 %v1393_v46  ;;  %v298_v44 = vld [vmem:[%s1478_s26 + $0x28] sm:$0xff] }
  0x73   : > { %733 = vmatprep.mubr.bf16.mxu0 %v1382_v45  ;;  %797 = vmatprep.mubr.bf16.mxu1 %v1394_v47 }
  0x7a   : > { %734 = vmatmul.mubr.bf16.gmra.mrb[28].mxu0 %v1384_v48  ;;  %798 = vmatmul.mubr.bf16.gmra.mrb[28].mxu1 %v1396_v49 }
 0x115   : > { %v1195_v50 = vpop.f32.mrb[0].mxu0  ;;  %v1243_v53 = vpop.f32.mrb[0].mxu1 }
 0x116   : > { %v1196_v52 = vpop.f32.mrb[1].mxu0  ;;  %v1244_v57 = vpop.f32.mrb[1].mxu1 }
 0x117   : > { %v1197_v54 = vadd.f32 %v1196_v52, %v1195_v50  ;;  %v1198_v55 = vpop.f32.mrb[2].mxu0  ;;  %v1245_v60 = vadd.f32 %v1244_v57, %v1243_v53  ;;  %v1246_v61 = vpop.f32.mrb[2].mxu1  ;;  %v314_v50 = vld [vmem:[%s1478_s26 + $0xa8] sm:$0xff] }
 0x118   : > { %v1199_v59 = vpop.f32.mrb[3].mxu0  ;;  %v1247_v1 = vpop.f32.mrb[3].mxu1 }
 0x119   : > { %v806_v62 = vadd.f32 %v1197_v54, %v293_v51  ;;  %v1200_v63 = vadd.f32 %v1199_v59, %v1198_v55  ;;  %v1604_v2 = vadd.f32 %v1245_v60, %v309_v56  ;;  %v1248_v3 = vadd.f32 %v1247_v1, %v1246_v61 }
 0x11b   : > { %838 = vst [vmem:[%s1478_s26] sm:$0xff] %v806_v62  ;;  %v807_v4 = vadd.f32 %v1200_v63, %v294_v58  ;;  %854 = vst [vmem:[%s1478_s26 + $0x80] sm:$0xff] %v1604_v2  ;;  %v1609_v5 = vadd.f32 %v1248_v3, %v310_v0  ;;  %v946_v6 = vmul.f32 %v806_v62, %v806_v62 }
 0x11d   : > { %839 = vst [vmem:[%s1478_s26 + $0x8] sm:$0xff] %v807_v4  ;;  %v906_v7 = vadd.f32 %v807_v4, %v806_v62  ;;  %v947_v8 = vmul.f32 %v807_v4, %v807_v4  ;;  %v1201_v9 = vpop.f32.mrb[4].mxu0  ;;  %855 = vst [vmem:[%s1478_s26 + $0x88] sm:$0xff] %v1609_v5  ;;  %v1249_v12 = vpop.f32.mrb[4].mxu1  ;;  %v299_v62 = vld [vmem:[%s1478_s26 + $0x30] sm:$0xff] }
 0x11e   : > { %v1202_v11 = vpop.f32.mrb[5].mxu0  ;;  %v1250_v17 = vpop.f32.mrb[5].mxu1 }
 0x11f   : > { %v978_v13 = vadd.f32 %v947_v8, %v946_v6  ;;  %v1203_v14 = vadd.f32 %v1202_v11, %v1201_v9  ;;  %v1204_v15 = vpop.f32.mrb[6].mxu0  ;;  %v1251_v20 = vadd.f32 %v1250_v17, %v1249_v12  ;;  %v1252_v21 = vpop.f32.mrb[6].mxu1  ;;  %v315_v6 = vld [vmem:[%s1478_s26 + $0xb0] sm:$0xff]  ;;  %v300_v8 = vld [vmem:[%s1478_s26 + $0x38] sm:$0xff] }
 0x120   : > { %v1205_v19 = vpop.f32.mrb[7].mxu0  ;;  %v1253_v25 = vpop.f32.mrb[7].mxu1 }
 0x121   : > { %v808_v22 = vadd.f32 %v1203_v14, %v295_v10  ;;  %v1206_v23 = vadd.f32 %v1205_v19, %v1204_v15  ;;  %v1618_v26 = vadd.f32 %v1251_v20, %v311_v16  ;;  %v1254_v27 = vadd.f32 %v1253_v25, %v1252_v21  ;;  %v316_v14 = vld [vmem:[%s1478_s26 + $0xb8] sm:$0xff] }
 0x123   : > { %840 = vst [vmem:[%s1478_s26 + $0x10] sm:$0xff] %v808_v22  ;;  %v907_v28 = vadd.f32 %v906_v7, %v808_v22  ;;  %v948_v29 = vmul.f32 %v808_v22, %v808_v22  ;;  %v809_v30 = vadd.f32 %v1206_v23, %v296_v18  ;;  %856 = vst [vmem:[%s1478_s26 + $0x90] sm:$0xff] %v1618_v26 }
 0x124   : > { %v1623_v31 = vadd.f32 %v1254_v27, %v312_v24  ;;  %v301_v27 = vld [vmem:[%s1478_s26 + $0x40] sm:$0xff] }
 0x125   : > { %v979_v32 = vadd.f32 %v978_v13, %v948_v29  ;;  %841 = vst [vmem:[%s1478_s26 + $0x18] sm:$0xff] %v809_v30  ;;  %v908_v33 = vadd.f32 %v907_v28, %v809_v30  ;;  %v949_v34 = vmul.f32 %v809_v30, %v809_v30  ;;  %v1207_v35 = vpop.f32.mrb[8].mxu0  ;;  %v1255_v38 = vpop.f32.mrb[8].mxu1 }
 0x126   : > { %v1208_v37 = vpop.f32.mrb[9].mxu0  ;;  %857 = vst [vmem:[%s1478_s26 + $0x98] sm:$0xff] %v1623_v31  ;;  %v1256_v43 = vpop.f32.mrb[9].mxu1 }
 0x127   : > { %v980_v39 = vadd.f32 %v979_v32, %v949_v34  ;;  %v1209_v40 = vadd.f32 %v1208_v37, %v1207_v35  ;;  %v1210_v41 = vpop.f32.mrb[10].mxu0  ;;  %v1257_v46 = vadd.f32 %v1256_v43, %v1255_v38  ;;  %v1258_v47 = vpop.f32.mrb[10].mxu1  ;;  %v317_v34 = vld [vmem:[%s1478_s26 + $0xc0] sm:$0xff] }
 0x128   : > { %v1211_v45 = vpop.f32.mrb[11].mxu0  ;;  %v1259_v51 = vpop.f32.mrb[11].mxu1 }
 0x129   : > { %v810_v48 = vadd.f32 %v1209_v40, %v297_v36  ;;  %v1212_v49 = vadd.f32 %v1211_v45, %v1210_v41  ;;  %v1632_v52 = vadd.f32 %v1257_v46, %v313_v42  ;;  %v1260_v53 = vadd.f32 %v1259_v51, %v1258_v47  ;;  %v302_v36 = vld [vmem:[%s1478_s26 + $0x48] sm:$0xff] }
 0x12a   : > { %v318_v42 = vld [vmem:[%s1478_s26 + $0xc8] sm:$0xff] }
 0x12b   : > { %842 = vst [vmem:[%s1478_s26 + $0x20] sm:$0xff] %v810_v48  ;;  %v909_v54 = vadd.f32 %v908_v33, %v810_v48  ;;  %v950_v55 = vmul.f32 %v810_v48, %v810_v48  ;;  %v811_v56 = vadd.f32 %v1212_v49, %v298_v44  ;;  %858 = vst [vmem:[%s1478_s26 + $0xa0] sm:$0xff] %v1632_v52 }
 0x12c   : > { %v1637_v57 = vadd.f32 %v1260_v53, %v314_v50 }
 0x12d   : > { %v981_v58 = vadd.f32 %v980_v39, %v950_v55  ;;  %843 = vst [vmem:[%s1478_s26 + $0x28] sm:$0xff] %v811_v56  ;;  %v910_v59 = vadd.f32 %v909_v54, %v811_v56  ;;  %v951_v60 = vmul.f32 %v811_v56, %v811_v56  ;;  %v1213_v61 = vpop.f32.mrb[12].mxu0  ;;  %v1261_v0 = vpop.f32.mrb[12].mxu1  ;;  %v303_v55 = vld [vmem:[%s1478_s26 + $0x50] sm:$0xff] }
 0x12e   : > { %v1214_v63 = vpop.f32.mrb[13].mxu0  ;;  %859 = vst [vmem:[%s1478_s26 + $0xa8] sm:$0xff] %v1637_v57  ;;  %v1262_v7 = vpop.f32.mrb[13].mxu1 }
 0x12f   : > { %v982_v1 = vadd.f32 %v981_v58, %v951_v60  ;;  %v1215_v3 = vadd.f32 %v1214_v63, %v1213_v61  ;;  %v1216_v4 = vpop.f32.mrb[14].mxu0  ;;  %v1263_v10 = vadd.f32 %v1262_v7, %v1261_v0  ;;  %v1264_v11 = vpop.f32.mrb[14].mxu1  ;;  %v304_v0 = vld [vmem:[%s1478_s26 + $0x58] sm:$0xff] }
 0x130   : > { %v1217_v9 = vpop.f32.mrb[15].mxu0  ;;  %v1265_v15 = vpop.f32.mrb[15].mxu1 }
 0x131   : > { %v812_v12 = vadd.f32 %v1215_v3, %v299_v62  ;;  %v1218_v13 = vadd.f32 %v1217_v9, %v1216_v4  ;;  %v1646_v16 = vadd.f32 %v1263_v10, %v315_v6  ;;  %v1266_v17 = vadd.f32 %v1265_v15, %v1264_v11  ;;  %v319_v62 = vld [vmem:[%s1478_s26 + $0xd0] sm:$0xff] }
 0x133   : > { %844 = vst [vmem:[%s1478_s26 + $0x30] sm:$0xff] %v812_v12  ;;  %v911_v18 = vadd.f32 %v910_v59, %v812_v12  ;;  %v952_v19 = vmul.f32 %v812_v12, %v812_v12  ;;  %v813_v20 = vadd.f32 %v1218_v13, %v300_v8  ;;  %860 = vst [vmem:[%s1478_s26 + $0xb0] sm:$0xff] %v1646_v16  ;;  %v320_v8 = vld [vmem:[%s1478_s26 + $0xd8] sm:$0xff] }
 0x134   : > { %v1651_v21 = vadd.f32 %v1266_v17, %v316_v14 }
 0x135   : > { %v983_v22 = vadd.f32 %v982_v1, %v952_v19  ;;  %845 = vst [vmem:[%s1478_s26 + $0x38] sm:$0xff] %v813_v20  ;;  %v912_v23 = vadd.f32 %v911_v18, %v813_v20  ;;  %v953_v24 = vmul.f32 %v813_v20, %v813_v20  ;;  %v1219_v25 = vpop.f32.mrb[16].mxu0  ;;  %v1267_v29 = vpop.f32.mrb[16].mxu1 }
 0x136   : > { %v1220_v28 = vpop.f32.mrb[17].mxu0  ;;  %861 = vst [vmem:[%s1478_s26 + $0xb8] sm:$0xff] %v1651_v21  ;;  %v1268_v35 = vpop.f32.mrb[17].mxu1 }
 0x137   : > { %v984_v30 = vadd.f32 %v983_v22, %v953_v24  ;;  %v1221_v32 = vadd.f32 %v1220_v28, %v1219_v25  ;;  %v1222_v33 = vpop.f32.mrb[18].mxu0  ;;  %v1269_v38 = vadd.f32 %v1268_v35, %v1267_v29  ;;  %v1270_v39 = vpop.f32.mrb[18].mxu1  ;;  %v305_v22 = vld [vmem:[%s1478_s26 + $0x60] sm:$0xff] }
 0x138   : > { %v1223_v37 = vpop.f32.mrb[19].mxu0  ;;  %v1271_v43 = vpop.f32.mrb[19].mxu1  ;;  %v321_v29 = vld [vmem:[%s1478_s26 + $0xe0] sm:$0xff] }
 0x139   : > { %v814_v40 = vadd.f32 %v1221_v32, %v301_v27  ;;  %v1224_v41 = vadd.f32 %v1223_v37, %v1222_v33  ;;  %v1660_v44 = vadd.f32 %v1269_v38, %v317_v34  ;;  %v1272_v45 = vadd.f32 %v1271_v43, %v1270_v39  ;;  %v306_v32 = vld [vmem:[%s1478_s26 + $0x68] sm:$0xff] }
 0x13a   : > { %v322_v38 = vld [vmem:[%s1478_s26 + $0xe8] sm:$0xff] }
 0x13b   : > { %846 = vst [vmem:[%s1478_s26 + $0x40] sm:$0xff] %v814_v40  ;;  %v913_v46 = vadd.f32 %v912_v23, %v814_v40  ;;  %v954_v47 = vmul.f32 %v814_v40, %v814_v40  ;;  %v815_v48 = vadd.f32 %v1224_v41, %v302_v36  ;;  %862 = vst [vmem:[%s1478_s26 + $0xc0] sm:$0xff] %v1660_v44 }
 0x13c   : > { %v1665_v49 = vadd.f32 %v1272_v45, %v318_v42 }
 0x13d   : > { %v985_v50 = vadd.f32 %v984_v30, %v954_v47  ;;  %847 = vst [vmem:[%s1478_s26 + $0x48] sm:$0xff] %v815_v48  ;;  %v914_v51 = vadd.f32 %v913_v46, %v815_v48  ;;  %v955_v53 = vmul.f32 %v815_v48, %v815_v48  ;;  %v1225_v54 = vpop.f32.mrb[20].mxu0  ;;  %v1273_v58 = vpop.f32.mrb[20].mxu1 }
 0x13e   : > { %v1226_v56 = vpop.f32.mrb[21].mxu0  ;;  %863 = vst [vmem:[%s1478_s26 + $0xc8] sm:$0xff] %v1665_v49  ;;  %v1274_v63 = vpop.f32.mrb[21].mxu1 }
 0x13f   : > { %v986_v59 = vadd.f32 %v985_v50, %v955_v53  ;;  %v1227_v60 = vadd.f32 %v1226_v56, %v1225_v54  ;;  %v1228_v61 = vpop.f32.mrb[22].mxu0  ;;  %v1275_v3 = vadd.f32 %v1274_v63, %v1273_v58  ;;  %v1276_v4 = vpop.f32.mrb[22].mxu1  ;;  %v307_v53 = vld [vmem:[%s1478_s26 + $0x70] sm:$0xff] }
 0x140   : > { %v1229_v1 = vpop.f32.mrb[23].mxu0  ;;  %v1277_v9 = vpop.f32.mrb[23].mxu1 }
 0x141   : > { %v816_v6 = vadd.f32 %v1227_v60, %v303_v55  ;;  %v1230_v7 = vadd.f32 %v1229_v1, %v1228_v61  ;;  %v1674_v10 = vadd.f32 %v1275_v3, %v319_v62  ;;  %v1278_v11 = vadd.f32 %v1277_v9, %v1276_v4  ;;  %v323_v60 = vld [vmem:[%s1478_s26 + $0xf0] sm:$0xff]  ;;  %v308_v62 = vld [vmem:[%s1478_s26 + $0x78] sm:$0xff] }
 0x143   : > { %848 = vst [vmem:[%s1478_s26 + $0x50] sm:$0xff] %v816_v6  ;;  %v915_v12 = vadd.f32 %v914_v51, %v816_v6  ;;  %v956_v13 = vmul.f32 %v816_v6, %v816_v6  ;;  %v817_v14 = vadd.f32 %v1230_v7, %v304_v0  ;;  %864 = vst [vmem:[%s1478_s26 + $0xd0] sm:$0xff] %v1674_v10  ;;  %v324_v6 = vld [vmem:[%s1478_s26 + $0xf8] sm:$0xff] }
 0x144   : > { %v1679_v15 = vadd.f32 %v1278_v11, %v320_v8 }
 0x145   : > { %v987_v17 = vadd.f32 %v986_v59, %v956_v13  ;;  %849 = vst [vmem:[%s1478_s26 + $0x58] sm:$0xff] %v817_v14  ;;  %v916_v18 = vadd.f32 %v915_v12, %v817_v14  ;;  %v957_v19 = vmul.f32 %v817_v14, %v817_v14  ;;  %v1231_v20 = vpop.f32.mrb[24].mxu0  ;;  %v1279_v24 = vpop.f32.mrb[24].mxu1 }
 0x146   : > { %v1232_v23 = vpop.f32.mrb[25].mxu0  ;;  %865 = vst [vmem:[%s1478_s26 + $0xd8] sm:$0xff] %v1679_v15  ;;  %v1280_v30 = vpop.f32.mrb[25].mxu1 }
 0x147   : > { %v988_v25 = vadd.f32 %v987_v17, %v957_v19  ;;  %v1233_v27 = vadd.f32 %v1232_v23, %v1231_v20  ;;  %v1234_v28 = vpop.f32.mrb[26].mxu0  ;;  %v1281_v34 = vadd.f32 %v1280_v30, %v1279_v24  ;;  %v1282_v35 = vpop.f32.mrb[26].mxu1  ;;  %v962_v20 = vmul.f32 %v1604_v2, %v1604_v2 }
 0x148   : > { %v1235_v33 = vpop.f32.mrb[27].mxu0  ;;  %v1283_v39 = vpop.f32.mrb[27].mxu1  ;;  %v963_v24 = vmul.f32 %v1609_v5, %v1609_v5 }
 0x149   : > { %v818_v36 = vadd.f32 %v1233_v27, %v305_v22  ;;  %v1236_v37 = vadd.f32 %v1235_v33, %v1234_v28  ;;  %v1688_v40 = vadd.f32 %v1281_v34, %v321_v29  ;;  %v1284_v41 = vadd.f32 %v1283_v39, %v1282_v35 }
 0x14a   : > { %v964_v28 = vmul.f32 %v1618_v26, %v1618_v26 }
 0x14b   : > { %850 = vst [vmem:[%s1478_s26 + $0x60] sm:$0xff] %v818_v36  ;;  %v917_v42 = vadd.f32 %v916_v18, %v818_v36  ;;  %v958_v43 = vmul.f32 %v818_v36, %v818_v36  ;;  %v819_v45 = vadd.f32 %v1236_v37, %v306_v32  ;;  %866 = vst [vmem:[%s1478_s26 + $0xe0] sm:$0xff] %v1688_v40 }
 0x14c   : > { %v1693_v46 = vadd.f32 %v1284_v41, %v322_v38  ;;  %v965_v32 = vmul.f32 %v1623_v31, %v1623_v31 }
 0x14d   : > { %v989_v47 = vadd.f32 %v988_v25, %v958_v43  ;;  %851 = vst [vmem:[%s1478_s26 + $0x68] sm:$0xff] %v819_v45  ;;  %v918_v48 = vadd.f32 %v917_v42, %v819_v45  ;;  %v959_v50 = vmul.f32 %v819_v45, %v819_v45  ;;  %v1237_v51 = vpop.f32.mrb[28].mxu0  ;;  %v1285_v55 = vpop.f32.mrb[28].mxu1  ;;  %v970_v45 = vmul.f32 %v1660_v44, %v1660_v44 }
 0x14e   : > { %v1238_v54 = vpop.f32.mrb[29].mxu0  ;;  %867 = vst [vmem:[%s1478_s26 + $0xe8] sm:$0xff] %v1693_v46  ;;  %v1286_v61 = vpop.f32.mrb[29].mxu1 }
 0x14f   : > { %v990_v56 = vadd.f32 %v989_v47, %v959_v50  ;;  %v1239_v58 = vadd.f32 %v1238_v54, %v1237_v51  ;;  %v1240_v59 = vpop.f32.mrb[30].mxu0  ;;  %v1287_v0 = vadd.f32 %v1286_v61, %v1285_v55  ;;  %v1288_v1 = vpop.f32.mrb[30].mxu1  ;;  %v971_v50 = vmul.f32 %v1665_v49, %v1665_v49 }
 0x150   : > { %v1241_v63 = vpop.f32.mrb[31].mxu0  ;;  %v1289_v7 = vpop.f32.mrb[31].mxu1  ;;  %v973_v55 = vmul.f32 %v1679_v15, %v1679_v15 }
 0x151   : > { %v820_v3 = vadd.f32 %v1239_v58, %v307_v53  ;;  %v1242_v4 = vadd.f32 %v1241_v63, %v1240_v59  ;;  %v836_v8 = vadd.f32 %v1287_v0, %v323_v60  ;;  %v1290_v9 = vadd.f32 %v1289_v7, %v1288_v1 }
 0x152   : > { %v972_v53 = vmul.f32 %v1674_v10, %v1674_v10  ;;  %v974_v58 = vmul.f32 %v1688_v40, %v1688_v40  ;;  %v975_v60 = vmul.f32 %v1693_v46, %v1693_v46 }
 0x153   : > { %852 = vst [vmem:[%s1478_s26 + $0x70] sm:$0xff] %v820_v3  ;;  %v919_v11 = vadd.f32 %v918_v48, %v820_v3  ;;  %v960_v12 = vmul.f32 %v820_v3, %v820_v3  ;;  %v821_v13 = vadd.f32 %v1242_v4, %v308_v62  ;;  %868 = vst [vmem:[%s1478_s26 + $0xf0] sm:$0xff] %v836_v8 }
 0x154   : > { %v837_v14 = vadd.f32 %v1290_v9, %v324_v6  ;;  %v976_v61 = vmul.f32 %v836_v8, %v836_v8 }
 0x155   : > { %v991_v17 = vadd.f32 %v990_v56, %v960_v12  ;;  %853 = vst [vmem:[%s1478_s26 + $0x78] sm:$0xff] %v821_v13  ;;  %v920_v18 = vadd.f32 %v919_v11, %v821_v13  ;;  %v961_v19 = vmul.f32 %v821_v13, %v821_v13 }
 0x156   : > { %869 = vst [vmem:[%s1478_s26 + $0xf8] sm:$0xff] %v837_v14  ;;  %v977_v1 = vmul.f32 %v837_v14, %v837_v14 }
 0x157   : > { %v921_v22 = vadd.f32 %v920_v18, %v1604_v2  ;;  %v992_v23 = vadd.f32 %v991_v17, %v961_v19  ;;  %v966_v2 = vmul.f32 %v1632_v52, %v1632_v52 }
 0x159   : > { %v922_v25 = vadd.f32 %v921_v22, %v1609_v5  ;;  %v993_v27 = vadd.f32 %v992_v23, %v962_v20  ;;  %v967_v5 = vmul.f32 %v1637_v57, %v1637_v57 }
 0x15b   : > { %v923_v29 = vadd.f32 %v922_v25, %v1618_v26  ;;  %v994_v30 = vadd.f32 %v993_v27, %v963_v24  ;;  %v968_v26 = vmul.f32 %v1646_v16, %v1646_v16 }
 0x15d   : > { %v924_v33 = vadd.f32 %v923_v29, %v1623_v31  ;;  %v995_v34 = vadd.f32 %v994_v30, %v964_v28  ;;  %v969_v31 = vmul.f32 %v1651_v21, %v1651_v21 }
 0x15f   : > { %v996_v35 = vadd.f32 %v995_v34, %v965_v32  ;;  %v925_v36 = vadd.f32 %v924_v33, %v1632_v52 }
 0x161   : > { %v926_v37 = vadd.f32 %v925_v36, %v1637_v57  ;;  %v997_v38 = vadd.f32 %v996_v35, %v966_v2 }
 0x163   : > { %v927_v39 = vadd.f32 %v926_v37, %v1646_v16  ;;  %v998_v41 = vadd.f32 %v997_v38, %v967_v5 }
 0x165   : > { %v928_v42 = vadd.f32 %v927_v39, %v1651_v21  ;;  %v999_v43 = vadd.f32 %v998_v41, %v968_v26 }
 0x167   : > { %v929_v52 = vadd.f32 %v928_v42, %v1660_v44  ;;  %v1000_v47 = vadd.f32 %v999_v43, %v969_v31 }
 0x169   : > { %v1001_v57 = vadd.f32 %v1000_v47, %v970_v45  ;;  %v930_v48 = vadd.f32 %v929_v52, %v1665_v49 }
 0x16b   : > { %v1002_v16 = vadd.f32 %v1001_v57, %v971_v50  ;;  %v931_v51 = vadd.f32 %v930_v48, %v1674_v10 }
 0x16d   : > { %v1003_v21 = vadd.f32 %v1002_v16, %v972_v53  ;;  %v932_v54 = vadd.f32 %v931_v51, %v1679_v15 }
 0x16f   : > { %v1004_v44 = vadd.f32 %v1003_v21, %v973_v55  ;;  %v933_v56 = vadd.f32 %v932_v54, %v1688_v40 }
 0x171   : > { %v1005_v59 = vadd.f32 %v1004_v44, %v974_v58  ;;  %v934_v49 = vadd.f32 %v933_v56, %v1693_v46  ;;  %v905_v46 = vld [vmem:[%s1772_s3] sm:$0x1] }
 0x173   : > { %v1006_v10 = vadd.f32 %v1005_v59, %v975_v60  ;;  %v935_v62 = vadd.f32 %v934_v49, %v836_v8  ;;  %v945_v8 = vld [vmem:[%s1773_s4] sm:$0x1] }
 0x175   : > { %v1007_v63 = vadd.f32 %v1006_v10, %v976_v61  ;;  %v936_v0 = vadd.f32 %v935_v62, %v837_v14 }
 0x177   : > { %v937_v3 = vrot.slane %v936_v0, 4  ;;  %v1008_v15 = vadd.f32 %v1007_v63, %v977_v1 }
 0x179   : > { %v938_v4 = vadd.f32 %v937_v3, %v936_v0  ;;  %v1009_v6 = vrot.slane %v1008_v15, 4 }
 0x17b   : > { %v939_v7 = vrot.slane %v938_v4, 2  ;;  %v1010_v9 = vadd.f32 %v1009_v6, %v1008_v15 }
 0x17d   : > { %v940_v11 = vadd.f32 %v939_v7, %v938_v4  ;;  %v1011_v40 = vrot.slane %v1010_v9, 2 }
 0x17f   : > { %v941_v12 = vrot.slane %v940_v11, 1  ;;  %v1012_v13 = vadd.f32 %v1011_v40, %v1010_v9 }
 0x181   : > { %v942_v17 = vadd.f32 %v941_v12, %v940_v11  ;;  %v1013_v18 = vrot.slane %v1012_v13, 1 }
 0x183   : > { %v943_v14 = vadd.f32 %v942_v17, %v905_v46  ;;  %v1014_v19 = vadd.f32 %v1013_v18, %v1012_v13 }
 0x185   : > { %944 = vst [vmem:[%s1772_s3] sm:$0x1] %v943_v14  ;;  %v1015_v20 = vadd.f32 %v1014_v19, %v945_v8 }
 0x187   : > { %1016 = vst [vmem:[%s1773_s4] sm:$0x1] %v1015_v20 }
 0x188 PF: > { %s15_s17 = sadd.s32 1, %s1419_s17   ;;  %s1774_s15 = smov %s1415_s16 }
 0x189   : > { %p12_p6 = scmp.ge.s32.totalorder %s15_s17, 4   ;;  %s1775_s16 = smov %s1777_s18 }
 0x18b   :  { %14 = sbr.rel (!%p12_p6) target bundleno = 2 (0x2), region = 89 }

// kernel: unet_hrpxp_forward.75
= control target key start
LH: loop header
LB: loop body
LE: loop exit
PB: predicated region body
PF: predicated region fallthrough
CT: control target
= control target key end

     0   :  { %s1920_s15 = smov 0   ;;  %s1922_s16 = smov 0   ;;  %s2248_s0 = inlined_call_operand.vmem [shape: bf16[512,384], index: 0, kind: input, shape index: {}]   ;;  %s2249_s1 = inlined_call_operand.vmem [shape: bf16[384,128], index: 1, kind: input, shape index: {}]   ;;  %s2250_s2 = inlined_call_operand.vmem [shape: f32[512,128], index: 2, kind: output, shape index: {0}]   ;;  %s2251_s3 = inlined_call_operand.vmem [shape: f32[1,128], index: 3, kind: output, shape index: {1}]   ;;  %s2252_s4 = inlined_call_operand.vmem [shape: f32[1,128], index: 4, kind: output, shape index: {2}]  }
   0x1   :  { %s1924_s17 = smov 0  }
   0x2 LB: > { %s27_s18 = sadd.s32 1, %s1887_s16  ;;  %p1473_p0 = scmp.ge.s32.totalorder %s1891_s17, 1  ;;  %s1891_s17 = sphi %s1924_s17, %s15_s17   ;;  %s1887_s16 = sphi %s1922_s16, %s2254_s16   ;;  %s1883_s15 = sphi %s1920_s15, %s2253_s15  }
   0x3   : > { %p29_p1 = scmp.ge.s32.totalorder %s27_s18, 2  ;;  %p189_p2 = scmp.lt.s32.totalorder %s1891_s17, 3 }
   0x5   : > { %s2256_s18 = smov (%p29_p1, %s27_s18), 0  ;;  %p190_p3 = pnand %p1473_p0, %p189_p2 }
   0x6   : > { %s1474_s19 = sshll.u32 (!%p190_p3), %s1883_s15, 5  ;;  %p286_p4 = scmp.eq.s32.totalorder (!%p190_p3), %s1883_s15, 0  ;;  %v1893_v0 = vmov (!%p190_p3), 0.0  }
   0x7   : > { %193 = sbr.rel (%p190_p3) target bundleno = 410 (0x19a), region = 28  ;;  %p227_p5 = scmp.lt.s32.totalorder (!%p190_p3), %s1474_s19, 63 }
   0xe   : > { %s2258_s19 = smov (!%p227_p5, %s1474_s19), 63  ;;  %v1894_v1 = vmov (%p286_p4), 0.0  }
   0xf   : > { %s1754_s20 = smul.u32 12, %s2258_s19  ;;  %s1477_s21 = sshll.u32 %s2258_s19, 3  ;;  %291 = vst [vmem:[%s2251_s3] sm:$0x1] (%p286_p4), %v1894_v1  ;;  %292 = vst [vmem:[%s2252_s4] sm:$0x1] (%p286_p4), %v1894_v1 }
  0x10   : > { %s1945_s24 = scalar_lea.vmem %s2250_s2, %s1477_s21 }
  0x11   : > { %s1950_s27 = scalar_lea.vmem %s2248_s0, %s1754_s20  ;;  %254 = vst [vmem:[%s1945_s24] sm:$0xff] %v1893_v0  ;;  %255 = vst [vmem:[%s1945_s24 + $0x8] sm:$0xff] %v1893_v0 }
  0x12   : > { %256 = vst [vmem:[%s1945_s24 + $0x10] sm:$0xff] %v1893_v0  ;;  %257 = vst [vmem:[%s1945_s24 + $0x18] sm:$0xff] %v1893_v0 }
  0x13   : > { %258 = vst [vmem:[%s1945_s24 + $0x20] sm:$0xff] %v1893_v0  ;;  %259 = vst [vmem:[%s1945_s24 + $0x28] sm:$0xff] %v1893_v0 }
  0x14   : > { %260 = vst [vmem:[%s1945_s24 + $0x30] sm:$0xff] %v1893_v0  ;;  %261 = vst [vmem:[%s1945_s24 + $0x38] sm:$0xff] %v1893_v0 }
  0x15   : > { %262 = vst [vmem:[%s1945_s24 + $0x40] sm:$0xff] %v1893_v0  ;;  %263 = vst [vmem:[%s1945_s24 + $0x48] sm:$0xff] %v1893_v0 }
  0x16   : > { %264 = vst [vmem:[%s1945_s24 + $0x50] sm:$0xff] %v1893_v0  ;;  %265 = vst [vmem:[%s1945_s24 + $0x58] sm:$0xff] %v1893_v0 }
  0x17   : > { %266 = vst [vmem:[%s1945_s24 + $0x60] sm:$0xff] %v1893_v0  ;;  %267 = vst [vmem:[%s1945_s24 + $0x68] sm:$0xff] %v1893_v0 }
  0x18   : > { %268 = vst [vmem:[%s1945_s24 + $0x70] sm:$0xff] %v1893_v0  ;;  %269 = vst [vmem:[%s1945_s24 + $0x78] sm:$0xff] %v1893_v0 }
  0x19   : > { %270 = vst [vmem:[%s1945_s24 + $0x80] sm:$0xff] %v1893_v0  ;;  %271 = vst [vmem:[%s1945_s24 + $0x88] sm:$0xff] %v1893_v0 }
  0x1a   : > { %272 = vst [vmem:[%s1945_s24 + $0x90] sm:$0xff] %v1893_v0  ;;  %273 = vst [vmem:[%s1945_s24 + $0x98] sm:$0xff] %v1893_v0  ;;  %290 = sbr.rel (!%p286_p4) target bundleno = 33 (0x21), region = 36 }
  0x1b   : > { %274 = vst [vmem:[%s1945_s24 + $0xa0] sm:$0xff] %v1893_v0  ;;  %275 = vst [vmem:[%s1945_s24 + $0xa8] sm:$0xff] %v1893_v0 }
  0x1c   : > { %276 = vst [vmem:[%s1945_s24 + $0xb0] sm:$0xff] %v1893_v0  ;;  %277 = vst [vmem:[%s1945_s24 + $0xb8] sm:$0xff] %v1893_v0 }
  0x1d   : > { %278 = vst [vmem:[%s1945_s24 + $0xc0] sm:$0xff] %v1893_v0  ;;  %279 = vst [vmem:[%s1945_s24 + $0xc8] sm:$0xff] %v1893_v0 }
  0x1e   : > { %280 = vst [vmem:[%s1945_s24 + $0xd0] sm:$0xff] %v1893_v0  ;;  %281 = vst [vmem:[%s1945_s24 + $0xd8] sm:$0xff] %v1893_v0 }
  0x1f   : > { %282 = vst [vmem:[%s1945_s24 + $0xe0] sm:$0xff] %v1893_v0  ;;  %283 = vst [vmem:[%s1945_s24 + $0xe8] sm:$0xff] %v1893_v0 }
  0x20   : > { %284 = vst [vmem:[%s1945_s24 + $0xf0] sm:$0xff] %v1893_v0  ;;  %285 = vst [vmem:[%s1945_s24 + $0xf8] sm:$0xff] %v1893_v0 }
  0x21 PF: > { %v1781_v2 = vld [vmem:[%s2249_s1 + $0x40] sm:$0xff]   ;;  %v1783_v4 = vld [vmem:[%s2249_s1 + $0x48] sm:$0xff]   ;;  %v1785_v6 = vld [vmem:[%s2249_s1 + $0x50] sm:$0xff]  }
  0x22   : > { %v1782_v3 = vld [vmem:[%s2249_s1] sm:$0xff]   ;;  %1554 = vmatprep.subr.bf16.mxu0 %v1781_v2  ;;  %1738 = vmatprep.subr.bf16.mxu1 %v1781_v2  ;;  %v1784_v5 = vld [vmem:[%s2249_s1 + $0x8] sm:$0xff]   ;;  %v1786_v7 = vld [vmem:[%s2249_s1 + $0x10] sm:$0xff]  }
  0x23   : > { %1555 = vmatpush3.bf16.msra.mxu0 %v1782_v3  ;;  %1746 = vmatpush3.bf16.msra.mxu1 %v1782_v3  ;;  %v1787_v8 = vld [vmem:[%s2249_s1 + $0x58] sm:$0xff]   ;;  %v1789_v10 = vld [vmem:[%s2249_s1 + $0x60] sm:$0xff]   ;;  %v1791_v12 = vld [vmem:[%s2249_s1 + $0x68] sm:$0xff]  }
  0x24   : > { %1556 = vmatprep.subr.bf16.mxu0 %v1783_v4  ;;  %1739 = vmatprep.subr.bf16.mxu1 %v1783_v4  ;;  %v1788_v9 = vld [vmem:[%s2249_s1 + $0x18] sm:$0xff]   ;;  %v1790_v11 = vld [vmem:[%s2249_s1 + $0x20] sm:$0xff]   ;;  %v1792_v15 = vld [vmem:[%s2249_s1 + $0x28] sm:$0xff]  }
  0x25   : > { %v1799_v13 = vld [vmem:[%s1950_s27 + $0x4] ss:$12 sps:$4 sm:$0xff]   ;;  %v1795_v18 = vld [vmem:[%s2249_s1 + $0x78] sm:$0xff]   ;;  %v1797_v21 = vld [vmem:[%s1950_s27] ss:$12 sps:$4 sm:$0xff]  }
  0x26   : > { %v1802_v14 = vld [vmem:[%s1950_s27 + $0x124] ss:$12 sps:$4 sm:$0xff]   ;;  %869 = vmatprep.mubr.bf16.mxu0 %v1799_v13  ;;  %v1796_v19 = vld [vmem:[%s2249_s1 + $0x38] sm:$0xff]   ;;  %v1800_v22 = vld [vmem:[%s1950_s27 + $0x120] ss:$12 sps:$4 sm:$0xff]  }
  0x27   : > { %1557 = vmatpush3.bf16.msra.mxu0 %v1784_v5  ;;  %1747 = vmatpush3.bf16.msra.mxu1 %v1784_v5  ;;  %v1793_v16 = vld [vmem:[%s2249_s1 + $0x70] sm:$0xff]   ;;  %v1803_v20 = vld [vmem:[%s2249_s1 + $0x80] sm:$0xff]   ;;  %v1805_v23 = vld [vmem:[%s1950_s27 + $0x1c] ss:$12 sps:$4 sm:$0xff]  }
  0x28   : > { %1558 = vmatprep.subr.bf16.mxu0 %v1785_v6  ;;  %1740 = vmatprep.subr.bf16.mxu1 %v1785_v6  ;;  %v1794_v17 = vld [vmem:[%s2249_s1 + $0x30] sm:$0xff]   ;;  %v1804_v24 = vld [vmem:[%s2249_s1 + $0x88] sm:$0xff]   ;;  %v1809_v26 = vld [vmem:[%s1950_s27 + $0x18] ss:$12 sps:$4 sm:$0xff]  }
  0x29   : > { %965 = vmatprep.mubr.bf16.mxu1 %v1802_v14  ;;  %v1807_v25 = vld [vmem:[%s1950_s27 + $0x13c] ss:$12 sps:$4 sm:$0xff]   ;;  %v1811_v27 = vld [vmem:[%s2249_s1 + $0x90] sm:$0xff]   ;;  %v1810_v28 = vld [vmem:[%s1950_s27 + $0x138] ss:$12 sps:$4 sm:$0xff]  }
  0x2a   : > { %v1812_v29 = vld [vmem:[%s2249_s1 + $0x98] sm:$0xff]   ;;  %v1813_v30 = vld [vmem:[%s1950_s27 + $0x34] ss:$12 sps:$4 sm:$0xff]   ;;  %v1820_v35 = vld [vmem:[%s2249_s1 + $0xa8] sm:$0xff]  }
  0x2b   : > { %1559 = vmatpush3.bf16.msra.mxu0 %v1786_v7  ;;  %1748 = vmatpush3.bf16.msra.mxu1 %v1786_v7  ;;  %v1815_v31 = vld [vmem:[%s1950_s27 + $0x154] ss:$12 sps:$4 sm:$0xff]   ;;  %v1817_v33 = vld [vmem:[%s1950_s27 + $0x30] ss:$12 sps:$4 sm:$0xff]   ;;  %v1821_v36 = vld [vmem:[%s1950_s27 + $0x4c] ss:$12 sps:$4 sm:$0xff]  }
  0x2c   : > { %1560 = vmatprep.subr.bf16.mxu0 %v1787_v8  ;;  %1741 = vmatprep.subr.bf16.mxu1 %v1787_v8  ;;  %v1819_v32 = vld [vmem:[%s2249_s1 + $0xa0] sm:$0xff]   ;;  %v1818_v34 = vld [vmem:[%s1950_s27 + $0x150] ss:$12 sps:$4 sm:$0xff]   ;;  %v1823_v37 = vld [vmem:[%s1950_s27 + $0x16c] ss:$12 sps:$4 sm:$0xff]  }
  0x2d   : > { %v1827_v38 = vld [vmem:[%s2249_s1 + $0xb0] sm:$0xff]   ;;  %v1828_v42 = vld [vmem:[%s2249_s1 + $0xb8] sm:$0xff]   ;;  %v1832_v44 = vld [vmem:[%s1950_s27 + $0x60] ss:$12 sps:$4 sm:$0xff]  }
  0x2e   : > { %v1825_v39 = vld [vmem:[%s1950_s27 + $0x48] ss:$12 sps:$4 sm:$0xff]   ;;  %v1829_v41 = vld [vmem:[%s1950_s27 + $0x64] ss:$12 sps:$4 sm:$0xff]   ;;  %v1833_v45 = vld [vmem:[%s1950_s27 + $0x20] ss:$12 sps:$4 sm:$0xff]  }
  0x2f   : > { %1561 = vmatpush3.bf16.msra.mxu0 %v1788_v9  ;;  %1749 = vmatpush3.bf16.msra.mxu1 %v1788_v9  ;;  %v1826_v40 = vld [vmem:[%s1950_s27 + $0x168] ss:$12 sps:$4 sm:$0xff]   ;;  %v1836_v47 = vld [vmem:[%s1950_s27 + $0x38] ss:$12 sps:$4 sm:$0xff]   ;;  %v1838_v49 = vld [vmem:[%s1950_s27 + $0x50] ss:$12 sps:$4 sm:$0xff]  }
  0x30   : > { %1562 = vmatprep.subr.bf16.mxu0 %v1789_v10  ;;  %1742 = vmatprep.subr.bf16.mxu1 %v1789_v10  ;;  %v1831_v43 = vld [vmem:[%s1950_s27 + $0x8] ss:$12 sps:$4 sm:$0xff]   ;;  %v1837_v48 = vld [vmem:[%s1950_s27 + $0x78] ss:$12 sps:$4 sm:$0xff]   ;;  %v1842_v52 = vld [vmem:[%s1950_s27 + $0x90] ss:$12 sps:$4 sm:$0xff]  }
  0x31   : > { %v1834_v46 = vld [vmem:[%s1950_s27 + $0x7c] ss:$12 sps:$4 sm:$0xff]   ;;  %v1839_v50 = vld [vmem:[%s1950_s27 + $0x94] ss:$12 sps:$4 sm:$0xff]   ;;  %v1844_v54 = vld [vmem:[%s1950_s27 + $0xac] ss:$12 sps:$4 sm:$0xff]  }
  0x32   : > { %v1841_v51 = vld [vmem:[%s1950_s27 + $0x68] ss:$12 sps:$4 sm:$0xff]   ;;  %v1843_v53 = vld [vmem:[%s1950_s27 + $0x80] ss:$12 sps:$4 sm:$0xff]   ;;  %v1846_v55 = vld [vmem:[%s1950_s27 + $0x98] ss:$12 sps:$4 sm:$0xff]  }
  0x33   : > { %1563 = vmatpush3.bf16.msra.mxu0 %v1790_v11  ;;  %1750 = vmatpush3.bf16.msra.mxu1 %v1790_v11  ;;  %v1847_v56 = vld [vmem:[%s1950_s27 + $0xa8] ss:$12 sps:$4 sm:$0xff]   ;;  %v1848_v57 = vld [vmem:[%s1950_s27 + $0xb0] ss:$12 sps:$4 sm:$0xff]   ;;  %v1852_v60 = vld [vmem:[%s1950_s27 + $0xc0] ss:$12 sps:$4 sm:$0xff]  }
  0x34   : > { %1564 = vmatprep.subr.bf16.mxu0 %v1791_v12  ;;  %1743 = vmatprep.subr.bf16.mxu1 %v1791_v12  ;;  %v1849_v58 = vld [vmem:[%s1950_s27 + $0xc4] ss:$12 sps:$4 sm:$0xff]   ;;  %v1851_v59 = vld [vmem:[%s1950_s27 + $0xc8] ss:$12 sps:$4 sm:$0xff]   ;;  %v1853_v61 = vld [vmem:[%s1950_s27 + $0xe0] ss:$12 sps:$4 sm:$0xff]  }
  0x35   : > { %v1854_v62 = vld [vmem:[%s1950_s27 + $0xdc] ss:$12 sps:$4 sm:$0xff]   ;;  %v1856_v63 = vld [vmem:[%s1950_s27 + $0xf8] ss:$12 sps:$4 sm:$0xff]   ;;  %v1859_v2 = vld [vmem:[%s1950_s27 + $0xf4] ss:$12 sps:$4 sm:$0xff]  }
  0x36   : > { %v1857_v0 = vld [vmem:[%s1950_s27 + $0xd8] ss:$12 sps:$4 sm:$0xff]   ;;  %v1858_v1 = vld [vmem:[%s1950_s27 + $0x110] ss:$12 sps:$4 sm:$0xff]   ;;  %v1861_v3 = vld [vmem:[%s1950_s27 + $0x128] ss:$12 sps:$4 sm:$0xff]  }
  0x37   : > { %1565 = vmatpush3.bf16.msra.mxu0 %v1792_v15  ;;  %1751 = vmatpush3.bf16.msra.mxu1 %v1792_v15  ;;  %v1862_v4 = vld [vmem:[%s1950_s27 + $0xf0] ss:$12 sps:$4 sm:$0xff]   ;;  %v1863_v5 = vld [vmem:[%s1950_s27 + $0x140] ss:$12 sps:$4 sm:$0xff]   ;;  %v1866_v7 = vld [vmem:[%s1950_s27 + $0x158] ss:$12 sps:$4 sm:$0xff]  }
  0x38   : > { %1566 = vmatprep.subr.bf16.mxu0 %v1793_v16  ;;  %1744 = vmatprep.subr.bf16.mxu1 %v1793_v16  ;;  %v1864_v6 = vld [vmem:[%s1950_s27 + $0x10c] ss:$12 sps:$4 sm:$0xff]   ;;  %v1867_v8 = vld [vmem:[%s1950_s27 + $0x108] ss:$12 sps:$4 sm:$0xff]   ;;  %v1868_v9 = vld [vmem:[%s1950_s27 + $0x170] ss:$12 sps:$4 sm:$0xff]  }
  0x3b   : > { %1567 = vmatpush3.bf16.msra.mxu0 %v1794_v17  ;;  %1752 = vmatpush3.bf16.msra.mxu1 %v1794_v17 }
  0x3c   : > { %1568 = vmatprep.subr.bf16.mxu0 %v1795_v18  ;;  %1745 = vmatprep.subr.bf16.mxu1 %v1795_v18 }
  0x3f   : > { %1569 = vmatpush3.bf16.msra.mxu0 %v1796_v19  ;;  %1753 = vmatpush3.bf16.msra.mxu1 %v1796_v19 }
  0x40   : > { %1690 = vmatprep.subr.bf16.mxu1 %v1803_v20 }
  0x42   : > { %870 = vmatmul.mubr.bf16.vlgmr.msra.gmra.mrb[0].mxu0 %v1797_v21  ;;  %966 = vmatmul.mubr.bf16.vlgmr.msra.gmra.mrb[0].mxu1 %v1800_v22 }
  0x43   : > { %1691 = vmatpush3.bf16.msra.mxu1 %v1803_v20  ;;  %877 = vmatprep.mubr.bf16.mxu0 %v1805_v23 }
  0x44   : > { %1692 = vmatprep.subr.bf16.mxu1 %v1804_v24  ;;  %973 = vmatprep.mubr.bf16.mxu1 %v1807_v25 }
  0x47   : > { %1693 = vmatpush3.bf16.msra.mxu1 %v1804_v24 }
  0x48   : > { %1694 = vmatprep.subr.bf16.mxu1 %v1811_v27 }
  0x4a   : > { %878 = vmatmul.mubr.bf16.gmra.mrb[4].mxu0 %v1809_v26  ;;  %974 = vmatmul.mubr.bf16.gmra.mrb[4].mxu1 %v1810_v28 }
  0x4b   : > { %1695 = vmatpush3.bf16.msra.mxu1 %v1811_v27  ;;  %885 = vmatprep.mubr.bf16.mxu0 %v1813_v30 }
  0x4c   : > { %1696 = vmatprep.subr.bf16.mxu1 %v1812_v29  ;;  %981 = vmatprep.mubr.bf16.mxu1 %v1815_v31 }
  0x4f   : > { %1697 = vmatpush3.bf16.msra.mxu1 %v1812_v29 }
  0x50   : > { %1698 = vmatprep.subr.bf16.mxu1 %v1819_v32 }
  0x52   : > { %886 = vmatmul.mubr.bf16.gmra.mrb[8].mxu0 %v1817_v33  ;;  %982 = vmatmul.mubr.bf16.gmra.mrb[8].mxu1 %v1818_v34 }
  0x53   : > { %1699 = vmatpush3.bf16.msra.mxu1 %v1819_v32  ;;  %893 = vmatprep.mubr.bf16.mxu0 %v1821_v36 }
  0x54   : > { %1700 = vmatprep.subr.bf16.mxu1 %v1820_v35  ;;  %989 = vmatprep.mubr.bf16.mxu1 %v1823_v37 }
  0x57   : > { %1701 = vmatpush3.bf16.msra.mxu1 %v1820_v35 }
  0x58   : > { %1702 = vmatprep.subr.bf16.mxu1 %v1827_v38 }
  0x5a   : > { %894 = vmatmul.mubr.bf16.gmra.mrb[12].mxu0 %v1825_v39  ;;  %990 = vmatmul.mubr.bf16.gmra.mrb[12].mxu1 %v1826_v40 }
  0x5b   : > { %1703 = vmatpush3.bf16.msra.mxu1 %v1827_v38  ;;  %901 = vmatprep.mubr.bf16.mxu0 %v1829_v41 }
  0x5c   : > { %1704 = vmatprep.subr.bf16.mxu1 %v1828_v42  ;;  %1706 = vmatprep.mubr.bf16.mxu1 %v1831_v43 }
  0x5f   : > { %1705 = vmatpush3.bf16.msra.mxu1 %v1828_v42 }
  0x62   : > { %902 = vmatmul.mubr.bf16.gmra.mrb[16].mxu0 %v1832_v44  ;;  %1707 = vmatmul.mubr.bf16.vlgmr.msra.gmra.mrb[16].mxu1 %v1833_v45 }
  0x63   : > { %909 = vmatprep.mubr.bf16.mxu0 %v1834_v46  ;;  %1710 = vmatprep.mubr.bf16.mxu1 %v1836_v47 }
  0x6a   : > { %910 = vmatmul.mubr.bf16.gmra.mrb[20].mxu0 %v1837_v48  ;;  %1711 = vmatmul.mubr.bf16.gmra.mrb[20].mxu1 %v1838_v49 }
  0x6b   : > { %917 = vmatprep.mubr.bf16.mxu0 %v1839_v50  ;;  %1714 = vmatprep.mubr.bf16.mxu1 %v1841_v51 }
  0x72   : > { %918 = vmatmul.mubr.bf16.gmra.mrb[24].mxu0 %v1842_v52  ;;  %1715 = vmatmul.mubr.bf16.gmra.mrb[24].mxu1 %v1843_v53 }
  0x73   : > { %925 = vmatprep.mubr.bf16.mxu0 %v1844_v54  ;;  %1718 = vmatprep.mubr.bf16.mxu1 %v1846_v55 }
  0x7a   : > { %926 = vmatmul.mubr.bf16.gmra.mrb[28].mxu0 %v1847_v56  ;;  %1719 = vmatmul.mubr.bf16.gmra.mrb[28].mxu1 %v1848_v57 }
  0x7b   : > { %933 = vmatprep.mubr.bf16.mxu0 %v1849_v58  ;;  %1722 = vmatprep.mubr.bf16.mxu1 %v1851_v59  ;;  %v295_v59 = vld [vmem:[%s1945_s24 + $0x10] sm:$0xff] }
  0x82   : > { %934 = vmatmul.mubr.bf16.gmra.mrb[32].mxu0 %v1852_v60  ;;  %1723 = vmatmul.mubr.bf16.gmra.mrb[32].mxu1 %v1853_v61 }
  0x83   : > { %941 = vmatprep.mubr.bf16.mxu0 %v1854_v62  ;;  %1726 = vmatprep.mubr.bf16.mxu1 %v1856_v63  ;;  %v293_v63 = vld [vmem:[%s1945_s24] sm:$0xff] }
  0x8a   : > { %942 = vmatmul.mubr.bf16.gmra.mrb[36].mxu0 %v1857_v0  ;;  %1727 = vmatmul.mubr.bf16.gmra.mrb[36].mxu1 %v1858_v1 }
  0x8b   : > { %949 = vmatprep.mubr.bf16.mxu0 %v1859_v2  ;;  %1730 = vmatprep.mubr.bf16.mxu1 %v1861_v3 }
  0x92   : > { %950 = vmatmul.mubr.bf16.gmra.mrb[40].mxu0 %v1862_v4  ;;  %1731 = vmatmul.mubr.bf16.gmra.mrb[40].mxu1 %v1863_v5  ;;  %v296_v4 = vld [vmem:[%s1945_s24 + $0x18] sm:$0xff] }
  0x93   : > { %957 = vmatprep.mubr.bf16.mxu0 %v1864_v6  ;;  %1734 = vmatprep.mubr.bf16.mxu1 %v1866_v7 }
  0x9a   : > { %958 = vmatmul.mubr.bf16.gmra.mrb[44].mxu0 %v1867_v8  ;;  %1735 = vmatmul.mubr.bf16.gmra.mrb[44].mxu1 %v1868_v9  ;;  %v294_v9 = vld [vmem:[%s1945_s24 + $0x8] sm:$0xff] }
 0x115   : > { %v1570_v10 = vpop.f32.mrb[0].mxu0  ;;  %v1642_v11 = vpop.f32.mrb[0].mxu1 }
 0x116   : > { %v1571_v12 = vpop.f32.mrb[1].mxu0  ;;  %v1643_v13 = vpop.f32.mrb[1].mxu1 }
 0x117   : > { %v1572_v14 = vadd.f32 %v1571_v12, %v1570_v10  ;;  %v1573_v15 = vpop.f32.mrb[2].mxu0  ;;  %v2112_v16 = vadd.f32 %v1643_v13, %v1642_v11  ;;  %v1645_v17 = vpop.f32.mrb[2].mxu1 }
 0x118   : > { %v1574_v18 = vpop.f32.mrb[3].mxu0  ;;  %v1646_v19 = vpop.f32.mrb[3].mxu1 }
 0x119   : > { %v1575_v20 = vadd.f32 %v1574_v18, %v1573_v15  ;;  %v2114_v21 = vadd.f32 %v1646_v19, %v1645_v17 }
 0x11d   : > { %v1576_v22 = vpop.f32.mrb[4].mxu0  ;;  %v1648_v23 = vpop.f32.mrb[4].mxu1 }
 0x11e   : > { %v1577_v24 = vpop.f32.mrb[5].mxu0  ;;  %v1649_v25 = vpop.f32.mrb[5].mxu1 }
 0x11f   : > { %v1578_v26 = vadd.f32 %v1577_v24, %v1576_v22  ;;  %v1579_v27 = vpop.f32.mrb[6].mxu0  ;;  %v2116_v28 = vadd.f32 %v1649_v25, %v1648_v23  ;;  %v1651_v29 = vpop.f32.mrb[6].mxu1  ;;  %v299_v23 = vld [vmem:[%s1945_s24 + $0x30] sm:$0xff] }
 0x120   : > { %v1580_v30 = vpop.f32.mrb[7].mxu0  ;;  %v1652_v31 = vpop.f32.mrb[7].mxu1 }
 0x121   : > { %v1581_v32 = vadd.f32 %v1580_v30, %v1579_v27  ;;  %v2118_v33 = vadd.f32 %v1652_v31, %v1651_v29  ;;  %v297_v29 = vld [vmem:[%s1945_s24 + $0x20] sm:$0xff] }
 0x125   : > { %v1582_v34 = vpop.f32.mrb[8].mxu0  ;;  %v1654_v35 = vpop.f32.mrb[8].mxu1 }
 0x126   : > { %v1583_v36 = vpop.f32.mrb[9].mxu0  ;;  %v1655_v37 = vpop.f32.mrb[9].mxu1 }
 0x127   : > { %v1584_v38 = vadd.f32 %v1583_v36, %v1582_v34  ;;  %v1585_v39 = vpop.f32.mrb[10].mxu0  ;;  %v2120_v40 = vadd.f32 %v1655_v37, %v1654_v35  ;;  %v1657_v41 = vpop.f32.mrb[10].mxu1  ;;  %v300_v36 = vld [vmem:[%s1945_s24 + $0x38] sm:$0xff] }
 0x128   : > { %v1586_v42 = vpop.f32.mrb[11].mxu0  ;;  %v1658_v43 = vpop.f32.mrb[11].mxu1 }
 0x129   : > { %v2122_v44 = vadd.f32 %v1586_v42, %v1585_v39  ;;  %v2124_v45 = vadd.f32 %v1658_v43, %v1657_v41 }
 0x12d   : > { %v1588_v46 = vpop.f32.mrb[12].mxu0  ;;  %v1660_v47 = vpop.f32.mrb[12].mxu1 }
 0x12e   : > { %v1589_v48 = vpop.f32.mrb[13].mxu0  ;;  %v1661_v49 = vpop.f32.mrb[13].mxu1 }
 0x12f   : > { %v1590_v50 = vadd.f32 %v1589_v48, %v1588_v46  ;;  %v1591_v51 = vpop.f32.mrb[14].mxu0  ;;  %v2126_v52 = vadd.f32 %v1661_v49, %v1660_v47  ;;  %v1663_v53 = vpop.f32.mrb[14].mxu1 }
 0x130   : > { %v1592_v54 = vpop.f32.mrb[15].mxu0  ;;  %v1664_v55 = vpop.f32.mrb[15].mxu1 }
 0x131   : > { %v1593_v56 = vadd.f32 %v1592_v54, %v1591_v51  ;;  %v2128_v57 = vadd.f32 %v1664_v55, %v1663_v53  ;;  %v298_v51 = vld [vmem:[%s1945_s24 + $0x28] sm:$0xff] }
 0x135   : > { %v1594_v58 = vpop.f32.mrb[16].mxu0  ;;  %v1708_v60 = vpop.f32.mrb[16].mxu1 }
 0x136   : > { %v1041_v61 = vadd.f32 %v1708_v60, %v1578_v26  ;;  %v1595_v62 = vpop.f32.mrb[17].mxu0  ;;  %v1032_v0 = vpop.f32.mrb[17].mxu1 }
 0x137   : > { %v2132_v1 = vadd.f32 %v1595_v62, %v1594_v58  ;;  %v1033_v2 = vadd.f32 %v1572_v14, %v1032_v0  ;;  %v1597_v3 = vpop.f32.mrb[18].mxu0  ;;  %v1709_v5 = vpop.f32.mrb[18].mxu1 }
 0x138   : > { %v1161_v6 = vadd.f32 %v1041_v61, %v295_v59  ;;  %v1044_v7 = vadd.f32 %v1709_v5, %v1581_v32  ;;  %v1598_v8 = vpop.f32.mrb[19].mxu0  ;;  %v1035_v10 = vpop.f32.mrb[19].mxu1  ;;  %v303_v61 = vld [vmem:[%s1945_s24 + $0x50] sm:$0xff] }
 0x139   : > { %v1159_v11 = vadd.f32 %v1033_v2, %v293_v63  ;;  %v2136_v12 = vadd.f32 %v1598_v8, %v1597_v3  ;;  %v1036_v13 = vadd.f32 %v1575_v20, %v1035_v10 }
 0x13a   : > { %1193 = vst [vmem:[%s1945_s24 + $0x10] sm:$0xff] %v1161_v6  ;;  %v1162_v15 = vadd.f32 %v1044_v7, %v296_v4  ;;  %v1301_v25 = vmul.f32 %v1161_v6, %v1161_v6  ;;  %v301_v4 = vld [vmem:[%s1945_s24 + $0x40] sm:$0xff] }
 0x13b   : > { %1191 = vst [vmem:[%s1945_s24] sm:$0xff] %v1159_v11  ;;  %v1160_v14 = vadd.f32 %v1036_v13, %v294_v9  ;;  %v1299_v17 = vmul.f32 %v1159_v11, %v1159_v11  ;;  %v304_v9 = vld [vmem:[%s1945_s24 + $0x58] sm:$0xff] }
 0x13c   : > { %1194 = vst [vmem:[%s1945_s24 + $0x18] sm:$0xff] %v1162_v15  ;;  %v1302_v39 = vmul.f32 %v1162_v15, %v1162_v15 }
 0x13d   : > { %1192 = vst [vmem:[%s1945_s24 + $0x8] sm:$0xff] %v1160_v14  ;;  %v1259_v18 = vadd.f32 %v1160_v14, %v1159_v11  ;;  %v1300_v19 = vmul.f32 %v1160_v14, %v1160_v14  ;;  %v1600_v22 = vpop.f32.mrb[20].mxu0  ;;  %v1712_v24 = vpop.f32.mrb[20].mxu1 }
 0x13e   : > { %v1057_v26 = vadd.f32 %v1712_v24, %v1590_v50  ;;  %v1601_v27 = vpop.f32.mrb[21].mxu0  ;;  %v1048_v30 = vpop.f32.mrb[21].mxu1 }
 0x13f   : > { %v1260_v20 = vadd.f32 %v1259_v18, %v1161_v6  ;;  %v1331_v31 = vadd.f32 %v1300_v19, %v1299_v17  ;;  %v1602_v32 = vadd.f32 %v1601_v27, %v1600_v22  ;;  %v1049_v34 = vadd.f32 %v1584_v38, %v1048_v30  ;;  %v1603_v35 = vpop.f32.mrb[22].mxu0  ;;  %v1713_v37 = vpop.f32.mrb[22].mxu1  ;;  %v302_v18 = vld [vmem:[%s1945_s24 + $0x48] sm:$0xff] }
 0x140   : > { %v1165_v41 = vadd.f32 %v1057_v26, %v299_v23  ;;  %v1060_v42 = vadd.f32 %v1713_v37, %v1593_v56  ;;  %v1604_v43 = vpop.f32.mrb[23].mxu0  ;;  %v1051_v46 = vpop.f32.mrb[23].mxu1 }
 0x141   : > { %v1332_v47 = vadd.f32 %v1331_v31, %v1301_v25  ;;  %v1163_v48 = vadd.f32 %v1049_v34, %v297_v29  ;;  %v1261_v49 = vadd.f32 %v1260_v20, %v1162_v15  ;;  %v1605_v50 = vadd.f32 %v1604_v43, %v1603_v35 }
 0x142   : > { %1197 = vst [vmem:[%s1945_s24 + $0x30] sm:$0xff] %v1165_v41  ;;  %v1166_v53 = vadd.f32 %v1060_v42, %v300_v36  ;;  %v1052_v38 = vadd.f32 %v2122_v44, %v1051_v46  ;;  %v1305_v5 = vmul.f32 %v1165_v41, %v1165_v41 }
 0x143   : > { %1195 = vst [vmem:[%s1945_s24 + $0x20] sm:$0xff] %v1163_v48  ;;  %v1262_v54 = vadd.f32 %v1261_v49, %v1163_v48  ;;  %v1303_v55 = vmul.f32 %v1163_v48, %v1163_v48  ;;  %v1333_v58 = vadd.f32 %v1332_v47, %v1302_v39  ;;  %v305_v39 = vld [vmem:[%s1945_s24 + $0x60] sm:$0xff] }
 0x144   : > { %1198 = vst [vmem:[%s1945_s24 + $0x38] sm:$0xff] %v1166_v53  ;;  %v1164_v56 = vadd.f32 %v1052_v38, %v298_v51  ;;  %v1306_v25 = vmul.f32 %v1166_v53, %v1166_v53  ;;  %v307_v51 = vld [vmem:[%s1945_s24 + $0x70] sm:$0xff]  ;;  %v306_v38 = vld [vmem:[%s1945_s24 + $0x68] sm:$0xff] }
 0x145   : > { %v1334_v59 = vadd.f32 %v1333_v58, %v1303_v55  ;;  %v1606_v60 = vpop.f32.mrb[24].mxu0  ;;  %v1716_v62 = vpop.f32.mrb[24].mxu1 }
 0x146   : > { %1196 = vst [vmem:[%s1945_s24 + $0x28] sm:$0xff] %v1164_v56  ;;  %v1263_v63 = vadd.f32 %v1262_v54, %v1164_v56  ;;  %v1304_v0 = vmul.f32 %v1164_v56, %v1164_v56  ;;  %v1073_v2 = vadd.f32 %v1716_v62, %v1602_v32  ;;  %v1607_v3 = vpop.f32.mrb[25].mxu0  ;;  %v1064_v44 = vpop.f32.mrb[25].mxu1 }
 0x147   : > { %v1608_v6 = vadd.f32 %v1607_v3, %v1606_v60  ;;  %v1065_v7 = vadd.f32 %v2132_v1, %v1064_v44  ;;  %v1609_v8 = vpop.f32.mrb[26].mxu0  ;;  %v1717_v10 = vpop.f32.mrb[26].mxu1 }
 0x148   : > { %v1264_v11 = vadd.f32 %v1263_v63, %v1165_v41  ;;  %v1335_v13 = vadd.f32 %v1334_v59, %v1304_v0  ;;  %v1169_v15 = vadd.f32 %v1073_v2, %v303_v61  ;;  %v1076_v14 = vadd.f32 %v1717_v10, %v1605_v50  ;;  %v1610_v17 = vpop.f32.mrb[27].mxu0  ;;  %v1067_v19 = vpop.f32.mrb[27].mxu1  ;;  %v308_v63 = vld [vmem:[%s1945_s24 + $0x78] sm:$0xff] }
 0x149   : > { %v1167_v22 = vadd.f32 %v1065_v7, %v301_v4  ;;  %v1611_v23 = vadd.f32 %v1610_v17, %v1609_v8  ;;  %v1068_v24 = vadd.f32 %v2136_v12, %v1067_v19 }
 0x14a   : > { %v1336_v1 = vadd.f32 %v1335_v13, %v1305_v5  ;;  %1201 = vst [vmem:[%s1945_s24 + $0x50] sm:$0xff] %v1169_v15  ;;  %v1265_v26 = vadd.f32 %v1264_v11, %v1166_v53  ;;  %v1170_v27 = vadd.f32 %v1076_v14, %v304_v9  ;;  %v1309_v48 = vmul.f32 %v1169_v15, %v1169_v15 }
 0x14b   : > { %1199 = vst [vmem:[%s1945_s24 + $0x40] sm:$0xff] %v1167_v22  ;;  %v1307_v29 = vmul.f32 %v1167_v22, %v1167_v22  ;;  %v1168_v30 = vadd.f32 %v1068_v24, %v302_v18 }
 0x14c   : > { %v1266_v20 = vadd.f32 %v1265_v26, %v1167_v22  ;;  %v1337_v31 = vadd.f32 %v1336_v1, %v1306_v25  ;;  %1202 = vst [vmem:[%s1945_s24 + $0x58] sm:$0xff] %v1170_v27  ;;  %v1310_v60 = vmul.f32 %v1170_v27, %v1170_v27  ;;  %v309_v25 = vld [vmem:[%s1945_s24 + $0x80] sm:$0xff] }
 0x14d   : > { %1200 = vst [vmem:[%s1945_s24 + $0x48] sm:$0xff] %v1168_v30  ;;  %v1308_v32 = vmul.f32 %v1168_v30, %v1168_v30  ;;  %v1612_v34 = vpop.f32.mrb[28].mxu0  ;;  %v1720_v35 = vpop.f32.mrb[28].mxu1 }
 0x14e   : > { %v1338_v36 = vadd.f32 %v1337_v31, %v1307_v29  ;;  %v1267_v12 = vadd.f32 %v1266_v20, %v1168_v30  ;;  %v1613_v37 = vpop.f32.mrb[29].mxu0  ;;  %v1080_v41 = vpop.f32.mrb[29].mxu1  ;;  %v310_v31 = vld [vmem:[%s1945_s24 + $0x88] sm:$0xff] }
 0x14f   : > { %v1614_v42 = vadd.f32 %v1613_v37, %v1612_v34  ;;  %v1081_v43 = vadd.f32 %v1608_v6, %v1080_v41  ;;  %v1615_v46 = vpop.f32.mrb[30].mxu0  ;;  %v1721_v47 = vpop.f32.mrb[30].mxu1 }
 0x150   : > { %v1268_v49 = vadd.f32 %v1267_v12, %v1169_v15  ;;  %v1339_v50 = vadd.f32 %v1338_v36, %v1308_v32  ;;  %v1616_v53 = vpop.f32.mrb[31].mxu0  ;;  %v1083_v54 = vpop.f32.mrb[31].mxu1 }
 0x151   : > { %v1089_v55 = vadd.f32 %v1720_v35, %v1614_v42  ;;  %v1171_v58 = vadd.f32 %v1081_v43, %v305_v39  ;;  %v1617_v56 = vadd.f32 %v1616_v53, %v1615_v46  ;;  %v1084_v59 = vadd.f32 %v1611_v23, %v1083_v54  ;;  %v311_v53 = vld [vmem:[%s1945_s24 + $0x90] sm:$0xff] }
 0x152   : > { %v1340_v61 = vadd.f32 %v1339_v50, %v1309_v48  ;;  %v1269_v62 = vadd.f32 %v1268_v49, %v1170_v27 }
 0x153   : > { %v1173_v0 = vadd.f32 %v1089_v55, %v307_v51  ;;  %1203 = vst [vmem:[%s1945_s24 + $0x60] sm:$0xff] %v1171_v58  ;;  %v1311_v2 = vmul.f32 %v1171_v58, %v1171_v58  ;;  %v1092_v3 = vadd.f32 %v1721_v47, %v1617_v56  ;;  %v1172_v4 = vadd.f32 %v1084_v59, %v306_v38  ;;  %v312_v59 = vld [vmem:[%s1945_s24 + $0x98] sm:$0xff] }
 0x154   : > { %v1270_v44 = vadd.f32 %v1269_v62, %v1171_v58  ;;  %v1341_v5 = vadd.f32 %v1340_v61, %v1310_v60 }
 0x155   : > { %1205 = vst [vmem:[%s1945_s24 + $0x70] sm:$0xff] %v1173_v0  ;;  %v1174_v6 = vadd.f32 %v1092_v3, %v308_v63  ;;  %1204 = vst [vmem:[%s1945_s24 + $0x68] sm:$0xff] %v1172_v4  ;;  %v1312_v7 = vmul.f32 %v1172_v4, %v1172_v4  ;;  %v1618_v8 = vpop.f32.mrb[32].mxu0  ;;  %v1724_v9 = vpop.f32.mrb[32].mxu1  ;;  %v1313_v19 = vmul.f32 %v1173_v0, %v1173_v0  ;;  %v319_v3 = vld [vmem:[%s1945_s24 + $0xd0] sm:$0xff] }
 0x156   : > { %v1342_v10 = vadd.f32 %v1341_v5, %v1311_v2  ;;  %v1271_v11 = vadd.f32 %v1270_v44, %v1172_v4  ;;  %v1619_v13 = vpop.f32.mrb[33].mxu0  ;;  %v1096_v15 = vpop.f32.mrb[33].mxu1 }
 0x157   : > { %1206 = vst [vmem:[%s1945_s24 + $0x78] sm:$0xff] %v1174_v6  ;;  %v1620_v14 = vadd.f32 %v1619_v13, %v1618_v8  ;;  %v1621_v17 = vpop.f32.mrb[34].mxu0  ;;  %v1725_v18 = vpop.f32.mrb[34].mxu1  ;;  %v1314_v29 = vmul.f32 %v1174_v6, %v1174_v6 }
 0x158   : > { %v1272_v22 = vadd.f32 %v1271_v11, %v1173_v0  ;;  %v1343_v23 = vadd.f32 %v1342_v10, %v1312_v7  ;;  %v1622_v24 = vpop.f32.mrb[35].mxu0  ;;  %v1099_v1 = vpop.f32.mrb[35].mxu1  ;;  %v317_v11 = vld [vmem:[%s1945_s24 + $0xc0] sm:$0xff] }
 0x159   : > { %v1623_v26 = vadd.f32 %v1622_v24, %v1621_v17  ;;  %v1097_v27 = vadd.f32 %v1620_v14, %v1096_v15  ;;  %v320_v15 = vld [vmem:[%s1945_s24 + $0xd8] sm:$0xff] }
 0x15a   : > { %v1344_v30 = vadd.f32 %v1343_v23, %v1313_v19  ;;  %v1273_v20 = vadd.f32 %v1272_v22, %v1174_v6  ;;  %v318_v23 = vld [vmem:[%s1945_s24 + $0xc8] sm:$0xff] }
 0x15b   : > { %v1175_v32 = vadd.f32 %v1097_v27, %v309_v25  ;;  %v1100_v34 = vadd.f32 %v1623_v26, %v1099_v1 }
 0x15c   : > { %v1345_v35 = vadd.f32 %v1344_v30, %v1314_v29 }
 0x15d   : > { %1207 = vst [vmem:[%s1945_s24 + $0x80] sm:$0xff] %v1175_v32  ;;  %v1274_v36 = vadd.f32 %v1273_v20, %v1175_v32  ;;  %v1315_v12 = vmul.f32 %v1175_v32, %v1175_v32  ;;  %v1176_v37 = vadd.f32 %v1100_v34, %v310_v31  ;;  %v1624_v39 = vpop.f32.mrb[36].mxu0  ;;  %v2172_v41 = vpop.f32.mrb[36].mxu1 }
 0x15e   : > { %v1625_v42 = vpop.f32.mrb[37].mxu0  ;;  %v1112_v43 = vpop.f32.mrb[37].mxu1 }
 0x15f   : > { %v1346_v46 = vadd.f32 %v1345_v35, %v1315_v12  ;;  %1208 = vst [vmem:[%s1945_s24 + $0x88] sm:$0xff] %v1176_v37  ;;  %v1275_v47 = vadd.f32 %v1274_v36, %v1176_v37  ;;  %v1316_v48 = vmul.f32 %v1176_v37, %v1176_v37  ;;  %v1626_v49 = vadd.f32 %v1625_v42, %v1624_v39  ;;  %v1627_v50 = vpop.f32.mrb[38].mxu0  ;;  %v2175_v51 = vpop.f32.mrb[38].mxu1  ;;  %v323_v36 = vld [vmem:[%s1945_s24 + $0xf0] sm:$0xff] }
 0x160   : > { %v1628_v38 = vpop.f32.mrb[39].mxu0  ;;  %v1115_v54 = vpop.f32.mrb[39].mxu1 }
 0x161   : > { %v1347_v55 = vadd.f32 %v1346_v46, %v1316_v48  ;;  %v1105_v58 = vadd.f32 %v1724_v9, %v1626_v49  ;;  %v1629_v56 = vadd.f32 %v1628_v38, %v1627_v50  ;;  %v321_v49 = vld [vmem:[%s1945_s24 + $0xe0] sm:$0xff] }
 0x163   : > { %v1177_v60 = vadd.f32 %v1105_v58, %v311_v53  ;;  %v1108_v61 = vadd.f32 %v1725_v18, %v1629_v56  ;;  %v313_v18 = vld [vmem:[%s1945_s24 + $0xa0] sm:$0xff]  ;;  %v324_v53 = vld [vmem:[%s1945_s24 + $0xf8] sm:$0xff] }
 0x165   : > { %1209 = vst [vmem:[%s1945_s24 + $0x90] sm:$0xff] %v1177_v60  ;;  %v1276_v62 = vadd.f32 %v1275_v47, %v1177_v60  ;;  %v1317_v63 = vmul.f32 %v1177_v60, %v1177_v60  ;;  %v1178_v0 = vadd.f32 %v1108_v61, %v312_v59  ;;  %v1630_v2 = vpop.f32.mrb[40].mxu0  ;;  %v1732_v4 = vpop.f32.mrb[40].mxu1  ;;  %v322_v59 = vld [vmem:[%s1945_s24 + $0xe8] sm:$0xff] }
 0x166   : > { %v1137_v44 = vadd.f32 %v1732_v4, %v2116_v28  ;;  %v1631_v5 = vpop.f32.mrb[41].mxu0  ;;  %v1128_v6 = vpop.f32.mrb[41].mxu1 }
 0x167   : > { %v1348_v7 = vadd.f32 %v1347_v55, %v1317_v63  ;;  %1210 = vst [vmem:[%s1945_s24 + $0x98] sm:$0xff] %v1178_v0  ;;  %v1277_v8 = vadd.f32 %v1276_v62, %v1178_v0  ;;  %v1318_v9 = vmul.f32 %v1178_v0, %v1178_v0  ;;  %v1632_v10 = vadd.f32 %v1631_v5, %v1630_v2  ;;  %v1633_v13 = vpop.f32.mrb[42].mxu0  ;;  %v1733_v14 = vpop.f32.mrb[42].mxu1  ;;  %v315_v55 = vld [vmem:[%s1945_s24 + $0xb0] sm:$0xff] }
 0x168   : > { %v2185_v17 = vadd.f32 %v1137_v44, %v319_v3  ;;  %v1129_v19 = vadd.f32 %v2112_v16, %v1128_v6  ;;  %v1140_v28 = vadd.f32 %v1733_v14, %v2118_v33  ;;  %v1634_v22 = vpop.f32.mrb[43].mxu0  ;;  %v1131_v24 = vpop.f32.mrb[43].mxu1  ;;  %v314_v16 = vld [vmem:[%s1945_s24 + $0xa8] sm:$0xff] }
 0x169   : > { %v1349_v25 = vadd.f32 %v1348_v7, %v1318_v9  ;;  %v1113_v1 = vadd.f32 %v1632_v10, %v1112_v43  ;;  %v1635_v26 = vadd.f32 %v1634_v22, %v1633_v13  ;;  %v1132_v27 = vadd.f32 %v2114_v21, %v1131_v24 }
 0x16a   : > { %1217 = vst [vmem:[%s1945_s24 + $0xd0] sm:$0xff] %v2185_v17  ;;  %v1183_v29 = vadd.f32 %v1129_v19, %v317_v11  ;;  %v2194_v30 = vadd.f32 %v1140_v28, %v320_v15 }
 0x16b   : > { %v1179_v20 = vadd.f32 %v1113_v1, %v313_v18  ;;  %v1116_v33 = vadd.f32 %v1635_v26, %v1115_v54  ;;  %v1184_v31 = vadd.f32 %v1132_v27, %v318_v23 }
 0x16c   : > { %1215 = vst [vmem:[%s1945_s24 + $0xc0] sm:$0xff] %v1183_v29  ;;  %1218 = vst [vmem:[%s1945_s24 + $0xd8] sm:$0xff] %v2194_v30  ;;  %v1323_v9 = vmul.f32 %v1183_v29, %v1183_v29  ;;  %v1326_v28 = vmul.f32 %v2194_v30, %v2194_v30 }
 0x16d   : > { %1211 = vst [vmem:[%s1945_s24 + $0xa0] sm:$0xff] %v1179_v20  ;;  %v1278_v32 = vadd.f32 %v1277_v8, %v1179_v20  ;;  %v1319_v34 = vmul.f32 %v1179_v20, %v1179_v20  ;;  %v1180_v21 = vadd.f32 %v1116_v33, %v314_v16  ;;  %1216 = vst [vmem:[%s1945_s24 + $0xc8] sm:$0xff] %v1184_v31  ;;  %v1636_v35 = vpop.f32.mrb[44].mxu0  ;;  %v1736_v12 = vpop.f32.mrb[44].mxu1 }
 0x16e   : > { %v1153_v37 = vadd.f32 %v1736_v12, %v2126_v52  ;;  %v1637_v39 = vpop.f32.mrb[45].mxu0  ;;  %v1144_v42 = vpop.f32.mrb[45].mxu1  ;;  %v1324_v13 = vmul.f32 %v1184_v31, %v1184_v31 }
 0x16f   : > { %v1350_v43 = vadd.f32 %v1349_v25, %v1319_v34  ;;  %1212 = vst [vmem:[%s1945_s24 + $0xa8] sm:$0xff] %v1180_v21  ;;  %v1279_v46 = vadd.f32 %v1278_v32, %v1180_v21  ;;  %v1320_v47 = vmul.f32 %v1180_v21, %v1180_v21  ;;  %v1638_v48 = vadd.f32 %v1637_v39, %v1636_v35  ;;  %v1639_v50 = vpop.f32.mrb[46].mxu0  ;;  %v1737_v38 = vpop.f32.mrb[46].mxu1 }
 0x170   : > { %v1189_v54 = vadd.f32 %v1153_v37, %v323_v36  ;;  %v1145_v58 = vadd.f32 %v2120_v40, %v1144_v42  ;;  %v1156_v52 = vadd.f32 %v1737_v38, %v2128_v57  ;;  %v1640_v56 = vpop.f32.mrb[47].mxu0  ;;  %v1147_v60 = vpop.f32.mrb[47].mxu1  ;;  %v316_v40 = vld [vmem:[%s1945_s24 + $0xb8] sm:$0xff] }
 0x171   : > { %v1351_v61 = vadd.f32 %v1350_v43, %v1320_v47  ;;  %v1121_v62 = vadd.f32 %v2172_v41, %v1638_v48  ;;  %v1641_v63 = vadd.f32 %v1640_v56, %v1639_v50  ;;  %v1148_v0 = vadd.f32 %v2124_v45, %v1147_v60 }
 0x172   : > { %1221 = vst [vmem:[%s1945_s24 + $0xf0] sm:$0xff] %v1189_v54  ;;  %v1187_v2 = vadd.f32 %v1145_v58, %v321_v49  ;;  %v1190_v3 = vadd.f32 %v1156_v52, %v324_v53  ;;  %v1329_v16 = vmul.f32 %v1189_v54, %v1189_v54  ;;  %v1298_v49 = vld [vmem:[%s2252_s4] sm:$0x1] }
 0x173   : > { %v1181_v4 = vadd.f32 %v1121_v62, %v315_v55  ;;  %v1124_v57 = vadd.f32 %v2175_v51, %v1641_v63  ;;  %v1188_v44 = vadd.f32 %v1148_v0, %v322_v59  ;;  %v1325_v51 = vmul.f32 %v2185_v17, %v2185_v17 }
 0x174   : > { %1219 = vst [vmem:[%s1945_s24 + $0xe0] sm:$0xff] %v1187_v2  ;;  %1222 = vst [vmem:[%s1945_s24 + $0xf8] sm:$0xff] %v1190_v3  ;;  %v1327_v24 = vmul.f32 %v1187_v2, %v1187_v2 }
 0x175   : > { %1213 = vst [vmem:[%s1945_s24 + $0xb0] sm:$0xff] %v1181_v4  ;;  %v1280_v5 = vadd.f32 %v1279_v46, %v1181_v4  ;;  %v1321_v6 = vmul.f32 %v1181_v4, %v1181_v4  ;;  %v1182_v7 = vadd.f32 %v1124_v57, %v316_v40  ;;  %1220 = vst [vmem:[%s1945_s24 + $0xe8] sm:$0xff] %v1188_v44  ;;  %v1258_v46 = vld [vmem:[%s2251_s3] sm:$0x1] }
 0x176   : > { %v1328_v27 = vmul.f32 %v1188_v44, %v1188_v44 }
 0x177   : > { %v1352_v41 = vadd.f32 %v1351_v61, %v1321_v6  ;;  %1214 = vst [vmem:[%s1945_s24 + $0xb8] sm:$0xff] %v1182_v7  ;;  %v1281_v8 = vadd.f32 %v1280_v5, %v1182_v7  ;;  %v1322_v45 = vmul.f32 %v1182_v7, %v1182_v7 }
 0x179   : > { %v1282_v10 = vadd.f32 %v1281_v8, %v1183_v29  ;;  %v1353_v11 = vadd.f32 %v1352_v41, %v1322_v45 }
 0x17b   : > { %v1283_v15 = vadd.f32 %v1282_v10, %v1184_v31  ;;  %v1354_v14 = vadd.f32 %v1353_v11, %v1323_v9  ;;  %v1330_v31 = vmul.f32 %v1190_v3, %v1190_v3 }
 0x17d   : > { %v1355_v18 = vadd.f32 %v1354_v14, %v1324_v13  ;;  %v1284_v19 = vadd.f32 %v1283_v15, %v2185_v17 }
 0x17f   : > { %v1285_v22 = vadd.f32 %v1284_v19, %v2194_v30  ;;  %v1356_v23 = vadd.f32 %v1355_v18, %v1325_v51 }
 0x181   : > { %v1286_v25 = vadd.f32 %v1285_v22, %v1187_v2  ;;  %v1357_v1 = vadd.f32 %v1356_v23, %v1326_v28 }
 0x183   : > { %v1287_v26 = vadd.f32 %v1286_v25, %v1188_v44  ;;  %v1358_v29 = vadd.f32 %v1357_v1, %v1327_v24 }
 0x185   : > { %v1288_v20 = vadd.f32 %v1287_v26, %v1189_v54  ;;  %v1359_v33 = vadd.f32 %v1358_v29, %v1328_v27 }
 0x187   : > { %v1289_v32 = vadd.f32 %v1288_v20, %v1190_v3  ;;  %v1360_v34 = vadd.f32 %v1359_v33, %v1329_v16 }
 0x189   : > { %v1290_v21 = vrot.slane %v1289_v32, 4  ;;  %v1361_v17 = vadd.f32 %v1360_v34, %v1330_v31 }
 0x18b   : > { %v1291_v35 = vadd.f32 %v1290_v21, %v1289_v32  ;;  %v1362_v36 = vrot.slane %v1361_v17, 4 }
 0x18d   : > { %v1292_v12 = vrot.slane %v1291_v35, 2  ;;  %v1363_v37 = vadd.f32 %v1362_v36, %v1361_v17 }
 0x18f   : > { %v1293_v30 = vadd.f32 %v1292_v12, %v1291_v35  ;;  %v1364_v39 = vrot.slane %v1363_v37, 2 }
 0x191   : > { %v1294_v42 = vrot.slane %v1293_v30, 1  ;;  %v1365_v43 = vadd.f32 %v1364_v39, %v1363_v37 }
 0x193   : > { %v1295_v47 = vadd.f32 %v1294_v42, %v1293_v30  ;;  %v1366_v48 = vrot.slane %v1365_v43, 1 }
 0x195   : > { %v1296_v50 = vadd.f32 %v1295_v47, %v1258_v46  ;;  %v1367_v53 = vadd.f32 %v1366_v48, %v1365_v43 }
 0x197   : > { %1297 = vst [vmem:[%s2251_s3] sm:$0x1] %v1296_v50  ;;  %v1368_v38 = vadd.f32 %v1367_v53, %v1298_v49 }
 0x199   : > { %1369 = vst [vmem:[%s2252_s4] sm:$0x1] %v1368_v38 }
 0x19a PF: > { %s15_s17 = sadd.s32 1, %s1891_s17   ;;  %s2253_s15 = smov %s1887_s16 }
 0x19b   : > { %p12_p6 = scmp.ge.s32.totalorder %s15_s17, 4   ;;  %s2254_s16 = smov %s2256_s18 }
 0x19d   :  { %14 = sbr.rel (!%p12_p6) target bundleno = 2 (0x2), region = 89 }

// kernel: unet_hrpxp_forward.77
= control target key start
LH: loop header
LB: loop body
LE: loop exit
PB: predicated region body
PF: predicated region fallthrough
CT: control target
= control target key end

     0   :  { %s2137_s15 = smov 0   ;;  %s2139_s16 = smov 0   ;;  %s2454_s0 = inlined_call_operand.vmem [shape: bf16[512,512], index: 0, kind: input, shape index: {}]   ;;  %s2455_s1 = inlined_call_operand.vmem [shape: bf16[512,128], index: 1, kind: input, shape index: {}]   ;;  %s2456_s2 = inlined_call_operand.vmem [shape: f32[512,128], index: 2, kind: output, shape index: {0}]   ;;  %s2457_s3 = inlined_call_operand.vmem [shape: f32[1,128], index: 3, kind: output, shape index: {1}]   ;;  %s2458_s4 = inlined_call_operand.vmem [shape: f32[1,128], index: 4, kind: output, shape index: {2}]  }
   0x1   :  { %s2141_s17 = smov 0  }
   0x2 LB: > { %s27_s18 = sadd.s32 1, %s2104_s16  ;;  %p1601_p0 = scmp.ge.s32.totalorder %s2108_s17, 1  ;;  %s2108_s17 = sphi %s2141_s17, %s15_s17   ;;  %s2104_s16 = sphi %s2139_s16, %s2460_s16   ;;  %s2100_s15 = sphi %s2137_s15, %s2459_s15  }
   0x3   : > { %p29_p1 = scmp.ge.s32.totalorder %s27_s18, 2  ;;  %p189_p2 = scmp.lt.s32.totalorder %s2108_s17, 3 }
   0x5   : > { %s2462_s18 = smov (%p29_p1, %s27_s18), 0  ;;  %p190_p3 = pnand %p1601_p0, %p189_p2 }
   0x6   : > { %s1602_s19 = sshll.u32 (!%p190_p3), %s2100_s15, 5  ;;  %p286_p4 = scmp.eq.s32.totalorder (!%p190_p3), %s2100_s15, 0  ;;  %v2110_v0 = vmov (!%p190_p3), 0.0  }
   0x7   : > { %193 = sbr.rel (%p190_p3) target bundleno = 428 (0x1ac), region = 28  ;;  %p227_p5 = scmp.lt.s32.totalorder (!%p190_p3), %s1602_s19, 63 }
   0xe   : > { %s2464_s19 = smov (!%p227_p5, %s1602_s19), 63  ;;  %v2111_v1 = vmov (%p286_p4), 0.0  }
   0xf   : > { %s1706_s20 = sshll.u32 %s2464_s19, 4  ;;  %s1606_s21 = sshll.u32 %s2464_s19, 3  ;;  %291 = vst [vmem:[%s2457_s3] sm:$0x1] (%p286_p4), %v2111_v1  ;;  %292 = vst [vmem:[%s2458_s4] sm:$0x1] (%p286_p4), %v2111_v1 }
  0x10   : > { %s2162_s24 = scalar_lea.vmem %s2454_s0, %s1706_s20  ;;  %s2167_s27 = scalar_lea.vmem %s2456_s2, %s1606_s21 }
  0x11   : > { %254 = vst [vmem:[%s2167_s27] sm:$0xff] %v2110_v0  ;;  %255 = vst [vmem:[%s2167_s27 + $0x8] sm:$0xff] %v2110_v0 }
  0x12   : > { %256 = vst [vmem:[%s2167_s27 + $0x10] sm:$0xff] %v2110_v0  ;;  %257 = vst [vmem:[%s2167_s27 + $0x18] sm:$0xff] %v2110_v0 }
  0x13   : > { %258 = vst [vmem:[%s2167_s27 + $0x20] sm:$0xff] %v2110_v0  ;;  %259 = vst [vmem:[%s2167_s27 + $0x28] sm:$0xff] %v2110_v0 }
  0x14   : > { %260 = vst [vmem:[%s2167_s27 + $0x30] sm:$0xff] %v2110_v0  ;;  %261 = vst [vmem:[%s2167_s27 + $0x38] sm:$0xff] %v2110_v0 }
  0x15   : > { %262 = vst [vmem:[%s2167_s27 + $0x40] sm:$0xff] %v2110_v0  ;;  %263 = vst [vmem:[%s2167_s27 + $0x48] sm:$0xff] %v2110_v0 }
  0x16   : > { %264 = vst [vmem:[%s2167_s27 + $0x50] sm:$0xff] %v2110_v0  ;;  %265 = vst [vmem:[%s2167_s27 + $0x58] sm:$0xff] %v2110_v0 }
  0x17   : > { %266 = vst [vmem:[%s2167_s27 + $0x60] sm:$0xff] %v2110_v0  ;;  %267 = vst [vmem:[%s2167_s27 + $0x68] sm:$0xff] %v2110_v0 }
  0x18   : > { %268 = vst [vmem:[%s2167_s27 + $0x70] sm:$0xff] %v2110_v0  ;;  %269 = vst [vmem:[%s2167_s27 + $0x78] sm:$0xff] %v2110_v0 }
  0x19   : > { %270 = vst [vmem:[%s2167_s27 + $0x80] sm:$0xff] %v2110_v0  ;;  %271 = vst [vmem:[%s2167_s27 + $0x88] sm:$0xff] %v2110_v0 }
  0x1a   : > { %272 = vst [vmem:[%s2167_s27 + $0x90] sm:$0xff] %v2110_v0  ;;  %273 = vst [vmem:[%s2167_s27 + $0x98] sm:$0xff] %v2110_v0  ;;  %290 = sbr.rel (!%p286_p4) target bundleno = 33 (0x21), region = 36 }
  0x1b   : > { %274 = vst [vmem:[%s2167_s27 + $0xa0] sm:$0xff] %v2110_v0  ;;  %275 = vst [vmem:[%s2167_s27 + $0xa8] sm:$0xff] %v2110_v0 }
  0x1c   : > { %276 = vst [vmem:[%s2167_s27 + $0xb0] sm:$0xff] %v2110_v0  ;;  %277 = vst [vmem:[%s2167_s27 + $0xb8] sm:$0xff] %v2110_v0 }
  0x1d   : > { %278 = vst [vmem:[%s2167_s27 + $0xc0] sm:$0xff] %v2110_v0  ;;  %279 = vst [vmem:[%s2167_s27 + $0xc8] sm:$0xff] %v2110_v0 }
  0x1e   : > { %280 = vst [vmem:[%s2167_s27 + $0xd0] sm:$0xff] %v2110_v0  ;;  %281 = vst [vmem:[%s2167_s27 + $0xd8] sm:$0xff] %v2110_v0 }
  0x1f   : > { %282 = vst [vmem:[%s2167_s27 + $0xe0] sm:$0xff] %v2110_v0  ;;  %283 = vst [vmem:[%s2167_s27 + $0xe8] sm:$0xff] %v2110_v0 }
  0x20   : > { %284 = vst [vmem:[%s2167_s27 + $0xf0] sm:$0xff] %v2110_v0  ;;  %285 = vst [vmem:[%s2167_s27 + $0xf8] sm:$0xff] %v2110_v0 }
  0x21 PF: > { %v1958_v2 = vld [vmem:[%s2455_s1 + $0x40] sm:$0xff]   ;;  %v1962_v6 = vld [vmem:[%s2455_s1 + $0x48] sm:$0xff]   ;;  %v1966_v10 = vld [vmem:[%s2455_s1 + $0x50] sm:$0xff]  }
  0x22   : > { %v1959_v3 = vld [vmem:[%s2455_s1 + $0xc0] sm:$0xff]   ;;  %1708 = vmatprep.subr.bf16.mxu0 %v1958_v2  ;;  %v1963_v7 = vld [vmem:[%s2455_s1 + $0xc8] sm:$0xff]   ;;  %v1967_v11 = vld [vmem:[%s2455_s1 + $0xd0] sm:$0xff]  }
  0x23   : > { %v1960_v4 = vld [vmem:[%s2455_s1] sm:$0xff]   ;;  %1820 = vmatprep.subr.bf16.mxu1 %v1959_v3  ;;  %v1964_v8 = vld [vmem:[%s2455_s1 + $0x8] sm:$0xff]   ;;  %v1968_v12 = vld [vmem:[%s2455_s1 + $0x10] sm:$0xff]  }
  0x24   : > { %v1961_v5 = vld [vmem:[%s2455_s1 + $0x80] sm:$0xff]   ;;  %1709 = vmatpush3.bf16.msra.mxu0 %v1960_v4  ;;  %v1965_v9 = vld [vmem:[%s2455_s1 + $0x88] sm:$0xff]   ;;  %v1969_v13 = vld [vmem:[%s2455_s1 + $0x90] sm:$0xff]  }
  0x25   : > { %1821 = vmatpush3.bf16.msra.mxu1 %v1961_v5  ;;  %1710 = vmatprep.subr.bf16.mxu0 %v1962_v6  ;;  %v1970_v14 = vld [vmem:[%s2455_s1 + $0x58] sm:$0xff]   ;;  %v1974_v18 = vld [vmem:[%s2455_s1 + $0x60] sm:$0xff]   ;;  %v1978_v22 = vld [vmem:[%s2455_s1 + $0x68] sm:$0xff]  }
  0x26   : > { %1822 = vmatprep.subr.bf16.mxu1 %v1963_v7  ;;  %v1971_v15 = vld [vmem:[%s2455_s1 + $0xd8] sm:$0xff]   ;;  %v1975_v19 = vld [vmem:[%s2455_s1 + $0xe0] sm:$0xff]   ;;  %v1979_v23 = vld [vmem:[%s2455_s1 + $0xe8] sm:$0xff]  }
  0x27   : > { %v1972_v16 = vld [vmem:[%s2455_s1 + $0x18] sm:$0xff]   ;;  %v1976_v20 = vld [vmem:[%s2455_s1 + $0x20] sm:$0xff]   ;;  %v1980_v24 = vld [vmem:[%s2455_s1 + $0x28] sm:$0xff]  }
  0x28   : > { %1711 = vmatpush3.bf16.msra.mxu0 %v1964_v8  ;;  %v1973_v17 = vld [vmem:[%s2455_s1 + $0x98] sm:$0xff]   ;;  %v1977_v21 = vld [vmem:[%s2455_s1 + $0xa0] sm:$0xff]   ;;  %v1981_v25 = vld [vmem:[%s2455_s1 + $0xa8] sm:$0xff]  }
  0x29   : > { %1823 = vmatpush3.bf16.msra.mxu1 %v1965_v9  ;;  %1712 = vmatprep.subr.bf16.mxu0 %v1966_v10  ;;  %v1982_v26 = vld [vmem:[%s2455_s1 + $0x70] sm:$0xff]   ;;  %v1986_v30 = vld [vmem:[%s2455_s1 + $0x78] sm:$0xff]  }
  0x2a   : > { %1824 = vmatprep.subr.bf16.mxu1 %v1967_v11  ;;  %v1983_v27 = vld [vmem:[%s2455_s1 + $0xf0] sm:$0xff]   ;;  %v1987_v31 = vld [vmem:[%s2455_s1 + $0xf8] sm:$0xff]  }
  0x2b   : > { %v1984_v28 = vld [vmem:[%s2455_s1 + $0x30] sm:$0xff]   ;;  %v1988_v32 = vld [vmem:[%s2455_s1 + $0x38] sm:$0xff]  }
  0x2c   : > { %1713 = vmatpush3.bf16.msra.mxu0 %v1968_v12  ;;  %v1985_v29 = vld [vmem:[%s2455_s1 + $0xb0] sm:$0xff]   ;;  %v1989_v33 = vld [vmem:[%s2455_s1 + $0xb8] sm:$0xff]  }
  0x2d   : > { %1825 = vmatpush3.bf16.msra.mxu1 %v1969_v13  ;;  %1714 = vmatprep.subr.bf16.mxu0 %v1970_v14  ;;  %v1990_v34 = vld [vmem:[%s2162_s24] ss:$16 sps:$4 sm:$0xff]   ;;  %v1992_v35 = vld [vmem:[%s2162_s24 + $0x4] ss:$16 sps:$4 sm:$0xff]   ;;  %v1993_v36 = vld [vmem:[%s2162_s24 + $0x8] ss:$16 sps:$4 sm:$0xff]  }
  0x2e   : > { %1826 = vmatprep.subr.bf16.mxu1 %v1971_v15  ;;  %v1995_v37 = vld [vmem:[%s2162_s24 + $0xc] ss:$16 sps:$4 sm:$0xff]   ;;  %997 = vmatprep.mubr.bf16.mxu0 %v1992_v35  ;;  %v1996_v38 = vld [vmem:[%s2162_s24 + $0x24] ss:$16 sps:$4 sm:$0xff]   ;;  %v2000_v40 = vld [vmem:[%s2162_s24 + $0x20] ss:$16 sps:$4 sm:$0xff]  }
  0x2f   : > { %1158 = vmatprep.mubr.bf16.mxu1 %v1995_v37  ;;  %v1998_v39 = vld [vmem:[%s2162_s24 + $0x2c] ss:$16 sps:$4 sm:$0xff]   ;;  %v2001_v41 = vld [vmem:[%s2162_s24 + $0x28] ss:$16 sps:$4 sm:$0xff]   ;;  %v2002_v42 = vld [vmem:[%s2162_s24 + $0x44] ss:$16 sps:$4 sm:$0xff]  }
  0x30   : > { %1715 = vmatpush3.bf16.msra.mxu0 %v1972_v16  ;;  %v2004_v43 = vld [vmem:[%s2162_s24 + $0x4c] ss:$16 sps:$4 sm:$0xff]   ;;  %v2006_v44 = vld [vmem:[%s2162_s24 + $0x40] ss:$16 sps:$4 sm:$0xff]   ;;  %v2007_v45 = vld [vmem:[%s2162_s24 + $0x48] ss:$16 sps:$4 sm:$0xff]  }
  0x31   : > { %1827 = vmatpush3.bf16.msra.mxu1 %v1973_v17  ;;  %1716 = vmatprep.subr.bf16.mxu0 %v1974_v18  ;;  %v2008_v46 = vld [vmem:[%s2162_s24 + $0x64] ss:$16 sps:$4 sm:$0xff]   ;;  %v2010_v47 = vld [vmem:[%s2162_s24 + $0x6c] ss:$16 sps:$4 sm:$0xff]   ;;  %v2012_v48 = vld [vmem:[%s2162_s24 + $0x60] ss:$16 sps:$4 sm:$0xff]  }
  0x32   : > { %1828 = vmatprep.subr.bf16.mxu1 %v1975_v19  ;;  %v2013_v49 = vld [vmem:[%s2162_s24 + $0x68] ss:$16 sps:$4 sm:$0xff]   ;;  %v2014_v50 = vld [vmem:[%s2162_s24 + $0x84] ss:$16 sps:$4 sm:$0xff]   ;;  %v2016_v51 = vld [vmem:[%s2162_s24 + $0x8c] ss:$16 sps:$4 sm:$0xff]  }
  0x33   : > { %v2018_v52 = vld [vmem:[%s2162_s24 + $0x80] ss:$16 sps:$4 sm:$0xff]   ;;  %v2019_v53 = vld [vmem:[%s2162_s24 + $0x88] ss:$16 sps:$4 sm:$0xff]   ;;  %v2020_v54 = vld [vmem:[%s2162_s24 + $0xa4] ss:$16 sps:$4 sm:$0xff]  }
  0x34   : > { %1717 = vmatpush3.bf16.msra.mxu0 %v1976_v20  ;;  %v2022_v55 = vld [vmem:[%s2162_s24 + $0xac] ss:$16 sps:$4 sm:$0xff]   ;;  %v2024_v56 = vld [vmem:[%s2162_s24 + $0xa0] ss:$16 sps:$4 sm:$0xff]   ;;  %v2025_v57 = vld [vmem:[%s2162_s24 + $0xa8] ss:$16 sps:$4 sm:$0xff]  }
  0x35   : > { %1829 = vmatpush3.bf16.msra.mxu1 %v1977_v21  ;;  %1718 = vmatprep.subr.bf16.mxu0 %v1978_v22  ;;  %v2026_v58 = vld [vmem:[%s2162_s24 + $0xc4] ss:$16 sps:$4 sm:$0xff]   ;;  %v2028_v59 = vld [vmem:[%s2162_s24 + $0xcc] ss:$16 sps:$4 sm:$0xff]   ;;  %v2030_v60 = vld [vmem:[%s2162_s24 + $0xc0] ss:$16 sps:$4 sm:$0xff]  }
  0x36   : > { %1830 = vmatprep.subr.bf16.mxu1 %v1979_v23  ;;  %v2031_v61 = vld [vmem:[%s2162_s24 + $0xc8] ss:$16 sps:$4 sm:$0xff]   ;;  %v2032_v62 = vld [vmem:[%s2162_s24 + $0xe4] ss:$16 sps:$4 sm:$0xff]   ;;  %v2034_v63 = vld [vmem:[%s2162_s24 + $0xec] ss:$16 sps:$4 sm:$0xff]  }
  0x37   : > { %v2036_v0 = vld [vmem:[%s2162_s24 + $0xe0] ss:$16 sps:$4 sm:$0xff]   ;;  %v2037_v1 = vld [vmem:[%s2162_s24 + $0xe8] ss:$16 sps:$4 sm:$0xff]   ;;  %v2038_v2 = vld [vmem:[%s2162_s24 + $0x104] ss:$16 sps:$4 sm:$0xff]  }
  0x38   : > { %1719 = vmatpush3.bf16.msra.mxu0 %v1980_v24  ;;  %v2040_v3 = vld [vmem:[%s2162_s24 + $0x10c] ss:$16 sps:$4 sm:$0xff]   ;;  %v2042_v4 = vld [vmem:[%s2162_s24 + $0x100] ss:$16 sps:$4 sm:$0xff]   ;;  %v2043_v5 = vld [vmem:[%s2162_s24 + $0x108] ss:$16 sps:$4 sm:$0xff]  }
  0x39   : > { %1831 = vmatpush3.bf16.msra.mxu1 %v1981_v25  ;;  %1720 = vmatprep.subr.bf16.mxu0 %v1982_v26  ;;  %v2044_v6 = vld [vmem:[%s2162_s24 + $0x124] ss:$16 sps:$4 sm:$0xff]   ;;  %v2046_v7 = vld [vmem:[%s2162_s24 + $0x12c] ss:$16 sps:$4 sm:$0xff]   ;;  %v2048_v8 = vld [vmem:[%s2162_s24 + $0x120] ss:$16 sps:$4 sm:$0xff]  }
  0x3a   : > { %1832 = vmatprep.subr.bf16.mxu1 %v1983_v27  ;;  %v2049_v9 = vld [vmem:[%s2162_s24 + $0x128] ss:$16 sps:$4 sm:$0xff]   ;;  %v2050_v10 = vld [vmem:[%s2162_s24 + $0x144] ss:$16 sps:$4 sm:$0xff]   ;;  %v2052_v11 = vld [vmem:[%s2162_s24 + $0x14c] ss:$16 sps:$4 sm:$0xff]  }
  0x3b   : > { %v2054_v12 = vld [vmem:[%s2162_s24 + $0x140] ss:$16 sps:$4 sm:$0xff]   ;;  %v2055_v13 = vld [vmem:[%s2162_s24 + $0x148] ss:$16 sps:$4 sm:$0xff]   ;;  %v2056_v14 = vld [vmem:[%s2162_s24 + $0x164] ss:$16 sps:$4 sm:$0xff]  }
  0x3c   : > { %1721 = vmatpush3.bf16.msra.mxu0 %v1984_v28  ;;  %v2058_v15 = vld [vmem:[%s2162_s24 + $0x16c] ss:$16 sps:$4 sm:$0xff]   ;;  %v2060_v16 = vld [vmem:[%s2162_s24 + $0x160] ss:$16 sps:$4 sm:$0xff]   ;;  %v2061_v17 = vld [vmem:[%s2162_s24 + $0x168] ss:$16 sps:$4 sm:$0xff]  }
  0x3d   : > { %1833 = vmatpush3.bf16.msra.mxu1 %v1985_v29  ;;  %1722 = vmatprep.subr.bf16.mxu0 %v1986_v30  ;;  %v2062_v18 = vld [vmem:[%s2162_s24 + $0x184] ss:$16 sps:$4 sm:$0xff]   ;;  %v2064_v19 = vld [vmem:[%s2162_s24 + $0x18c] ss:$16 sps:$4 sm:$0xff]   ;;  %v2066_v20 = vld [vmem:[%s2162_s24 + $0x180] ss:$16 sps:$4 sm:$0xff]  }
  0x3e   : > { %1834 = vmatprep.subr.bf16.mxu1 %v1987_v31  ;;  %v2067_v21 = vld [vmem:[%s2162_s24 + $0x188] ss:$16 sps:$4 sm:$0xff]   ;;  %v2068_v22 = vld [vmem:[%s2162_s24 + $0x1a4] ss:$16 sps:$4 sm:$0xff]   ;;  %v2070_v23 = vld [vmem:[%s2162_s24 + $0x1ac] ss:$16 sps:$4 sm:$0xff]  }
  0x3f   : > { %v2072_v24 = vld [vmem:[%s2162_s24 + $0x1a0] ss:$16 sps:$4 sm:$0xff]   ;;  %v2073_v25 = vld [vmem:[%s2162_s24 + $0x1a8] ss:$16 sps:$4 sm:$0xff]   ;;  %v2074_v26 = vld [vmem:[%s2162_s24 + $0x1c4] ss:$16 sps:$4 sm:$0xff]  }
  0x40   : > { %1723 = vmatpush3.bf16.msra.mxu0 %v1988_v32  ;;  %v2076_v27 = vld [vmem:[%s2162_s24 + $0x1cc] ss:$16 sps:$4 sm:$0xff]   ;;  %v2078_v28 = vld [vmem:[%s2162_s24 + $0x1c0] ss:$16 sps:$4 sm:$0xff]   ;;  %v2079_v29 = vld [vmem:[%s2162_s24 + $0x1c8] ss:$16 sps:$4 sm:$0xff]  }
  0x41   : > { %1835 = vmatpush3.bf16.msra.mxu1 %v1989_v33  ;;  %v2080_v30 = vld [vmem:[%s2162_s24 + $0x1e4] ss:$16 sps:$4 sm:$0xff]   ;;  %v2082_v31 = vld [vmem:[%s2162_s24 + $0x1ec] ss:$16 sps:$4 sm:$0xff]   ;;  %v2084_v32 = vld [vmem:[%s2162_s24 + $0x1e0] ss:$16 sps:$4 sm:$0xff]  }
  0x42   : > { %v2085_v33 = vld [vmem:[%s2162_s24 + $0x1e8] ss:$16 sps:$4 sm:$0xff]  }
  0x43   : > { %998 = vmatmul.mubr.bf16.vlgmr.msra.gmra.mrb[0].mxu0 %v1990_v34 }
  0x44   : > { %1159 = vmatmul.mubr.bf16.vlgmr.msra.gmra.mrb[0].mxu1 %v1993_v36  ;;  %1005 = vmatprep.mubr.bf16.mxu0 %v1996_v38 }
  0x45   : > { %1166 = vmatprep.mubr.bf16.mxu1 %v1998_v39 }
  0x4b   : > { %1006 = vmatmul.mubr.bf16.gmra.mrb[4].mxu0 %v2000_v40 }
  0x4c   : > { %1167 = vmatmul.mubr.bf16.gmra.mrb[4].mxu1 %v2001_v41  ;;  %1013 = vmatprep.mubr.bf16.mxu0 %v2002_v42 }
  0x4d   : > { %1174 = vmatprep.mubr.bf16.mxu1 %v2004_v43  ;;  %v293_v43 = vld [vmem:[%s2167_s27] sm:$0xff] }
  0x53   : > { %1014 = vmatmul.mubr.bf16.gmra.mrb[8].mxu0 %v2006_v44 }
  0x54   : > { %1175 = vmatmul.mubr.bf16.gmra.mrb[8].mxu1 %v2007_v45  ;;  %1021 = vmatprep.mubr.bf16.mxu0 %v2008_v46 }
  0x55   : > { %1182 = vmatprep.mubr.bf16.mxu1 %v2010_v47 }
  0x5b   : > { %1022 = vmatmul.mubr.bf16.gmra.mrb[12].mxu0 %v2012_v48  ;;  %v294_v48 = vld [vmem:[%s2167_s27 + $0x8] sm:$0xff] }
  0x5c   : > { %1183 = vmatmul.mubr.bf16.gmra.mrb[12].mxu1 %v2013_v49  ;;  %1029 = vmatprep.mubr.bf16.mxu0 %v2014_v50 }
  0x5d   : > { %1190 = vmatprep.mubr.bf16.mxu1 %v2016_v51 }
  0x63   : > { %1030 = vmatmul.mubr.bf16.gmra.mrb[16].mxu0 %v2018_v52 }
  0x64   : > { %1191 = vmatmul.mubr.bf16.gmra.mrb[16].mxu1 %v2019_v53  ;;  %1037 = vmatprep.mubr.bf16.mxu0 %v2020_v54 }
  0x65   : > { %1198 = vmatprep.mubr.bf16.mxu1 %v2022_v55 }
  0x6b   : > { %1038 = vmatmul.mubr.bf16.gmra.mrb[20].mxu0 %v2024_v56 }
  0x6c   : > { %1199 = vmatmul.mubr.bf16.gmra.mrb[20].mxu1 %v2025_v57  ;;  %1045 = vmatprep.mubr.bf16.mxu0 %v2026_v58 }
  0x6d   : > { %1206 = vmatprep.mubr.bf16.mxu1 %v2028_v59 }
  0x73   : > { %1046 = vmatmul.mubr.bf16.gmra.mrb[24].mxu0 %v2030_v60 }
  0x74   : > { %1207 = vmatmul.mubr.bf16.gmra.mrb[24].mxu1 %v2031_v61  ;;  %1053 = vmatprep.mubr.bf16.mxu0 %v2032_v62 }
  0x75   : > { %1214 = vmatprep.mubr.bf16.mxu1 %v2034_v63 }
  0x7b   : > { %1054 = vmatmul.mubr.bf16.gmra.mrb[28].mxu0 %v2036_v0  ;;  %v295_v0 = vld [vmem:[%s2167_s27 + $0x10] sm:$0xff] }
  0x7c   : > { %1215 = vmatmul.mubr.bf16.gmra.mrb[28].mxu1 %v2037_v1  ;;  %1061 = vmatprep.mubr.bf16.mxu0 %v2038_v2 }
  0x7d   : > { %1222 = vmatprep.mubr.bf16.mxu1 %v2040_v3 }
  0x83   : > { %1062 = vmatmul.mubr.bf16.gmra.mrb[32].mxu0 %v2042_v4 }
  0x84   : > { %1223 = vmatmul.mubr.bf16.gmra.mrb[32].mxu1 %v2043_v5  ;;  %1069 = vmatprep.mubr.bf16.mxu0 %v2044_v6  ;;  %v296_v6 = vld [vmem:[%s2167_s27 + $0x18] sm:$0xff] }
  0x85   : > { %1230 = vmatprep.mubr.bf16.mxu1 %v2046_v7 }
  0x8b   : > { %1070 = vmatmul.mubr.bf16.gmra.mrb[36].mxu0 %v2048_v8 }
  0x8c   : > { %1231 = vmatmul.mubr.bf16.gmra.mrb[36].mxu1 %v2049_v9  ;;  %1077 = vmatprep.mubr.bf16.mxu0 %v2050_v10 }
  0x8d   : > { %1238 = vmatprep.mubr.bf16.mxu1 %v2052_v11 }
  0x93   : > { %1078 = vmatmul.mubr.bf16.gmra.mrb[40].mxu0 %v2054_v12 }
  0x94   : > { %1239 = vmatmul.mubr.bf16.gmra.mrb[40].mxu1 %v2055_v13  ;;  %1085 = vmatprep.mubr.bf16.mxu0 %v2056_v14 }
  0x95   : > { %1246 = vmatprep.mubr.bf16.mxu1 %v2058_v15 }
  0x9b   : > { %1086 = vmatmul.mubr.bf16.gmra.mrb[44].mxu0 %v2060_v16 }
  0x9c   : > { %1247 = vmatmul.mubr.bf16.gmra.mrb[44].mxu1 %v2061_v17  ;;  %1093 = vmatprep.mubr.bf16.mxu0 %v2062_v18 }
  0x9d   : > { %1254 = vmatprep.mubr.bf16.mxu1 %v2064_v19 }
  0xa3   : > { %1094 = vmatmul.mubr.bf16.gmra.mrb[48].mxu0 %v2066_v20 }
  0xa4   : > { %1255 = vmatmul.mubr.bf16.gmra.mrb[48].mxu1 %v2067_v21  ;;  %1101 = vmatprep.mubr.bf16.mxu0 %v2068_v22 }
  0xa5   : > { %1262 = vmatprep.mubr.bf16.mxu1 %v2070_v23 }
  0xab   : > { %1102 = vmatmul.mubr.bf16.gmra.mrb[52].mxu0 %v2072_v24  ;;  %v297_v24 = vld [vmem:[%s2167_s27 + $0x20] sm:$0xff] }
  0xac   : > { %1263 = vmatmul.mubr.bf16.gmra.mrb[52].mxu1 %v2073_v25  ;;  %1109 = vmatprep.mubr.bf16.mxu0 %v2074_v26 }
  0xad   : > { %1270 = vmatprep.mubr.bf16.mxu1 %v2076_v27 }
  0xb3   : > { %1110 = vmatmul.mubr.bf16.gmra.mrb[56].mxu0 %v2078_v28 }
  0xb4   : > { %1271 = vmatmul.mubr.bf16.gmra.mrb[56].mxu1 %v2079_v29  ;;  %1117 = vmatprep.mubr.bf16.mxu0 %v2080_v30  ;;  %v298_v30 = vld [vmem:[%s2167_s27 + $0x28] sm:$0xff] }
  0xb5   : > { %1278 = vmatprep.mubr.bf16.mxu1 %v2082_v31 }
  0xbb   : > { %1118 = vmatmul.mubr.bf16.gmra.mrb[60].mxu0 %v2084_v32 }
  0xbc   : > { %1279 = vmatmul.mubr.bf16.gmra.mrb[60].mxu1 %v2085_v33 }
 0x116   : > { %v1724_v34 = vpop.f32.mrb[0].mxu0 }
 0x117   : > { %v1836_v35 = vpop.f32.mrb[0].mxu1  ;;  %v1725_v36 = vpop.f32.mrb[1].mxu0 }
 0x118   : > { %v1726_v37 = vadd.f32 %v1725_v36, %v1724_v34  ;;  %v1837_v38 = vpop.f32.mrb[1].mxu1  ;;  %v1727_v39 = vpop.f32.mrb[2].mxu0 }
 0x119   : > { %v1838_v40 = vadd.f32 %v1837_v38, %v1836_v35  ;;  %v1839_v41 = vpop.f32.mrb[2].mxu1  ;;  %v1728_v42 = vpop.f32.mrb[3].mxu0 }
 0x11a   : > { %v1729_v44 = vadd.f32 %v1728_v42, %v1727_v39  ;;  %v1840_v45 = vpop.f32.mrb[3].mxu1 }
 0x11b   : > { %v1161_v46 = vadd.f32 %v1838_v40, %v1726_v37  ;;  %v1841_v47 = vadd.f32 %v1840_v45, %v1839_v41 }
 0x11d   : > { %v1287_v49 = vadd.f32 %v1161_v46, %v293_v43  ;;  %v1164_v50 = vadd.f32 %v1841_v47, %v1729_v44 }
 0x11e   : > { %v1730_v51 = vpop.f32.mrb[4].mxu0 }
 0x11f   : > { %1319 = vst [vmem:[%s2167_s27] sm:$0xff] %v1287_v49  ;;  %v1288_v52 = vadd.f32 %v1164_v50, %v294_v48  ;;  %v1842_v53 = vpop.f32.mrb[4].mxu1  ;;  %v1731_v54 = vpop.f32.mrb[5].mxu0  ;;  %v1427_v58 = vmul.f32 %v1287_v49, %v1287_v49  ;;  %v299_v48 = vld [vmem:[%s2167_s27 + $0x30] sm:$0xff] }
 0x120   : > { %v1732_v55 = vadd.f32 %v1731_v54, %v1730_v51  ;;  %v1843_v56 = vpop.f32.mrb[5].mxu1  ;;  %v1733_v57 = vpop.f32.mrb[6].mxu0  ;;  %v300_v54 = vld [vmem:[%s2167_s27 + $0x38] sm:$0xff] }
 0x121   : > { %1320 = vst [vmem:[%s2167_s27 + $0x8] sm:$0xff] %v1288_v52  ;;  %v1387_v59 = vadd.f32 %v1288_v52, %v1287_v49  ;;  %v1428_v60 = vmul.f32 %v1288_v52, %v1288_v52  ;;  %v1844_v61 = vadd.f32 %v1843_v56, %v1842_v53  ;;  %v1845_v62 = vpop.f32.mrb[6].mxu1  ;;  %v1734_v63 = vpop.f32.mrb[7].mxu0 }
 0x122   : > { %v1735_v1 = vadd.f32 %v1734_v63, %v1733_v57  ;;  %v1846_v2 = vpop.f32.mrb[7].mxu1 }
 0x123   : > { %v1459_v3 = vadd.f32 %v1428_v60, %v1427_v58  ;;  %v1169_v4 = vadd.f32 %v1844_v61, %v1732_v55  ;;  %v1847_v5 = vadd.f32 %v1846_v2, %v1845_v62 }
 0x125   : > { %v1289_v7 = vadd.f32 %v1169_v4, %v295_v0  ;;  %v1172_v8 = vadd.f32 %v1847_v5, %v1735_v1 }
 0x126   : > { %v1736_v9 = vpop.f32.mrb[8].mxu0 }
 0x127   : > { %1321 = vst [vmem:[%s2167_s27 + $0x10] sm:$0xff] %v1289_v7  ;;  %v1388_v10 = vadd.f32 %v1387_v59, %v1289_v7  ;;  %v1429_v11 = vmul.f32 %v1289_v7, %v1289_v7  ;;  %v1290_v12 = vadd.f32 %v1172_v8, %v296_v6  ;;  %v1848_v13 = vpop.f32.mrb[8].mxu1  ;;  %v1737_v14 = vpop.f32.mrb[9].mxu0  ;;  %v301_v8 = vld [vmem:[%s2167_s27 + $0x40] sm:$0xff] }
 0x128   : > { %v1738_v15 = vadd.f32 %v1737_v14, %v1736_v9  ;;  %v1849_v16 = vpop.f32.mrb[9].mxu1  ;;  %v1739_v17 = vpop.f32.mrb[10].mxu0  ;;  %v302_v14 = vld [vmem:[%s2167_s27 + $0x48] sm:$0xff] }
 0x129   : > { %v1460_v18 = vadd.f32 %v1459_v3, %v1429_v11  ;;  %1322 = vst [vmem:[%s2167_s27 + $0x18] sm:$0xff] %v1290_v12  ;;  %v1389_v19 = vadd.f32 %v1388_v10, %v1290_v12  ;;  %v1430_v20 = vmul.f32 %v1290_v12, %v1290_v12  ;;  %v1850_v21 = vadd.f32 %v1849_v16, %v1848_v13  ;;  %v1851_v22 = vpop.f32.mrb[10].mxu1  ;;  %v1740_v23 = vpop.f32.mrb[11].mxu0 }
 0x12a   : > { %v1741_v25 = vadd.f32 %v1740_v23, %v1739_v17  ;;  %v1852_v26 = vpop.f32.mrb[11].mxu1 }
 0x12b   : > { %v1461_v27 = vadd.f32 %v1460_v18, %v1430_v20  ;;  %v1177_v28 = vadd.f32 %v1850_v21, %v1738_v15  ;;  %v1853_v29 = vadd.f32 %v1852_v26, %v1851_v22 }
 0x12d   : > { %v1291_v31 = vadd.f32 %v1177_v28, %v297_v24  ;;  %v1180_v32 = vadd.f32 %v1853_v29, %v1741_v25 }
 0x12e   : > { %v1742_v33 = vpop.f32.mrb[12].mxu0 }
 0x12f   : > { %1323 = vst [vmem:[%s2167_s27 + $0x20] sm:$0xff] %v1291_v31  ;;  %v1390_v34 = vadd.f32 %v1389_v19, %v1291_v31  ;;  %v1431_v35 = vmul.f32 %v1291_v31, %v1291_v31  ;;  %v1292_v36 = vadd.f32 %v1180_v32, %v298_v30  ;;  %v1854_v37 = vpop.f32.mrb[12].mxu1  ;;  %v1743_v38 = vpop.f32.mrb[13].mxu0  ;;  %v303_v32 = vld [vmem:[%s2167_s27 + $0x50] sm:$0xff] }
 0x130   : > { %v1744_v39 = vadd.f32 %v1743_v38, %v1742_v33  ;;  %v1855_v40 = vpop.f32.mrb[13].mxu1  ;;  %v1745_v41 = vpop.f32.mrb[14].mxu0  ;;  %v304_v38 = vld [vmem:[%s2167_s27 + $0x58] sm:$0xff] }
 0x131   : > { %v1462_v42 = vadd.f32 %v1461_v27, %v1431_v35  ;;  %1324 = vst [vmem:[%s2167_s27 + $0x28] sm:$0xff] %v1292_v36  ;;  %v1391_v43 = vadd.f32 %v1390_v34, %v1292_v36  ;;  %v1432_v44 = vmul.f32 %v1292_v36, %v1292_v36  ;;  %v1856_v45 = vadd.f32 %v1855_v40, %v1854_v37  ;;  %v1857_v46 = vpop.f32.mrb[14].mxu1  ;;  %v1746_v47 = vpop.f32.mrb[15].mxu0 }
 0x132   : > { %v1747_v49 = vadd.f32 %v1746_v47, %v1745_v41  ;;  %v1858_v50 = vpop.f32.mrb[15].mxu1 }
 0x133   : > { %v1463_v51 = vadd.f32 %v1462_v42, %v1432_v44  ;;  %v1185_v52 = vadd.f32 %v1856_v45, %v1744_v39  ;;  %v1859_v53 = vadd.f32 %v1858_v50, %v1857_v46 }
 0x135   : > { %v1293_v55 = vadd.f32 %v1185_v52, %v299_v48  ;;  %v1188_v56 = vadd.f32 %v1859_v53, %v1747_v49 }
 0x136   : > { %v1748_v57 = vpop.f32.mrb[16].mxu0 }
 0x137   : > { %1325 = vst [vmem:[%s2167_s27 + $0x30] sm:$0xff] %v1293_v55  ;;  %v1392_v58 = vadd.f32 %v1391_v43, %v1293_v55  ;;  %v1433_v59 = vmul.f32 %v1293_v55, %v1293_v55  ;;  %v1294_v60 = vadd.f32 %v1188_v56, %v300_v54  ;;  %v1860_v61 = vpop.f32.mrb[16].mxu1  ;;  %v1749_v62 = vpop.f32.mrb[17].mxu0  ;;  %v305_v56 = vld [vmem:[%s2167_s27 + $0x60] sm:$0xff] }
 0x138   : > { %v1750_v63 = vadd.f32 %v1749_v62, %v1748_v57  ;;  %v1861_v0 = vpop.f32.mrb[17].mxu1  ;;  %v1751_v1 = vpop.f32.mrb[18].mxu0  ;;  %v306_v62 = vld [vmem:[%s2167_s27 + $0x68] sm:$0xff] }
 0x139   : > { %v1464_v2 = vadd.f32 %v1463_v51, %v1433_v59  ;;  %1326 = vst [vmem:[%s2167_s27 + $0x38] sm:$0xff] %v1294_v60  ;;  %v1393_v3 = vadd.f32 %v1392_v58, %v1294_v60  ;;  %v1434_v4 = vmul.f32 %v1294_v60, %v1294_v60  ;;  %v1862_v5 = vadd.f32 %v1861_v0, %v1860_v61  ;;  %v1863_v6 = vpop.f32.mrb[18].mxu1  ;;  %v1752_v7 = vpop.f32.mrb[19].mxu0 }
 0x13a   : > { %v1753_v9 = vadd.f32 %v1752_v7, %v1751_v1  ;;  %v1864_v10 = vpop.f32.mrb[19].mxu1 }
 0x13b   : > { %v1465_v11 = vadd.f32 %v1464_v2, %v1434_v4  ;;  %v1193_v12 = vadd.f32 %v1862_v5, %v1750_v63  ;;  %v1865_v13 = vadd.f32 %v1864_v10, %v1863_v6 }
 0x13d   : > { %v1295_v15 = vadd.f32 %v1193_v12, %v301_v8  ;;  %v1196_v16 = vadd.f32 %v1865_v13, %v1753_v9 }
 0x13e   : > { %v1754_v17 = vpop.f32.mrb[20].mxu0 }
 0x13f   : > { %1327 = vst [vmem:[%s2167_s27 + $0x40] sm:$0xff] %v1295_v15  ;;  %v1394_v18 = vadd.f32 %v1393_v3, %v1295_v15  ;;  %v1435_v19 = vmul.f32 %v1295_v15, %v1295_v15  ;;  %v1296_v20 = vadd.f32 %v1196_v16, %v302_v14  ;;  %v1866_v21 = vpop.f32.mrb[20].mxu1  ;;  %v1755_v22 = vpop.f32.mrb[21].mxu0  ;;  %v307_v16 = vld [vmem:[%s2167_s27 + $0x70] sm:$0xff] }
 0x140   : > { %v1756_v23 = vadd.f32 %v1755_v22, %v1754_v17  ;;  %v1867_v24 = vpop.f32.mrb[21].mxu1  ;;  %v1757_v25 = vpop.f32.mrb[22].mxu0  ;;  %v308_v22 = vld [vmem:[%s2167_s27 + $0x78] sm:$0xff] }
 0x141   : > { %v1466_v26 = vadd.f32 %v1465_v11, %v1435_v19  ;;  %1328 = vst [vmem:[%s2167_s27 + $0x48] sm:$0xff] %v1296_v20  ;;  %v1395_v27 = vadd.f32 %v1394_v18, %v1296_v20  ;;  %v1436_v28 = vmul.f32 %v1296_v20, %v1296_v20  ;;  %v1868_v29 = vadd.f32 %v1867_v24, %v1866_v21  ;;  %v1869_v30 = vpop.f32.mrb[22].mxu1  ;;  %v1758_v31 = vpop.f32.mrb[23].mxu0 }
 0x142   : > { %v1759_v33 = vadd.f32 %v1758_v31, %v1757_v25  ;;  %v1870_v34 = vpop.f32.mrb[23].mxu1 }
 0x143   : > { %v1467_v35 = vadd.f32 %v1466_v26, %v1436_v28  ;;  %v1201_v36 = vadd.f32 %v1868_v29, %v1756_v23  ;;  %v1871_v37 = vadd.f32 %v1870_v34, %v1869_v30 }
 0x145   : > { %v1297_v39 = vadd.f32 %v1201_v36, %v303_v32  ;;  %v1204_v40 = vadd.f32 %v1871_v37, %v1759_v33 }
 0x146   : > { %v1760_v41 = vpop.f32.mrb[24].mxu0 }
 0x147   : > { %1329 = vst [vmem:[%s2167_s27 + $0x50] sm:$0xff] %v1297_v39  ;;  %v1396_v42 = vadd.f32 %v1395_v27, %v1297_v39  ;;  %v1437_v43 = vmul.f32 %v1297_v39, %v1297_v39  ;;  %v1298_v44 = vadd.f32 %v1204_v40, %v304_v38  ;;  %v1872_v45 = vpop.f32.mrb[24].mxu1  ;;  %v1761_v46 = vpop.f32.mrb[25].mxu0  ;;  %v309_v40 = vld [vmem:[%s2167_s27 + $0x80] sm:$0xff] }
 0x148   : > { %v1762_v47 = vadd.f32 %v1761_v46, %v1760_v41  ;;  %v1873_v48 = vpop.f32.mrb[25].mxu1  ;;  %v1763_v49 = vpop.f32.mrb[26].mxu0  ;;  %v310_v46 = vld [vmem:[%s2167_s27 + $0x88] sm:$0xff] }
 0x149   : > { %v1468_v50 = vadd.f32 %v1467_v35, %v1437_v43  ;;  %1330 = vst [vmem:[%s2167_s27 + $0x58] sm:$0xff] %v1298_v44  ;;  %v1397_v51 = vadd.f32 %v1396_v42, %v1298_v44  ;;  %v1438_v52 = vmul.f32 %v1298_v44, %v1298_v44  ;;  %v1874_v53 = vadd.f32 %v1873_v48, %v1872_v45  ;;  %v1875_v54 = vpop.f32.mrb[26].mxu1  ;;  %v1764_v55 = vpop.f32.mrb[27].mxu0 }
 0x14a   : > { %v1765_v57 = vadd.f32 %v1764_v55, %v1763_v49  ;;  %v1876_v58 = vpop.f32.mrb[27].mxu1 }
 0x14b   : > { %v1469_v59 = vadd.f32 %v1468_v50, %v1438_v52  ;;  %v1209_v60 = vadd.f32 %v1874_v53, %v1762_v47  ;;  %v1877_v61 = vadd.f32 %v1876_v58, %v1875_v54 }
 0x14d   : > { %v1299_v63 = vadd.f32 %v1209_v60, %v305_v56  ;;  %v1212_v0 = vadd.f32 %v1877_v61, %v1765_v57 }
 0x14e   : > { %v1766_v1 = vpop.f32.mrb[28].mxu0 }
 0x14f   : > { %1331 = vst [vmem:[%s2167_s27 + $0x60] sm:$0xff] %v1299_v63  ;;  %v1398_v2 = vadd.f32 %v1397_v51, %v1299_v63  ;;  %v1439_v3 = vmul.f32 %v1299_v63, %v1299_v63  ;;  %v1300_v4 = vadd.f32 %v1212_v0, %v306_v62  ;;  %v1878_v5 = vpop.f32.mrb[28].mxu1  ;;  %v1767_v6 = vpop.f32.mrb[29].mxu0  ;;  %v311_v0 = vld [vmem:[%s2167_s27 + $0x90] sm:$0xff] }
 0x150   : > { %v1768_v7 = vadd.f32 %v1767_v6, %v1766_v1  ;;  %v1879_v8 = vpop.f32.mrb[29].mxu1  ;;  %v1769_v9 = vpop.f32.mrb[30].mxu0  ;;  %v312_v6 = vld [vmem:[%s2167_s27 + $0x98] sm:$0xff] }
 0x151   : > { %v1470_v10 = vadd.f32 %v1469_v59, %v1439_v3  ;;  %1332 = vst [vmem:[%s2167_s27 + $0x68] sm:$0xff] %v1300_v4  ;;  %v1399_v11 = vadd.f32 %v1398_v2, %v1300_v4  ;;  %v1440_v12 = vmul.f32 %v1300_v4, %v1300_v4  ;;  %v1880_v13 = vadd.f32 %v1879_v8, %v1878_v5  ;;  %v1881_v14 = vpop.f32.mrb[30].mxu1  ;;  %v1770_v15 = vpop.f32.mrb[31].mxu0 }
 0x152   : > { %v1771_v17 = vadd.f32 %v1770_v15, %v1769_v9  ;;  %v1882_v18 = vpop.f32.mrb[31].mxu1 }
 0x153   : > { %v1471_v19 = vadd.f32 %v1470_v10, %v1440_v12  ;;  %v1217_v20 = vadd.f32 %v1880_v13, %v1768_v7  ;;  %v1883_v21 = vadd.f32 %v1882_v18, %v1881_v14 }
 0x155   : > { %v1301_v23 = vadd.f32 %v1217_v20, %v307_v16  ;;  %v1220_v24 = vadd.f32 %v1883_v21, %v1771_v17 }
 0x156   : > { %v1772_v25 = vpop.f32.mrb[32].mxu0 }
 0x157   : > { %1333 = vst [vmem:[%s2167_s27 + $0x70] sm:$0xff] %v1301_v23  ;;  %v1400_v26 = vadd.f32 %v1399_v11, %v1301_v23  ;;  %v1441_v27 = vmul.f32 %v1301_v23, %v1301_v23  ;;  %v1302_v28 = vadd.f32 %v1220_v24, %v308_v22  ;;  %v1884_v29 = vpop.f32.mrb[32].mxu1  ;;  %v1773_v30 = vpop.f32.mrb[33].mxu0  ;;  %v313_v24 = vld [vmem:[%s2167_s27 + $0xa0] sm:$0xff] }
 0x158   : > { %v1774_v31 = vadd.f32 %v1773_v30, %v1772_v25  ;;  %v1885_v32 = vpop.f32.mrb[33].mxu1  ;;  %v1775_v33 = vpop.f32.mrb[34].mxu0  ;;  %v314_v30 = vld [vmem:[%s2167_s27 + $0xa8] sm:$0xff] }
 0x159   : > { %v1472_v34 = vadd.f32 %v1471_v19, %v1441_v27  ;;  %1334 = vst [vmem:[%s2167_s27 + $0x78] sm:$0xff] %v1302_v28  ;;  %v1401_v35 = vadd.f32 %v1400_v26, %v1302_v28  ;;  %v1442_v36 = vmul.f32 %v1302_v28, %v1302_v28  ;;  %v1886_v37 = vadd.f32 %v1885_v32, %v1884_v29  ;;  %v1887_v38 = vpop.f32.mrb[34].mxu1  ;;  %v1776_v39 = vpop.f32.mrb[35].mxu0 }
 0x15a   : > { %v1777_v41 = vadd.f32 %v1776_v39, %v1775_v33  ;;  %v1888_v42 = vpop.f32.mrb[35].mxu1 }
 0x15b   : > { %v1473_v43 = vadd.f32 %v1472_v34, %v1442_v36  ;;  %v1225_v44 = vadd.f32 %v1886_v37, %v1774_v31  ;;  %v1889_v45 = vadd.f32 %v1888_v42, %v1887_v38 }
 0x15d   : > { %v1303_v47 = vadd.f32 %v1225_v44, %v309_v40  ;;  %v1228_v48 = vadd.f32 %v1889_v45, %v1777_v41 }
 0x15e   : > { %v1778_v49 = vpop.f32.mrb[36].mxu0 }
 0x15f   : > { %1335 = vst [vmem:[%s2167_s27 + $0x80] sm:$0xff] %v1303_v47  ;;  %v1402_v50 = vadd.f32 %v1401_v35, %v1303_v47  ;;  %v1443_v51 = vmul.f32 %v1303_v47, %v1303_v47  ;;  %v1304_v52 = vadd.f32 %v1228_v48, %v310_v46  ;;  %v1890_v53 = vpop.f32.mrb[36].mxu1  ;;  %v1779_v54 = vpop.f32.mrb[37].mxu0  ;;  %v315_v48 = vld [vmem:[%s2167_s27 + $0xb0] sm:$0xff] }
 0x160   : > { %v1780_v55 = vadd.f32 %v1779_v54, %v1778_v49  ;;  %v1891_v56 = vpop.f32.mrb[37].mxu1  ;;  %v1781_v57 = vpop.f32.mrb[38].mxu0  ;;  %v316_v54 = vld [vmem:[%s2167_s27 + $0xb8] sm:$0xff] }
 0x161   : > { %v1474_v58 = vadd.f32 %v1473_v43, %v1443_v51  ;;  %1336 = vst [vmem:[%s2167_s27 + $0x88] sm:$0xff] %v1304_v52  ;;  %v1403_v59 = vadd.f32 %v1402_v50, %v1304_v52  ;;  %v1444_v60 = vmul.f32 %v1304_v52, %v1304_v52  ;;  %v1892_v61 = vadd.f32 %v1891_v56, %v1890_v53  ;;  %v1893_v62 = vpop.f32.mrb[38].mxu1  ;;  %v1782_v63 = vpop.f32.mrb[39].mxu0 }
 0x162   : > { %v1783_v1 = vadd.f32 %v1782_v63, %v1781_v57  ;;  %v1894_v2 = vpop.f32.mrb[39].mxu1 }
 0x163   : > { %v1475_v3 = vadd.f32 %v1474_v58, %v1444_v60  ;;  %v1233_v4 = vadd.f32 %v1892_v61, %v1780_v55  ;;  %v1895_v5 = vadd.f32 %v1894_v2, %v1893_v62 }
 0x165   : > { %v1305_v7 = vadd.f32 %v1233_v4, %v311_v0  ;;  %v1236_v8 = vadd.f32 %v1895_v5, %v1783_v1 }
 0x166   : > { %v1784_v9 = vpop.f32.mrb[40].mxu0 }
 0x167   : > { %1337 = vst [vmem:[%s2167_s27 + $0x90] sm:$0xff] %v1305_v7  ;;  %v1404_v10 = vadd.f32 %v1403_v59, %v1305_v7  ;;  %v1445_v11 = vmul.f32 %v1305_v7, %v1305_v7  ;;  %v1306_v12 = vadd.f32 %v1236_v8, %v312_v6  ;;  %v1896_v13 = vpop.f32.mrb[40].mxu1  ;;  %v1785_v14 = vpop.f32.mrb[41].mxu0  ;;  %v317_v8 = vld [vmem:[%s2167_s27 + $0xc0] sm:$0xff] }
 0x168   : > { %v1786_v15 = vadd.f32 %v1785_v14, %v1784_v9  ;;  %v1897_v16 = vpop.f32.mrb[41].mxu1  ;;  %v1787_v17 = vpop.f32.mrb[42].mxu0  ;;  %v318_v14 = vld [vmem:[%s2167_s27 + $0xc8] sm:$0xff] }
 0x169   : > { %v1476_v18 = vadd.f32 %v1475_v3, %v1445_v11  ;;  %1338 = vst [vmem:[%s2167_s27 + $0x98] sm:$0xff] %v1306_v12  ;;  %v1405_v19 = vadd.f32 %v1404_v10, %v1306_v12  ;;  %v1446_v20 = vmul.f32 %v1306_v12, %v1306_v12  ;;  %v1898_v21 = vadd.f32 %v1897_v16, %v1896_v13  ;;  %v1899_v22 = vpop.f32.mrb[42].mxu1  ;;  %v1788_v23 = vpop.f32.mrb[43].mxu0 }
 0x16a   : > { %v1789_v25 = vadd.f32 %v1788_v23, %v1787_v17  ;;  %v1900_v26 = vpop.f32.mrb[43].mxu1 }
 0x16b   : > { %v1477_v27 = vadd.f32 %v1476_v18, %v1446_v20  ;;  %v1241_v28 = vadd.f32 %v1898_v21, %v1786_v15  ;;  %v1901_v29 = vadd.f32 %v1900_v26, %v1899_v22 }
 0x16d   : > { %v1307_v31 = vadd.f32 %v1241_v28, %v313_v24  ;;  %v1244_v32 = vadd.f32 %v1901_v29, %v1789_v25 }
 0x16e   : > { %v1790_v33 = vpop.f32.mrb[44].mxu0 }
 0x16f   : > { %1339 = vst [vmem:[%s2167_s27 + $0xa0] sm:$0xff] %v1307_v31  ;;  %v1406_v34 = vadd.f32 %v1405_v19, %v1307_v31  ;;  %v1447_v35 = vmul.f32 %v1307_v31, %v1307_v31  ;;  %v1308_v36 = vadd.f32 %v1244_v32, %v314_v30  ;;  %v1902_v37 = vpop.f32.mrb[44].mxu1  ;;  %v1791_v38 = vpop.f32.mrb[45].mxu0  ;;  %v319_v32 = vld [vmem:[%s2167_s27 + $0xd0] sm:$0xff] }
 0x170   : > { %v1792_v39 = vadd.f32 %v1791_v38, %v1790_v33  ;;  %v1903_v40 = vpop.f32.mrb[45].mxu1  ;;  %v1793_v41 = vpop.f32.mrb[46].mxu0  ;;  %v320_v38 = vld [vmem:[%s2167_s27 + $0xd8] sm:$0xff] }
 0x171   : > { %v1478_v42 = vadd.f32 %v1477_v27, %v1447_v35  ;;  %1340 = vst [vmem:[%s2167_s27 + $0xa8] sm:$0xff] %v1308_v36  ;;  %v1407_v43 = vadd.f32 %v1406_v34, %v1308_v36  ;;  %v1448_v44 = vmul.f32 %v1308_v36, %v1308_v36  ;;  %v1904_v45 = vadd.f32 %v1903_v40, %v1902_v37  ;;  %v1905_v46 = vpop.f32.mrb[46].mxu1  ;;  %v1794_v47 = vpop.f32.mrb[47].mxu0 }
 0x172   : > { %v1795_v49 = vadd.f32 %v1794_v47, %v1793_v41  ;;  %v1906_v50 = vpop.f32.mrb[47].mxu1 }
 0x173   : > { %v1479_v51 = vadd.f32 %v1478_v42, %v1448_v44  ;;  %v1249_v52 = vadd.f32 %v1904_v45, %v1792_v39  ;;  %v1907_v53 = vadd.f32 %v1906_v50, %v1905_v46 }
 0x175   : > { %v1309_v55 = vadd.f32 %v1249_v52, %v315_v48  ;;  %v1252_v56 = vadd.f32 %v1907_v53, %v1795_v49 }
 0x176   : > { %v1796_v57 = vpop.f32.mrb[48].mxu0 }
 0x177   : > { %1341 = vst [vmem:[%s2167_s27 + $0xb0] sm:$0xff] %v1309_v55  ;;  %v1408_v58 = vadd.f32 %v1407_v43, %v1309_v55  ;;  %v1449_v59 = vmul.f32 %v1309_v55, %v1309_v55  ;;  %v1310_v60 = vadd.f32 %v1252_v56, %v316_v54  ;;  %v1908_v61 = vpop.f32.mrb[48].mxu1  ;;  %v1797_v62 = vpop.f32.mrb[49].mxu0  ;;  %v321_v56 = vld [vmem:[%s2167_s27 + $0xe0] sm:$0xff] }
 0x178   : > { %v1798_v63 = vadd.f32 %v1797_v62, %v1796_v57  ;;  %v1909_v0 = vpop.f32.mrb[49].mxu1  ;;  %v1799_v1 = vpop.f32.mrb[50].mxu0  ;;  %v322_v62 = vld [vmem:[%s2167_s27 + $0xe8] sm:$0xff] }
 0x179   : > { %v1480_v2 = vadd.f32 %v1479_v51, %v1449_v59  ;;  %1342 = vst [vmem:[%s2167_s27 + $0xb8] sm:$0xff] %v1310_v60  ;;  %v1409_v3 = vadd.f32 %v1408_v58, %v1310_v60  ;;  %v1450_v4 = vmul.f32 %v1310_v60, %v1310_v60  ;;  %v1910_v5 = vadd.f32 %v1909_v0, %v1908_v61  ;;  %v1911_v6 = vpop.f32.mrb[50].mxu1  ;;  %v1800_v7 = vpop.f32.mrb[51].mxu0 }
 0x17a   : > { %v1801_v9 = vadd.f32 %v1800_v7, %v1799_v1  ;;  %v1912_v10 = vpop.f32.mrb[51].mxu1 }
 0x17b   : > { %v1481_v11 = vadd.f32 %v1480_v2, %v1450_v4  ;;  %v1257_v12 = vadd.f32 %v1910_v5, %v1798_v63  ;;  %v1913_v13 = vadd.f32 %v1912_v10, %v1911_v6 }
 0x17d   : > { %v1311_v15 = vadd.f32 %v1257_v12, %v317_v8  ;;  %v1260_v16 = vadd.f32 %v1913_v13, %v1801_v9 }
 0x17e   : > { %v1802_v17 = vpop.f32.mrb[52].mxu0 }
 0x17f   : > { %1343 = vst [vmem:[%s2167_s27 + $0xc0] sm:$0xff] %v1311_v15  ;;  %v1410_v18 = vadd.f32 %v1409_v3, %v1311_v15  ;;  %v1451_v19 = vmul.f32 %v1311_v15, %v1311_v15  ;;  %v1312_v20 = vadd.f32 %v1260_v16, %v318_v14  ;;  %v1914_v21 = vpop.f32.mrb[52].mxu1  ;;  %v1803_v22 = vpop.f32.mrb[53].mxu0  ;;  %v323_v16 = vld [vmem:[%s2167_s27 + $0xf0] sm:$0xff] }
 0x180   : > { %v1804_v23 = vadd.f32 %v1803_v22, %v1802_v17  ;;  %v1915_v24 = vpop.f32.mrb[53].mxu1  ;;  %v1805_v25 = vpop.f32.mrb[54].mxu0  ;;  %v324_v22 = vld [vmem:[%s2167_s27 + $0xf8] sm:$0xff] }
 0x181   : > { %v1482_v26 = vadd.f32 %v1481_v11, %v1451_v19  ;;  %1344 = vst [vmem:[%s2167_s27 + $0xc8] sm:$0xff] %v1312_v20  ;;  %v1411_v27 = vadd.f32 %v1410_v18, %v1312_v20  ;;  %v1452_v28 = vmul.f32 %v1312_v20, %v1312_v20  ;;  %v1916_v29 = vadd.f32 %v1915_v24, %v1914_v21  ;;  %v1917_v30 = vpop.f32.mrb[54].mxu1  ;;  %v1806_v31 = vpop.f32.mrb[55].mxu0 }
 0x182   : > { %v1807_v33 = vadd.f32 %v1806_v31, %v1805_v25  ;;  %v1918_v34 = vpop.f32.mrb[55].mxu1 }
 0x183   : > { %v1483_v35 = vadd.f32 %v1482_v26, %v1452_v28  ;;  %v1265_v36 = vadd.f32 %v1916_v29, %v1804_v23  ;;  %v1919_v37 = vadd.f32 %v1918_v34, %v1917_v30 }
 0x185   : > { %v1313_v39 = vadd.f32 %v1265_v36, %v319_v32  ;;  %v1268_v40 = vadd.f32 %v1919_v37, %v1807_v33 }
 0x186   : > { %v1808_v41 = vpop.f32.mrb[56].mxu0 }
 0x187   : > { %1345 = vst [vmem:[%s2167_s27 + $0xd0] sm:$0xff] %v1313_v39  ;;  %v1412_v42 = vadd.f32 %v1411_v27, %v1313_v39  ;;  %v1453_v43 = vmul.f32 %v1313_v39, %v1313_v39  ;;  %v1314_v44 = vadd.f32 %v1268_v40, %v320_v38  ;;  %v1920_v45 = vpop.f32.mrb[56].mxu1  ;;  %v1809_v46 = vpop.f32.mrb[57].mxu0 }
 0x188   : > { %v1810_v47 = vadd.f32 %v1809_v46, %v1808_v41  ;;  %v1921_v48 = vpop.f32.mrb[57].mxu1  ;;  %v1811_v49 = vpop.f32.mrb[58].mxu0  ;;  %v1386_v41 = vld [vmem:[%s2457_s3] sm:$0x1] }
 0x189   : > { %v1484_v50 = vadd.f32 %v1483_v35, %v1453_v43  ;;  %1346 = vst [vmem:[%s2167_s27 + $0xd8] sm:$0xff] %v1314_v44  ;;  %v1413_v51 = vadd.f32 %v1412_v42, %v1314_v44  ;;  %v1454_v52 = vmul.f32 %v1314_v44, %v1314_v44  ;;  %v1922_v53 = vadd.f32 %v1921_v48, %v1920_v45  ;;  %v1923_v54 = vpop.f32.mrb[58].mxu1  ;;  %v1812_v55 = vpop.f32.mrb[59].mxu0  ;;  %v1426_v44 = vld [vmem:[%s2458_s4] sm:$0x1] }
 0x18a   : > { %v1813_v57 = vadd.f32 %v1812_v55, %v1811_v49  ;;  %v1924_v58 = vpop.f32.mrb[59].mxu1 }
 0x18b   : > { %v1485_v59 = vadd.f32 %v1484_v50, %v1454_v52  ;;  %v1273_v60 = vadd.f32 %v1922_v53, %v1810_v47  ;;  %v1925_v61 = vadd.f32 %v1924_v58, %v1923_v54 }
 0x18d   : > { %v1315_v63 = vadd.f32 %v1273_v60, %v321_v56  ;;  %v1276_v0 = vadd.f32 %v1925_v61, %v1813_v57 }
 0x18e   : > { %v1814_v1 = vpop.f32.mrb[60].mxu0 }
 0x18f   : > { %1347 = vst [vmem:[%s2167_s27 + $0xe0] sm:$0xff] %v1315_v63  ;;  %v1414_v2 = vadd.f32 %v1413_v51, %v1315_v63  ;;  %v1455_v3 = vmul.f32 %v1315_v63, %v1315_v63  ;;  %v1316_v4 = vadd.f32 %v1276_v0, %v322_v62  ;;  %v1926_v5 = vpop.f32.mrb[60].mxu1  ;;  %v1815_v6 = vpop.f32.mrb[61].mxu0 }
 0x190   : > { %v1816_v7 = vadd.f32 %v1815_v6, %v1814_v1  ;;  %v1927_v8 = vpop.f32.mrb[61].mxu1  ;;  %v1817_v9 = vpop.f32.mrb[62].mxu0 }
 0x191   : > { %v1486_v10 = vadd.f32 %v1485_v59, %v1455_v3  ;;  %1348 = vst [vmem:[%s2167_s27 + $0xe8] sm:$0xff] %v1316_v4  ;;  %v1415_v11 = vadd.f32 %v1414_v2, %v1316_v4  ;;  %v1456_v12 = vmul.f32 %v1316_v4, %v1316_v4  ;;  %v1928_v13 = vadd.f32 %v1927_v8, %v1926_v5  ;;  %v1929_v14 = vpop.f32.mrb[62].mxu1  ;;  %v1818_v15 = vpop.f32.mrb[63].mxu0 }
 0x192   : > { %v1819_v17 = vadd.f32 %v1818_v15, %v1817_v9  ;;  %v1930_v18 = vpop.f32.mrb[63].mxu1 }
 0x193   : > { %v1487_v19 = vadd.f32 %v1486_v10, %v1456_v12  ;;  %v1281_v20 = vadd.f32 %v1928_v13, %v1816_v7  ;;  %v1931_v21 = vadd.f32 %v1930_v18, %v1929_v14 }
 0x195   : > { %v1317_v23 = vadd.f32 %v1281_v20, %v323_v16  ;;  %v1284_v24 = vadd.f32 %v1931_v21, %v1819_v17 }
 0x197   : > { %1349 = vst [vmem:[%s2167_s27 + $0xf0] sm:$0xff] %v1317_v23  ;;  %v1416_v25 = vadd.f32 %v1415_v11, %v1317_v23  ;;  %v1457_v26 = vmul.f32 %v1317_v23, %v1317_v23  ;;  %v1318_v27 = vadd.f32 %v1284_v24, %v324_v22 }
 0x199   : > { %v1488_v28 = vadd.f32 %v1487_v19, %v1457_v26  ;;  %1350 = vst [vmem:[%s2167_s27 + $0xf8] sm:$0xff] %v1318_v27  ;;  %v1417_v29 = vadd.f32 %v1416_v25, %v1318_v27  ;;  %v1458_v30 = vmul.f32 %v1318_v27, %v1318_v27 }
 0x19b   : > { %v1418_v31 = vrot.slane %v1417_v29, 4  ;;  %v1489_v32 = vadd.f32 %v1488_v28, %v1458_v30 }
 0x19d   : > { %v1419_v33 = vadd.f32 %v1418_v31, %v1417_v29  ;;  %v1490_v34 = vrot.slane %v1489_v32, 4 }
 0x19f   : > { %v1420_v35 = vrot.slane %v1419_v33, 2  ;;  %v1491_v36 = vadd.f32 %v1490_v34, %v1489_v32 }
 0x1a1   : > { %v1421_v37 = vadd.f32 %v1420_v35, %v1419_v33  ;;  %v1492_v38 = vrot.slane %v1491_v36, 2 }
 0x1a3   : > { %v1422_v39 = vrot.slane %v1421_v37, 1  ;;  %v1493_v40 = vadd.f32 %v1492_v38, %v1491_v36 }
 0x1a5   : > { %v1423_v42 = vadd.f32 %v1422_v39, %v1421_v37  ;;  %v1494_v43 = vrot.slane %v1493_v40, 1 }
 0x1a7   : > { %v1424_v45 = vadd.f32 %v1423_v42, %v1386_v41  ;;  %v1495_v46 = vadd.f32 %v1494_v43, %v1493_v40 }
 0x1a9   : > { %1425 = vst [vmem:[%s2457_s3] sm:$0x1] %v1424_v45  ;;  %v1496_v47 = vadd.f32 %v1495_v46, %v1426_v44 }
 0x1ab   : > { %1497 = vst [vmem:[%s2458_s4] sm:$0x1] %v1496_v47 }
 0x1ac PF: > { %s15_s17 = sadd.s32 1, %s2108_s17   ;;  %s2459_s15 = smov %s2104_s16 }
 0x1ad   : > { %p12_p6 = scmp.ge.s32.totalorder %s15_s17, 4   ;;  %s2460_s16 = smov %s2462_s18 }
 0x1af   :  { %14 = sbr.rel (!%p12_p6) target bundleno = 2 (0x2), region = 89 }

// kernel: unet_hrpxp_forward.91
= control target key start
LH: loop header
LB: loop body
LE: loop exit
PB: predicated region body
PF: predicated region fallthrough
CT: control target
= control target key end

     0   :  { %s2625_s15 = smov 0   ;;  %s2627_s16 = smov 0   ;;  %s3117_s0 = inlined_call_operand.vmem [shape: bf16[512,640], index: 0, kind: input, shape index: {}]   ;;  %s3118_s1 = inlined_call_operand.vmem [shape: bf16[640,128], index: 1, kind: input, shape index: {}]   ;;  %s3119_s2 = inlined_call_operand.vmem [shape: f32[512,128], index: 2, kind: output, shape index: {0}]   ;;  %s3120_s3 = inlined_call_operand.vmem [shape: f32[1,128], index: 3, kind: output, shape index: {1}]   ;;  %s3121_s4 = inlined_call_operand.vmem [shape: f32[1,128], index: 4, kind: output, shape index: {2}]  }
   0x1   :  { %s2629_s17 = smov 0  }
   0x2 LB: > { %s27_s18 = sadd.s32 1, %s2592_s16  ;;  %p1954_p0 = scmp.ge.s32.totalorder %s2596_s17, 1  ;;  %s2596_s17 = sphi %s2629_s17, %s15_s17   ;;  %s2592_s16 = sphi %s2627_s16, %s3123_s16   ;;  %s2588_s15 = sphi %s2625_s15, %s3122_s15  }
   0x3   : > { %p29_p1 = scmp.ge.s32.totalorder %s27_s18, 2  ;;  %p189_p2 = scmp.lt.s32.totalorder %s2596_s17, 3 }
   0x5   : > { %s3125_s18 = smov (%p29_p1, %s27_s18), 0  ;;  %p190_p3 = pnand %p1954_p0, %p189_p2 }
   0x6   : > { %s1955_s19 = sshll.u32 (!%p190_p3), %s2588_s15, 5  ;;  %p286_p4 = scmp.eq.s32.totalorder (!%p190_p3), %s2588_s15, 0  ;;  %v2598_v0 = vmov (!%p190_p3), 0.0  }
   0x7   : > { %193 = sbr.rel (%p190_p3) target bundleno = 461 (0x1cd), region = 28  ;;  %p227_p5 = scmp.lt.s32.totalorder (!%p190_p3), %s1955_s19, 63 }
   0xe   : > { %s3127_s19 = smov (!%p227_p5, %s1955_s19), 63  ;;  %v2599_v1 = vmov (%p286_p4), 0.0  }
   0xf   : > { %s2395_s20 = smul.u32 20, %s3127_s19  ;;  %s1958_s21 = sshll.u32 %s3127_s19, 3  ;;  %291 = vst [vmem:[%s3120_s3] sm:$0x1] (%p286_p4), %v2599_v1  ;;  %292 = vst [vmem:[%s3121_s4] sm:$0x1] (%p286_p4), %v2599_v1 }
  0x10   : > { %s2650_s24 = scalar_lea.vmem %s3119_s2, %s1958_s21 }
  0x11   : > { %s2655_s27 = scalar_lea.vmem %s3117_s0, %s2395_s20  ;;  %254 = vst [vmem:[%s2650_s24] sm:$0xff] %v2598_v0  ;;  %255 = vst [vmem:[%s2650_s24 + $0x8] sm:$0xff] %v2598_v0 }
  0x12   : > { %256 = vst [vmem:[%s2650_s24 + $0x10] sm:$0xff] %v2598_v0  ;;  %257 = vst [vmem:[%s2650_s24 + $0x18] sm:$0xff] %v2598_v0 }
  0x13   : > { %258 = vst [vmem:[%s2650_s24 + $0x20] sm:$0xff] %v2598_v0  ;;  %259 = vst [vmem:[%s2650_s24 + $0x28] sm:$0xff] %v2598_v0 }
  0x14   : > { %260 = vst [vmem:[%s2650_s24 + $0x30] sm:$0xff] %v2598_v0  ;;  %261 = vst [vmem:[%s2650_s24 + $0x38] sm:$0xff] %v2598_v0 }
  0x15   : > { %262 = vst [vmem:[%s2650_s24 + $0x40] sm:$0xff] %v2598_v0  ;;  %263 = vst [vmem:[%s2650_s24 + $0x48] sm:$0xff] %v2598_v0 }
  0x16   : > { %264 = vst [vmem:[%s2650_s24 + $0x50] sm:$0xff] %v2598_v0  ;;  %265 = vst [vmem:[%s2650_s24 + $0x58] sm:$0xff] %v2598_v0 }
  0x17   : > { %266 = vst [vmem:[%s2650_s24 + $0x60] sm:$0xff] %v2598_v0  ;;  %267 = vst [vmem:[%s2650_s24 + $0x68] sm:$0xff] %v2598_v0 }
  0x18   : > { %268 = vst [vmem:[%s2650_s24 + $0x70] sm:$0xff] %v2598_v0  ;;  %269 = vst [vmem:[%s2650_s24 + $0x78] sm:$0xff] %v2598_v0 }
  0x19   : > { %270 = vst [vmem:[%s2650_s24 + $0x80] sm:$0xff] %v2598_v0  ;;  %271 = vst [vmem:[%s2650_s24 + $0x88] sm:$0xff] %v2598_v0 }
  0x1a   : > { %272 = vst [vmem:[%s2650_s24 + $0x90] sm:$0xff] %v2598_v0  ;;  %273 = vst [vmem:[%s2650_s24 + $0x98] sm:$0xff] %v2598_v0  ;;  %290 = sbr.rel (!%p286_p4) target bundleno = 33 (0x21), region = 36 }
  0x1b   : > { %274 = vst [vmem:[%s2650_s24 + $0xa0] sm:$0xff] %v2598_v0  ;;  %275 = vst [vmem:[%s2650_s24 + $0xa8] sm:$0xff] %v2598_v0 }
  0x1c   : > { %276 = vst [vmem:[%s2650_s24 + $0xb0] sm:$0xff] %v2598_v0  ;;  %277 = vst [vmem:[%s2650_s24 + $0xb8] sm:$0xff] %v2598_v0 }
  0x1d   : > { %278 = vst [vmem:[%s2650_s24 + $0xc0] sm:$0xff] %v2598_v0  ;;  %279 = vst [vmem:[%s2650_s24 + $0xc8] sm:$0xff] %v2598_v0 }
  0x1e   : > { %280 = vst [vmem:[%s2650_s24 + $0xd0] sm:$0xff] %v2598_v0  ;;  %281 = vst [vmem:[%s2650_s24 + $0xd8] sm:$0xff] %v2598_v0 }
  0x1f   : > { %282 = vst [vmem:[%s2650_s24 + $0xe0] sm:$0xff] %v2598_v0  ;;  %283 = vst [vmem:[%s2650_s24 + $0xe8] sm:$0xff] %v2598_v0 }
  0x20   : > { %284 = vst [vmem:[%s2650_s24 + $0xf0] sm:$0xff] %v2598_v0  ;;  %285 = vst [vmem:[%s2650_s24 + $0xf8] sm:$0xff] %v2598_v0 }
  0x21 PF: > { %v2422_v2 = vld [vmem:[%s3118_s1 + $0x40] sm:$0xff]   ;;  %v2424_v4 = vld [vmem:[%s3118_s1 + $0x48] sm:$0xff]   ;;  %v2426_v6 = vld [vmem:[%s3118_s1 + $0x50] sm:$0xff]  }
  0x22   : > { %v2423_v3 = vld [vmem:[%s3118_s1] sm:$0xff]   ;;  %2083 = vmatprep.subr.bf16.mxu0 %v2422_v2  ;;  %2379 = vmatprep.subr.bf16.mxu1 %v2422_v2  ;;  %v2425_v5 = vld [vmem:[%s3118_s1 + $0x8] sm:$0xff]   ;;  %v2427_v7 = vld [vmem:[%s3118_s1 + $0x10] sm:$0xff]  }
  0x23   : > { %2084 = vmatpush3.bf16.msra.mxu0 %v2423_v3  ;;  %2387 = vmatpush3.bf16.msra.mxu1 %v2423_v3  ;;  %v2428_v8 = vld [vmem:[%s3118_s1 + $0x58] sm:$0xff]   ;;  %v2430_v10 = vld [vmem:[%s3118_s1 + $0x60] sm:$0xff]   ;;  %v2432_v12 = vld [vmem:[%s3118_s1 + $0x68] sm:$0xff]  }
  0x24   : > { %2085 = vmatprep.subr.bf16.mxu0 %v2424_v4  ;;  %2380 = vmatprep.subr.bf16.mxu1 %v2424_v4  ;;  %v2429_v9 = vld [vmem:[%s3118_s1 + $0x18] sm:$0xff]   ;;  %v2431_v11 = vld [vmem:[%s3118_s1 + $0x20] sm:$0xff]   ;;  %v2433_v15 = vld [vmem:[%s3118_s1 + $0x28] sm:$0xff]  }
  0x25   : > { %v2440_v13 = vld [vmem:[%s2655_s27 + $0x4] ss:$20 sps:$4 sm:$0xff]   ;;  %v2434_v16 = vld [vmem:[%s3118_s1 + $0x70] sm:$0xff]   ;;  %v2447_v25 = vld [vmem:[%s3118_s1 + $0xc8] sm:$0xff]  }
  0x26   : > { %v2443_v14 = vld [vmem:[%s2655_s27 + $0x1e4] ss:$20 sps:$4 sm:$0xff]   ;;  %1189 = vmatprep.mubr.bf16.mxu0 %v2440_v13  ;;  %v2435_v17 = vld [vmem:[%s3118_s1 + $0x30] sm:$0xff]   ;;  %v2449_v26 = vld [vmem:[%s2655_s27 + $0x2c] ss:$20 sps:$4 sm:$0xff]  }
  0x27   : > { %2086 = vmatpush3.bf16.msra.mxu0 %v2425_v5  ;;  %2388 = vmatpush3.bf16.msra.mxu1 %v2425_v5  ;;  %v2436_v18 = vld [vmem:[%s3118_s1 + $0x78] sm:$0xff]   ;;  %v2444_v20 = vld [vmem:[%s3118_s1 + $0xc0] sm:$0xff]   ;;  %v2458_v28 = vld [vmem:[%s3118_s1 + $0x108] sm:$0xff]  }
  0x28   : > { %2087 = vmatprep.subr.bf16.mxu0 %v2426_v6  ;;  %2381 = vmatprep.subr.bf16.mxu1 %v2426_v6  ;;  %v2437_v19 = vld [vmem:[%s3118_s1 + $0x38] sm:$0xff]   ;;  %v2438_v21 = vld [vmem:[%s2655_s27] ss:$20 sps:$4 sm:$0xff]   ;;  %v2448_v29 = vld [vmem:[%s3118_s1 + $0x88] sm:$0xff]  }
  0x29   : > { %1285 = vmatprep.mubr.bf16.mxu1 %v2443_v14  ;;  %v2445_v22 = vld [vmem:[%s3118_s1 + $0x100] sm:$0xff]   ;;  %v2453_v30 = vld [vmem:[%s2655_s27 + $0x28] ss:$20 sps:$4 sm:$0xff]   ;;  %v2455_v31 = vld [vmem:[%s3118_s1 + $0xd0] sm:$0xff]  }
  0x2a   : > { %v2441_v23 = vld [vmem:[%s2655_s27 + $0x1e0] ss:$20 sps:$4 sm:$0xff]   ;;  %v2454_v32 = vld [vmem:[%s2655_s27 + $0x208] ss:$20 sps:$4 sm:$0xff]   ;;  %v2464_v39 = vld [vmem:[%s2655_s27 + $0x50] ss:$20 sps:$4 sm:$0xff]  }
  0x2b   : > { %2088 = vmatpush3.bf16.msra.mxu0 %v2427_v7  ;;  %2389 = vmatpush3.bf16.msra.mxu1 %v2427_v7  ;;  %v2446_v24 = vld [vmem:[%s3118_s1 + $0x80] sm:$0xff]   ;;  %v2456_v33 = vld [vmem:[%s3118_s1 + $0x90] sm:$0xff]   ;;  %v2457_v35 = vld [vmem:[%s3118_s1 + $0xd8] sm:$0xff]  }
  0x2c   : > { %2089 = vmatprep.subr.bf16.mxu0 %v2428_v8  ;;  %2382 = vmatprep.subr.bf16.mxu1 %v2428_v8  ;;  %v2451_v27 = vld [vmem:[%s2655_s27 + $0x20c] ss:$20 sps:$4 sm:$0xff]   ;;  %v2460_v34 = vld [vmem:[%s2655_s27 + $0x54] ss:$20 sps:$4 sm:$0xff]   ;;  %v2459_v38 = vld [vmem:[%s3118_s1 + $0x98] sm:$0xff]  }
  0x2d   : > { %v2462_v36 = vld [vmem:[%s2655_s27 + $0x234] ss:$20 sps:$4 sm:$0xff]   ;;  %v2466_v40 = vld [vmem:[%s3118_s1 + $0xe0] sm:$0xff]   ;;  %v2470_v44 = vld [vmem:[%s2655_s27 + $0x7c] ss:$20 sps:$4 sm:$0xff]  }
  0x2e   : > { %v2477_v37 = vld [vmem:[%s3118_s1 + $0x110] sm:$0xff]   ;;  %v2467_v42 = vld [vmem:[%s3118_s1 + $0xa0] sm:$0xff]   ;;  %v2468_v43 = vld [vmem:[%s3118_s1 + $0xe8] sm:$0xff]  }
  0x2f   : > { %2090 = vmatpush3.bf16.msra.mxu0 %v2429_v9  ;;  %2390 = vmatpush3.bf16.msra.mxu1 %v2429_v9  ;;  %v2465_v41 = vld [vmem:[%s2655_s27 + $0x230] ss:$20 sps:$4 sm:$0xff]   ;;  %v2487_v46 = vld [vmem:[%s3118_s1 + $0x118] sm:$0xff]   ;;  %v2469_v47 = vld [vmem:[%s3118_s1 + $0xa8] sm:$0xff]  }
  0x30   : > { %2091 = vmatprep.subr.bf16.mxu0 %v2430_v10  ;;  %2383 = vmatprep.subr.bf16.mxu1 %v2430_v10  ;;  %v2472_v45 = vld [vmem:[%s2655_s27 + $0x25c] ss:$20 sps:$4 sm:$0xff]   ;;  %v2474_v48 = vld [vmem:[%s2655_s27 + $0x78] ss:$20 sps:$4 sm:$0xff]   ;;  %v2500_v54 = vld [vmem:[%s3118_s1 + $0x120] sm:$0xff]  }
  0x31   : > { %v2475_v49 = vld [vmem:[%s2655_s27 + $0x258] ss:$20 sps:$4 sm:$0xff]   ;;  %v2476_v50 = vld [vmem:[%s3118_s1 + $0xf0] sm:$0xff]   ;;  %v2483_v58 = vld [vmem:[%s2655_s27 + $0x8] ss:$20 sps:$4 sm:$0xff]  }
  0x32   : > { %v2478_v51 = vld [vmem:[%s3118_s1 + $0xb0] sm:$0xff]   ;;  %v2479_v52 = vld [vmem:[%s3118_s1 + $0xf8] sm:$0xff]   ;;  %v2485_v55 = vld [vmem:[%s2655_s27 + $0xc] ss:$20 sps:$4 sm:$0xff]  }
  0x33   : > { %2092 = vmatpush3.bf16.msra.mxu0 %v2431_v11  ;;  %2391 = vmatpush3.bf16.msra.mxu1 %v2431_v11  ;;  %v2481_v53 = vld [vmem:[%s2655_s27 + $0xa4] ss:$20 sps:$4 sm:$0xff]   ;;  %v2507_v57 = vld [vmem:[%s3118_s1 + $0x128] sm:$0xff]   ;;  %v2486_v59 = vld [vmem:[%s2655_s27 + $0xa0] ss:$20 sps:$4 sm:$0xff]  }
  0x34   : > { %2093 = vmatprep.subr.bf16.mxu0 %v2432_v12  ;;  %2384 = vmatprep.subr.bf16.mxu1 %v2432_v12  ;;  %v2480_v56 = vld [vmem:[%s3118_s1 + $0xb8] sm:$0xff]   ;;  %v2488_v60 = vld [vmem:[%s2655_s27 + $0xcc] ss:$20 sps:$4 sm:$0xff]   ;;  %v2490_v61 = vld [vmem:[%s2655_s27 + $0x34] ss:$20 sps:$4 sm:$0xff]  }
  0x35   : > { %v2520_v62 = vld [vmem:[%s3118_s1 + $0x130] sm:$0xff]   ;;  %v2492_v63 = vld [vmem:[%s2655_s27 + $0xc8] ss:$20 sps:$4 sm:$0xff]   ;;  %v2499_v5 = vld [vmem:[%s2655_s27 + $0x58] ss:$20 sps:$4 sm:$0xff]  }
  0x36   : > { %v2527_v0 = vld [vmem:[%s3118_s1 + $0x138] sm:$0xff]   ;;  %v2493_v1 = vld [vmem:[%s2655_s27 + $0x30] ss:$20 sps:$4 sm:$0xff]   ;;  %v2494_v2 = vld [vmem:[%s2655_s27 + $0xf4] ss:$20 sps:$4 sm:$0xff]  }
  0x37   : > { %2094 = vmatpush3.bf16.msra.mxu0 %v2433_v15  ;;  %2392 = vmatpush3.bf16.msra.mxu1 %v2433_v15  ;;  %v2496_v3 = vld [vmem:[%s2655_s27 + $0x5c] ss:$20 sps:$4 sm:$0xff]   ;;  %v2503_v7 = vld [vmem:[%s2655_s27 + $0x84] ss:$20 sps:$4 sm:$0xff]   ;;  %v2506_v9 = vld [vmem:[%s2655_s27 + $0x80] ss:$20 sps:$4 sm:$0xff]  }
  0x38   : > { %2095 = vmatprep.subr.bf16.mxu0 %v2434_v16  ;;  %2385 = vmatprep.subr.bf16.mxu1 %v2434_v16  ;;  %v2498_v4 = vld [vmem:[%s2655_s27 + $0xf0] ss:$20 sps:$4 sm:$0xff]   ;;  %v2505_v8 = vld [vmem:[%s2655_s27 + $0x118] ss:$20 sps:$4 sm:$0xff]   ;;  %v2512_v12 = vld [vmem:[%s2655_s27 + $0x140] ss:$20 sps:$4 sm:$0xff]  }
  0x39   : > { %v2501_v6 = vld [vmem:[%s2655_s27 + $0x11c] ss:$20 sps:$4 sm:$0xff]   ;;  %v2508_v10 = vld [vmem:[%s2655_s27 + $0x144] ss:$20 sps:$4 sm:$0xff]   ;;  %v2510_v11 = vld [vmem:[%s2655_s27 + $0xac] ss:$20 sps:$4 sm:$0xff]  }
  0x3a   : > { %v2513_v13 = vld [vmem:[%s2655_s27 + $0xa8] ss:$20 sps:$4 sm:$0xff]   ;;  %v2514_v14 = vld [vmem:[%s2655_s27 + $0x16c] ss:$20 sps:$4 sm:$0xff]  }
  0x3b   : > { %2096 = vmatpush3.bf16.msra.mxu0 %v2435_v17  ;;  %2393 = vmatpush3.bf16.msra.mxu1 %v2435_v17  ;;  %v2516_v15 = vld [vmem:[%s2655_s27 + $0xd4] ss:$20 sps:$4 sm:$0xff]   ;;  %v2519_v17 = vld [vmem:[%s2655_s27 + $0xd0] ss:$20 sps:$4 sm:$0xff]  }
  0x3c   : > { %2097 = vmatprep.subr.bf16.mxu0 %v2436_v18  ;;  %2386 = vmatprep.subr.bf16.mxu1 %v2436_v18  ;;  %v2518_v16 = vld [vmem:[%s2655_s27 + $0x168] ss:$20 sps:$4 sm:$0xff]  }
  0x3d   : > { %v2521_v18 = vld [vmem:[%s2655_s27 + $0x194] ss:$20 sps:$4 sm:$0xff]  }
  0x3f   : > { %2098 = vmatpush3.bf16.msra.mxu0 %v2437_v19  ;;  %2394 = vmatpush3.bf16.msra.mxu1 %v2437_v19  ;;  %v2523_v19 = vld [vmem:[%s2655_s27 + $0xfc] ss:$20 sps:$4 sm:$0xff]  }
  0x40   : > { %2195 = vmatprep.subr.bf16.mxu1 %v2444_v20  ;;  %2331 = vmatprep.subr.bf16.mxu0 %v2445_v22  ;;  %v2525_v20 = vld [vmem:[%s2655_s27 + $0x190] ss:$20 sps:$4 sm:$0xff]  }
  0x42   : > { %1190 = vmatmul.mubr.bf16.vlgmr.msra.gmra.mrb[0].mxu0 %v2438_v21  ;;  %1286 = vmatmul.mubr.bf16.vlgmr.msra.gmra.mrb[0].mxu1 %v2441_v23  ;;  %v2526_v21 = vld [vmem:[%s2655_s27 + $0xf8] ss:$20 sps:$4 sm:$0xff]  }
  0x43   : > { %2196 = vmatpush3.bf16.msra.mxu1 %v2446_v24  ;;  %2332 = vmatpush3.bf16.msra.mxu0 %v2445_v22  ;;  %v2528_v22 = vld [vmem:[%s2655_s27 + $0x1bc] ss:$20 sps:$4 sm:$0xff]   ;;  %v2530_v23 = vld [vmem:[%s2655_s27 + $0x124] ss:$20 sps:$4 sm:$0xff]  }
  0x44   : > { %2197 = vmatprep.subr.bf16.mxu1 %v2447_v25  ;;  %1197 = vmatprep.mubr.bf16.mxu0 %v2449_v26  ;;  %v2532_v24 = vld [vmem:[%s2655_s27 + $0x1b8] ss:$20 sps:$4 sm:$0xff]   ;;  %v2533_v25 = vld [vmem:[%s2655_s27 + $0x120] ss:$20 sps:$4 sm:$0xff]  }
  0x45   : > { %1293 = vmatprep.mubr.bf16.mxu1 %v2451_v27  ;;  %2333 = vmatprep.subr.bf16.mxu0 %v2458_v28  ;;  %v2534_v26 = vld [vmem:[%s2655_s27 + $0x14c] ss:$20 sps:$4 sm:$0xff]   ;;  %v2536_v27 = vld [vmem:[%s2655_s27 + $0x10] ss:$20 sps:$4 sm:$0xff]  }
  0x47   : > { %2198 = vmatpush3.bf16.msra.mxu1 %v2448_v29  ;;  %2334 = vmatpush3.bf16.msra.mxu0 %v2458_v28  ;;  %v2537_v28 = vld [vmem:[%s2655_s27 + $0x148] ss:$20 sps:$4 sm:$0xff]   ;;  %v2538_v29 = vld [vmem:[%s2655_s27 + $0x38] ss:$20 sps:$4 sm:$0xff]  }
  0x48   : > { %2199 = vmatprep.subr.bf16.mxu1 %v2455_v31  ;;  %2335 = vmatprep.subr.bf16.mxu0 %v2477_v37  ;;  %v2541_v31 = vld [vmem:[%s2655_s27 + $0x60] ss:$20 sps:$4 sm:$0xff]  }
  0x4a   : > { %1198 = vmatmul.mubr.bf16.gmra.mrb[4].mxu0 %v2453_v30  ;;  %1294 = vmatmul.mubr.bf16.gmra.mrb[4].mxu1 %v2454_v32  ;;  %v2539_v30 = vld [vmem:[%s2655_s27 + $0x174] ss:$20 sps:$4 sm:$0xff]   ;;  %v2542_v32 = vld [vmem:[%s2655_s27 + $0x170] ss:$20 sps:$4 sm:$0xff]  }
  0x4b   : > { %2200 = vmatpush3.bf16.msra.mxu1 %v2456_v33  ;;  %1205 = vmatprep.mubr.bf16.mxu0 %v2460_v34  ;;  %v2543_v33 = vld [vmem:[%s2655_s27 + $0x88] ss:$20 sps:$4 sm:$0xff]  }
  0x4c   : > { %2201 = vmatprep.subr.bf16.mxu1 %v2457_v35  ;;  %1301 = vmatprep.mubr.bf16.mxu1 %v2462_v36  ;;  %v2544_v34 = vld [vmem:[%s2655_s27 + $0x19c] ss:$20 sps:$4 sm:$0xff]   ;;  %v2547_v36 = vld [vmem:[%s2655_s27 + $0x198] ss:$20 sps:$4 sm:$0xff]  }
  0x4d   : > { %2336 = vmatpush3.bf16.msra.mxu0 %v2477_v37  ;;  %v2546_v35 = vld [vmem:[%s2655_s27 + $0xb0] ss:$20 sps:$4 sm:$0xff]   ;;  %v2548_v37 = vld [vmem:[%s2655_s27 + $0xd8] ss:$20 sps:$4 sm:$0xff]  }
  0x4e   : > { %2337 = vmatprep.subr.bf16.mxu0 %v2487_v46 }
  0x4f   : > { %2202 = vmatpush3.bf16.msra.mxu1 %v2459_v38  ;;  %v2549_v38 = vld [vmem:[%s2655_s27 + $0x1c4] ss:$20 sps:$4 sm:$0xff]  }
  0x50   : > { %2203 = vmatprep.subr.bf16.mxu1 %v2466_v40  ;;  %v2552_v40 = vld [vmem:[%s2655_s27 + $0x1c0] ss:$20 sps:$4 sm:$0xff]  }
  0x51   : > { %2338 = vmatpush3.bf16.msra.mxu0 %v2487_v46  ;;  %v2559_v46 = vld [vmem:[%s2655_s27 + $0x214] ss:$20 sps:$4 sm:$0xff]  }
  0x52   : > { %1206 = vmatmul.mubr.bf16.gmra.mrb[8].mxu0 %v2464_v39  ;;  %1302 = vmatmul.mubr.bf16.gmra.mrb[8].mxu1 %v2465_v41  ;;  %v2551_v39 = vld [vmem:[%s2655_s27 + $0x100] ss:$20 sps:$4 sm:$0xff]   ;;  %v2553_v41 = vld [vmem:[%s2655_s27 + $0x128] ss:$20 sps:$4 sm:$0xff]  }
  0x53   : > { %2204 = vmatpush3.bf16.msra.mxu1 %v2467_v42  ;;  %1213 = vmatprep.mubr.bf16.mxu0 %v2470_v44  ;;  %v2554_v42 = vld [vmem:[%s2655_s27 + $0x1ec] ss:$20 sps:$4 sm:$0xff]   ;;  %v2557_v44 = vld [vmem:[%s2655_s27 + $0x1e8] ss:$20 sps:$4 sm:$0xff]  }
  0x54   : > { %2205 = vmatprep.subr.bf16.mxu1 %v2468_v43  ;;  %1309 = vmatprep.mubr.bf16.mxu1 %v2472_v45  ;;  %v2556_v43 = vld [vmem:[%s2655_s27 + $0x150] ss:$20 sps:$4 sm:$0xff]   ;;  %v2558_v45 = vld [vmem:[%s2655_s27 + $0x178] ss:$20 sps:$4 sm:$0xff]  }
  0x55   : > { %2339 = vmatprep.subr.bf16.mxu0 %v2500_v54 }
  0x56   : > { %2340 = vmatpush3.bf16.msra.mxu0 %v2500_v54  ;;  %v2569_v54 = vld [vmem:[%s2655_s27 + $0x264] ss:$20 sps:$4 sm:$0xff]  }
  0x57   : > { %2206 = vmatpush3.bf16.msra.mxu1 %v2469_v47  ;;  %2341 = vmatprep.subr.bf16.mxu0 %v2507_v57  ;;  %v2561_v47 = vld [vmem:[%s2655_s27 + $0x1a0] ss:$20 sps:$4 sm:$0xff]  }
  0x58   : > { %2207 = vmatprep.subr.bf16.mxu1 %v2476_v50  ;;  %v2564_v50 = vld [vmem:[%s2655_s27 + $0x23c] ss:$20 sps:$4 sm:$0xff]  }
  0x5a   : > { %1214 = vmatmul.mubr.bf16.gmra.mrb[12].mxu0 %v2474_v48  ;;  %1310 = vmatmul.mubr.bf16.gmra.mrb[12].mxu1 %v2475_v49  ;;  %v2562_v48 = vld [vmem:[%s2655_s27 + $0x210] ss:$20 sps:$4 sm:$0xff]   ;;  %v2563_v49 = vld [vmem:[%s2655_s27 + $0x1c8] ss:$20 sps:$4 sm:$0xff]  }
  0x5b   : > { %2208 = vmatpush3.bf16.msra.mxu1 %v2478_v51  ;;  %1221 = vmatprep.mubr.bf16.mxu0 %v2481_v53  ;;  %v2566_v51 = vld [vmem:[%s2655_s27 + $0x1f0] ss:$20 sps:$4 sm:$0xff]   ;;  %v2568_v53 = vld [vmem:[%s2655_s27 + $0x218] ss:$20 sps:$4 sm:$0xff]  }
  0x5c   : > { %2209 = vmatprep.subr.bf16.mxu1 %v2479_v52  ;;  %1350 = vmatprep.mubr.bf16.mxu1 %v2485_v55  ;;  %v2567_v52 = vld [vmem:[%s2655_s27 + $0x238] ss:$20 sps:$4 sm:$0xff]   ;;  %v2571_v55 = vld [vmem:[%s2655_s27 + $0x240] ss:$20 sps:$4 sm:$0xff]  }
  0x5d   : > { %2342 = vmatpush3.bf16.msra.mxu0 %v2507_v57  ;;  %v2573_v57 = vld [vmem:[%s2655_s27 + $0x268] ss:$20 sps:$4 sm:$0xff]  }
  0x5e   : > { %2343 = vmatprep.subr.bf16.mxu0 %v2520_v62 }
  0x5f   : > { %2210 = vmatpush3.bf16.msra.mxu1 %v2480_v56  ;;  %v2572_v56 = vld [vmem:[%s2655_s27 + $0x260] ss:$20 sps:$4 sm:$0xff]  }
  0x61   : > { %2344 = vmatpush3.bf16.msra.mxu0 %v2520_v62 }
  0x62   : > { %1222 = vmatmul.mubr.bf16.gmra.mrb[16].mxu0 %v2486_v59  ;;  %1351 = vmatmul.mubr.bf16.vlgmr.msra.gmra.mrb[16].mxu1 %v2483_v58 }
  0x63   : > { %1229 = vmatprep.mubr.bf16.mxu0 %v2488_v60  ;;  %1358 = vmatprep.mubr.bf16.mxu1 %v2490_v61 }
  0x64   : > { %2345 = vmatprep.subr.bf16.mxu0 %v2527_v0 }
  0x65   : > { %2346 = vmatpush3.bf16.msra.mxu0 %v2527_v0 }
  0x6a   : > { %1230 = vmatmul.mubr.bf16.gmra.mrb[20].mxu0 %v2492_v63  ;;  %1359 = vmatmul.mubr.bf16.gmra.mrb[20].mxu1 %v2493_v1 }
  0x6b   : > { %1237 = vmatprep.mubr.bf16.mxu0 %v2494_v2  ;;  %1366 = vmatprep.mubr.bf16.mxu1 %v2496_v3 }
  0x72   : > { %1238 = vmatmul.mubr.bf16.gmra.mrb[24].mxu0 %v2498_v4  ;;  %1367 = vmatmul.mubr.bf16.gmra.mrb[24].mxu1 %v2499_v5 }
  0x73   : > { %1245 = vmatprep.mubr.bf16.mxu0 %v2501_v6  ;;  %1374 = vmatprep.mubr.bf16.mxu1 %v2503_v7 }
  0x7a   : > { %1246 = vmatmul.mubr.bf16.gmra.mrb[28].mxu0 %v2505_v8  ;;  %1375 = vmatmul.mubr.bf16.gmra.mrb[28].mxu1 %v2506_v9 }
  0x7b   : > { %1253 = vmatprep.mubr.bf16.mxu0 %v2508_v10  ;;  %1382 = vmatprep.mubr.bf16.mxu1 %v2510_v11 }
  0x82   : > { %1254 = vmatmul.mubr.bf16.gmra.mrb[32].mxu0 %v2512_v12  ;;  %1383 = vmatmul.mubr.bf16.gmra.mrb[32].mxu1 %v2513_v13 }
  0x83   : > { %1261 = vmatprep.mubr.bf16.mxu0 %v2514_v14  ;;  %1390 = vmatprep.mubr.bf16.mxu1 %v2516_v15 }
  0x8a   : > { %1262 = vmatmul.mubr.bf16.gmra.mrb[36].mxu0 %v2518_v16  ;;  %1391 = vmatmul.mubr.bf16.gmra.mrb[36].mxu1 %v2519_v17 }
  0x8b   : > { %1269 = vmatprep.mubr.bf16.mxu0 %v2521_v18  ;;  %1398 = vmatprep.mubr.bf16.mxu1 %v2523_v19 }
  0x92   : > { %1270 = vmatmul.mubr.bf16.gmra.mrb[40].mxu0 %v2525_v20  ;;  %1399 = vmatmul.mubr.bf16.gmra.mrb[40].mxu1 %v2526_v21 }
  0x93   : > { %1277 = vmatprep.mubr.bf16.mxu0 %v2528_v22  ;;  %1406 = vmatprep.mubr.bf16.mxu1 %v2530_v23 }
  0x9a   : > { %1278 = vmatmul.mubr.bf16.gmra.mrb[44].mxu0 %v2532_v24  ;;  %1407 = vmatmul.mubr.bf16.gmra.mrb[44].mxu1 %v2533_v25 }
  0x9b   : > { %1414 = vmatprep.mubr.bf16.mxu1 %v2534_v26  ;;  %2347 = vmatprep.mubr.bf16.mxu0 %v2536_v27 }
  0xa2   : > { %1415 = vmatmul.mubr.bf16.gmra.mrb[48].mxu1 %v2537_v28  ;;  %2348 = vmatmul.mubr.bf16.vlgmr.msra.gmra.mrb[48].mxu0 %v2538_v29 }
  0xa3   : > { %1422 = vmatprep.mubr.bf16.mxu1 %v2539_v30  ;;  %2351 = vmatprep.mubr.bf16.mxu0 %v2541_v31 }
  0xaa   : > { %1423 = vmatmul.mubr.bf16.gmra.mrb[52].mxu1 %v2542_v32  ;;  %2352 = vmatmul.mubr.bf16.gmra.mrb[52].mxu0 %v2543_v33 }
  0xab   : > { %1430 = vmatprep.mubr.bf16.mxu1 %v2544_v34  ;;  %2355 = vmatprep.mubr.bf16.mxu0 %v2546_v35 }
  0xb2   : > { %1431 = vmatmul.mubr.bf16.gmra.mrb[56].mxu1 %v2547_v36  ;;  %2356 = vmatmul.mubr.bf16.gmra.mrb[56].mxu0 %v2548_v37 }
  0xb3   : > { %1438 = vmatprep.mubr.bf16.mxu1 %v2549_v38  ;;  %2359 = vmatprep.mubr.bf16.mxu0 %v2551_v39 }
  0xba   : > { %1439 = vmatmul.mubr.bf16.gmra.mrb[60].mxu1 %v2552_v40  ;;  %2360 = vmatmul.mubr.bf16.gmra.mrb[60].mxu0 %v2553_v41 }
  0xbb   : > { %1446 = vmatprep.mubr.bf16.mxu1 %v2554_v42  ;;  %2363 = vmatprep.mubr.bf16.mxu0 %v2556_v43 }
  0xc2   : > { %1447 = vmatmul.mubr.bf16.gmra.mrb[64].mxu1 %v2557_v44  ;;  %2364 = vmatmul.mubr.bf16.gmra.mrb[64].mxu0 %v2558_v45 }
  0xc3   : > { %1454 = vmatprep.mubr.bf16.mxu1 %v2559_v46  ;;  %2367 = vmatprep.mubr.bf16.mxu0 %v2561_v47 }
  0xca   : > { %1455 = vmatmul.mubr.bf16.gmra.mrb[68].mxu1 %v2562_v48  ;;  %2368 = vmatmul.mubr.bf16.gmra.mrb[68].mxu0 %v2563_v49 }
  0xcb   : > { %1462 = vmatprep.mubr.bf16.mxu1 %v2564_v50  ;;  %2371 = vmatprep.mubr.bf16.mxu0 %v2566_v51 }
  0xd2   : > { %1463 = vmatmul.mubr.bf16.gmra.mrb[72].mxu1 %v2567_v52  ;;  %2372 = vmatmul.mubr.bf16.gmra.mrb[72].mxu0 %v2568_v53 }
  0xd3   : > { %1470 = vmatprep.mubr.bf16.mxu1 %v2569_v54  ;;  %2375 = vmatprep.mubr.bf16.mxu0 %v2571_v55 }
  0xda   : > { %1471 = vmatmul.mubr.bf16.gmra.mrb[76].mxu1 %v2572_v56  ;;  %2376 = vmatmul.mubr.bf16.gmra.mrb[76].mxu0 %v2573_v57 }
 0x115   : > { %v2099_v58 = vpop.f32.mrb[0].mxu0  ;;  %v2171_v59 = vpop.f32.mrb[0].mxu1 }
 0x116   : > { %v2100_v60 = vpop.f32.mrb[1].mxu0  ;;  %v2172_v61 = vpop.f32.mrb[1].mxu1 }
 0x117   : > { %v2101_v62 = vadd.f32 %v2100_v60, %v2099_v58  ;;  %v2897_v63 = vadd.f32 %v2172_v61, %v2171_v59  ;;  %v2102_v0 = vpop.f32.mrb[2].mxu0  ;;  %v2174_v1 = vpop.f32.mrb[2].mxu1 }
 0x118   : > { %v2103_v2 = vpop.f32.mrb[3].mxu0  ;;  %v2175_v3 = vpop.f32.mrb[3].mxu1 }
 0x119   : > { %v2104_v4 = vadd.f32 %v2103_v2, %v2102_v0  ;;  %v2899_v5 = vadd.f32 %v2175_v3, %v2174_v1 }
 0x11d   : > { %v2105_v6 = vpop.f32.mrb[4].mxu0  ;;  %v2177_v7 = vpop.f32.mrb[4].mxu1 }
 0x11e   : > { %v2106_v8 = vpop.f32.mrb[5].mxu0  ;;  %v2178_v9 = vpop.f32.mrb[5].mxu1 }
 0x11f   : > { %v2107_v10 = vadd.f32 %v2106_v8, %v2105_v6  ;;  %v2901_v11 = vadd.f32 %v2178_v9, %v2177_v7  ;;  %v2108_v12 = vpop.f32.mrb[6].mxu0  ;;  %v2180_v13 = vpop.f32.mrb[6].mxu1 }
 0x120   : > { %v2109_v14 = vpop.f32.mrb[7].mxu0  ;;  %v2181_v15 = vpop.f32.mrb[7].mxu1 }
 0x121   : > { %v2110_v16 = vadd.f32 %v2109_v14, %v2108_v12  ;;  %v2903_v17 = vadd.f32 %v2181_v15, %v2180_v13 }
 0x125   : > { %v2111_v18 = vpop.f32.mrb[8].mxu0  ;;  %v2183_v19 = vpop.f32.mrb[8].mxu1 }
 0x126   : > { %v2112_v20 = vpop.f32.mrb[9].mxu0  ;;  %v2184_v21 = vpop.f32.mrb[9].mxu1 }
 0x127   : > { %v2113_v22 = vadd.f32 %v2112_v20, %v2111_v18  ;;  %v2905_v23 = vadd.f32 %v2184_v21, %v2183_v19  ;;  %v2114_v24 = vpop.f32.mrb[10].mxu0  ;;  %v2186_v25 = vpop.f32.mrb[10].mxu1 }
 0x128   : > { %v2115_v26 = vpop.f32.mrb[11].mxu0  ;;  %v2187_v27 = vpop.f32.mrb[11].mxu1 }
 0x129   : > { %v2116_v28 = vadd.f32 %v2115_v26, %v2114_v24  ;;  %v2907_v29 = vadd.f32 %v2187_v27, %v2186_v25 }
 0x12d   : > { %v2117_v30 = vpop.f32.mrb[12].mxu0  ;;  %v2189_v31 = vpop.f32.mrb[12].mxu1 }
 0x12e   : > { %v2118_v32 = vpop.f32.mrb[13].mxu0  ;;  %v2190_v33 = vpop.f32.mrb[13].mxu1 }
 0x12f   : > { %v2119_v34 = vadd.f32 %v2118_v32, %v2117_v30  ;;  %v2909_v35 = vadd.f32 %v2190_v33, %v2189_v31  ;;  %v2120_v36 = vpop.f32.mrb[14].mxu0  ;;  %v2192_v37 = vpop.f32.mrb[14].mxu1 }
 0x130   : > { %v2121_v38 = vpop.f32.mrb[15].mxu0  ;;  %v2193_v39 = vpop.f32.mrb[15].mxu1 }
 0x131   : > { %v2122_v40 = vadd.f32 %v2121_v38, %v2120_v36  ;;  %v2911_v41 = vadd.f32 %v2193_v39, %v2192_v37 }
 0x135   : > { %v2123_v42 = vpop.f32.mrb[16].mxu0  ;;  %v2211_v43 = vpop.f32.mrb[16].mxu1 }
 0x136   : > { %v2124_v44 = vpop.f32.mrb[17].mxu0  ;;  %v2212_v45 = vpop.f32.mrb[17].mxu1 }
 0x137   : > { %v2913_v46 = vadd.f32 %v2124_v44, %v2123_v42  ;;  %v2213_v47 = vadd.f32 %v2212_v45, %v2211_v43  ;;  %v2126_v48 = vpop.f32.mrb[18].mxu0  ;;  %v2214_v49 = vpop.f32.mrb[18].mxu1 }
 0x138   : > { %v2127_v50 = vpop.f32.mrb[19].mxu0  ;;  %v2215_v51 = vpop.f32.mrb[19].mxu1 }
 0x139   : > { %v2128_v52 = vadd.f32 %v2127_v50, %v2126_v48  ;;  %v2216_v53 = vadd.f32 %v2215_v51, %v2214_v49  ;;  %v2915_v54 = vadd.f32 %v2213_v47, %v2101_v62 }
 0x13b   : > { %v2917_v55 = vadd.f32 %v2216_v53, %v2104_v4 }
 0x13d   : > { %v2129_v56 = vpop.f32.mrb[20].mxu0  ;;  %v2217_v57 = vpop.f32.mrb[20].mxu1 }
 0x13e   : > { %v2130_v58 = vpop.f32.mrb[21].mxu0  ;;  %v2218_v59 = vpop.f32.mrb[21].mxu1 }
 0x13f   : > { %v2919_v60 = vadd.f32 %v2130_v58, %v2129_v56  ;;  %v2219_v61 = vadd.f32 %v2218_v59, %v2217_v57  ;;  %v2132_v0 = vpop.f32.mrb[22].mxu0  ;;  %v2220_v1 = vpop.f32.mrb[22].mxu1 }
 0x140   : > { %v2133_v2 = vpop.f32.mrb[23].mxu0  ;;  %v2221_v3 = vpop.f32.mrb[23].mxu1 }
 0x141   : > { %v2134_v6 = vadd.f32 %v2133_v2, %v2132_v0  ;;  %v2222_v7 = vadd.f32 %v2221_v3, %v2220_v1  ;;  %v2921_v8 = vadd.f32 %v2219_v61, %v2107_v10 }
 0x143   : > { %v2923_v9 = vadd.f32 %v2222_v7, %v2110_v16 }
 0x145   : > { %v2135_v62 = vpop.f32.mrb[24].mxu0  ;;  %v2223_v4 = vpop.f32.mrb[24].mxu1 }
 0x146   : > { %v2136_v12 = vpop.f32.mrb[25].mxu0  ;;  %v2224_v13 = vpop.f32.mrb[25].mxu1 }
 0x147   : > { %v2925_v14 = vadd.f32 %v2136_v12, %v2135_v62  ;;  %v2225_v15 = vadd.f32 %v2224_v13, %v2223_v4  ;;  %v2138_v18 = vpop.f32.mrb[26].mxu0  ;;  %v2226_v19 = vpop.f32.mrb[26].mxu1 }
 0x148   : > { %v2139_v20 = vpop.f32.mrb[27].mxu0  ;;  %v2227_v21 = vpop.f32.mrb[27].mxu1 }
 0x149   : > { %v2140_v24 = vadd.f32 %v2139_v20, %v2138_v18  ;;  %v2228_v25 = vadd.f32 %v2227_v21, %v2226_v19  ;;  %v2927_v26 = vadd.f32 %v2225_v15, %v2113_v22 }
 0x14b   : > { %v2929_v27 = vadd.f32 %v2228_v25, %v2116_v28 }
 0x14d   : > { %v2141_v10 = vpop.f32.mrb[28].mxu0  ;;  %v2229_v16 = vpop.f32.mrb[28].mxu1 }
 0x14e   : > { %v2142_v30 = vpop.f32.mrb[29].mxu0  ;;  %v2230_v31 = vpop.f32.mrb[29].mxu1 }
 0x14f   : > { %v2931_v32 = vadd.f32 %v2142_v30, %v2141_v10  ;;  %v2231_v33 = vadd.f32 %v2230_v31, %v2229_v16  ;;  %v2144_v36 = vpop.f32.mrb[30].mxu0  ;;  %v2232_v37 = vpop.f32.mrb[30].mxu1 }
 0x150   : > { %v2145_v38 = vpop.f32.mrb[31].mxu0  ;;  %v2233_v39 = vpop.f32.mrb[31].mxu1 }
 0x151   : > { %v2146_v42 = vadd.f32 %v2145_v38, %v2144_v36  ;;  %v2234_v43 = vadd.f32 %v2233_v39, %v2232_v37  ;;  %v2933_v44 = vadd.f32 %v2231_v33, %v2119_v34 }
 0x153   : > { %v2935_v45 = vadd.f32 %v2234_v43, %v2122_v40 }
 0x155   : > { %v2147_v22 = vpop.f32.mrb[32].mxu0  ;;  %v2235_v28 = vpop.f32.mrb[32].mxu1 }
 0x156   : > { %v2148_v47 = vpop.f32.mrb[33].mxu0  ;;  %v2236_v48 = vpop.f32.mrb[33].mxu1 }
 0x157   : > { %v2937_v49 = vadd.f32 %v2148_v47, %v2147_v22  ;;  %v2237_v50 = vadd.f32 %v2236_v48, %v2235_v28  ;;  %v2150_v51 = vpop.f32.mrb[34].mxu0  ;;  %v2238_v53 = vpop.f32.mrb[34].mxu1 }
 0x158   : > { %v2151_v56 = vpop.f32.mrb[35].mxu0  ;;  %v2239_v57 = vpop.f32.mrb[35].mxu1 }
 0x159   : > { %v2939_v58 = vadd.f32 %v2151_v56, %v2150_v51  ;;  %v2240_v59 = vadd.f32 %v2239_v57, %v2238_v53  ;;  %v2942_v61 = vadd.f32 %v2237_v50, %v2913_v46 }
 0x15b   : > { %v2944_v34 = vadd.f32 %v2240_v59, %v2128_v52 }
 0x15d   : > { %v2153_v40 = vpop.f32.mrb[36].mxu0  ;;  %v2241_v0 = vpop.f32.mrb[36].mxu1 }
 0x15e   : > { %v2154_v1 = vpop.f32.mrb[37].mxu0  ;;  %v2242_v2 = vpop.f32.mrb[37].mxu1 }
 0x15f   : > { %v2946_v3 = vadd.f32 %v2154_v1, %v2153_v40  ;;  %v2243_v7 = vadd.f32 %v2242_v2, %v2241_v0  ;;  %v2156_v62 = vpop.f32.mrb[38].mxu0  ;;  %v2244_v4 = vpop.f32.mrb[38].mxu1  ;;  %v295_v0 = vld [vmem:[%s2650_s24 + $0x10] sm:$0xff] }
 0x160   : > { %v2157_v12 = vpop.f32.mrb[39].mxu0  ;;  %v2245_v13 = vpop.f32.mrb[39].mxu1 }
 0x161   : > { %v2948_v15 = vadd.f32 %v2157_v12, %v2156_v62  ;;  %v2246_v18 = vadd.f32 %v2245_v13, %v2244_v4  ;;  %v2951_v19 = vadd.f32 %v2243_v7, %v2919_v60  ;;  %v293_v62 = vld [vmem:[%s2650_s24] sm:$0xff] }
 0x163   : > { %v2953_v46 = vadd.f32 %v2246_v18, %v2134_v6 }
 0x165   : > { %v2159_v52 = vpop.f32.mrb[40].mxu0  ;;  %v2247_v20 = vpop.f32.mrb[40].mxu1 }
 0x166   : > { %v2160_v21 = vpop.f32.mrb[41].mxu0  ;;  %v2248_v25 = vpop.f32.mrb[41].mxu1 }
 0x167   : > { %v2955_v10 = vadd.f32 %v2160_v21, %v2159_v52  ;;  %v2249_v16 = vadd.f32 %v2248_v25, %v2247_v20  ;;  %v2162_v30 = vpop.f32.mrb[42].mxu0  ;;  %v2250_v31 = vpop.f32.mrb[42].mxu1  ;;  %v296_v52 = vld [vmem:[%s2650_s24 + $0x18] sm:$0xff]  ;;  %v294_v25 = vld [vmem:[%s2650_s24 + $0x8] sm:$0xff] }
 0x168   : > { %v2163_v33 = vpop.f32.mrb[43].mxu0  ;;  %v2251_v36 = vpop.f32.mrb[43].mxu1 }
 0x169   : > { %v2957_v37 = vadd.f32 %v2163_v33, %v2162_v30  ;;  %v2252_v38 = vadd.f32 %v2251_v36, %v2250_v31  ;;  %v2960_v39 = vadd.f32 %v2249_v16, %v2925_v14 }
 0x16b   : > { %v2962_v60 = vadd.f32 %v2252_v38, %v2140_v24 }
 0x16d   : > { %v2165_v6 = vpop.f32.mrb[44].mxu0  ;;  %v2253_v43 = vpop.f32.mrb[44].mxu1 }
 0x16e   : > { %v2166_v22 = vpop.f32.mrb[45].mxu0  ;;  %v2254_v28 = vpop.f32.mrb[45].mxu1 }
 0x16f   : > { %v2964_v47 = vadd.f32 %v2166_v22, %v2165_v6  ;;  %v2255_v48 = vadd.f32 %v2254_v28, %v2253_v43  ;;  %v2168_v50 = vpop.f32.mrb[46].mxu0  ;;  %v2256_v51 = vpop.f32.mrb[46].mxu1  ;;  %v299_v28 = vld [vmem:[%s2650_s24 + $0x30] sm:$0xff] }
 0x170   : > { %v2169_v53 = vpop.f32.mrb[47].mxu0  ;;  %v2257_v56 = vpop.f32.mrb[47].mxu1 }
 0x171   : > { %v2966_v57 = vadd.f32 %v2169_v53, %v2168_v50  ;;  %v2258_v14 = vadd.f32 %v2257_v56, %v2256_v51  ;;  %v2969_v24 = vadd.f32 %v2255_v48, %v2931_v32  ;;  %v297_v51 = vld [vmem:[%s2650_s24 + $0x20] sm:$0xff] }
 0x173   : > { %v2971_v59 = vadd.f32 %v2258_v14, %v2146_v42 }
 0x175   : > { %v2259_v40 = vpop.f32.mrb[48].mxu1  ;;  %v2349_v1 = vpop.f32.mrb[48].mxu0 }
 0x176   : > { %v1522_v2 = vadd.f32 %v2349_v1, %v2921_v8  ;;  %v2260_v7 = vpop.f32.mrb[49].mxu1  ;;  %v1513_v4 = vpop.f32.mrb[49].mxu0  ;;  %v300_v1 = vld [vmem:[%s2650_s24 + $0x38] sm:$0xff] }
 0x177   : > { %v2261_v12 = vadd.f32 %v2260_v7, %v2259_v40  ;;  %v1514_v13 = vadd.f32 %v1513_v4, %v2915_v54  ;;  %v2262_v18 = vpop.f32.mrb[50].mxu1  ;;  %v2350_v32 = vpop.f32.mrb[50].mxu0 }
 0x178   : > { %v1642_v42 = vadd.f32 %v1522_v2, %v295_v0  ;;  %v1525_v20 = vadd.f32 %v2350_v32, %v2923_v9  ;;  %v2263_v21 = vpop.f32.mrb[51].mxu1  ;;  %v1516_v16 = vpop.f32.mrb[51].mxu0 }
 0x179   : > { %v1640_v8 = vadd.f32 %v1514_v13, %v293_v62  ;;  %v2264_v30 = vadd.f32 %v2263_v21, %v2262_v18  ;;  %v1517_v31 = vadd.f32 %v1516_v16, %v2917_v55  ;;  %v2982_v33 = vadd.f32 %v2261_v12, %v2937_v49 }
 0x17a   : > { %1674 = vst [vmem:[%s2650_s24 + $0x10] sm:$0xff] %v1642_v42  ;;  %v1643_v54 = vadd.f32 %v1525_v20, %v296_v52  ;;  %v1782_v48 = vmul.f32 %v1642_v42, %v1642_v42 }
 0x17b   : > { %1672 = vst [vmem:[%s2650_s24] sm:$0xff] %v1640_v8  ;;  %v1641_v36 = vadd.f32 %v1517_v31, %v294_v25  ;;  %v2987_v38 = vadd.f32 %v2264_v30, %v2939_v58  ;;  %v1780_v9 = vmul.f32 %v1640_v8, %v1640_v8 }
 0x17c   : > { %1675 = vst [vmem:[%s2650_s24 + $0x18] sm:$0xff] %v1643_v54  ;;  %v1783_v7 = vmul.f32 %v1643_v54, %v1643_v54 }
 0x17d   : > { %1673 = vst [vmem:[%s2650_s24 + $0x8] sm:$0xff] %v1641_v36  ;;  %v1740_v6 = vadd.f32 %v1641_v36, %v1640_v8  ;;  %v1781_v43 = vmul.f32 %v1641_v36, %v1641_v36  ;;  %v2265_v22 = vpop.f32.mrb[52].mxu1  ;;  %v2353_v55 = vpop.f32.mrb[52].mxu0  ;;  %v303_v36 = vld [vmem:[%s2650_s24 + $0x50] sm:$0xff] }
 0x17e   : > { %v1538_v49 = vadd.f32 %v2353_v55, %v2933_v44  ;;  %v2266_v50 = vpop.f32.mrb[53].mxu1  ;;  %v1529_v53 = vpop.f32.mrb[53].mxu0 }
 0x17f   : > { %v1741_v56 = vadd.f32 %v1740_v6, %v1642_v42  ;;  %v1812_v14 = vadd.f32 %v1781_v43, %v1780_v9  ;;  %v2267_v58 = vadd.f32 %v2266_v50, %v2265_v22  ;;  %v1530_v40 = vadd.f32 %v1529_v53, %v2927_v26  ;;  %v2268_v0 = vpop.f32.mrb[54].mxu1  ;;  %v2354_v2 = vpop.f32.mrb[54].mxu0  ;;  %v298_v42 = vld [vmem:[%s2650_s24 + $0x28] sm:$0xff]  ;;  %v301_v22 = vld [vmem:[%s2650_s24 + $0x40] sm:$0xff]  ;;  %v304_v50 = vld [vmem:[%s2650_s24 + $0x58] sm:$0xff] }
 0x180   : > { %v1646_v62 = vadd.f32 %v1538_v49, %v299_v28  ;;  %v1541_v4 = vadd.f32 %v2354_v2, %v2935_v45  ;;  %v2269_v12 = vpop.f32.mrb[55].mxu1  ;;  %v1532_v44 = vpop.f32.mrb[55].mxu0 }
 0x181   : > { %v1813_v13 = vadd.f32 %v1812_v14, %v1782_v48  ;;  %v1644_v18 = vadd.f32 %v1530_v40, %v297_v51  ;;  %v1742_v52 = vadd.f32 %v1741_v56, %v1643_v54  ;;  %v2270_v32 = vadd.f32 %v2269_v12, %v2268_v0  ;;  %v302_v0 = vld [vmem:[%s2650_s24 + $0x48] sm:$0xff] }
 0x182   : > { %1678 = vst [vmem:[%s2650_s24 + $0x30] sm:$0xff] %v1646_v62  ;;  %v1647_v26 = vadd.f32 %v1541_v4, %v300_v1  ;;  %v1533_v20 = vadd.f32 %v1532_v44, %v2929_v27  ;;  %v3001_v21 = vadd.f32 %v2267_v58, %v2946_v3  ;;  %v1786_v55 = vmul.f32 %v1646_v62, %v1646_v62 }
 0x183   : > { %1676 = vst [vmem:[%s2650_s24 + $0x20] sm:$0xff] %v1644_v18  ;;  %v1743_v45 = vadd.f32 %v1742_v52, %v1644_v18  ;;  %v1784_v25 = vmul.f32 %v1644_v18, %v1644_v18  ;;  %v1814_v16 = vadd.f32 %v1813_v13, %v1783_v7  ;;  %v3005_v8 = vadd.f32 %v2270_v32, %v2948_v15 }
 0x184   : > { %1679 = vst [vmem:[%s2650_s24 + $0x38] sm:$0xff] %v1647_v26  ;;  %v1645_v30 = vadd.f32 %v1533_v20, %v298_v42  ;;  %v1787_v4 = vmul.f32 %v1647_v26, %v1647_v26  ;;  %v307_v42 = vld [vmem:[%s2650_s24 + $0x70] sm:$0xff] }
 0x185   : > { %v1815_v31 = vadd.f32 %v1814_v16, %v1784_v25  ;;  %v2271_v54 = vpop.f32.mrb[56].mxu1  ;;  %v2357_v9 = vpop.f32.mrb[56].mxu0 }
 0x186   : > { %1677 = vst [vmem:[%s2650_s24 + $0x28] sm:$0xff] %v1645_v30  ;;  %v1744_v27 = vadd.f32 %v1743_v45, %v1645_v30  ;;  %v1785_v6 = vmul.f32 %v1645_v30, %v1645_v30  ;;  %v1554_v3 = vadd.f32 %v2357_v9, %v2951_v19  ;;  %v2272_v43 = vpop.f32.mrb[57].mxu1  ;;  %v1545_v28 = vpop.f32.mrb[57].mxu0  ;;  %v305_v30 = vld [vmem:[%s2650_s24 + $0x60] sm:$0xff] }
 0x187   : > { %v2273_v48 = vadd.f32 %v2272_v43, %v2271_v54  ;;  %v1546_v15 = vadd.f32 %v1545_v28, %v2942_v61  ;;  %v2274_v49 = vpop.f32.mrb[58].mxu1  ;;  %v2358_v51 = vpop.f32.mrb[58].mxu0 }
 0x188   : > { %v1745_v53 = vadd.f32 %v1744_v27, %v1646_v62  ;;  %v1816_v56 = vadd.f32 %v1815_v31, %v1785_v6  ;;  %v1650_v14 = vadd.f32 %v1554_v3, %v303_v36  ;;  %v1557_v58 = vadd.f32 %v2358_v51, %v2953_v46  ;;  %v2275_v40 = vpop.f32.mrb[59].mxu1  ;;  %v1548_v19 = vpop.f32.mrb[59].mxu0  ;;  %v308_v27 = vld [vmem:[%s2650_s24 + $0x78] sm:$0xff] }
 0x189   : > { %v1648_v1 = vadd.f32 %v1546_v15, %v301_v22  ;;  %v2276_v2 = vadd.f32 %v2275_v40, %v2274_v49  ;;  %v1549_v7 = vadd.f32 %v1548_v19, %v2944_v34  ;;  %v3018_v61 = vadd.f32 %v2273_v48, %v2955_v10  ;;  %v306_v48 = vld [vmem:[%s2650_s24 + $0x68] sm:$0xff] }
 0x18a   : > { %v1817_v62 = vadd.f32 %v1816_v56, %v1786_v55  ;;  %1682 = vst [vmem:[%s2650_s24 + $0x50] sm:$0xff] %v1650_v14  ;;  %v1746_v12 = vadd.f32 %v1745_v53, %v1647_v26  ;;  %v1651_v44 = vadd.f32 %v1557_v58, %v304_v50  ;;  %v1790_v54 = vmul.f32 %v1650_v14, %v1650_v14 }
 0x18b   : > { %1680 = vst [vmem:[%s2650_s24 + $0x40] sm:$0xff] %v1648_v1  ;;  %v1788_v46 = vmul.f32 %v1648_v1, %v1648_v1  ;;  %v1649_v13 = vadd.f32 %v1549_v7, %v302_v0  ;;  %v3023_v18 = vadd.f32 %v2276_v2, %v2957_v37 }
 0x18c   : > { %v1747_v52 = vadd.f32 %v1746_v12, %v1648_v1  ;;  %v1818_v32 = vadd.f32 %v1817_v62, %v1787_v4  ;;  %1683 = vst [vmem:[%s2650_s24 + $0x58] sm:$0xff] %v1651_v44  ;;  %v1791_v51 = vmul.f32 %v1651_v44, %v1651_v44  ;;  %v311_v1 = vld [vmem:[%s2650_s24 + $0x90] sm:$0xff] }
 0x18d   : > { %1681 = vst [vmem:[%s2650_s24 + $0x48] sm:$0xff] %v1649_v13  ;;  %v1789_v34 = vmul.f32 %v1649_v13, %v1649_v13  ;;  %v2277_v10 = vpop.f32.mrb[60].mxu1  ;;  %v2361_v20 = vpop.f32.mrb[60].mxu0 }
 0x18e   : > { %v1819_v45 = vadd.f32 %v1818_v32, %v1788_v46  ;;  %v1748_v25 = vadd.f32 %v1747_v52, %v1649_v13  ;;  %v1570_v26 = vadd.f32 %v2361_v20, %v2969_v24  ;;  %v2278_v16 = vpop.f32.mrb[61].mxu1  ;;  %v1561_v31 = vpop.f32.mrb[61].mxu0 }
 0x18f   : > { %v2279_v37 = vadd.f32 %v2278_v16, %v2277_v10  ;;  %v1562_v36 = vadd.f32 %v1561_v31, %v2960_v39  ;;  %v2280_v9 = vpop.f32.mrb[62].mxu1  ;;  %v2362_v6 = vpop.f32.mrb[62].mxu0  ;;  %v310_v16 = vld [vmem:[%s2650_s24 + $0x88] sm:$0xff] }
 0x190   : > { %v1749_v3 = vadd.f32 %v1748_v25, %v1650_v14  ;;  %v1820_v43 = vadd.f32 %v1819_v45, %v1789_v34  ;;  %v1654_v22 = vadd.f32 %v1570_v26, %v307_v42  ;;  %v1573_v28 = vadd.f32 %v2362_v6, %v2971_v59  ;;  %v2281_v55 = vpop.f32.mrb[63].mxu1  ;;  %v1564_v24 = vpop.f32.mrb[63].mxu0  ;;  %v312_v34 = vld [vmem:[%s2650_s24 + $0x98] sm:$0xff] }
 0x191   : > { %v1652_v15 = vadd.f32 %v1562_v36, %v305_v30  ;;  %v2282_v49 = vadd.f32 %v2281_v55, %v2280_v9  ;;  %v1565_v50 = vadd.f32 %v1564_v24, %v2962_v60  ;;  %v1441_v39 = vadd.f32 %v2279_v37, %v2964_v47 }
 0x192   : > { %v1821_v53 = vadd.f32 %v1820_v43, %v1790_v54  ;;  %1686 = vst [vmem:[%s2650_s24 + $0x70] sm:$0xff] %v1654_v22  ;;  %v1750_v56 = vadd.f32 %v1749_v3, %v1651_v44  ;;  %v1655_v14 = vadd.f32 %v1573_v28, %v308_v27  ;;  %v309_v44 = vld [vmem:[%s2650_s24 + $0x80] sm:$0xff]  ;;  %v1794_v13 = vmul.f32 %v1654_v22, %v1654_v22  ;;  %v315_v28 = vld [vmem:[%s2650_s24 + $0xb0] sm:$0xff] }
 0x193   : > { %1684 = vst [vmem:[%s2650_s24 + $0x60] sm:$0xff] %v1652_v15  ;;  %v1792_v59 = vmul.f32 %v1652_v15, %v1652_v15  ;;  %v1653_v58 = vadd.f32 %v1565_v50, %v306_v48  ;;  %v3039_v40 = vadd.f32 %v2282_v49, %v2966_v57  ;;  %v313_v50 = vld [vmem:[%s2650_s24 + $0xa0] sm:$0xff] }
 0x194   : > { %v1751_v0 = vadd.f32 %v1750_v56, %v1652_v15  ;;  %v1822_v19 = vadd.f32 %v1821_v53, %v1791_v51  ;;  %1687 = vst [vmem:[%s2650_s24 + $0x78] sm:$0xff] %v1655_v14  ;;  %v1795_v37 = vmul.f32 %v1655_v14, %v1655_v14 }
 0x195   : > { %1685 = vst [vmem:[%s2650_s24 + $0x68] sm:$0xff] %v1653_v58  ;;  %v1793_v60 = vmul.f32 %v1653_v58, %v1653_v58  ;;  %v2283_v47 = vpop.f32.mrb[64].mxu1  ;;  %v2365_v2 = vpop.f32.mrb[64].mxu0 }
 0x196   : > { %v1823_v7 = vadd.f32 %v1822_v19, %v1792_v59  ;;  %v1752_v4 = vadd.f32 %v1751_v0, %v1653_v58  ;;  %v1586_v62 = vadd.f32 %v2365_v2, %v3001_v21  ;;  %v2284_v12 = vpop.f32.mrb[65].mxu1  ;;  %v1577_v46 = vpop.f32.mrb[65].mxu0  ;;  %v316_v59 = vld [vmem:[%s2650_s24 + $0xb8] sm:$0xff]  ;;  %v314_v2 = vld [vmem:[%s2650_s24 + $0xa8] sm:$0xff] }
 0x197   : > { %v2285_v57 = vadd.f32 %v2284_v12, %v2283_v47  ;;  %v1578_v52 = vadd.f32 %v1577_v46, %v2982_v33  ;;  %v2286_v32 = vpop.f32.mrb[66].mxu1  ;;  %v2366_v10 = vpop.f32.mrb[66].mxu0 }
 0x198   : > { %v1753_v42 = vadd.f32 %v1752_v4, %v1654_v22  ;;  %v1824_v20 = vadd.f32 %v1823_v7, %v1793_v60  ;;  %v1658_v45 = vadd.f32 %v1586_v62, %v311_v1  ;;  %v1589_v25 = vadd.f32 %v2366_v10, %v3005_v8  ;;  %v2287_v26 = vpop.f32.mrb[67].mxu1  ;;  %v1580_v21 = vpop.f32.mrb[67].mxu0 }
 0x199   : > { %v1656_v30 = vadd.f32 %v1578_v52, %v309_v44  ;;  %v2288_v31 = vadd.f32 %v2287_v26, %v2286_v32  ;;  %v1581_v54 = vadd.f32 %v1580_v21, %v2987_v38  ;;  %v3052_v33 = vadd.f32 %v2285_v57, %v2897_v63 }
 0x19a   : > { %v1825_v36 = vadd.f32 %v1824_v20, %v1794_v13  ;;  %1690 = vst [vmem:[%s2650_s24 + $0x90] sm:$0xff] %v1658_v45  ;;  %v1754_v9 = vadd.f32 %v1753_v42, %v1655_v14  ;;  %v1659_v27 = vadd.f32 %v1589_v25, %v312_v34  ;;  %v1798_v53 = vmul.f32 %v1658_v45, %v1658_v45 }
 0x19b   : > { %1688 = vst [vmem:[%s2650_s24 + $0x80] sm:$0xff] %v1656_v30  ;;  %v1796_v8 = vmul.f32 %v1656_v30, %v1656_v30  ;;  %v1657_v6 = vadd.f32 %v1581_v54, %v310_v16  ;;  %v3057_v3 = vadd.f32 %v2288_v31, %v2899_v5  ;;  %v317_v16 = vld [vmem:[%s2650_s24 + $0xc0] sm:$0xff] }
 0x19c   : > { %v1755_v43 = vadd.f32 %v1754_v9, %v1656_v30  ;;  %v1826_v22 = vadd.f32 %v1825_v36, %v1795_v37  ;;  %1691 = vst [vmem:[%s2650_s24 + $0x98] sm:$0xff] %v1659_v27  ;;  %v1799_v12 = vmul.f32 %v1659_v27, %v1659_v27  ;;  %v320_v37 = vld [vmem:[%s2650_s24 + $0xd8] sm:$0xff] }
 0x19d   : > { %1689 = vst [vmem:[%s2650_s24 + $0x88] sm:$0xff] %v1657_v6  ;;  %v1797_v63 = vmul.f32 %v1657_v6, %v1657_v6  ;;  %v2289_v38 = vpop.f32.mrb[68].mxu1  ;;  %v2369_v55 = vpop.f32.mrb[68].mxu0 }
 0x19e   : > { %v1827_v48 = vadd.f32 %v1826_v22, %v1796_v8  ;;  %v1756_v24 = vadd.f32 %v1755_v43, %v1657_v6  ;;  %v1602_v15 = vadd.f32 %v2369_v55, %v1441_v39  ;;  %v2290_v49 = vpop.f32.mrb[69].mxu1  ;;  %v1593_v51 = vpop.f32.mrb[69].mxu0  ;;  %v318_v22 = vld [vmem:[%s2650_s24 + $0xc8] sm:$0xff] }
 0x19f   : > { %v2291_v56 = vadd.f32 %v2290_v49, %v2289_v38  ;;  %v1594_v5 = vadd.f32 %v1593_v51, %v3018_v61  ;;  %v2292_v14 = vpop.f32.mrb[70].mxu1  ;;  %v2370_v58 = vpop.f32.mrb[70].mxu0 }
 0x1a0   : > { %v1757_v0 = vadd.f32 %v1756_v24, %v1658_v45  ;;  %v1828_v19 = vadd.f32 %v1827_v48, %v1797_v63  ;;  %v1662_v60 = vadd.f32 %v1602_v15, %v315_v28  ;;  %v1605_v47 = vadd.f32 %v2370_v58, %v3039_v40  ;;  %v2293_v1 = vpop.f32.mrb[71].mxu1  ;;  %v1596_v39 = vpop.f32.mrb[71].mxu0 }
 0x1a1   : > { %v1660_v7 = vadd.f32 %v1594_v5, %v313_v50  ;;  %v2294_v4 = vadd.f32 %v2293_v1, %v2292_v14  ;;  %v1597_v62 = vadd.f32 %v1596_v39, %v3023_v18  ;;  %v1457_v61 = vadd.f32 %v2291_v56, %v2901_v11  ;;  %v319_v11 = vld [vmem:[%s2650_s24 + $0xd0] sm:$0xff] }
 0x1a2   : > { %v1829_v44 = vadd.f32 %v1828_v19, %v1798_v53  ;;  %1694 = vst [vmem:[%s2650_s24 + $0xb0] sm:$0xff] %v1662_v60  ;;  %v1758_v46 = vadd.f32 %v1757_v0, %v1659_v27  ;;  %v1663_v13 = vadd.f32 %v1605_v47, %v316_v59  ;;  %v1802_v30 = vmul.f32 %v1662_v60, %v1662_v60  ;;  %v321_v19 = vld [vmem:[%s2650_s24 + $0xe0] sm:$0xff] }
 0x1a3   : > { %1692 = vst [vmem:[%s2650_s24 + $0xa0] sm:$0xff] %v1660_v7  ;;  %v1800_v40 = vmul.f32 %v1660_v7, %v1660_v7  ;;  %v1661_v57 = vadd.f32 %v1597_v62, %v314_v2  ;;  %v1460_v52 = vadd.f32 %v2294_v4, %v2903_v17 }
 0x1a4   : > { %v1759_v32 = vadd.f32 %v1758_v46, %v1660_v7  ;;  %v1830_v34 = vadd.f32 %v1829_v44, %v1799_v12  ;;  %1695 = vst [vmem:[%s2650_s24 + $0xb8] sm:$0xff] %v1663_v13  ;;  %v1803_v48 = vmul.f32 %v1663_v13, %v1663_v13 }
 0x1a5   : > { %1693 = vst [vmem:[%s2650_s24 + $0xa8] sm:$0xff] %v1661_v57  ;;  %v1801_v18 = vmul.f32 %v1661_v57, %v1661_v57  ;;  %v2295_v10 = vpop.f32.mrb[72].mxu1  ;;  %v2373_v42 = vpop.f32.mrb[72].mxu0 }
 0x1a6   : > { %v1831_v20 = vadd.f32 %v1830_v34, %v1800_v40  ;;  %v1760_v45 = vadd.f32 %v1759_v32, %v1661_v57  ;;  %v1618_v25 = vadd.f32 %v2373_v42, %v1457_v61  ;;  %v2296_v26 = vpop.f32.mrb[73].mxu1  ;;  %v1609_v21 = vpop.f32.mrb[73].mxu0  ;;  %v322_v61 = vld [vmem:[%s2650_s24 + $0xe8] sm:$0xff]  ;;  %v323_v32 = vld [vmem:[%s2650_s24 + $0xf0] sm:$0xff] }
 0x1a7   : > { %v2297_v31 = vadd.f32 %v2296_v26, %v2295_v10  ;;  %v1610_v17 = vadd.f32 %v1609_v21, %v3052_v33  ;;  %v2298_v54 = vpop.f32.mrb[74].mxu1  ;;  %v2374_v36 = vpop.f32.mrb[74].mxu0 }
 0x1a8   : > { %v1761_v9 = vadd.f32 %v1760_v45, %v1662_v60  ;;  %v1832_v27 = vadd.f32 %v1831_v20, %v1801_v18  ;;  %v1666_v8 = vadd.f32 %v1618_v25, %v319_v11  ;;  %v1621_v6 = vadd.f32 %v2374_v36, %v1460_v52  ;;  %v2299_v43 = vpop.f32.mrb[75].mxu1  ;;  %v1612_v63 = vpop.f32.mrb[75].mxu0  ;;  %v324_v25 = vld [vmem:[%s2650_s24 + $0xf8] sm:$0xff] }
 0x1a9   : > { %v1664_v38 = vadd.f32 %v1610_v17, %v317_v16  ;;  %v2300_v28 = vadd.f32 %v2299_v43, %v2298_v54  ;;  %v1613_v55 = vadd.f32 %v1612_v63, %v3057_v3  ;;  %v1465_v33 = vadd.f32 %v2297_v31, %v2905_v23 }
 0x1aa   : > { %v1833_v24 = vadd.f32 %v1832_v27, %v1802_v30  ;;  %1698 = vst [vmem:[%s2650_s24 + $0xd0] sm:$0xff] %v1666_v8  ;;  %v1762_v15 = vadd.f32 %v1761_v9, %v1663_v13  ;;  %v1667_v49 = vadd.f32 %v1621_v6, %v320_v37 }
 0x1ab   : > { %1696 = vst [vmem:[%s2650_s24 + $0xc0] sm:$0xff] %v1664_v38  ;;  %v1804_v50 = vmul.f32 %v1664_v38, %v1664_v38  ;;  %v1665_v51 = vadd.f32 %v1613_v55, %v318_v22  ;;  %v1468_v53 = vadd.f32 %v2300_v28, %v2907_v29  ;;  %v1806_v29 = vmul.f32 %v1666_v8, %v1666_v8 }
 0x1ac   : > { %v1763_v56 = vadd.f32 %v1762_v15, %v1664_v38  ;;  %v1834_v5 = vadd.f32 %v1833_v24, %v1803_v48  ;;  %1699 = vst [vmem:[%s2650_s24 + $0xd8] sm:$0xff] %v1667_v49  ;;  %v1807_v57 = vmul.f32 %v1667_v49, %v1667_v49  ;;  %v1739_v48 = vld [vmem:[%s3120_s3] sm:$0x1] }
 0x1ad   : > { %1697 = vst [vmem:[%s2650_s24 + $0xc8] sm:$0xff] %v1665_v51  ;;  %v1805_v14 = vmul.f32 %v1665_v51, %v1665_v51  ;;  %v2301_v3 = vpop.f32.mrb[76].mxu1  ;;  %v2377_v59 = vpop.f32.mrb[76].mxu0 }
 0x1ae   : > { %v1835_v23 = vadd.f32 %v1834_v5, %v1804_v50  ;;  %v1764_v58 = vadd.f32 %v1763_v56, %v1665_v51  ;;  %v2302_v0 = vpop.f32.mrb[77].mxu1  ;;  %v1625_v60 = vpop.f32.mrb[77].mxu0 }
 0x1af   : > { %v2303_v47 = vadd.f32 %v2302_v0, %v2301_v3  ;;  %v1626_v1 = vadd.f32 %v1625_v60, %v1465_v33  ;;  %v2304_v2 = vpop.f32.mrb[78].mxu1  ;;  %v2378_v39 = vpop.f32.mrb[78].mxu0 }
 0x1b0   : > { %v1765_v7 = vadd.f32 %v1764_v58, %v1666_v8  ;;  %v1836_v4 = vadd.f32 %v1835_v23, %v1805_v14  ;;  %v2305_v62 = vpop.f32.mrb[79].mxu1  ;;  %v1628_v12 = vpop.f32.mrb[79].mxu0 }
 0x1b1   : > { %v1473_v44 = vadd.f32 %v2303_v47, %v2909_v35  ;;  %v1668_v46 = vadd.f32 %v1626_v1, %v321_v19  ;;  %v2306_v13 = vadd.f32 %v2305_v62, %v2304_v2  ;;  %v1629_v40 = vadd.f32 %v1628_v12, %v1468_v53 }
 0x1b2   : > { %v1837_v52 = vadd.f32 %v1836_v4, %v1806_v29  ;;  %v1766_v34 = vadd.f32 %v1765_v7, %v1667_v49  ;;  %v1779_v49 = vld [vmem:[%s3121_s4] sm:$0x1] }
 0x1b3   : > { %v1634_v18 = vadd.f32 %v2377_v59, %v1473_v44  ;;  %1700 = vst [vmem:[%s2650_s24 + $0xe0] sm:$0xff] %v1668_v46  ;;  %v1808_v10 = vmul.f32 %v1668_v46, %v1668_v46  ;;  %v1476_v11 = vadd.f32 %v2306_v13, %v2911_v41  ;;  %v1669_v42 = vadd.f32 %v1629_v40, %v322_v61 }
 0x1b4   : > { %v1767_v20 = vadd.f32 %v1766_v34, %v1668_v46  ;;  %v1838_v45 = vadd.f32 %v1837_v52, %v1807_v57 }
 0x1b5   : > { %v1670_v35 = vadd.f32 %v1634_v18, %v323_v32  ;;  %v1637_v26 = vadd.f32 %v2378_v39, %v1476_v11  ;;  %1701 = vst [vmem:[%s2650_s24 + $0xe8] sm:$0xff] %v1669_v42  ;;  %v1809_v16 = vmul.f32 %v1669_v42, %v1669_v42 }
 0x1b6   : > { %v1839_v21 = vadd.f32 %v1838_v45, %v1808_v10  ;;  %v1768_v30 = vadd.f32 %v1767_v20, %v1669_v42 }
 0x1b7   : > { %1702 = vst [vmem:[%s2650_s24 + $0xf0] sm:$0xff] %v1670_v35  ;;  %v1671_v31 = vadd.f32 %v1637_v26, %v324_v25  ;;  %v1810_v17 = vmul.f32 %v1670_v35, %v1670_v35 }
 0x1b8   : > { %v1769_v54 = vadd.f32 %v1768_v30, %v1670_v35  ;;  %v1840_v37 = vadd.f32 %v1839_v21, %v1809_v16 }
 0x1b9   : > { %1703 = vst [vmem:[%s2650_s24 + $0xf8] sm:$0xff] %v1671_v31  ;;  %v1811_v36 = vmul.f32 %v1671_v31, %v1671_v31 }
 0x1ba   : > { %v1770_v9 = vadd.f32 %v1769_v54, %v1671_v31  ;;  %v1841_v41 = vadd.f32 %v1840_v37, %v1810_v17 }
 0x1bc   : > { %v1771_v27 = vrot.slane %v1770_v9, 4  ;;  %v1842_v8 = vadd.f32 %v1841_v41, %v1811_v36 }
 0x1be   : > { %v1772_v6 = vadd.f32 %v1771_v27, %v1770_v9  ;;  %v1843_v43 = vrot.slane %v1842_v8, 4 }
 0x1c0   : > { %v1773_v22 = vrot.slane %v1772_v6, 2  ;;  %v1844_v63 = vadd.f32 %v1843_v43, %v1842_v8 }
 0x1c2   : > { %v1774_v38 = vadd.f32 %v1773_v22, %v1772_v6  ;;  %v1845_v28 = vrot.slane %v1844_v63, 2 }
 0x1c4   : > { %v1775_v55 = vrot.slane %v1774_v38, 1  ;;  %v1846_v33 = vadd.f32 %v1845_v28, %v1844_v63 }
 0x1c6   : > { %v1776_v24 = vadd.f32 %v1775_v55, %v1774_v38  ;;  %v1847_v15 = vrot.slane %v1846_v33, 1 }
 0x1c8   : > { %v1777_v50 = vadd.f32 %v1776_v24, %v1739_v48  ;;  %v1848_v51 = vadd.f32 %v1847_v15, %v1846_v33 }
 0x1ca   : > { %1778 = vst [vmem:[%s3120_s3] sm:$0x1] %v1777_v50  ;;  %v1849_v53 = vadd.f32 %v1848_v51, %v1779_v49 }
 0x1cc   : > { %1850 = vst [vmem:[%s3121_s4] sm:$0x1] %v1849_v53 }
 0x1cd PF: > { %s15_s17 = sadd.s32 1, %s2596_s17   ;;  %s3122_s15 = smov %s2592_s16 }
 0x1ce   : > { %p12_p6 = scmp.ge.s32.totalorder %s15_s17, 4   ;;  %s3123_s16 = smov %s3125_s18 }
 0x1d0   :  { %14 = sbr.rel (!%p12_p6) target bundleno = 2 (0x2), region = 89 }

// kernel: unet_hrpxp_forward.93
= control target key start
LH: loop header
LB: loop body
LE: loop exit
PB: predicated region body
PF: predicated region fallthrough
CT: control target
= control target key end

     0   :  { %s4035_s15 = smov 0   ;;  %s4037_s16 = smov 0   ;;  %s4909_s0 = inlined_call_operand.vmem [shape: bf16[512,1152], index: 0, kind: input, shape index: {}]   ;;  %s4910_s1 = inlined_call_operand.vmem [shape: bf16[1152,128], index: 1, kind: input, shape index: {}]   ;;  %s4911_s2 = inlined_call_operand.vmem [shape: f32[512,128], index: 2, kind: output, shape index: {0}]   ;;  %s4912_s3 = inlined_call_operand.vmem [shape: f32[1,128], index: 3, kind: output, shape index: {1}]   ;;  %s4913_s4 = inlined_call_operand.vmem [shape: f32[1,128], index: 4, kind: output, shape index: {2}]  }
   0x1   :  { %s4039_s17 = smov 0  }
   0x2 LB: > { %s27_s18 = sadd.s32 1, %s4002_s16  ;;  %p2916_p0 = scmp.ge.s32.totalorder %s4006_s17, 1  ;;  %s4006_s17 = sphi %s4039_s17, %s15_s17   ;;  %s4002_s16 = sphi %s4037_s16, %s4915_s16   ;;  %s3998_s15 = sphi %s4035_s15, %s4914_s15  }
   0x3   : > { %p29_p1 = scmp.ge.s32.totalorder %s27_s18, 2  ;;  %p189_p2 = scmp.lt.s32.totalorder %s4006_s17, 3 }
   0x5   : > { %s4917_s18 = smov (%p29_p1, %s27_s18), 0  ;;  %p190_p3 = pnand %p2916_p0, %p189_p2 }
   0x6   : > { %s2917_s19 = sshll.u32 (!%p190_p3), %s3998_s15, 5  ;;  %p286_p4 = scmp.eq.s32.totalorder (!%p190_p3), %s3998_s15, 0  ;;  %v4008_v0 = vmov (!%p190_p3), 0.0  }
   0x7   : > { %193 = sbr.rel (%p190_p3) target bundleno = 589 (0x24d), region = 28  ;;  %p227_p5 = scmp.lt.s32.totalorder (!%p190_p3), %s2917_s19, 63 }
   0xe   : > { %s4919_s19 = smov (!%p227_p5, %s2917_s19), 63  ;;  %v4009_v1 = vmov (%p286_p4), 0.0  }
   0xf   : > { %s3677_s20 = smul.u32 36, %s4919_s19  ;;  %s2920_s21 = sshll.u32 %s4919_s19, 3  ;;  %291 = vst [vmem:[%s4912_s3] sm:$0x1] (%p286_p4), %v4009_v1  ;;  %292 = vst [vmem:[%s4913_s4] sm:$0x1] (%p286_p4), %v4009_v1 }
  0x10   : > { %s4060_s24 = scalar_lea.vmem %s4911_s2, %s2920_s21 }
  0x11   : > { %s4065_s27 = scalar_lea.vmem %s4909_s0, %s3677_s20  ;;  %254 = vst [vmem:[%s4060_s24] sm:$0xff] %v4008_v0  ;;  %255 = vst [vmem:[%s4060_s24 + $0x8] sm:$0xff] %v4008_v0 }
  0x12   : > { %256 = vst [vmem:[%s4060_s24 + $0x10] sm:$0xff] %v4008_v0  ;;  %257 = vst [vmem:[%s4060_s24 + $0x18] sm:$0xff] %v4008_v0 }
  0x13   : > { %258 = vst [vmem:[%s4060_s24 + $0x20] sm:$0xff] %v4008_v0  ;;  %259 = vst [vmem:[%s4060_s24 + $0x28] sm:$0xff] %v4008_v0 }
  0x14   : > { %260 = vst [vmem:[%s4060_s24 + $0x30] sm:$0xff] %v4008_v0  ;;  %261 = vst [vmem:[%s4060_s24 + $0x38] sm:$0xff] %v4008_v0 }
  0x15   : > { %262 = vst [vmem:[%s4060_s24 + $0x40] sm:$0xff] %v4008_v0  ;;  %263 = vst [vmem:[%s4060_s24 + $0x48] sm:$0xff] %v4008_v0 }
  0x16   : > { %264 = vst [vmem:[%s4060_s24 + $0x50] sm:$0xff] %v4008_v0  ;;  %265 = vst [vmem:[%s4060_s24 + $0x58] sm:$0xff] %v4008_v0 }
  0x17   : > { %266 = vst [vmem:[%s4060_s24 + $0x60] sm:$0xff] %v4008_v0  ;;  %267 = vst [vmem:[%s4060_s24 + $0x68] sm:$0xff] %v4008_v0 }
  0x18   : > { %268 = vst [vmem:[%s4060_s24 + $0x70] sm:$0xff] %v4008_v0  ;;  %269 = vst [vmem:[%s4060_s24 + $0x78] sm:$0xff] %v4008_v0 }
  0x19   : > { %270 = vst [vmem:[%s4060_s24 + $0x80] sm:$0xff] %v4008_v0  ;;  %271 = vst [vmem:[%s4060_s24 + $0x88] sm:$0xff] %v4008_v0 }
  0x1a   : > { %272 = vst [vmem:[%s4060_s24 + $0x90] sm:$0xff] %v4008_v0  ;;  %273 = vst [vmem:[%s4060_s24 + $0x98] sm:$0xff] %v4008_v0  ;;  %290 = sbr.rel (!%p286_p4) target bundleno = 33 (0x21), region = 36 }
  0x1b   : > { %274 = vst [vmem:[%s4060_s24 + $0xa0] sm:$0xff] %v4008_v0  ;;  %275 = vst [vmem:[%s4060_s24 + $0xa8] sm:$0xff] %v4008_v0 }
  0x1c   : > { %276 = vst [vmem:[%s4060_s24 + $0xb0] sm:$0xff] %v4008_v0  ;;  %277 = vst [vmem:[%s4060_s24 + $0xb8] sm:$0xff] %v4008_v0 }
  0x1d   : > { %278 = vst [vmem:[%s4060_s24 + $0xc0] sm:$0xff] %v4008_v0  ;;  %279 = vst [vmem:[%s4060_s24 + $0xc8] sm:$0xff] %v4008_v0 }
  0x1e   : > { %280 = vst [vmem:[%s4060_s24 + $0xd0] sm:$0xff] %v4008_v0  ;;  %281 = vst [vmem:[%s4060_s24 + $0xd8] sm:$0xff] %v4008_v0 }
  0x1f   : > { %282 = vst [vmem:[%s4060_s24 + $0xe0] sm:$0xff] %v4008_v0  ;;  %283 = vst [vmem:[%s4060_s24 + $0xe8] sm:$0xff] %v4008_v0 }
  0x20   : > { %284 = vst [vmem:[%s4060_s24 + $0xf0] sm:$0xff] %v4008_v0  ;;  %285 = vst [vmem:[%s4060_s24 + $0xf8] sm:$0xff] %v4008_v0 }
  0x21 PF: > { %v3704_v2 = vld [vmem:[%s4910_s1 + $0x40] sm:$0xff]   ;;  %v3706_v4 = vld [vmem:[%s4910_s1 + $0x48] sm:$0xff]   ;;  %v3708_v6 = vld [vmem:[%s4910_s1 + $0x50] sm:$0xff]  }
  0x22   : > { %v3705_v3 = vld [vmem:[%s4910_s1] sm:$0xff]   ;;  %3141 = vmatprep.subr.bf16.mxu0 %v3704_v2  ;;  %3661 = vmatprep.subr.bf16.mxu1 %v3704_v2  ;;  %v3707_v5 = vld [vmem:[%s4910_s1 + $0x8] sm:$0xff]   ;;  %v3709_v7 = vld [vmem:[%s4910_s1 + $0x10] sm:$0xff]  }
  0x23   : > { %3142 = vmatpush3.bf16.msra.mxu0 %v3705_v3  ;;  %3669 = vmatpush3.bf16.msra.mxu1 %v3705_v3  ;;  %v3710_v8 = vld [vmem:[%s4910_s1 + $0x58] sm:$0xff]   ;;  %v3712_v10 = vld [vmem:[%s4910_s1 + $0x60] sm:$0xff]   ;;  %v3714_v12 = vld [vmem:[%s4910_s1 + $0x68] sm:$0xff]  }
  0x24   : > { %3143 = vmatprep.subr.bf16.mxu0 %v3706_v4  ;;  %3662 = vmatprep.subr.bf16.mxu1 %v3706_v4  ;;  %v3711_v9 = vld [vmem:[%s4910_s1 + $0x18] sm:$0xff]   ;;  %v3713_v11 = vld [vmem:[%s4910_s1 + $0x20] sm:$0xff]   ;;  %v3715_v15 = vld [vmem:[%s4910_s1 + $0x28] sm:$0xff]  }
  0x25   : > { %v3722_v13 = vld [vmem:[%s4065_s27 + $0x4] ss:$36 sps:$4 sm:$0xff]   ;;  %v3716_v16 = vld [vmem:[%s4910_s1 + $0x70] sm:$0xff]   ;;  %v3718_v18 = vld [vmem:[%s4910_s1 + $0x78] sm:$0xff]  }
  0x26   : > { %v3725_v14 = vld [vmem:[%s4065_s27 + $0x364] ss:$36 sps:$4 sm:$0xff]   ;;  %1829 = vmatprep.mubr.bf16.mxu0 %v3722_v13  ;;  %v3717_v17 = vld [vmem:[%s4910_s1 + $0x30] sm:$0xff]   ;;  %v3719_v19 = vld [vmem:[%s4910_s1 + $0x38] sm:$0xff]  }
  0x27   : > { %3144 = vmatpush3.bf16.msra.mxu0 %v3707_v5  ;;  %3670 = vmatpush3.bf16.msra.mxu1 %v3707_v5  ;;  %v3726_v20 = vld [vmem:[%s4910_s1 + $0xc0] sm:$0xff]   ;;  %v3730_v26 = vld [vmem:[%s4910_s1 + $0xc8] sm:$0xff]   ;;  %v3738_v34 = vld [vmem:[%s4910_s1 + $0xd0] sm:$0xff]  }
  0x28   : > { %3145 = vmatprep.subr.bf16.mxu0 %v3708_v6  ;;  %3663 = vmatprep.subr.bf16.mxu1 %v3708_v6  ;;  %v3720_v21 = vld [vmem:[%s4065_s27] ss:$36 sps:$4 sm:$0xff]   ;;  %v3732_v27 = vld [vmem:[%s4065_s27 + $0x4c] ss:$36 sps:$4 sm:$0xff]   ;;  %v3740_v36 = vld [vmem:[%s4910_s1 + $0xd8] sm:$0xff]  }
  0x29   : > { %1925 = vmatprep.mubr.bf16.mxu1 %v3725_v14  ;;  %v3723_v22 = vld [vmem:[%s4065_s27 + $0x360] ss:$36 sps:$4 sm:$0xff]   ;;  %v3734_v28 = vld [vmem:[%s4065_s27 + $0x3ac] ss:$36 sps:$4 sm:$0xff]   ;;  %v3744_v37 = vld [vmem:[%s4065_s27 + $0x94] ss:$36 sps:$4 sm:$0xff]  }
  0x2a   : > { %v3727_v23 = vld [vmem:[%s4910_s1 + $0x140] sm:$0xff]   ;;  %v3741_v29 = vld [vmem:[%s4910_s1 + $0x148] sm:$0xff]   ;;  %v3739_v35 = vld [vmem:[%s4910_s1 + $0x90] sm:$0xff]  }
  0x2b   : > { %3146 = vmatpush3.bf16.msra.mxu0 %v3709_v7  ;;  %3671 = vmatpush3.bf16.msra.mxu1 %v3709_v7  ;;  %v3728_v24 = vld [vmem:[%s4910_s1 + $0x80] sm:$0xff]   ;;  %v3731_v30 = vld [vmem:[%s4910_s1 + $0x88] sm:$0xff]   ;;  %v3746_v38 = vld [vmem:[%s4065_s27 + $0x3f4] ss:$36 sps:$4 sm:$0xff]  }
  0x2c   : > { %3147 = vmatprep.subr.bf16.mxu0 %v3710_v8  ;;  %3664 = vmatprep.subr.bf16.mxu1 %v3710_v8  ;;  %v3729_v25 = vld [vmem:[%s4910_s1 + $0x100] sm:$0xff]   ;;  %v3743_v31 = vld [vmem:[%s4910_s1 + $0x108] sm:$0xff]   ;;  %v3742_v39 = vld [vmem:[%s4910_s1 + $0x98] sm:$0xff]  }
  0x2d   : > { %v3736_v32 = vld [vmem:[%s4065_s27 + $0x48] ss:$36 sps:$4 sm:$0xff]   ;;  %v3750_v40 = vld [vmem:[%s4910_s1 + $0xe0] sm:$0xff]   ;;  %v3748_v41 = vld [vmem:[%s4065_s27 + $0x90] ss:$36 sps:$4 sm:$0xff]  }
  0x2e   : > { %v3737_v33 = vld [vmem:[%s4065_s27 + $0x3a8] ss:$36 sps:$4 sm:$0xff]   ;;  %v3749_v42 = vld [vmem:[%s4065_s27 + $0x3f0] ss:$36 sps:$4 sm:$0xff]   ;;  %v3751_v44 = vld [vmem:[%s4910_s1 + $0xa0] sm:$0xff]  }
  0x2f   : > { %3148 = vmatpush3.bf16.msra.mxu0 %v3711_v9  ;;  %3672 = vmatpush3.bf16.msra.mxu1 %v3711_v9  ;;  %v3761_v43 = vld [vmem:[%s4910_s1 + $0x150] sm:$0xff]   ;;  %v3752_v45 = vld [vmem:[%s4910_s1 + $0xe8] sm:$0xff]   ;;  %v3754_v47 = vld [vmem:[%s4065_s27 + $0xdc] ss:$36 sps:$4 sm:$0xff]  }
  0x30   : > { %3149 = vmatprep.subr.bf16.mxu0 %v3712_v10  ;;  %3665 = vmatprep.subr.bf16.mxu1 %v3712_v10  ;;  %v3763_v46 = vld [vmem:[%s4910_s1 + $0x110] sm:$0xff]   ;;  %v3756_v48 = vld [vmem:[%s4065_s27 + $0x43c] ss:$36 sps:$4 sm:$0xff]   ;;  %v3753_v49 = vld [vmem:[%s4910_s1 + $0xa8] sm:$0xff]  }
  0x31   : > { %v3758_v50 = vld [vmem:[%s4065_s27 + $0xd8] ss:$36 sps:$4 sm:$0xff]   ;;  %v3760_v52 = vld [vmem:[%s4910_s1 + $0xf0] sm:$0xff]   ;;  %v3766_v54 = vld [vmem:[%s4065_s27 + $0x124] ss:$36 sps:$4 sm:$0xff]  }
  0x32   : > { %v3759_v51 = vld [vmem:[%s4065_s27 + $0x438] ss:$36 sps:$4 sm:$0xff]   ;;  %v3762_v53 = vld [vmem:[%s4910_s1 + $0xb0] sm:$0xff]   ;;  %v3768_v60 = vld [vmem:[%s4065_s27 + $0x8] ss:$36 sps:$4 sm:$0xff]  }
  0x33   : > { %3150 = vmatpush3.bf16.msra.mxu0 %v3713_v11  ;;  %3673 = vmatpush3.bf16.msra.mxu1 %v3713_v11  ;;  %v3764_v55 = vld [vmem:[%s4910_s1 + $0xf8] sm:$0xff]   ;;  %v3770_v58 = vld [vmem:[%s4065_s27 + $0xc] ss:$36 sps:$4 sm:$0xff]   ;;  %v3771_v61 = vld [vmem:[%s4065_s27 + $0x120] ss:$36 sps:$4 sm:$0xff]  }
  0x34   : > { %3151 = vmatprep.subr.bf16.mxu0 %v3714_v12  ;;  %3666 = vmatprep.subr.bf16.mxu1 %v3714_v12  ;;  %v3774_v56 = vld [vmem:[%s4910_s1 + $0x158] sm:$0xff]   ;;  %v3772_v62 = vld [vmem:[%s4910_s1 + $0x1c0] sm:$0xff]   ;;  %v3776_v0 = vld [vmem:[%s4065_s27 + $0x16c] ss:$36 sps:$4 sm:$0xff]  }
  0x35   : > { %v3775_v57 = vld [vmem:[%s4910_s1 + $0x118] sm:$0xff]   ;;  %v3773_v63 = vld [vmem:[%s4910_s1 + $0x180] sm:$0xff]   ;;  %v3789_v4 = vld [vmem:[%s4910_s1 + $0x1c8] sm:$0xff]  }
  0x36   : > { %v3765_v59 = vld [vmem:[%s4910_s1 + $0xb8] sm:$0xff]   ;;  %v3788_v1 = vld [vmem:[%s4910_s1 + $0x160] sm:$0xff]   ;;  %v3791_v5 = vld [vmem:[%s4910_s1 + $0x188] sm:$0xff]  }
  0x37   : > { %3152 = vmatpush3.bf16.msra.mxu0 %v3715_v15  ;;  %3674 = vmatpush3.bf16.msra.mxu1 %v3715_v15  ;;  %v3778_v2 = vld [vmem:[%s4065_s27 + $0x54] ss:$36 sps:$4 sm:$0xff]   ;;  %v3790_v3 = vld [vmem:[%s4910_s1 + $0x120] sm:$0xff]   ;;  %v3780_v6 = vld [vmem:[%s4065_s27 + $0x168] ss:$36 sps:$4 sm:$0xff]  }
  0x38   : > { %3153 = vmatprep.subr.bf16.mxu0 %v3716_v16  ;;  %3667 = vmatprep.subr.bf16.mxu1 %v3716_v16  ;;  %v3798_v7 = vld [vmem:[%s4910_s1 + $0x168] sm:$0xff]   ;;  %v3781_v9 = vld [vmem:[%s4065_s27 + $0x50] ss:$36 sps:$4 sm:$0xff]   ;;  %v3784_v11 = vld [vmem:[%s4065_s27 + $0x9c] ss:$36 sps:$4 sm:$0xff]  }
  0x39   : > { %v3799_v8 = vld [vmem:[%s4910_s1 + $0x128] sm:$0xff]   ;;  %v3782_v10 = vld [vmem:[%s4065_s27 + $0x1b4] ss:$36 sps:$4 sm:$0xff]   ;;  %v3792_v16 = vld [vmem:[%s4065_s27 + $0x1fc] ss:$36 sps:$4 sm:$0xff]  }
  0x3a   : > { %v3806_v12 = vld [vmem:[%s4910_s1 + $0x1d0] sm:$0xff]   ;;  %v3787_v15 = vld [vmem:[%s4065_s27 + $0x98] ss:$36 sps:$4 sm:$0xff]  }
  0x3b   : > { %3154 = vmatpush3.bf16.msra.mxu0 %v3717_v17  ;;  %3675 = vmatpush3.bf16.msra.mxu1 %v3717_v17  ;;  %v3807_v13 = vld [vmem:[%s4910_s1 + $0x190] sm:$0xff]  }
  0x3c   : > { %3155 = vmatprep.subr.bf16.mxu0 %v3718_v18  ;;  %3668 = vmatprep.subr.bf16.mxu1 %v3718_v18  ;;  %v3786_v14 = vld [vmem:[%s4065_s27 + $0x1b0] ss:$36 sps:$4 sm:$0xff]  }
  0x3d   : > { %v3814_v17 = vld [vmem:[%s4910_s1 + $0x170] sm:$0xff]  }
  0x3e   : > { %v3815_v18 = vld [vmem:[%s4910_s1 + $0x130] sm:$0xff]  }
  0x3f   : > { %3156 = vmatpush3.bf16.msra.mxu0 %v3719_v19  ;;  %3676 = vmatpush3.bf16.msra.mxu1 %v3719_v19  ;;  %v3794_v19 = vld [vmem:[%s4065_s27 + $0xe4] ss:$36 sps:$4 sm:$0xff]  }
  0x40   : > { %3253 = vmatprep.subr.bf16.mxu1 %v3726_v20  ;;  %3365 = vmatprep.subr.bf16.mxu0 %v3727_v23  ;;  %v3822_v20 = vld [vmem:[%s4910_s1 + $0x1d8] sm:$0xff]  }
  0x41   : > { %v3824_v23 = vld [vmem:[%s4910_s1 + $0x178] sm:$0xff]  }
  0x42   : > { %1830 = vmatmul.mubr.bf16.vlgmr.msra.gmra.mrb[0].mxu0 %v3720_v21  ;;  %1926 = vmatmul.mubr.bf16.vlgmr.msra.gmra.mrb[0].mxu1 %v3723_v22  ;;  %v3823_v21 = vld [vmem:[%s4910_s1 + $0x198] sm:$0xff]  }
  0x43   : > { %3254 = vmatpush3.bf16.msra.mxu1 %v3728_v24  ;;  %3366 = vmatpush3.bf16.msra.mxu0 %v3729_v25  ;;  %v3796_v22 = vld [vmem:[%s4065_s27 + $0x1f8] ss:$36 sps:$4 sm:$0xff]   ;;  %v3797_v25 = vld [vmem:[%s4065_s27 + $0xe0] ss:$36 sps:$4 sm:$0xff]  }
  0x44   : > { %3255 = vmatprep.subr.bf16.mxu1 %v3730_v26  ;;  %1837 = vmatprep.mubr.bf16.mxu0 %v3732_v27  ;;  %v3825_v24 = vld [vmem:[%s4910_s1 + $0x138] sm:$0xff]   ;;  %v3800_v26 = vld [vmem:[%s4065_s27 + $0x244] ss:$36 sps:$4 sm:$0xff]   ;;  %v3802_v27 = vld [vmem:[%s4065_s27 + $0x12c] ss:$36 sps:$4 sm:$0xff]  }
  0x45   : > { %1933 = vmatprep.mubr.bf16.mxu1 %v3734_v28  ;;  %3367 = vmatprep.subr.bf16.mxu0 %v3741_v29  ;;  %v3838_v28 = vld [vmem:[%s4910_s1 + $0x1e0] sm:$0xff]  }
  0x46   : > { %v3804_v29 = vld [vmem:[%s4065_s27 + $0x240] ss:$36 sps:$4 sm:$0xff]  }
  0x47   : > { %3256 = vmatpush3.bf16.msra.mxu1 %v3731_v30  ;;  %3368 = vmatpush3.bf16.msra.mxu0 %v3743_v31  ;;  %v3839_v30 = vld [vmem:[%s4910_s1 + $0x200] sm:$0xff]  }
  0x48   : > { %3257 = vmatprep.subr.bf16.mxu1 %v3738_v34  ;;  %3369 = vmatprep.subr.bf16.mxu0 %v3761_v43  ;;  %v3840_v31 = vld [vmem:[%s4910_s1 + $0x1a0] sm:$0xff]   ;;  %v3810_v34 = vld [vmem:[%s4065_s27 + $0x174] ss:$36 sps:$4 sm:$0xff]  }
  0x49   : > { %v3868_v43 = vld [vmem:[%s4910_s1 + $0x1f0] sm:$0xff]  }
  0x4a   : > { %1838 = vmatmul.mubr.bf16.gmra.mrb[4].mxu0 %v3736_v32  ;;  %1934 = vmatmul.mubr.bf16.gmra.mrb[4].mxu1 %v3737_v33  ;;  %v3805_v32 = vld [vmem:[%s4065_s27 + $0x128] ss:$36 sps:$4 sm:$0xff]  }
  0x4b   : > { %3258 = vmatpush3.bf16.msra.mxu1 %v3739_v35  ;;  %1845 = vmatprep.mubr.bf16.mxu0 %v3744_v37  ;;  %v3808_v33 = vld [vmem:[%s4065_s27 + $0x28c] ss:$36 sps:$4 sm:$0xff]  }
  0x4c   : > { %3259 = vmatprep.subr.bf16.mxu1 %v3740_v36  ;;  %1941 = vmatprep.mubr.bf16.mxu1 %v3746_v38  ;;  %v3853_v35 = vld [vmem:[%s4910_s1 + $0x1e8] sm:$0xff]   ;;  %v3813_v37 = vld [vmem:[%s4065_s27 + $0x170] ss:$36 sps:$4 sm:$0xff]  }
  0x4d   : > { %3370 = vmatpush3.bf16.msra.mxu0 %v3763_v46  ;;  %v3812_v36 = vld [vmem:[%s4065_s27 + $0x288] ss:$36 sps:$4 sm:$0xff]  }
  0x4e   : > { %3371 = vmatprep.subr.bf16.mxu0 %v3774_v56  ;;  %v3855_v38 = vld [vmem:[%s4910_s1 + $0x1a8] sm:$0xff]   ;;  %v3843_v56 = vld [vmem:[%s4065_s27 + $0x5c] ss:$36 sps:$4 sm:$0xff]  }
  0x4f   : > { %3260 = vmatpush3.bf16.msra.mxu1 %v3742_v39  ;;  %v3816_v39 = vld [vmem:[%s4065_s27 + $0x2d4] ss:$36 sps:$4 sm:$0xff]   ;;  %v3828_v46 = vld [vmem:[%s4065_s27 + $0x204] ss:$36 sps:$4 sm:$0xff]  }
  0x50   : > { %3261 = vmatprep.subr.bf16.mxu1 %v3750_v40  ;;  %v3818_v40 = vld [vmem:[%s4065_s27 + $0x1bc] ss:$36 sps:$4 sm:$0xff]  }
  0x51   : > { %3372 = vmatpush3.bf16.msra.mxu0 %v3775_v57  ;;  %v3854_v57 = vld [vmem:[%s4910_s1 + $0x208] sm:$0xff]  }
  0x52   : > { %1846 = vmatmul.mubr.bf16.gmra.mrb[8].mxu0 %v3748_v41  ;;  %1942 = vmatmul.mubr.bf16.gmra.mrb[8].mxu1 %v3749_v42  ;;  %v3820_v41 = vld [vmem:[%s4065_s27 + $0x2d0] ss:$36 sps:$4 sm:$0xff]   ;;  %v3821_v42 = vld [vmem:[%s4065_s27 + $0x1b8] ss:$36 sps:$4 sm:$0xff]  }
  0x53   : > { %3262 = vmatpush3.bf16.msra.mxu1 %v3751_v44  ;;  %1853 = vmatprep.mubr.bf16.mxu0 %v3754_v47  ;;  %v3826_v44 = vld [vmem:[%s4065_s27 + $0x31c] ss:$36 sps:$4 sm:$0xff]  }
  0x54   : > { %3263 = vmatprep.subr.bf16.mxu1 %v3752_v45  ;;  %1949 = vmatprep.mubr.bf16.mxu1 %v3756_v48  ;;  %v3870_v45 = vld [vmem:[%s4910_s1 + $0x1b0] sm:$0xff]   ;;  %v3830_v47 = vld [vmem:[%s4065_s27 + $0x318] ss:$36 sps:$4 sm:$0xff]   ;;  %v3831_v48 = vld [vmem:[%s4065_s27 + $0x200] ss:$36 sps:$4 sm:$0xff]  }
  0x55   : > { %3373 = vmatprep.subr.bf16.mxu0 %v3788_v1  ;;  %v3851_v1 = vld [vmem:[%s4065_s27 + $0x2d8] ss:$36 sps:$4 sm:$0xff]  }
  0x56   : > { %3374 = vmatpush3.bf16.msra.mxu0 %v3790_v3  ;;  %v3856_v3 = vld [vmem:[%s4065_s27 + $0x324] ss:$36 sps:$4 sm:$0xff]  }
  0x57   : > { %3264 = vmatpush3.bf16.msra.mxu1 %v3753_v49  ;;  %3375 = vmatprep.subr.bf16.mxu0 %v3798_v7  ;;  %v3883_v49 = vld [vmem:[%s4910_s1 + $0x1f8] sm:$0xff]   ;;  %v3861_v7 = vld [vmem:[%s4065_s27 + $0xe8] ss:$36 sps:$4 sm:$0xff]  }
  0x58   : > { %3265 = vmatprep.subr.bf16.mxu1 %v3760_v52  ;;  %v3836_v52 = vld [vmem:[%s4065_s27 + $0x14] ss:$36 sps:$4 sm:$0xff]  }
  0x5a   : > { %1854 = vmatmul.mubr.bf16.gmra.mrb[12].mxu0 %v3758_v50  ;;  %1950 = vmatmul.mubr.bf16.gmra.mrb[12].mxu1 %v3759_v51  ;;  %v3832_v50 = vld [vmem:[%s4065_s27 + $0x24c] ss:$36 sps:$4 sm:$0xff]   ;;  %v3885_v51 = vld [vmem:[%s4910_s1 + $0x1b8] sm:$0xff]  }
  0x5b   : > { %3266 = vmatpush3.bf16.msra.mxu1 %v3762_v53  ;;  %1861 = vmatprep.mubr.bf16.mxu0 %v3766_v54  ;;  %v3834_v53 = vld [vmem:[%s4065_s27 + $0x10] ss:$36 sps:$4 sm:$0xff]   ;;  %v3837_v54 = vld [vmem:[%s4065_s27 + $0x248] ss:$36 sps:$4 sm:$0xff]  }
  0x5c   : > { %3267 = vmatprep.subr.bf16.mxu1 %v3764_v55  ;;  %1990 = vmatprep.mubr.bf16.mxu1 %v3770_v58  ;;  %v3841_v55 = vld [vmem:[%s4065_s27 + $0x294] ss:$36 sps:$4 sm:$0xff]  }
  0x5d   : > { %3376 = vmatpush3.bf16.msra.mxu0 %v3799_v8  ;;  %v3869_v58 = vld [vmem:[%s4910_s1 + $0x210] sm:$0xff]  }
  0x5e   : > { %3377 = vmatprep.subr.bf16.mxu0 %v3814_v17  ;;  %v3924_v8 = vld [vmem:[%s4910_s1 + $0x230] sm:$0xff]   ;;  %v3876_v17 = vld [vmem:[%s4065_s27 + $0x178] ss:$36 sps:$4 sm:$0xff]  }
  0x5f   : > { %3268 = vmatpush3.bf16.msra.mxu1 %v3765_v59  ;;  %v3845_v59 = vld [vmem:[%s4065_s27 + $0x290] ss:$36 sps:$4 sm:$0xff]  }
  0x60   : > { %3477 = vmatprep.subr.bf16.mxu1 %v3772_v62  ;;  %v3849_v62 = vld [vmem:[%s4065_s27 + $0xa4] ss:$36 sps:$4 sm:$0xff]  }
  0x61   : > { %3378 = vmatpush3.bf16.msra.mxu0 %v3815_v18  ;;  %v3877_v18 = vld [vmem:[%s4065_s27 + $0x3fc] ss:$36 sps:$4 sm:$0xff]  }
  0x62   : > { %1862 = vmatmul.mubr.bf16.gmra.mrb[16].mxu0 %v3771_v61  ;;  %1991 = vmatmul.mubr.bf16.vlgmr.msra.gmra.mrb[16].mxu1 %v3768_v60  ;;  %v3846_v60 = vld [vmem:[%s4065_s27 + $0x58] ss:$36 sps:$4 sm:$0xff]  }
  0x63   : > { %3478 = vmatpush3.bf16.msra.mxu1 %v3773_v63  ;;  %1869 = vmatprep.mubr.bf16.mxu0 %v3776_v0  ;;  %v3847_v61 = vld [vmem:[%s4065_s27 + $0x2dc] ss:$36 sps:$4 sm:$0xff]  }
  0x64   : > { %1998 = vmatprep.mubr.bf16.mxu1 %v3778_v2  ;;  %3479 = vmatprep.subr.bf16.mxu1 %v3789_v4  ;;  %v3884_v63 = vld [vmem:[%s4910_s1 + $0x218] sm:$0xff]   ;;  %v3898_v0 = vld [vmem:[%s4910_s1 + $0x220] sm:$0xff]   ;;  %v3858_v4 = vld [vmem:[%s4065_s27 + $0xec] ss:$36 sps:$4 sm:$0xff]  }
  0x65   : > { %3379 = vmatprep.subr.bf16.mxu0 %v3824_v23  ;;  %v3852_v2 = vld [vmem:[%s4065_s27 + $0xa0] ss:$36 sps:$4 sm:$0xff]   ;;  %v3888_v23 = vld [vmem:[%s4065_s27 + $0x20c] ss:$36 sps:$4 sm:$0xff]  }
  0x66   : > { %3380 = vmatpush3.bf16.msra.mxu0 %v3825_v24  ;;  %v3890_v24 = vld [vmem:[%s4065_s27 + $0x440] ss:$36 sps:$4 sm:$0xff]  }
  0x67   : > { %3480 = vmatpush3.bf16.msra.mxu1 %v3791_v5  ;;  %3613 = vmatprep.subr.bf16.mxu0 %v3839_v30  ;;  %v3911_v5 = vld [vmem:[%s4910_s1 + $0x228] sm:$0xff]  }
  0x68   : > { %3481 = vmatprep.subr.bf16.mxu1 %v3806_v12  ;;  %v3866_v12 = vld [vmem:[%s4065_s27 + $0x368] ss:$36 sps:$4 sm:$0xff]  }
  0x6a   : > { %1870 = vmatmul.mubr.bf16.gmra.mrb[20].mxu0 %v3780_v6  ;;  %1999 = vmatmul.mubr.bf16.gmra.mrb[20].mxu1 %v3781_v9  ;;  %v3860_v6 = vld [vmem:[%s4065_s27 + $0x320] ss:$36 sps:$4 sm:$0xff]   ;;  %v3862_v9 = vld [vmem:[%s4065_s27 + $0x36c] ss:$36 sps:$4 sm:$0xff]  }
  0x6b   : > { %1877 = vmatprep.mubr.bf16.mxu0 %v3782_v10  ;;  %2006 = vmatprep.mubr.bf16.mxu1 %v3784_v11  ;;  %v3864_v10 = vld [vmem:[%s4065_s27 + $0x134] ss:$36 sps:$4 sm:$0xff]  }
  0x6c   : > { %3482 = vmatpush3.bf16.msra.mxu1 %v3807_v13  ;;  %v3937_v11 = vld [vmem:[%s4910_s1 + $0x238] sm:$0xff]   ;;  %v3867_v13 = vld [vmem:[%s4065_s27 + $0x130] ss:$36 sps:$4 sm:$0xff]  }
  0x6d   : > { %3483 = vmatprep.subr.bf16.mxu1 %v3822_v20  ;;  %v3881_v20 = vld [vmem:[%s4065_s27 + $0x3f8] ss:$36 sps:$4 sm:$0xff]  }
  0x70   : > { %3484 = vmatpush3.bf16.msra.mxu1 %v3823_v21  ;;  %v3882_v21 = vld [vmem:[%s4065_s27 + $0x1c0] ss:$36 sps:$4 sm:$0xff]  }
  0x71   : > { %3485 = vmatprep.subr.bf16.mxu1 %v3838_v28  ;;  %v3894_v28 = vld [vmem:[%s4065_s27 + $0x18] ss:$36 sps:$4 sm:$0xff]  }
  0x72   : > { %1878 = vmatmul.mubr.bf16.gmra.mrb[24].mxu0 %v3786_v14  ;;  %2007 = vmatmul.mubr.bf16.gmra.mrb[24].mxu1 %v3787_v15  ;;  %v3871_v14 = vld [vmem:[%s4065_s27 + $0x3b4] ss:$36 sps:$4 sm:$0xff]   ;;  %v3873_v15 = vld [vmem:[%s4065_s27 + $0x17c] ss:$36 sps:$4 sm:$0xff]  }
  0x73   : > { %1885 = vmatprep.mubr.bf16.mxu0 %v3792_v16  ;;  %2014 = vmatprep.mubr.bf16.mxu1 %v3794_v19  ;;  %v3875_v16 = vld [vmem:[%s4065_s27 + $0x3b0] ss:$36 sps:$4 sm:$0xff]   ;;  %v3879_v19 = vld [vmem:[%s4065_s27 + $0x1c4] ss:$36 sps:$4 sm:$0xff]  }
  0x74   : > { %3486 = vmatpush3.bf16.msra.mxu1 %v3840_v31  ;;  %v3901_v31 = vld [vmem:[%s4065_s27 + $0x64] ss:$36 sps:$4 sm:$0xff]  }
  0x75   : > { %3487 = vmatprep.subr.bf16.mxu1 %v3853_v35  ;;  %v3907_v35 = vld [vmem:[%s4065_s27 + $0xac] ss:$36 sps:$4 sm:$0xff]  }
  0x78   : > { %3488 = vmatpush3.bf16.msra.mxu1 %v3855_v38  ;;  %v3912_v38 = vld [vmem:[%s4065_s27 + $0x32c] ss:$36 sps:$4 sm:$0xff]  }
  0x79   : > { %3489 = vmatprep.subr.bf16.mxu1 %v3868_v43  ;;  %v3920_v43 = vld [vmem:[%s4065_s27 + $0x13c] ss:$36 sps:$4 sm:$0xff]  }
  0x7a   : > { %1886 = vmatmul.mubr.bf16.gmra.mrb[28].mxu0 %v3796_v22  ;;  %2015 = vmatmul.mubr.bf16.gmra.mrb[28].mxu1 %v3797_v25  ;;  %v3886_v22 = vld [vmem:[%s4065_s27 + $0x444] ss:$36 sps:$4 sm:$0xff]  }
  0x7b   : > { %1893 = vmatprep.mubr.bf16.mxu0 %v3800_v26  ;;  %2022 = vmatprep.mubr.bf16.mxu1 %v3802_v27  ;;  %v3891_v25 = vld [vmem:[%s4065_s27 + $0x208] ss:$36 sps:$4 sm:$0xff]   ;;  %v3892_v26 = vld [vmem:[%s4065_s27 + $0x254] ss:$36 sps:$4 sm:$0xff]   ;;  %v3896_v27 = vld [vmem:[%s4065_s27 + $0x1c] ss:$36 sps:$4 sm:$0xff]  }
  0x7c   : > { %3490 = vmatpush3.bf16.msra.mxu1 %v3870_v45  ;;  %v3923_v45 = vld [vmem:[%s4065_s27 + $0x138] ss:$36 sps:$4 sm:$0xff]  }
  0x7d   : > { %3491 = vmatprep.subr.bf16.mxu1 %v3883_v49  ;;  %v3930_v49 = vld [vmem:[%s4065_s27 + $0x180] ss:$36 sps:$4 sm:$0xff]  }
  0x80   : > { %3492 = vmatpush3.bf16.msra.mxu1 %v3885_v51  ;;  %v3933_v51 = vld [vmem:[%s4065_s27 + $0x1cc] ss:$36 sps:$4 sm:$0xff]  }
  0x82   : > { %1894 = vmatmul.mubr.bf16.gmra.mrb[32].mxu0 %v3804_v29  ;;  %2023 = vmatmul.mubr.bf16.gmra.mrb[32].mxu1 %v3805_v32  ;;  %v3897_v29 = vld [vmem:[%s4065_s27 + $0x250] ss:$36 sps:$4 sm:$0xff]   ;;  %v3903_v32 = vld [vmem:[%s4065_s27 + $0x298] ss:$36 sps:$4 sm:$0xff]  }
  0x83   : > { %1901 = vmatprep.mubr.bf16.mxu0 %v3808_v33  ;;  %2030 = vmatprep.mubr.bf16.mxu1 %v3810_v34  ;;  %v3904_v33 = vld [vmem:[%s4065_s27 + $0x60] ss:$36 sps:$4 sm:$0xff]  }
  0x84   : > { %v3905_v34 = vld [vmem:[%s4065_s27 + $0x2e4] ss:$36 sps:$4 sm:$0xff]  }
  0x8a   : > { %1902 = vmatmul.mubr.bf16.gmra.mrb[36].mxu0 %v3812_v36  ;;  %2031 = vmatmul.mubr.bf16.gmra.mrb[36].mxu1 %v3813_v37  ;;  %v3909_v36 = vld [vmem:[%s4065_s27 + $0x2e0] ss:$36 sps:$4 sm:$0xff]   ;;  %v3910_v37 = vld [vmem:[%s4065_s27 + $0xa8] ss:$36 sps:$4 sm:$0xff]  }
  0x8b   : > { %1909 = vmatprep.mubr.bf16.mxu0 %v3816_v39  ;;  %2038 = vmatprep.mubr.bf16.mxu1 %v3818_v40  ;;  %v3914_v39 = vld [vmem:[%s4065_s27 + $0xf4] ss:$36 sps:$4 sm:$0xff]   ;;  %v3916_v40 = vld [vmem:[%s4065_s27 + $0x328] ss:$36 sps:$4 sm:$0xff]  }
  0x92   : > { %1910 = vmatmul.mubr.bf16.gmra.mrb[40].mxu0 %v3820_v41  ;;  %2039 = vmatmul.mubr.bf16.gmra.mrb[40].mxu1 %v3821_v42  ;;  %v3917_v41 = vld [vmem:[%s4065_s27 + $0xf0] ss:$36 sps:$4 sm:$0xff]  }
  0x93   : > { %1917 = vmatprep.mubr.bf16.mxu0 %v3826_v44  ;;  %2046 = vmatprep.mubr.bf16.mxu1 %v3828_v46  ;;  %v3918_v42 = vld [vmem:[%s4065_s27 + $0x374] ss:$36 sps:$4 sm:$0xff]   ;;  %v3925_v46 = vld [vmem:[%s4065_s27 + $0x3bc] ss:$36 sps:$4 sm:$0xff]  }
  0x94   : > { %v3922_v44 = vld [vmem:[%s4065_s27 + $0x370] ss:$36 sps:$4 sm:$0xff]  }
  0x9a   : > { %1918 = vmatmul.mubr.bf16.gmra.mrb[44].mxu0 %v3830_v47  ;;  %2047 = vmatmul.mubr.bf16.gmra.mrb[44].mxu1 %v3831_v48  ;;  %v3927_v47 = vld [vmem:[%s4065_s27 + $0x184] ss:$36 sps:$4 sm:$0xff]   ;;  %v3929_v48 = vld [vmem:[%s4065_s27 + $0x3b8] ss:$36 sps:$4 sm:$0xff]  }
  0x9b   : > { %2054 = vmatprep.mubr.bf16.mxu1 %v3832_v50  ;;  %2151 = vmatprep.mubr.bf16.mxu0 %v3836_v52  ;;  %v3931_v50 = vld [vmem:[%s4065_s27 + $0x404] ss:$36 sps:$4 sm:$0xff]  }
  0x9c   : > { %v3935_v52 = vld [vmem:[%s4065_s27 + $0x400] ss:$36 sps:$4 sm:$0xff]  }
  0xa2   : > { %2055 = vmatmul.mubr.bf16.gmra.mrb[48].mxu1 %v3837_v54  ;;  %2152 = vmatmul.mubr.bf16.vlgmr.msra.gmra.mrb[48].mxu0 %v3834_v53  ;;  %v3936_v53 = vld [vmem:[%s4065_s27 + $0x1c8] ss:$36 sps:$4 sm:$0xff]  }
  0xa3   : > { %3614 = vmatpush3.bf16.msra.mxu0 %v3839_v30  ;;  %2062 = vmatprep.mubr.bf16.mxu1 %v3841_v55  ;;  %v3899_v30 = vld [vmem:[%s4065_s27 + $0x29c] ss:$36 sps:$4 sm:$0xff]   ;;  %v3938_v54 = vld [vmem:[%s4065_s27 + $0x44c] ss:$36 sps:$4 sm:$0xff]   ;;  %v3940_v55 = vld [vmem:[%s4065_s27 + $0x214] ss:$36 sps:$4 sm:$0xff]  }
  0xa4   : > { %2159 = vmatprep.mubr.bf16.mxu0 %v3843_v56  ;;  %3615 = vmatprep.subr.bf16.mxu0 %v3854_v57 }
  0xa7   : > { %3616 = vmatpush3.bf16.msra.mxu0 %v3854_v57 }
  0xa8   : > { %3617 = vmatprep.subr.bf16.mxu0 %v3869_v58 }
  0xaa   : > { %2063 = vmatmul.mubr.bf16.gmra.mrb[52].mxu1 %v3845_v59  ;;  %2160 = vmatmul.mubr.bf16.gmra.mrb[52].mxu0 %v3846_v60  ;;  %v3942_v60 = vld [vmem:[%s4065_s27 + $0x448] ss:$36 sps:$4 sm:$0xff]  }
  0xab   : > { %2070 = vmatprep.mubr.bf16.mxu1 %v3847_v61  ;;  %2167 = vmatprep.mubr.bf16.mxu0 %v3849_v62  ;;  %v3943_v61 = vld [vmem:[%s4065_s27 + $0x210] ss:$36 sps:$4 sm:$0xff]  }
  0xac   : > { %3618 = vmatpush3.bf16.msra.mxu0 %v3869_v58 }
  0xad   : > { %3619 = vmatprep.subr.bf16.mxu0 %v3884_v63 }
  0xb0   : > { %3620 = vmatpush3.bf16.msra.mxu0 %v3884_v63 }
  0xb1   : > { %3621 = vmatprep.subr.bf16.mxu0 %v3898_v0 }
  0xb2   : > { %2071 = vmatmul.mubr.bf16.gmra.mrb[56].mxu1 %v3851_v1  ;;  %2168 = vmatmul.mubr.bf16.gmra.mrb[56].mxu0 %v3852_v2  ;;  %v3944_v2 = vld [vmem:[%s4065_s27 + $0x25c] ss:$36 sps:$4 sm:$0xff]  }
  0xb3   : > { %2078 = vmatprep.mubr.bf16.mxu1 %v3856_v3  ;;  %2175 = vmatprep.mubr.bf16.mxu0 %v3858_v4  ;;  %v3946_v3 = vld [vmem:[%s4065_s27 + $0x20] ss:$36 sps:$4 sm:$0xff]  }
  0xb4   : > { %3622 = vmatpush3.bf16.msra.mxu0 %v3898_v0 }
  0xb5   : > { %3623 = vmatprep.subr.bf16.mxu0 %v3911_v5 }
  0xb8   : > { %3624 = vmatpush3.bf16.msra.mxu0 %v3911_v5 }
  0xb9   : > { %3625 = vmatprep.subr.bf16.mxu0 %v3924_v8 }
  0xba   : > { %2079 = vmatmul.mubr.bf16.gmra.mrb[60].mxu1 %v3860_v6  ;;  %2176 = vmatmul.mubr.bf16.gmra.mrb[60].mxu0 %v3861_v7 }
  0xbb   : > { %2086 = vmatprep.mubr.bf16.mxu1 %v3862_v9  ;;  %2183 = vmatprep.mubr.bf16.mxu0 %v3864_v10 }
  0xbc   : > { %3626 = vmatpush3.bf16.msra.mxu0 %v3924_v8 }
  0xbd   : > { %3627 = vmatprep.subr.bf16.mxu0 %v3937_v11 }
  0xc0   : > { %3628 = vmatpush3.bf16.msra.mxu0 %v3937_v11 }
  0xc2   : > { %2087 = vmatmul.mubr.bf16.gmra.mrb[64].mxu1 %v3866_v12  ;;  %2184 = vmatmul.mubr.bf16.gmra.mrb[64].mxu0 %v3867_v13  ;;  %v3947_v12 = vld [vmem:[%s4065_s27 + $0x258] ss:$36 sps:$4 sm:$0xff]   ;;  %v3948_v13 = vld [vmem:[%s4065_s27 + $0x68] ss:$36 sps:$4 sm:$0xff]  }
  0xc3   : > { %2094 = vmatprep.mubr.bf16.mxu1 %v3871_v14  ;;  %2191 = vmatprep.mubr.bf16.mxu0 %v3873_v15 }
  0xca   : > { %2095 = vmatmul.mubr.bf16.gmra.mrb[68].mxu1 %v3875_v16  ;;  %2192 = vmatmul.mubr.bf16.gmra.mrb[68].mxu0 %v3876_v17 }
  0xcb   : > { %2102 = vmatprep.mubr.bf16.mxu1 %v3877_v18  ;;  %2199 = vmatprep.mubr.bf16.mxu0 %v3879_v19  ;;  %v3949_v18 = vld [vmem:[%s4065_s27 + $0x2a4] ss:$36 sps:$4 sm:$0xff]   ;;  %v3951_v19 = vld [vmem:[%s4065_s27 + $0xb0] ss:$36 sps:$4 sm:$0xff]  }
  0xd2   : > { %2103 = vmatmul.mubr.bf16.gmra.mrb[72].mxu1 %v3881_v20  ;;  %2200 = vmatmul.mubr.bf16.gmra.mrb[72].mxu0 %v3882_v21 }
  0xd3   : > { %2110 = vmatprep.mubr.bf16.mxu1 %v3886_v22  ;;  %2207 = vmatprep.mubr.bf16.mxu0 %v3888_v23 }
  0xda   : > { %2111 = vmatmul.mubr.bf16.gmra.mrb[76].mxu1 %v3890_v24  ;;  %2208 = vmatmul.mubr.bf16.gmra.mrb[76].mxu0 %v3891_v25 }
  0xdb   : > { %2215 = vmatprep.mubr.bf16.mxu0 %v3892_v26  ;;  %2312 = vmatprep.mubr.bf16.mxu1 %v3896_v27 }
  0xe2   : > { %2216 = vmatmul.mubr.bf16.gmra.mrb[80].mxu0 %v3897_v29  ;;  %2313 = vmatmul.mubr.bf16.vlgmr.msra.gmra.mrb[80].mxu1 %v3894_v28  ;;  %v3952_v28 = vld [vmem:[%s4065_s27 + $0x2a0] ss:$36 sps:$4 sm:$0xff]   ;;  %v3953_v29 = vld [vmem:[%s4065_s27 + $0xf8] ss:$36 sps:$4 sm:$0xff]  }
  0xe3   : > { %2223 = vmatprep.mubr.bf16.mxu0 %v3899_v30  ;;  %2320 = vmatprep.mubr.bf16.mxu1 %v3901_v31 }
  0xea   : > { %2224 = vmatmul.mubr.bf16.gmra.mrb[84].mxu0 %v3903_v32  ;;  %2321 = vmatmul.mubr.bf16.gmra.mrb[84].mxu1 %v3904_v33 }
  0xeb   : > { %2231 = vmatprep.mubr.bf16.mxu0 %v3905_v34  ;;  %2328 = vmatprep.mubr.bf16.mxu1 %v3907_v35  ;;  %v3954_v34 = vld [vmem:[%s4065_s27 + $0x2ec] ss:$36 sps:$4 sm:$0xff]   ;;  %v3956_v35 = vld [vmem:[%s4065_s27 + $0x140] ss:$36 sps:$4 sm:$0xff]  }
  0xf2   : > { %2232 = vmatmul.mubr.bf16.gmra.mrb[88].mxu0 %v3909_v36  ;;  %2329 = vmatmul.mubr.bf16.gmra.mrb[88].mxu1 %v3910_v37 }
  0xf3   : > { %2239 = vmatprep.mubr.bf16.mxu0 %v3912_v38  ;;  %2336 = vmatprep.mubr.bf16.mxu1 %v3914_v39 }
  0xfa   : > { %2240 = vmatmul.mubr.bf16.gmra.mrb[92].mxu0 %v3916_v40  ;;  %2337 = vmatmul.mubr.bf16.gmra.mrb[92].mxu1 %v3917_v41 }
  0xfb   : > { %2247 = vmatprep.mubr.bf16.mxu0 %v3918_v42  ;;  %2344 = vmatprep.mubr.bf16.mxu1 %v3920_v43 }
 0x102   : > { %2248 = vmatmul.mubr.bf16.gmra.mrb[96].mxu0 %v3922_v44  ;;  %2345 = vmatmul.mubr.bf16.gmra.mrb[96].mxu1 %v3923_v45  ;;  %v3957_v44 = vld [vmem:[%s4065_s27 + $0x2e8] ss:$36 sps:$4 sm:$0xff]  }
 0x103   : > { %2255 = vmatprep.mubr.bf16.mxu0 %v3925_v46  ;;  %2352 = vmatprep.mubr.bf16.mxu1 %v3927_v47  ;;  %v3958_v45 = vld [vmem:[%s4065_s27 + $0x188] ss:$36 sps:$4 sm:$0xff]  }
 0x10a   : > { %2256 = vmatmul.mubr.bf16.gmra.mrb[100].mxu0 %v3929_v48  ;;  %2353 = vmatmul.mubr.bf16.gmra.mrb[100].mxu1 %v3930_v49 }
 0x10b   : > { %2263 = vmatprep.mubr.bf16.mxu0 %v3931_v50  ;;  %2360 = vmatprep.mubr.bf16.mxu1 %v3933_v51  ;;  %v3959_v50 = vld [vmem:[%s4065_s27 + $0x334] ss:$36 sps:$4 sm:$0xff]  }
 0x10c   : > { %v3961_v51 = vld [vmem:[%s4065_s27 + $0x1d0] ss:$36 sps:$4 sm:$0xff]  }
 0x112   : > { %2264 = vmatmul.mubr.bf16.gmra.mrb[104].mxu0 %v3935_v52  ;;  %2361 = vmatmul.mubr.bf16.gmra.mrb[104].mxu1 %v3936_v53 }
 0x113   : > { %2271 = vmatprep.mubr.bf16.mxu0 %v3938_v54  ;;  %2368 = vmatprep.mubr.bf16.mxu1 %v3940_v55 }
 0x115   : > { %v3157_v56 = vpop.f32.mrb[0].mxu0  ;;  %v3229_v57 = vpop.f32.mrb[0].mxu1 }
 0x116   : > { %v3158_v58 = vpop.f32.mrb[1].mxu0  ;;  %v3230_v59 = vpop.f32.mrb[1].mxu1 }
 0x117   : > { %v4435_v62 = vadd.f32 %v3158_v58, %v3157_v56  ;;  %v4437_v63 = vadd.f32 %v3230_v59, %v3229_v57  ;;  %v3160_v0 = vpop.f32.mrb[2].mxu0  ;;  %v3232_v1 = vpop.f32.mrb[2].mxu1 }
 0x118   : > { %v3161_v4 = vpop.f32.mrb[3].mxu0  ;;  %v3233_v5 = vpop.f32.mrb[3].mxu1 }
 0x119   : > { %v4441_v6 = vadd.f32 %v3161_v4, %v3160_v0  ;;  %v4443_v7 = vadd.f32 %v3233_v5, %v3232_v1  ;;  %v3964_v4 = vld [vmem:[%s4065_s27 + $0x37c] ss:$36 sps:$4 sm:$0xff]  }
 0x11a   : > { %2272 = vmatmul.mubr.bf16.gmra.mrb[108].mxu0 %v3942_v60  ;;  %2369 = vmatmul.mubr.bf16.gmra.mrb[108].mxu1 %v3943_v61  ;;  %v3962_v60 = vld [vmem:[%s4065_s27 + $0x330] ss:$36 sps:$4 sm:$0xff]   ;;  %v3963_v61 = vld [vmem:[%s4065_s27 + $0x218] ss:$36 sps:$4 sm:$0xff]   ;;  %v3966_v5 = vld [vmem:[%s4065_s27 + $0x260] ss:$36 sps:$4 sm:$0xff]  }
 0x11b   : > { %2376 = vmatprep.mubr.bf16.mxu1 %v3944_v2  ;;  %3629 = vmatprep.mubr.bf16.mxu0 %v3946_v3 }
 0x11d   : > { %v3163_v8 = vpop.f32.mrb[4].mxu0  ;;  %v3235_v9 = vpop.f32.mrb[4].mxu1 }
 0x11e   : > { %v3164_v10 = vpop.f32.mrb[5].mxu0  ;;  %v3236_v11 = vpop.f32.mrb[5].mxu1 }
 0x11f   : > { %v4447_v14 = vadd.f32 %v3164_v10, %v3163_v8  ;;  %v4449_v15 = vadd.f32 %v3236_v11, %v3235_v9  ;;  %v3166_v16 = vpop.f32.mrb[6].mxu0  ;;  %v3238_v17 = vpop.f32.mrb[6].mxu1 }
 0x120   : > { %v3167_v20 = vpop.f32.mrb[7].mxu0  ;;  %v3239_v21 = vpop.f32.mrb[7].mxu1 }
 0x121   : > { %v4453_v22 = vadd.f32 %v3167_v20, %v3166_v16  ;;  %v4455_v23 = vadd.f32 %v3239_v21, %v3238_v17  ;;  %v3967_v20 = vld [vmem:[%s4065_s27 + $0x378] ss:$36 sps:$4 sm:$0xff]   ;;  %v3968_v21 = vld [vmem:[%s4065_s27 + $0x2a8] ss:$36 sps:$4 sm:$0xff]  }
 0x122   : > { %2377 = vmatmul.mubr.bf16.gmra.mrb[112].mxu1 %v3947_v12  ;;  %3630 = vmatmul.mubr.bf16.vlgmr.msra.gmra.mrb[112].mxu0 %v3948_v13 }
 0x123   : > { %2384 = vmatprep.mubr.bf16.mxu1 %v3949_v18  ;;  %3633 = vmatprep.mubr.bf16.mxu0 %v3951_v19 }
 0x125   : > { %v3169_v24 = vpop.f32.mrb[8].mxu0  ;;  %v3241_v25 = vpop.f32.mrb[8].mxu1 }
 0x126   : > { %v3170_v26 = vpop.f32.mrb[9].mxu0  ;;  %v3242_v27 = vpop.f32.mrb[9].mxu1 }
 0x127   : > { %v4459_v30 = vadd.f32 %v3170_v26, %v3169_v24  ;;  %v4461_v31 = vadd.f32 %v3242_v27, %v3241_v25  ;;  %v3172_v32 = vpop.f32.mrb[10].mxu0  ;;  %v3244_v33 = vpop.f32.mrb[10].mxu1  ;;  %v3969_v27 = vld [vmem:[%s4065_s27 + $0x3c4] ss:$36 sps:$4 sm:$0xff]  }
 0x128   : > { %v3173_v36 = vpop.f32.mrb[11].mxu0  ;;  %v3245_v37 = vpop.f32.mrb[11].mxu1 }
 0x129   : > { %v4465_v38 = vadd.f32 %v3173_v36, %v3172_v32  ;;  %v4467_v39 = vadd.f32 %v3245_v37, %v3244_v33 }
 0x12a   : > { %2385 = vmatmul.mubr.bf16.gmra.mrb[116].mxu1 %v3952_v28  ;;  %3634 = vmatmul.mubr.bf16.gmra.mrb[116].mxu0 %v3953_v29  ;;  %v3971_v28 = vld [vmem:[%s4065_s27 + $0x2f0] ss:$36 sps:$4 sm:$0xff]  }
 0x12b   : > { %2392 = vmatprep.mubr.bf16.mxu1 %v3954_v34  ;;  %3637 = vmatprep.mubr.bf16.mxu0 %v3956_v35 }
 0x12d   : > { %v3175_v40 = vpop.f32.mrb[12].mxu0  ;;  %v3247_v41 = vpop.f32.mrb[12].mxu1 }
 0x12e   : > { %v3176_v42 = vpop.f32.mrb[13].mxu0  ;;  %v3248_v43 = vpop.f32.mrb[13].mxu1 }
 0x12f   : > { %v4471_v46 = vadd.f32 %v3176_v42, %v3175_v40  ;;  %v4473_v47 = vadd.f32 %v3248_v43, %v3247_v41  ;;  %v3178_v48 = vpop.f32.mrb[14].mxu0  ;;  %v3250_v49 = vpop.f32.mrb[14].mxu1  ;;  %v3972_v42 = vld [vmem:[%s4065_s27 + $0x3c0] ss:$36 sps:$4 sm:$0xff]   ;;  %v3973_v43 = vld [vmem:[%s4065_s27 + $0x338] ss:$36 sps:$4 sm:$0xff]  }
 0x130   : > { %v3179_v52 = vpop.f32.mrb[15].mxu0  ;;  %v3251_v53 = vpop.f32.mrb[15].mxu1 }
 0x131   : > { %v4477_v54 = vadd.f32 %v3179_v52, %v3178_v48  ;;  %v4479_v55 = vadd.f32 %v3251_v53, %v3250_v49  ;;  %v3974_v49 = vld [vmem:[%s4065_s27 + $0x40c] ss:$36 sps:$4 sm:$0xff]  }
 0x132   : > { %2393 = vmatmul.mubr.bf16.gmra.mrb[120].mxu1 %v3957_v44  ;;  %3638 = vmatmul.mubr.bf16.gmra.mrb[120].mxu0 %v3958_v45 }
 0x133   : > { %2400 = vmatprep.mubr.bf16.mxu1 %v3959_v50  ;;  %3641 = vmatprep.mubr.bf16.mxu0 %v3961_v51  ;;  %v3976_v50 = vld [vmem:[%s4065_s27 + $0x380] ss:$36 sps:$4 sm:$0xff]  }
 0x135   : > { %v3181_v56 = vpop.f32.mrb[16].mxu0  ;;  %v3269_v57 = vpop.f32.mrb[16].mxu1 }
 0x136   : > { %v3182_v58 = vpop.f32.mrb[17].mxu0  ;;  %v3270_v59 = vpop.f32.mrb[17].mxu1 }
 0x137   : > { %v4483_v0 = vadd.f32 %v3182_v58, %v3181_v56  ;;  %v3271_v1 = vadd.f32 %v3270_v59, %v3269_v57  ;;  %v3184_v2 = vpop.f32.mrb[18].mxu0  ;;  %v3272_v3 = vpop.f32.mrb[18].mxu1 }
 0x138   : > { %v3185_v8 = vpop.f32.mrb[19].mxu0  ;;  %v3273_v9 = vpop.f32.mrb[19].mxu1 }
 0x139   : > { %v4488_v10 = vadd.f32 %v3271_v1, %v4435_v62  ;;  %v4490_v11 = vadd.f32 %v3185_v8, %v3184_v2  ;;  %v3274_v12 = vadd.f32 %v3273_v9, %v3272_v3  ;;  %v3977_v1 = vld [vmem:[%s4065_s27 + $0x408] ss:$36 sps:$4 sm:$0xff]   ;;  %v3979_v8 = vld [vmem:[%s4065_s27 + $0x454] ss:$36 sps:$4 sm:$0xff]  }
 0x13a   : > { %2401 = vmatmul.mubr.bf16.gmra.mrb[124].mxu1 %v3962_v60  ;;  %3642 = vmatmul.mubr.bf16.gmra.mrb[124].mxu0 %v3963_v61  ;;  %v3978_v2 = vld [vmem:[%s4065_s27 + $0x3c8] ss:$36 sps:$4 sm:$0xff]   ;;  %v3981_v9 = vld [vmem:[%s4065_s27 + $0x410] ss:$36 sps:$4 sm:$0xff]  }
 0x13b   : > { %v4493_v13 = vadd.f32 %v3274_v12, %v4441_v6  ;;  %2408 = vmatprep.mubr.bf16.mxu1 %v3964_v4  ;;  %3645 = vmatprep.mubr.bf16.mxu0 %v3966_v5 }
 0x13d   : > { %v3187_v16 = vpop.f32.mrb[20].mxu0  ;;  %v3275_v17 = vpop.f32.mrb[20].mxu1 }
 0x13e   : > { %v3188_v18 = vpop.f32.mrb[21].mxu0  ;;  %v3276_v19 = vpop.f32.mrb[21].mxu1 }
 0x13f   : > { %v4497_v62 = vadd.f32 %v3188_v18, %v3187_v16  ;;  %v3277_v24 = vadd.f32 %v3276_v19, %v3275_v17  ;;  %v3190_v25 = vpop.f32.mrb[22].mxu0  ;;  %v3278_v26 = vpop.f32.mrb[22].mxu1 }
 0x140   : > { %v3191_v29 = vpop.f32.mrb[23].mxu0  ;;  %v3279_v6 = vpop.f32.mrb[23].mxu1 }
 0x141   : > { %v4502_v32 = vadd.f32 %v3277_v24, %v4447_v14  ;;  %v4504_v33 = vadd.f32 %v3191_v29, %v3190_v25  ;;  %v3280_v34 = vadd.f32 %v3279_v6, %v3278_v26  ;;  %v3982_v26 = vld [vmem:[%s4065_s27 + $0x450] ss:$36 sps:$4 sm:$0xff]  }
 0x142   : > { %2409 = vmatmul.mubr.bf16.gmra.mrb[128].mxu1 %v3967_v20  ;;  %3646 = vmatmul.mubr.bf16.gmra.mrb[128].mxu0 %v3968_v21 }
 0x143   : > { %v4507_v35 = vadd.f32 %v3280_v34, %v4453_v22  ;;  %2416 = vmatprep.mubr.bf16.mxu1 %v3969_v27  ;;  %3649 = vmatprep.mubr.bf16.mxu0 %v3971_v28  ;;  %v3983_v27 = vld [vmem:[%s4065_s27 + $0x458] ss:$36 sps:$4 sm:$0xff]  }
 0x145   : > { %v3193_v36 = vpop.f32.mrb[24].mxu0  ;;  %v3281_v37 = vpop.f32.mrb[24].mxu1 }
 0x146   : > { %v3194_v40 = vpop.f32.mrb[25].mxu0  ;;  %v3282_v41 = vpop.f32.mrb[25].mxu1 }
 0x147   : > { %v4511_v14 = vadd.f32 %v3194_v40, %v3193_v36  ;;  %v3283_v44 = vadd.f32 %v3282_v41, %v3281_v37  ;;  %v3196_v45 = vpop.f32.mrb[26].mxu0  ;;  %v3284_v48 = vpop.f32.mrb[26].mxu1 }
 0x148   : > { %v3197_v51 = vpop.f32.mrb[27].mxu0  ;;  %v3285_v22 = vpop.f32.mrb[27].mxu1 }
 0x149   : > { %v4516_v52 = vadd.f32 %v3283_v44, %v4459_v30  ;;  %v4518_v53 = vadd.f32 %v3197_v51, %v3196_v45  ;;  %v3286_v56 = vadd.f32 %v3285_v22, %v3284_v48 }
 0x14a   : > { %2417 = vmatmul.mubr.bf16.gmra.mrb[132].mxu1 %v3972_v42  ;;  %3650 = vmatmul.mubr.bf16.gmra.mrb[132].mxu0 %v3973_v43 }
 0x14b   : > { %v4521_v57 = vadd.f32 %v3286_v56, %v4465_v38  ;;  %2424 = vmatprep.mubr.bf16.mxu1 %v3974_v49  ;;  %3653 = vmatprep.mubr.bf16.mxu0 %v3976_v50 }
 0x14d   : > { %v3199_v58 = vpop.f32.mrb[28].mxu0  ;;  %v3287_v59 = vpop.f32.mrb[28].mxu1 }
 0x14e   : > { %v3200_v60 = vpop.f32.mrb[29].mxu0  ;;  %v3288_v61 = vpop.f32.mrb[29].mxu1 }
 0x14f   : > { %v4525_v30 = vadd.f32 %v3200_v60, %v3199_v58  ;;  %v3289_v3 = vadd.f32 %v3288_v61, %v3287_v59  ;;  %v3202_v4 = vpop.f32.mrb[30].mxu0  ;;  %v3290_v5 = vpop.f32.mrb[30].mxu1 }
 0x150   : > { %v3203_v12 = vpop.f32.mrb[31].mxu0  ;;  %v3291_v38 = vpop.f32.mrb[31].mxu1 }
 0x151   : > { %v4530_v16 = vadd.f32 %v3289_v3, %v4471_v46  ;;  %v4532_v17 = vadd.f32 %v3203_v12, %v3202_v4  ;;  %v3292_v18 = vadd.f32 %v3291_v38, %v3290_v5 }
 0x152   : > { %2425 = vmatmul.mubr.bf16.gmra.mrb[136].mxu1 %v3977_v1  ;;  %3654 = vmatmul.mubr.bf16.gmra.mrb[136].mxu0 %v3978_v2 }
 0x153   : > { %v4535_v19 = vadd.f32 %v3292_v18, %v4477_v54  ;;  %2432 = vmatprep.mubr.bf16.mxu1 %v3979_v8  ;;  %3657 = vmatprep.mubr.bf16.mxu0 %v3981_v9 }
 0x155   : > { %v3205_v20 = vpop.f32.mrb[32].mxu0  ;;  %v3293_v21 = vpop.f32.mrb[32].mxu1 }
 0x156   : > { %v3206_v24 = vpop.f32.mrb[33].mxu0  ;;  %v3294_v25 = vpop.f32.mrb[33].mxu1 }
 0x157   : > { %v4539_v28 = vadd.f32 %v3206_v24, %v3205_v20  ;;  %v3295_v46 = vadd.f32 %v3294_v25, %v3293_v21  ;;  %v3208_v29 = vpop.f32.mrb[34].mxu0  ;;  %v3296_v6 = vpop.f32.mrb[34].mxu1 }
 0x158   : > { %v3209_v34 = vpop.f32.mrb[35].mxu0  ;;  %v3297_v36 = vpop.f32.mrb[35].mxu1 }
 0x159   : > { %v4542_v37 = vadd.f32 %v3295_v46, %v4483_v0  ;;  %v3210_v54 = vadd.f32 %v3209_v34, %v3208_v29  ;;  %v3298_v40 = vadd.f32 %v3297_v36, %v3296_v6 }
 0x15a   : > { %2433 = vmatmul.mubr.bf16.gmra.mrb[140].mxu1 %v3982_v26  ;;  %3658 = vmatmul.mubr.bf16.gmra.mrb[140].mxu0 %v3983_v27 }
 0x15b   : > { %v4545_v41 = vadd.f32 %v3298_v40, %v4490_v11 }
 0x15d   : > { %v3211_v42 = vpop.f32.mrb[36].mxu0  ;;  %v3299_v43 = vpop.f32.mrb[36].mxu1 }
 0x15e   : > { %v3212_v44 = vpop.f32.mrb[37].mxu0  ;;  %v3300_v45 = vpop.f32.mrb[37].mxu1 }
 0x15f   : > { %v4547_v48 = vadd.f32 %v3212_v44, %v3211_v42  ;;  %v3301_v49 = vadd.f32 %v3300_v45, %v3299_v43  ;;  %v3214_v50 = vpop.f32.mrb[38].mxu0  ;;  %v3302_v51 = vpop.f32.mrb[38].mxu1 }
 0x160   : > { %v3215_v22 = vpop.f32.mrb[39].mxu0  ;;  %v3303_v56 = vpop.f32.mrb[39].mxu1 }
 0x161   : > { %v4550_v0 = vadd.f32 %v3301_v49, %v4497_v62  ;;  %v3216_v58 = vadd.f32 %v3215_v22, %v3214_v50  ;;  %v3304_v59 = vadd.f32 %v3303_v56, %v3302_v51 }
 0x163   : > { %v4553_v60 = vadd.f32 %v3304_v59, %v4504_v33 }
 0x165   : > { %v3217_v11 = vpop.f32.mrb[40].mxu0  ;;  %v3305_v61 = vpop.f32.mrb[40].mxu1 }
 0x166   : > { %v3218_v1 = vpop.f32.mrb[41].mxu0  ;;  %v3306_v2 = vpop.f32.mrb[41].mxu1 }
 0x167   : > { %v4555_v3 = vadd.f32 %v3218_v1, %v3217_v11  ;;  %v3307_v4 = vadd.f32 %v3306_v2, %v3305_v61  ;;  %v3220_v5 = vpop.f32.mrb[42].mxu0  ;;  %v3308_v8 = vpop.f32.mrb[42].mxu1 }
 0x168   : > { %v3221_v9 = vpop.f32.mrb[43].mxu0  ;;  %v3309_v12 = vpop.f32.mrb[43].mxu1 }
 0x169   : > { %v4558_v38 = vadd.f32 %v3307_v4, %v4511_v14  ;;  %v4560_v62 = vadd.f32 %v3221_v9, %v3220_v5  ;;  %v3310_v18 = vadd.f32 %v3309_v12, %v3308_v8 }
 0x16b   : > { %v4563_v33 = vadd.f32 %v3310_v18, %v4518_v53 }
 0x16d   : > { %v3223_v20 = vpop.f32.mrb[44].mxu0  ;;  %v3311_v21 = vpop.f32.mrb[44].mxu1 }
 0x16e   : > { %v3224_v24 = vpop.f32.mrb[45].mxu0  ;;  %v3312_v25 = vpop.f32.mrb[45].mxu1 }
 0x16f   : > { %v4565_v26 = vadd.f32 %v3224_v24, %v3223_v20  ;;  %v3313_v27 = vadd.f32 %v3312_v25, %v3311_v21  ;;  %v3226_v46 = vpop.f32.mrb[46].mxu0  ;;  %v3314_v29 = vpop.f32.mrb[46].mxu1 }
 0x170   : > { %v3227_v6 = vpop.f32.mrb[47].mxu0  ;;  %v3315_v34 = vpop.f32.mrb[47].mxu1 }
 0x171   : > { %v4568_v14 = vadd.f32 %v3313_v27, %v4525_v30  ;;  %v4570_v36 = vadd.f32 %v3227_v6, %v3226_v46  ;;  %v3316_v40 = vadd.f32 %v3315_v34, %v3314_v29 }
 0x173   : > { %v4573_v53 = vadd.f32 %v3316_v40, %v4532_v17 }
 0x175   : > { %v3317_v42 = vpop.f32.mrb[48].mxu1  ;;  %v3381_v43 = vpop.f32.mrb[48].mxu0 }
 0x176   : > { %v3318_v44 = vpop.f32.mrb[49].mxu1  ;;  %v3382_v45 = vpop.f32.mrb[49].mxu0 }
 0x177   : > { %v3319_v49 = vadd.f32 %v3318_v44, %v3317_v42  ;;  %v3383_v50 = vadd.f32 %v3382_v45, %v3381_v43  ;;  %v3320_v51 = vpop.f32.mrb[50].mxu1  ;;  %v3384_v22 = vpop.f32.mrb[50].mxu0 }
 0x178   : > { %v3321_v56 = vpop.f32.mrb[51].mxu1  ;;  %v3385_v59 = vpop.f32.mrb[51].mxu0 }
 0x179   : > { %v4576_v11 = vadd.f32 %v3319_v49, %v4539_v28  ;;  %v4579_v30 = vadd.f32 %v3383_v50, %v4488_v10  ;;  %v3322_v61 = vadd.f32 %v3321_v56, %v3320_v51  ;;  %v3386_v1 = vadd.f32 %v3385_v59, %v3384_v22 }
 0x17b   : > { %v4581_v17 = vadd.f32 %v3322_v61, %v3210_v54  ;;  %v4584_v2 = vadd.f32 %v3386_v1, %v4493_v13 }
 0x17d   : > { %v3323_v4 = vpop.f32.mrb[52].mxu1  ;;  %v3387_v5 = vpop.f32.mrb[52].mxu0 }
 0x17e   : > { %v3324_v8 = vpop.f32.mrb[53].mxu1  ;;  %v3388_v9 = vpop.f32.mrb[53].mxu0 }
 0x17f   : > { %v3325_v12 = vadd.f32 %v3324_v8, %v3323_v4  ;;  %v3389_v18 = vadd.f32 %v3388_v9, %v3387_v5  ;;  %v3326_v20 = vpop.f32.mrb[54].mxu1  ;;  %v3390_v21 = vpop.f32.mrb[54].mxu0 }
 0x180   : > { %v3327_v28 = vpop.f32.mrb[55].mxu1  ;;  %v3391_v24 = vpop.f32.mrb[55].mxu0 }
 0x181   : > { %v4587_v10 = vadd.f32 %v3325_v12, %v4547_v48  ;;  %v4590_v25 = vadd.f32 %v3389_v18, %v4502_v32  ;;  %v3328_v54 = vadd.f32 %v3327_v28, %v3326_v20  ;;  %v3392_v27 = vadd.f32 %v3391_v24, %v3390_v21 }
 0x183   : > { %v4592_v13 = vadd.f32 %v3328_v54, %v3216_v58  ;;  %v4595_v46 = vadd.f32 %v3392_v27, %v4507_v35 }
 0x185   : > { %v3329_v29 = vpop.f32.mrb[56].mxu1  ;;  %v3393_v6 = vpop.f32.mrb[56].mxu0 }
 0x186   : > { %v3330_v34 = vpop.f32.mrb[57].mxu1  ;;  %v3394_v40 = vpop.f32.mrb[57].mxu0 }
 0x187   : > { %v3331_v42 = vadd.f32 %v3330_v34, %v3329_v29  ;;  %v3395_v43 = vadd.f32 %v3394_v40, %v3393_v6  ;;  %v3332_v44 = vpop.f32.mrb[58].mxu1  ;;  %v3396_v45 = vpop.f32.mrb[58].mxu0 }
 0x188   : > { %v3333_v48 = vpop.f32.mrb[59].mxu1  ;;  %v3397_v49 = vpop.f32.mrb[59].mxu0 }
 0x189   : > { %v4598_v32 = vadd.f32 %v3331_v42, %v4555_v3  ;;  %v4601_v50 = vadd.f32 %v3395_v43, %v4516_v52  ;;  %v3334_v58 = vadd.f32 %v3333_v48, %v3332_v44  ;;  %v3398_v51 = vadd.f32 %v3397_v49, %v3396_v45 }
 0x18b   : > { %v4604_v35 = vadd.f32 %v3334_v58, %v4560_v62  ;;  %v4607_v22 = vadd.f32 %v3398_v51, %v4521_v57 }
 0x18d   : > { %v3335_v56 = vpop.f32.mrb[60].mxu1  ;;  %v3399_v59 = vpop.f32.mrb[60].mxu0 }
 0x18e   : > { %v3336_v61 = vpop.f32.mrb[61].mxu1  ;;  %v3400_v1 = vpop.f32.mrb[61].mxu0 }
 0x18f   : > { %v3337_v4 = vadd.f32 %v3336_v61, %v3335_v56  ;;  %v3401_v5 = vadd.f32 %v3400_v1, %v3399_v59  ;;  %v3338_v8 = vpop.f32.mrb[62].mxu1  ;;  %v3402_v3 = vpop.f32.mrb[62].mxu0 }
 0x190   : > { %v3339_v9 = vpop.f32.mrb[63].mxu1  ;;  %v3403_v12 = vpop.f32.mrb[63].mxu0 }
 0x191   : > { %v4610_v52 = vadd.f32 %v3337_v4, %v4565_v26  ;;  %v4613_v18 = vadd.f32 %v3401_v5, %v4530_v16  ;;  %v3340_v62 = vadd.f32 %v3339_v9, %v3338_v8  ;;  %v3404_v20 = vadd.f32 %v3403_v12, %v3402_v3 }
 0x193   : > { %v4616_v57 = vadd.f32 %v3340_v62, %v4570_v36  ;;  %v4619_v21 = vadd.f32 %v3404_v20, %v4535_v19 }
 0x195   : > { %v3341_v28 = vpop.f32.mrb[64].mxu1  ;;  %v3405_v24 = vpop.f32.mrb[64].mxu0 }
 0x196   : > { %v3342_v54 = vpop.f32.mrb[65].mxu1  ;;  %v3406_v27 = vpop.f32.mrb[65].mxu0 }
 0x197   : > { %v3343_v29 = vadd.f32 %v3342_v54, %v3341_v28  ;;  %v3407_v6 = vadd.f32 %v3406_v27, %v3405_v24  ;;  %v3344_v34 = vpop.f32.mrb[66].mxu1  ;;  %v3408_v26 = vpop.f32.mrb[66].mxu0 }
 0x198   : > { %v3345_v40 = vpop.f32.mrb[67].mxu1  ;;  %v3409_v42 = vpop.f32.mrb[67].mxu0 }
 0x199   : > { %v4622_v16 = vadd.f32 %v3343_v29, %v4437_v63  ;;  %v4625_v43 = vadd.f32 %v3407_v6, %v4542_v37  ;;  %v3346_v36 = vadd.f32 %v3345_v40, %v3344_v34  ;;  %v3410_v44 = vadd.f32 %v3409_v42, %v3408_v26 }
 0x19b   : > { %v4628_v19 = vadd.f32 %v3346_v36, %v4443_v7  ;;  %v4631_v45 = vadd.f32 %v3410_v44, %v4545_v41 }
 0x19d   : > { %v3347_v48 = vpop.f32.mrb[68].mxu1  ;;  %v3411_v49 = vpop.f32.mrb[68].mxu0 }
 0x19e   : > { %v3348_v58 = vpop.f32.mrb[69].mxu1  ;;  %v3412_v51 = vpop.f32.mrb[69].mxu0 }
 0x19f   : > { %v3349_v56 = vadd.f32 %v3348_v58, %v3347_v48  ;;  %v3413_v59 = vadd.f32 %v3412_v51, %v3411_v49  ;;  %v3350_v61 = vpop.f32.mrb[70].mxu1  ;;  %v3414_v63 = vpop.f32.mrb[70].mxu0 }
 0x1a0   : > { %v3351_v1 = vpop.f32.mrb[71].mxu1  ;;  %v3415_v4 = vpop.f32.mrb[71].mxu0 }
 0x1a1   : > { %v4634_v37 = vadd.f32 %v3349_v56, %v4449_v15  ;;  %v4637_v5 = vadd.f32 %v3413_v59, %v4550_v0  ;;  %v3352_v7 = vadd.f32 %v3351_v1, %v3350_v61  ;;  %v3416_v8 = vadd.f32 %v3415_v4, %v3414_v63 }
 0x1a3   : > { %v4640_v41 = vadd.f32 %v3352_v7, %v4455_v23  ;;  %v4643_v3 = vadd.f32 %v3416_v8, %v4553_v60 }
 0x1a5   : > { %v3353_v9 = vpop.f32.mrb[72].mxu1  ;;  %v3417_v12 = vpop.f32.mrb[72].mxu0 }
 0x1a6   : > { %v3354_v62 = vpop.f32.mrb[73].mxu1  ;;  %v3418_v20 = vpop.f32.mrb[73].mxu0 }
 0x1a7   : > { %v3355_v28 = vadd.f32 %v3354_v62, %v3353_v9  ;;  %v3419_v24 = vadd.f32 %v3418_v20, %v3417_v12  ;;  %v3356_v54 = vpop.f32.mrb[74].mxu1  ;;  %v3420_v15 = vpop.f32.mrb[74].mxu0 }
 0x1a8   : > { %v3357_v27 = vpop.f32.mrb[75].mxu1  ;;  %v3421_v29 = vpop.f32.mrb[75].mxu0 }
 0x1a9   : > { %v4646_v0 = vadd.f32 %v3355_v28, %v4461_v31  ;;  %v4649_v6 = vadd.f32 %v3419_v24, %v4558_v38  ;;  %v3358_v23 = vadd.f32 %v3357_v27, %v3356_v54  ;;  %v3422_v34 = vadd.f32 %v3421_v29, %v3420_v15 }
 0x1ab   : > { %v4652_v60 = vadd.f32 %v3358_v23, %v4467_v39  ;;  %v4655_v26 = vadd.f32 %v3422_v34, %v4563_v33 }
 0x1ad   : > { %v3359_v40 = vpop.f32.mrb[76].mxu1  ;;  %v3423_v42 = vpop.f32.mrb[76].mxu0 }
 0x1ae   : > { %v3360_v36 = vpop.f32.mrb[77].mxu1  ;;  %v3424_v44 = vpop.f32.mrb[77].mxu0 }
 0x1af   : > { %v3361_v48 = vadd.f32 %v3360_v36, %v3359_v40  ;;  %v3425_v49 = vadd.f32 %v3424_v44, %v3423_v42  ;;  %v3362_v58 = vpop.f32.mrb[78].mxu1  ;;  %v3426_v31 = vpop.f32.mrb[78].mxu0 }
 0x1b0   : > { %v3363_v51 = vpop.f32.mrb[79].mxu1  ;;  %v3427_v56 = vpop.f32.mrb[79].mxu0 }
 0x1b1   : > { %v4658_v38 = vadd.f32 %v3361_v48, %v4473_v47  ;;  %v4661_v59 = vadd.f32 %v3425_v49, %v4568_v14  ;;  %v3364_v39 = vadd.f32 %v3363_v51, %v3362_v58  ;;  %v3428_v61 = vadd.f32 %v3427_v56, %v3426_v31 }
 0x1b3   : > { %v4664_v33 = vadd.f32 %v3364_v39, %v4479_v55  ;;  %v4667_v63 = vadd.f32 %v3428_v61, %v4573_v53 }
 0x1b5   : > { %v3429_v1 = vpop.f32.mrb[80].mxu0  ;;  %v3493_v4 = vpop.f32.mrb[80].mxu1 }
 0x1b6   : > { %v3430_v7 = vpop.f32.mrb[81].mxu0  ;;  %v3494_v8 = vpop.f32.mrb[81].mxu1 }
 0x1b7   : > { %v3431_v9 = vadd.f32 %v3430_v7, %v3429_v1  ;;  %v3495_v12 = vadd.f32 %v3494_v8, %v3493_v4  ;;  %v3432_v62 = vpop.f32.mrb[82].mxu0  ;;  %v3496_v47 = vpop.f32.mrb[82].mxu1 }
 0x1b8   : > { %v3433_v20 = vpop.f32.mrb[83].mxu0  ;;  %v3497_v28 = vpop.f32.mrb[83].mxu1 }
 0x1b9   : > { %v4670_v14 = vadd.f32 %v3431_v9, %v4576_v11  ;;  %v3434_v24 = vadd.f32 %v3433_v20, %v3432_v62  ;;  %v3498_v54 = vadd.f32 %v3497_v28, %v3496_v47  ;;  %v4673_v55 = vadd.f32 %v3495_v12, %v4579_v30 }
 0x1bb   : > { %v4676_v53 = vadd.f32 %v3434_v24, %v4581_v17  ;;  %v4679_v15 = vadd.f32 %v3498_v54, %v4584_v2 }
 0x1bd   : > { %v3435_v27 = vpop.f32.mrb[84].mxu0  ;;  %v3499_v29 = vpop.f32.mrb[84].mxu1 }
 0x1be   : > { %v3436_v23 = vpop.f32.mrb[85].mxu0  ;;  %v3500_v34 = vpop.f32.mrb[85].mxu1 }
 0x1bf   : > { %v3437_v40 = vadd.f32 %v3436_v23, %v3435_v27  ;;  %v3501_v42 = vadd.f32 %v3500_v34, %v3499_v29  ;;  %v3438_v36 = vpop.f32.mrb[86].mxu0  ;;  %v3502_v11 = vpop.f32.mrb[86].mxu1 }
 0x1c0   : > { %v3439_v44 = vpop.f32.mrb[87].mxu0  ;;  %v3503_v48 = vpop.f32.mrb[87].mxu1 }
 0x1c1   : > { %v4682_v49 = vadd.f32 %v3437_v40, %v4587_v10  ;;  %v3440_v30 = vadd.f32 %v3439_v44, %v3438_v36  ;;  %v3504_v58 = vadd.f32 %v3503_v48, %v3502_v11  ;;  %v4685_v17 = vadd.f32 %v3501_v42, %v4590_v25 }
 0x1c3   : > { %v4688_v2 = vadd.f32 %v3440_v30, %v4592_v13  ;;  %v4691_v31 = vadd.f32 %v3504_v58, %v4595_v46 }
 0x1c5   : > { %v3441_v51 = vpop.f32.mrb[88].mxu0  ;;  %v3505_v56 = vpop.f32.mrb[88].mxu1 }
 0x1c6   : > { %v3442_v39 = vpop.f32.mrb[89].mxu0  ;;  %v3506_v61 = vpop.f32.mrb[89].mxu1 }
 0x1c7   : > { %v3443_v1 = vadd.f32 %v3442_v39, %v3441_v51  ;;  %v3507_v4 = vadd.f32 %v3506_v61, %v3505_v56  ;;  %v3444_v7 = vpop.f32.mrb[90].mxu0  ;;  %v3508_v10 = vpop.f32.mrb[90].mxu1 }
 0x1c8   : > { %v3445_v8 = vpop.f32.mrb[91].mxu0  ;;  %v3509_v9 = vpop.f32.mrb[91].mxu1 }
 0x1c9   : > { %v4694_v12 = vadd.f32 %v3443_v1, %v4598_v32  ;;  %v3446_v25 = vadd.f32 %v3445_v8, %v3444_v7  ;;  %v3510_v62 = vadd.f32 %v3509_v9, %v3508_v10  ;;  %v4697_v13 = vadd.f32 %v3507_v4, %v4601_v50 }
 0x1cb   : > { %v4700_v46 = vadd.f32 %v3446_v25, %v4604_v35  ;;  %v4703_v47 = vadd.f32 %v3510_v62, %v4607_v22 }
 0x1cd   : > { %v3447_v20 = vpop.f32.mrb[92].mxu0  ;;  %v3511_v28 = vpop.f32.mrb[92].mxu1 }
 0x1ce   : > { %v3448_v24 = vpop.f32.mrb[93].mxu0  ;;  %v3512_v54 = vpop.f32.mrb[93].mxu1 }
 0x1cf   : > { %v3449_v27 = vadd.f32 %v3448_v24, %v3447_v20  ;;  %v3513_v29 = vadd.f32 %v3512_v54, %v3511_v28  ;;  %v3450_v23 = vpop.f32.mrb[94].mxu0  ;;  %v3514_v32 = vpop.f32.mrb[94].mxu1 }
 0x1d0   : > { %v3451_v34 = vpop.f32.mrb[95].mxu0  ;;  %v3515_v40 = vpop.f32.mrb[95].mxu1 }
 0x1d1   : > { %v4706_v42 = vadd.f32 %v3449_v27, %v4610_v52  ;;  %v3452_v50 = vadd.f32 %v3451_v34, %v3450_v23  ;;  %v3516_v36 = vadd.f32 %v3515_v40, %v3514_v32  ;;  %v4709_v35 = vadd.f32 %v3513_v29, %v4613_v18 }
 0x1d3   : > { %v4712_v22 = vadd.f32 %v3452_v50, %v4616_v57  ;;  %v4715_v11 = vadd.f32 %v3516_v36, %v4619_v21 }
 0x1d5   : > { %v3453_v44 = vpop.f32.mrb[96].mxu0  ;;  %v3517_v48 = vpop.f32.mrb[96].mxu1 }
 0x1d6   : > { %v3454_v30 = vpop.f32.mrb[97].mxu0  ;;  %v3518_v58 = vpop.f32.mrb[97].mxu1 }
 0x1d7   : > { %v3455_v51 = vadd.f32 %v3454_v30, %v3453_v44  ;;  %v3519_v56 = vadd.f32 %v3518_v58, %v3517_v48  ;;  %v3456_v39 = vpop.f32.mrb[98].mxu0  ;;  %v3520_v52 = vpop.f32.mrb[98].mxu1 }
 0x1d8   : > { %v3457_v61 = vpop.f32.mrb[99].mxu0  ;;  %v3521_v1 = vpop.f32.mrb[99].mxu1 }
 0x1d9   : > { %v4718_v4 = vadd.f32 %v3455_v51, %v4622_v16  ;;  %v3458_v18 = vadd.f32 %v3457_v61, %v3456_v39  ;;  %v3522_v7 = vadd.f32 %v3521_v1, %v3520_v52  ;;  %v4721_v57 = vadd.f32 %v3519_v56, %v4625_v43 }
 0x1db   : > { %v4724_v21 = vadd.f32 %v3458_v18, %v4628_v19  ;;  %v4727_v10 = vadd.f32 %v3522_v7, %v4631_v45 }
 0x1dd   : > { %v3459_v8 = vpop.f32.mrb[100].mxu0  ;;  %v3523_v9 = vpop.f32.mrb[100].mxu1 }
 0x1de   : > { %v3460_v25 = vpop.f32.mrb[101].mxu0  ;;  %v3524_v62 = vpop.f32.mrb[101].mxu1 }
 0x1df   : > { %v3461_v20 = vadd.f32 %v3460_v25, %v3459_v8  ;;  %v3525_v28 = vadd.f32 %v3524_v62, %v3523_v9  ;;  %v3462_v24 = vpop.f32.mrb[102].mxu0  ;;  %v3526_v16 = vpop.f32.mrb[102].mxu1 }
 0x1e0   : > { %v3463_v54 = vpop.f32.mrb[103].mxu0  ;;  %v3527_v27 = vpop.f32.mrb[103].mxu1 }
 0x1e1   : > { %v4730_v29 = vadd.f32 %v3461_v20, %v4634_v37  ;;  %v3464_v43 = vadd.f32 %v3463_v54, %v3462_v24  ;;  %v3528_v23 = vadd.f32 %v3527_v27, %v3526_v16  ;;  %v4733_v19 = vadd.f32 %v3525_v28, %v4637_v5  ;;  %v295_v27 = vld [vmem:[%s4060_s24 + $0x10] sm:$0xff] }
 0x1e3   : > { %v4736_v45 = vadd.f32 %v3464_v43, %v4640_v41  ;;  %v4739_v32 = vadd.f32 %v3528_v23, %v4643_v3 }
 0x1e5   : > { %v3465_v34 = vpop.f32.mrb[104].mxu0  ;;  %v3529_v40 = vpop.f32.mrb[104].mxu1 }
 0x1e6   : > { %v3466_v50 = vpop.f32.mrb[105].mxu0  ;;  %v3530_v36 = vpop.f32.mrb[105].mxu1 }
 0x1e7   : > { %v3467_v44 = vadd.f32 %v3466_v50, %v3465_v34  ;;  %v3531_v48 = vadd.f32 %v3530_v36, %v3529_v40  ;;  %v3468_v30 = vpop.f32.mrb[106].mxu0  ;;  %v3532_v37 = vpop.f32.mrb[106].mxu1  ;;  %v293_v34 = vld [vmem:[%s4060_s24] sm:$0xff] }
 0x1e8   : > { %v3469_v58 = vpop.f32.mrb[107].mxu0  ;;  %v3533_v51 = vpop.f32.mrb[107].mxu1 }
 0x1e9   : > { %v4742_v56 = vadd.f32 %v3467_v44, %v4646_v0  ;;  %v3470_v5 = vadd.f32 %v3469_v58, %v3468_v30  ;;  %v3534_v39 = vadd.f32 %v3533_v51, %v3532_v37  ;;  %v4745_v41 = vadd.f32 %v3531_v48, %v4649_v6  ;;  %v294_v37 = vld [vmem:[%s4060_s24 + $0x8] sm:$0xff] }
 0x1eb   : > { %v4748_v3 = vadd.f32 %v3470_v5, %v4652_v60  ;;  %v4751_v52 = vadd.f32 %v3534_v39, %v4655_v26 }
 0x1ed   : > { %v3471_v61 = vpop.f32.mrb[108].mxu0  ;;  %v3535_v1 = vpop.f32.mrb[108].mxu1 }
 0x1ee   : > { %v3472_v18 = vpop.f32.mrb[109].mxu0  ;;  %v3536_v7 = vpop.f32.mrb[109].mxu1 }
 0x1ef   : > { %v3473_v8 = vadd.f32 %v3472_v18, %v3471_v61  ;;  %v3537_v9 = vadd.f32 %v3536_v7, %v3535_v1  ;;  %v3474_v0 = vpop.f32.mrb[110].mxu0  ;;  %v3538_v25 = vpop.f32.mrb[110].mxu1 }
 0x1f0   : > { %v3475_v62 = vpop.f32.mrb[111].mxu0  ;;  %v3539_v20 = vpop.f32.mrb[111].mxu1 }
 0x1f1   : > { %v4754_v6 = vadd.f32 %v3473_v8, %v4658_v38  ;;  %v3476_v60 = vadd.f32 %v3475_v62, %v3474_v0  ;;  %v3540_v28 = vadd.f32 %v3539_v20, %v3538_v25  ;;  %v4757_v26 = vadd.f32 %v3537_v9, %v4661_v59  ;;  %v299_v9 = vld [vmem:[%s4060_s24 + $0x30] sm:$0xff]  ;;  %v297_v62 = vld [vmem:[%s4060_s24 + $0x20] sm:$0xff] }
 0x1f3   : > { %v4760_v24 = vadd.f32 %v3476_v60, %v4664_v33  ;;  %v4763_v16 = vadd.f32 %v3540_v28, %v4667_v63  ;;  %v296_v33 = vld [vmem:[%s4060_s24 + $0x18] sm:$0xff] }
 0x1f5   : > { %v3541_v54 = vpop.f32.mrb[112].mxu1  ;;  %v3631_v43 = vpop.f32.mrb[112].mxu0 }
 0x1f6   : > { %v2484_v23 = vadd.f32 %v3631_v43, %v4685_v17  ;;  %v3542_v38 = vpop.f32.mrb[113].mxu1  ;;  %v2475_v40 = vpop.f32.mrb[113].mxu0  ;;  %v300_v43 = vld [vmem:[%s4060_s24 + $0x38] sm:$0xff] }
 0x1f7   : > { %v3543_v50 = vadd.f32 %v3542_v38, %v3541_v54  ;;  %v2476_v59 = vadd.f32 %v2475_v40, %v4673_v55  ;;  %v3544_v36 = vpop.f32.mrb[114].mxu1  ;;  %v3632_v44 = vpop.f32.mrb[114].mxu0 }
 0x1f8   : > { %v2604_v63 = vadd.f32 %v2484_v23, %v295_v27  ;;  %v2487_v48 = vadd.f32 %v3632_v44, %v4691_v31  ;;  %v3545_v30 = vpop.f32.mrb[115].mxu1  ;;  %v2478_v58 = vpop.f32.mrb[115].mxu0 }
 0x1f9   : > { %v2602_v17 = vadd.f32 %v2476_v59, %v293_v34  ;;  %v3546_v51 = vadd.f32 %v3545_v30, %v3544_v36  ;;  %v2479_v5 = vadd.f32 %v2478_v58, %v4679_v15  ;;  %v4774_v39 = vadd.f32 %v3543_v50, %v4670_v14 }
 0x1fa   : > { %2636 = vst [vmem:[%s4060_s24 + $0x10] sm:$0xff] %v2604_v63  ;;  %v2605_v55 = vadd.f32 %v2487_v48, %v296_v33  ;;  %v2744_v0 = vmul.f32 %v2604_v63, %v2604_v63 }
 0x1fb   : > { %2634 = vst [vmem:[%s4060_s24] sm:$0xff] %v2602_v17  ;;  %v2603_v61 = vadd.f32 %v2479_v5, %v294_v37  ;;  %v4779_v1 = vadd.f32 %v3546_v51, %v4676_v53  ;;  %v2742_v31 = vmul.f32 %v2602_v17, %v2602_v17 }
 0x1fc   : > { %2637 = vst [vmem:[%s4060_s24 + $0x18] sm:$0xff] %v2605_v55  ;;  %v2745_v38 = vmul.f32 %v2605_v55, %v2605_v55 }
 0x1fd   : > { %2635 = vst [vmem:[%s4060_s24 + $0x8] sm:$0xff] %v2603_v61  ;;  %v2702_v18 = vadd.f32 %v2603_v61, %v2602_v17  ;;  %v2743_v7 = vmul.f32 %v2603_v61, %v2603_v61  ;;  %v3547_v8 = vpop.f32.mrb[116].mxu1  ;;  %v3635_v15 = vpop.f32.mrb[116].mxu0  ;;  %v303_v61 = vld [vmem:[%s4060_s24 + $0x50] sm:$0xff] }
 0x1fe   : > { %v2500_v14 = vadd.f32 %v3635_v15, %v4709_v35  ;;  %v3548_v25 = vpop.f32.mrb[117].mxu1  ;;  %v2491_v20 = vpop.f32.mrb[117].mxu0 }
 0x1ff   : > { %v2703_v60 = vadd.f32 %v2702_v18, %v2604_v63  ;;  %v2774_v28 = vadd.f32 %v2743_v7, %v2742_v31  ;;  %v3549_v53 = vadd.f32 %v3548_v25, %v3547_v8  ;;  %v2492_v54 = vadd.f32 %v2491_v20, %v4697_v13  ;;  %v3550_v27 = vpop.f32.mrb[118].mxu1  ;;  %v3636_v23 = vpop.f32.mrb[118].mxu0  ;;  %v298_v63 = vld [vmem:[%s4060_s24 + $0x28] sm:$0xff]  ;;  %v301_v8 = vld [vmem:[%s4060_s24 + $0x40] sm:$0xff]  ;;  %v304_v25 = vld [vmem:[%s4060_s24 + $0x58] sm:$0xff] }
 0x200   : > { %v2608_v34 = vadd.f32 %v2500_v14, %v299_v9  ;;  %v2503_v40 = vadd.f32 %v3636_v23, %v4715_v11  ;;  %v3551_v50 = vpop.f32.mrb[119].mxu1  ;;  %v2494_v35 = vpop.f32.mrb[119].mxu0 }
 0x201   : > { %v2775_v59 = vadd.f32 %v2774_v28, %v2744_v0  ;;  %v2606_v36 = vadd.f32 %v2492_v54, %v297_v62  ;;  %v2704_v33 = vadd.f32 %v2703_v60, %v2605_v55  ;;  %v3552_v44 = vadd.f32 %v3551_v50, %v3550_v27  ;;  %v302_v27 = vld [vmem:[%s4060_s24 + $0x48] sm:$0xff] }
 0x202   : > { %2640 = vst [vmem:[%s4060_s24 + $0x30] sm:$0xff] %v2608_v34  ;;  %v2609_v13 = vadd.f32 %v2503_v40, %v300_v43  ;;  %v2495_v48 = vadd.f32 %v2494_v35, %v4703_v47  ;;  %v4793_v30 = vadd.f32 %v3549_v53, %v4682_v49  ;;  %v2748_v15 = vmul.f32 %v2608_v34, %v2608_v34 }
 0x203   : > { %2638 = vst [vmem:[%s4060_s24 + $0x20] sm:$0xff] %v2606_v36  ;;  %v2705_v11 = vadd.f32 %v2704_v33, %v2606_v36  ;;  %v2746_v37 = vmul.f32 %v2606_v36, %v2606_v36  ;;  %v2776_v58 = vadd.f32 %v2775_v59, %v2745_v38  ;;  %v4797_v17 = vadd.f32 %v3552_v44, %v4688_v2 }
 0x204   : > { %2641 = vst [vmem:[%s4060_s24 + $0x38] sm:$0xff] %v2609_v13  ;;  %v2607_v51 = vadd.f32 %v2495_v48, %v298_v63  ;;  %v2749_v40 = vmul.f32 %v2609_v13, %v2609_v13  ;;  %v307_v63 = vld [vmem:[%s4060_s24 + $0x70] sm:$0xff] }
 0x205   : > { %v2777_v5 = vadd.f32 %v2776_v58, %v2746_v37  ;;  %v3553_v55 = vpop.f32.mrb[120].mxu1  ;;  %v3639_v31 = vpop.f32.mrb[120].mxu0 }
 0x206   : > { %2639 = vst [vmem:[%s4060_s24 + $0x28] sm:$0xff] %v2607_v51  ;;  %v2706_v47 = vadd.f32 %v2705_v11, %v2607_v51  ;;  %v2747_v18 = vmul.f32 %v2607_v51, %v2607_v51  ;;  %v2516_v49 = vadd.f32 %v3639_v31, %v4733_v19  ;;  %v3554_v7 = vpop.f32.mrb[121].mxu1  ;;  %v2507_v9 = vpop.f32.mrb[121].mxu0  ;;  %v305_v51 = vld [vmem:[%s4060_s24 + $0x60] sm:$0xff] }
 0x207   : > { %v3555_v0 = vadd.f32 %v3554_v7, %v3553_v55  ;;  %v2508_v2 = vadd.f32 %v2507_v9, %v4721_v57  ;;  %v3556_v14 = vpop.f32.mrb[122].mxu1  ;;  %v3640_v62 = vpop.f32.mrb[122].mxu0 }
 0x208   : > { %v2707_v20 = vadd.f32 %v2706_v47, %v2608_v34  ;;  %v2778_v60 = vadd.f32 %v2777_v5, %v2747_v18  ;;  %v2612_v28 = vadd.f32 %v2516_v49, %v303_v61  ;;  %v2519_v53 = vadd.f32 %v3640_v62, %v4739_v32  ;;  %v3557_v54 = vpop.f32.mrb[123].mxu1  ;;  %v2510_v19 = vpop.f32.mrb[123].mxu0  ;;  %v308_v47 = vld [vmem:[%s4060_s24 + $0x78] sm:$0xff] }
 0x209   : > { %v2610_v43 = vadd.f32 %v2508_v2, %v301_v8  ;;  %v3558_v23 = vadd.f32 %v3557_v54, %v3556_v14  ;;  %v2511_v38 = vadd.f32 %v2510_v19, %v4727_v10  ;;  %v4810_v57 = vadd.f32 %v3555_v0, %v4694_v12  ;;  %v306_v0 = vld [vmem:[%s4060_s24 + $0x68] sm:$0xff] }
 0x20a   : > { %v2779_v34 = vadd.f32 %v2778_v60, %v2748_v15  ;;  %2644 = vst [vmem:[%s4060_s24 + $0x50] sm:$0xff] %v2612_v28  ;;  %v2708_v50 = vadd.f32 %v2707_v20, %v2609_v13  ;;  %v2613_v35 = vadd.f32 %v2519_v53, %v304_v25  ;;  %v2752_v55 = vmul.f32 %v2612_v28, %v2612_v28 }
 0x20b   : > { %2642 = vst [vmem:[%s4060_s24 + $0x40] sm:$0xff] %v2610_v43  ;;  %v2750_v32 = vmul.f32 %v2610_v43, %v2610_v43  ;;  %v2611_v59 = vadd.f32 %v2511_v38, %v302_v27  ;;  %v4815_v36 = vadd.f32 %v3558_v23, %v4700_v46 }
 0x20c   : > { %v2709_v33 = vadd.f32 %v2708_v50, %v2610_v43  ;;  %v2780_v44 = vadd.f32 %v2779_v34, %v2749_v40  ;;  %2645 = vst [vmem:[%s4060_s24 + $0x58] sm:$0xff] %v2613_v35  ;;  %v2753_v62 = vmul.f32 %v2613_v35, %v2613_v35  ;;  %v311_v43 = vld [vmem:[%s4060_s24 + $0x90] sm:$0xff] }
 0x20d   : > { %2643 = vst [vmem:[%s4060_s24 + $0x48] sm:$0xff] %v2611_v59  ;;  %v2751_v12 = vmul.f32 %v2611_v59, %v2611_v59  ;;  %v3559_v10 = vpop.f32.mrb[124].mxu1  ;;  %v3643_v48 = vpop.f32.mrb[124].mxu0 }
 0x20e   : > { %v2781_v11 = vadd.f32 %v2780_v44, %v2750_v32  ;;  %v2710_v37 = vadd.f32 %v2709_v33, %v2611_v59  ;;  %v2532_v13 = vadd.f32 %v3643_v48, %v4757_v26  ;;  %v3560_v58 = vpop.f32.mrb[125].mxu1  ;;  %v2523_v5 = vpop.f32.mrb[125].mxu0 }
 0x20f   : > { %v3561_v46 = vadd.f32 %v3560_v58, %v3559_v10  ;;  %v2524_v61 = vadd.f32 %v2523_v5, %v4745_v41  ;;  %v3562_v31 = vpop.f32.mrb[126].mxu1  ;;  %v3644_v18 = vpop.f32.mrb[126].mxu0  ;;  %v310_v58 = vld [vmem:[%s4060_s24 + $0x88] sm:$0xff] }
 0x210   : > { %v2711_v49 = vadd.f32 %v2710_v37, %v2612_v28  ;;  %v2782_v7 = vadd.f32 %v2781_v11, %v2751_v12  ;;  %v2616_v8 = vadd.f32 %v2532_v13, %v307_v63  ;;  %v2535_v9 = vadd.f32 %v3644_v18, %v4763_v16  ;;  %v3563_v15 = vpop.f32.mrb[127].mxu1  ;;  %v2526_v26 = vpop.f32.mrb[127].mxu0  ;;  %v312_v12 = vld [vmem:[%s4060_s24 + $0x98] sm:$0xff] }
 0x211   : > { %v2614_v2 = vadd.f32 %v2524_v61, %v305_v51  ;;  %v3564_v14 = vadd.f32 %v3563_v15, %v3562_v31  ;;  %v2527_v25 = vadd.f32 %v2526_v26, %v4751_v52  ;;  %v2403_v41 = vadd.f32 %v3561_v46, %v4706_v42 }
 0x212   : > { %v2783_v20 = vadd.f32 %v2782_v7, %v2752_v55  ;;  %2648 = vst [vmem:[%s4060_s24 + $0x70] sm:$0xff] %v2616_v8  ;;  %v2712_v60 = vadd.f32 %v2711_v49, %v2613_v35  ;;  %v2617_v28 = vadd.f32 %v2535_v9, %v308_v47  ;;  %v309_v35 = vld [vmem:[%s4060_s24 + $0x80] sm:$0xff]  ;;  %v2756_v59 = vmul.f32 %v2616_v8, %v2616_v8  ;;  %v315_v9 = vld [vmem:[%s4060_s24 + $0xb0] sm:$0xff] }
 0x213   : > { %2646 = vst [vmem:[%s4060_s24 + $0x60] sm:$0xff] %v2614_v2  ;;  %v2754_v16 = vmul.f32 %v2614_v2, %v2614_v2  ;;  %v2615_v53 = vadd.f32 %v2527_v25, %v306_v0  ;;  %v4831_v54 = vadd.f32 %v3564_v14, %v4712_v22  ;;  %v313_v25 = vld [vmem:[%s4060_s24 + $0xa0] sm:$0xff] }
 0x214   : > { %v2713_v27 = vadd.f32 %v2712_v60, %v2614_v2  ;;  %v2784_v19 = vadd.f32 %v2783_v20, %v2753_v62  ;;  %2649 = vst [vmem:[%s4060_s24 + $0x78] sm:$0xff] %v2617_v28  ;;  %v2757_v46 = vmul.f32 %v2617_v28, %v2617_v28 }
 0x215   : > { %2647 = vst [vmem:[%s4060_s24 + $0x68] sm:$0xff] %v2615_v53  ;;  %v2755_v52 = vmul.f32 %v2615_v53, %v2615_v53  ;;  %v3565_v42 = vpop.f32.mrb[128].mxu1  ;;  %v3647_v23 = vpop.f32.mrb[128].mxu0 }
 0x216   : > { %v2785_v38 = vadd.f32 %v2784_v19, %v2754_v16  ;;  %v2714_v40 = vadd.f32 %v2713_v27, %v2615_v53  ;;  %v2548_v34 = vadd.f32 %v3647_v23, %v4793_v30  ;;  %v3566_v50 = vpop.f32.mrb[129].mxu1  ;;  %v2539_v32 = vpop.f32.mrb[129].mxu0  ;;  %v316_v16 = vld [vmem:[%s4060_s24 + $0xb8] sm:$0xff]  ;;  %v314_v23 = vld [vmem:[%s4060_s24 + $0xa8] sm:$0xff] }
 0x217   : > { %v3567_v22 = vadd.f32 %v3566_v50, %v3565_v42  ;;  %v2540_v33 = vadd.f32 %v2539_v32, %v4774_v39  ;;  %v3568_v44 = vpop.f32.mrb[130].mxu1  ;;  %v3648_v10 = vpop.f32.mrb[130].mxu0 }
 0x218   : > { %v2715_v63 = vadd.f32 %v2714_v40, %v2616_v8  ;;  %v2786_v48 = vadd.f32 %v2785_v38, %v2755_v52  ;;  %v2620_v11 = vadd.f32 %v2548_v34, %v311_v43  ;;  %v2551_v37 = vadd.f32 %v3648_v10, %v4797_v17  ;;  %v3569_v13 = vpop.f32.mrb[131].mxu1  ;;  %v2542_v30 = vpop.f32.mrb[131].mxu0 }
 0x219   : > { %v2618_v51 = vadd.f32 %v2540_v33, %v309_v35  ;;  %v3570_v5 = vadd.f32 %v3569_v13, %v3568_v44  ;;  %v2543_v55 = vadd.f32 %v2542_v30, %v4779_v1  ;;  %v4844_v39 = vadd.f32 %v3567_v22, %v4718_v4 }
 0x21a   : > { %v2787_v61 = vadd.f32 %v2786_v48, %v2756_v59  ;;  %2652 = vst [vmem:[%s4060_s24 + $0x90] sm:$0xff] %v2620_v11  ;;  %v2716_v31 = vadd.f32 %v2715_v63, %v2617_v28  ;;  %v2621_v47 = vadd.f32 %v2551_v37, %v312_v12  ;;  %v2760_v20 = vmul.f32 %v2620_v11, %v2620_v11 }
 0x21b   : > { %2650 = vst [vmem:[%s4060_s24 + $0x80] sm:$0xff] %v2618_v51  ;;  %v2758_v17 = vmul.f32 %v2618_v51, %v2618_v51  ;;  %v2619_v18 = vadd.f32 %v2543_v55, %v310_v58  ;;  %v4849_v49 = vadd.f32 %v3570_v5, %v4724_v21  ;;  %v317_v58 = vld [vmem:[%s4060_s24 + $0xc0] sm:$0xff] }
 0x21c   : > { %v2717_v7 = vadd.f32 %v2716_v31, %v2618_v51  ;;  %v2788_v8 = vadd.f32 %v2787_v61, %v2757_v46  ;;  %2653 = vst [vmem:[%s4060_s24 + $0x98] sm:$0xff] %v2621_v47  ;;  %v2761_v50 = vmul.f32 %v2621_v47, %v2621_v47  ;;  %v320_v46 = vld [vmem:[%s4060_s24 + $0xd8] sm:$0xff] }
 0x21d   : > { %2651 = vst [vmem:[%s4060_s24 + $0x88] sm:$0xff] %v2619_v18  ;;  %v2759_v4 = vmul.f32 %v2619_v18, %v2619_v18  ;;  %v3571_v1 = vpop.f32.mrb[132].mxu1  ;;  %v3651_v15 = vpop.f32.mrb[132].mxu0 }
 0x21e   : > { %v2789_v0 = vadd.f32 %v2788_v8, %v2758_v17  ;;  %v2718_v26 = vadd.f32 %v2717_v7, %v2619_v18  ;;  %v2564_v2 = vadd.f32 %v3651_v15, %v2403_v41  ;;  %v3572_v14 = vpop.f32.mrb[133].mxu1  ;;  %v2555_v62 = vpop.f32.mrb[133].mxu0  ;;  %v318_v8 = vld [vmem:[%s4060_s24 + $0xc8] sm:$0xff] }
 0x21f   : > { %v3573_v60 = vadd.f32 %v3572_v14, %v3571_v1  ;;  %v2556_v21 = vadd.f32 %v2555_v62, %v4810_v57  ;;  %v3574_v28 = vpop.f32.mrb[134].mxu1  ;;  %v3652_v53 = vpop.f32.mrb[134].mxu0 }
 0x220   : > { %v2719_v27 = vadd.f32 %v2718_v26, %v2620_v11  ;;  %v2790_v19 = vadd.f32 %v2789_v0, %v2759_v4  ;;  %v2624_v52 = vadd.f32 %v2564_v2, %v315_v9  ;;  %v2567_v42 = vadd.f32 %v3652_v53, %v4831_v54  ;;  %v3575_v43 = vpop.f32.mrb[135].mxu1  ;;  %v2558_v41 = vpop.f32.mrb[135].mxu0 }
 0x221   : > { %v2622_v38 = vadd.f32 %v2556_v21, %v313_v25  ;;  %v3576_v40 = vadd.f32 %v3575_v43, %v3574_v28  ;;  %v2559_v34 = vadd.f32 %v2558_v41, %v4815_v36  ;;  %v2419_v57 = vadd.f32 %v3573_v60, %v4730_v29  ;;  %v319_v29 = vld [vmem:[%s4060_s24 + $0xd0] sm:$0xff] }
 0x222   : > { %v2791_v35 = vadd.f32 %v2790_v19, %v2760_v20  ;;  %2656 = vst [vmem:[%s4060_s24 + $0xb0] sm:$0xff] %v2624_v52  ;;  %v2720_v32 = vadd.f32 %v2719_v27, %v2621_v47  ;;  %v2625_v59 = vadd.f32 %v2567_v42, %v316_v16  ;;  %v2764_v51 = vmul.f32 %v2624_v52, %v2624_v52  ;;  %v321_v19 = vld [vmem:[%s4060_s24 + $0xe0] sm:$0xff] }
 0x223   : > { %2654 = vst [vmem:[%s4060_s24 + $0xa0] sm:$0xff] %v2622_v38  ;;  %v2762_v54 = vmul.f32 %v2622_v38, %v2622_v38  ;;  %v2623_v22 = vadd.f32 %v2559_v34, %v314_v23  ;;  %v2422_v33 = vadd.f32 %v3576_v40, %v4736_v45 }
 0x224   : > { %v2721_v44 = vadd.f32 %v2720_v32, %v2622_v38  ;;  %v2792_v12 = vadd.f32 %v2791_v35, %v2761_v50  ;;  %2657 = vst [vmem:[%s4060_s24 + $0xb8] sm:$0xff] %v2625_v59  ;;  %v2765_v0 = vmul.f32 %v2625_v59, %v2625_v59 }
 0x225   : > { %2655 = vst [vmem:[%s4060_s24 + $0xa8] sm:$0xff] %v2623_v22  ;;  %v2763_v36 = vmul.f32 %v2623_v22, %v2623_v22  ;;  %v3577_v10 = vpop.f32.mrb[136].mxu1  ;;  %v3655_v63 = vpop.f32.mrb[136].mxu0 }
 0x226   : > { %v2793_v48 = vadd.f32 %v2792_v12, %v2762_v54  ;;  %v2722_v11 = vadd.f32 %v2721_v44, %v2623_v22  ;;  %v2580_v37 = vadd.f32 %v3655_v63, %v2419_v57  ;;  %v3578_v13 = vpop.f32.mrb[137].mxu1  ;;  %v2571_v30 = vpop.f32.mrb[137].mxu0  ;;  %v322_v57 = vld [vmem:[%s4060_s24 + $0xe8] sm:$0xff]  ;;  %v323_v44 = vld [vmem:[%s4060_s24 + $0xf0] sm:$0xff] }
 0x227   : > { %v3579_v5 = vadd.f32 %v3578_v13, %v3577_v10  ;;  %v2572_v45 = vadd.f32 %v2571_v30, %v4844_v39  ;;  %v3580_v55 = vpop.f32.mrb[138].mxu1  ;;  %v3656_v61 = vpop.f32.mrb[138].mxu0 }
 0x228   : > { %v2723_v31 = vadd.f32 %v2722_v11, %v2624_v52  ;;  %v2794_v47 = vadd.f32 %v2793_v48, %v2763_v36  ;;  %v2628_v17 = vadd.f32 %v2580_v37, %v319_v29  ;;  %v2583_v18 = vadd.f32 %v3656_v61, %v2422_v33  ;;  %v3581_v7 = vpop.f32.mrb[139].mxu1  ;;  %v2574_v4 = vpop.f32.mrb[139].mxu0  ;;  %v324_v37 = vld [vmem:[%s4060_s24 + $0xf8] sm:$0xff] }
 0x229   : > { %v2626_v1 = vadd.f32 %v2572_v45, %v317_v58  ;;  %v3582_v9 = vadd.f32 %v3581_v7, %v3580_v55  ;;  %v2575_v15 = vadd.f32 %v2574_v4, %v4849_v49  ;;  %v2427_v39 = vadd.f32 %v3579_v5, %v4742_v56 }
 0x22a   : > { %v2795_v26 = vadd.f32 %v2794_v47, %v2764_v51  ;;  %2660 = vst [vmem:[%s4060_s24 + $0xd0] sm:$0xff] %v2628_v17  ;;  %v2724_v2 = vadd.f32 %v2723_v31, %v2625_v59  ;;  %v2629_v14 = vadd.f32 %v2583_v18, %v320_v46 }
 0x22b   : > { %2658 = vst [vmem:[%s4060_s24 + $0xc0] sm:$0xff] %v2626_v1  ;;  %v2766_v25 = vmul.f32 %v2626_v1, %v2626_v1  ;;  %v2627_v62 = vadd.f32 %v2575_v15, %v318_v8  ;;  %v2430_v20 = vadd.f32 %v3582_v9, %v4748_v3  ;;  %v2768_v3 = vmul.f32 %v2628_v17, %v2628_v17 }
 0x22c   : > { %v2725_v60 = vadd.f32 %v2724_v2, %v2626_v1  ;;  %v2796_v21 = vadd.f32 %v2795_v26, %v2765_v0  ;;  %2661 = vst [vmem:[%s4060_s24 + $0xd8] sm:$0xff] %v2629_v14  ;;  %v2769_v22 = vmul.f32 %v2629_v14, %v2629_v14  ;;  %v2701_v0 = vld [vmem:[%s4912_s3] sm:$0x1] }
 0x22d   : > { %2659 = vst [vmem:[%s4060_s24 + $0xc8] sm:$0xff] %v2627_v62  ;;  %v2767_v28 = vmul.f32 %v2627_v62, %v2627_v62  ;;  %v3583_v49 = vpop.f32.mrb[140].mxu1  ;;  %v3659_v16 = vpop.f32.mrb[140].mxu0 }
 0x22e   : > { %v2797_v56 = vadd.f32 %v2796_v21, %v2766_v25  ;;  %v2726_v53 = vadd.f32 %v2725_v60, %v2627_v62  ;;  %v3584_v27 = vpop.f32.mrb[141].mxu1  ;;  %v2587_v52 = vpop.f32.mrb[141].mxu0 }
 0x22f   : > { %v3585_v42 = vadd.f32 %v3584_v27, %v3583_v49  ;;  %v2588_v43 = vadd.f32 %v2587_v52, %v2427_v39  ;;  %v3586_v23 = vpop.f32.mrb[142].mxu1  ;;  %v3660_v41 = vpop.f32.mrb[142].mxu0 }
 0x230   : > { %v2727_v38 = vadd.f32 %v2726_v53, %v2628_v17  ;;  %v2798_v40 = vadd.f32 %v2797_v56, %v2767_v28  ;;  %v3587_v34 = vpop.f32.mrb[143].mxu1  ;;  %v2590_v50 = vpop.f32.mrb[143].mxu0 }
 0x231   : > { %v2435_v35 = vadd.f32 %v3585_v42, %v4754_v6  ;;  %v2630_v32 = vadd.f32 %v2588_v43, %v321_v19  ;;  %v3588_v59 = vadd.f32 %v3587_v34, %v3586_v23  ;;  %v2591_v54 = vadd.f32 %v2590_v50, %v2430_v20 }
 0x232   : > { %v2799_v33 = vadd.f32 %v2798_v40, %v2768_v3  ;;  %v2728_v12 = vadd.f32 %v2727_v38, %v2629_v14  ;;  %v2741_v14 = vld [vmem:[%s4913_s4] sm:$0x1] }
 0x233   : > { %v2596_v36 = vadd.f32 %v3659_v16, %v2435_v35  ;;  %2662 = vst [vmem:[%s4060_s24 + $0xe0] sm:$0xff] %v2630_v32  ;;  %v2770_v10 = vmul.f32 %v2630_v32, %v2630_v32  ;;  %v2438_v29 = vadd.f32 %v3588_v59, %v4760_v24  ;;  %v2631_v63 = vadd.f32 %v2591_v54, %v322_v57 }
 0x234   : > { %v2729_v48 = vadd.f32 %v2728_v12, %v2630_v32  ;;  %v2800_v11 = vadd.f32 %v2799_v33, %v2769_v22 }
 0x235   : > { %v2632_v6 = vadd.f32 %v2596_v36, %v323_v44  ;;  %v2599_v13 = vadd.f32 %v3660_v41, %v2438_v29  ;;  %2663 = vst [vmem:[%s4060_s24 + $0xe8] sm:$0xff] %v2631_v63  ;;  %v2771_v58 = vmul.f32 %v2631_v63, %v2631_v63 }
 0x236   : > { %v2801_v30 = vadd.f32 %v2800_v11, %v2770_v10  ;;  %v2730_v51 = vadd.f32 %v2729_v48, %v2631_v63 }
 0x237   : > { %2664 = vst [vmem:[%s4060_s24 + $0xf0] sm:$0xff] %v2632_v6  ;;  %v2633_v5 = vadd.f32 %v2599_v13, %v324_v37  ;;  %v2772_v45 = vmul.f32 %v2632_v6, %v2632_v6 }
 0x238   : > { %v2731_v55 = vadd.f32 %v2730_v51, %v2632_v6  ;;  %v2802_v46 = vadd.f32 %v2801_v30, %v2771_v58 }
 0x239   : > { %2665 = vst [vmem:[%s4060_s24 + $0xf8] sm:$0xff] %v2633_v5  ;;  %v2773_v61 = vmul.f32 %v2633_v5, %v2633_v5 }
 0x23a   : > { %v2732_v31 = vadd.f32 %v2731_v55, %v2633_v5  ;;  %v2803_v24 = vadd.f32 %v2802_v46, %v2772_v45 }
 0x23c   : > { %v2733_v47 = vrot.slane %v2732_v31, 4  ;;  %v2804_v17 = vadd.f32 %v2803_v24, %v2773_v61 }
 0x23e   : > { %v2734_v18 = vadd.f32 %v2733_v47, %v2732_v31  ;;  %v2805_v7 = vrot.slane %v2804_v17, 4 }
 0x240   : > { %v2735_v8 = vrot.slane %v2734_v18, 2  ;;  %v2806_v4 = vadd.f32 %v2805_v7, %v2804_v17 }
 0x242   : > { %v2736_v1 = vadd.f32 %v2735_v8, %v2734_v18  ;;  %v2807_v9 = vrot.slane %v2806_v4, 2 }
 0x244   : > { %v2737_v15 = vrot.slane %v2736_v1, 1  ;;  %v2808_v39 = vadd.f32 %v2807_v9, %v2806_v4 }
 0x246   : > { %v2738_v26 = vadd.f32 %v2737_v15, %v2736_v1  ;;  %v2809_v2 = vrot.slane %v2808_v39, 1 }
 0x248   : > { %v2739_v25 = vadd.f32 %v2738_v26, %v2701_v0  ;;  %v2810_v62 = vadd.f32 %v2809_v2, %v2808_v39 }
 0x24a   : > { %2740 = vst [vmem:[%s4912_s3] sm:$0x1] %v2739_v25  ;;  %v2811_v20 = vadd.f32 %v2810_v62, %v2741_v14 }
 0x24c   : > { %2812 = vst [vmem:[%s4913_s4] sm:$0x1] %v2811_v20 }
 0x24d PF: > { %s15_s17 = sadd.s32 1, %s4006_s17   ;;  %s4914_s15 = smov %s4002_s16 }
 0x24e   : > { %p12_p6 = scmp.ge.s32.totalorder %s15_s17, 4   ;;  %s4915_s16 = smov %s4917_s18 }
 0x250   :  { %14 = sbr.rel (!%p12_p6) target bundleno = 2 (0x2), region = 89 }

// kernel: unet_hrpxp_forward.96
= control target key start
LH: loop header
LB: loop body
LE: loop exit
PB: predicated region body
PF: predicated region fallthrough
CT: control target
= control target key end

     0   :  { %s800_s0 = inlined_call_operand.vmem [shape: f32[512,128], index: 0, kind: input, shape index: {}]   ;;  %s801_s1 = inlined_call_operand.vmem [shape: f32[1,128], index: 1, kind: input, shape index: {}]   ;;  %s802_s2 = inlined_call_operand.vmem [shape: f32[1,128], index: 2, kind: input, shape index: {}]   ;;  %s803_s3 = inlined_call_operand.vmem [shape: bf16[512,128], index: 3, kind: output, shape index: {}]  }
   0x1   :  { %v14_v0 = vld [vmem:[%s800_s0] sm:$0xff]  ;;  %v15_v1 = vld [vmem:[%s800_s0 + $0x8] sm:$0xff]  ;;  %v16_v6 = vld [vmem:[%s800_s0 + $0x10] sm:$0xff] }
   0x2   :  { %v383_v2 = vld [vmem:[%s801_s1] ss:$0 sm:$0xff]  ;;  %v17_v7 = vld [vmem:[%s800_s0 + $0x18] sm:$0xff]  ;;  %v19_v11 = vld [vmem:[%s800_s0 + $0x28] sm:$0xff] }
   0x3   :  { %v85_v3 = vmul.f32 %v383_v2, %v14_v0  ;;  %v86_v4 = vmul.f32 %v383_v2, %v15_v1  ;;  %v390_v5 = vld [vmem:[%s802_s2] ss:$0 sm:$0xff]  ;;  %v87_v8 = vmul.f32 %v383_v2, %v16_v6  ;;  %v88_v9 = vmul.f32 %v383_v2, %v17_v7  ;;  %v20_v12 = vld [vmem:[%s800_s0 + $0x30] sm:$0xff]  ;;  %v21_v17 = vld [vmem:[%s800_s0 + $0x38] sm:$0xff] }
   0x4   :  { %v18_v10 = vld [vmem:[%s800_s0 + $0x20] sm:$0xff]  ;;  %v90_v16 = vmul.f32 %v383_v2, %v19_v11  ;;  %v91_v20 = vmul.f32 %v383_v2, %v20_v12  ;;  %v92_v21 = vmul.f32 %v383_v2, %v21_v17  ;;  %v23_v27 = vld [vmem:[%s800_s0 + $0x48] sm:$0xff]  ;;  %v24_v32 = vld [vmem:[%s800_s0 + $0x50] sm:$0xff] }
   0x5   :  { %v156_v13 = vadd.f32 %v390_v5, %v85_v3  ;;  %v157_v14 = vadd.f32 %v390_v5, %v86_v4  ;;  %v89_v15 = vmul.f32 %v383_v2, %v18_v10  ;;  %v158_v18 = vadd.f32 %v390_v5, %v87_v8  ;;  %v22_v22 = vld [vmem:[%s800_s0 + $0x40] sm:$0xff]  ;;  %v25_v33 = vld [vmem:[%s800_s0 + $0x58] sm:$0xff]  ;;  %v27_v39 = vld [vmem:[%s800_s0 + $0x68] sm:$0xff] }
   0x6   :  { %v159_v19 = vadd.f32 %v390_v5, %v88_v9  ;;  %v161_v26 = vadd.f32 %v390_v5, %v90_v16  ;;  %v162_v30 = vadd.f32 %v390_v5, %v91_v20  ;;  %v163_v31 = vadd.f32 %v390_v5, %v92_v21  ;;  %v26_v38 = vld [vmem:[%s800_s0 + $0x60] sm:$0xff]  ;;  %v28_v44 = vld [vmem:[%s800_s0 + $0x70] sm:$0xff]  ;;  %v29_v49 = vld [vmem:[%s800_s0 + $0x78] sm:$0xff] }
   0x7   :  { %v220_v23 = vmax.f32 %v156_v13, 0.0  ;;  %v221_v24 = vmax.f32 %v157_v14, 0.0  ;;  %v160_v25 = vadd.f32 %v390_v5, %v89_v15  ;;  %v222_v28 = vmax.f32 %v158_v18, 0.0  ;;  %v30_v54 = vld [vmem:[%s800_s0 + $0x80] sm:$0xff]  ;;  %v31_v63 = vld [vmem:[%s800_s0 + $0x88] sm:$0xff]  ;;  %v32_v6 = vld [vmem:[%s800_s0 + $0x90] sm:$0xff] }
   0x8   :  { %v223_v29 = vmax.f32 %v159_v19, 0.0  ;;  %v225_v36 = vmax.f32 %v161_v26, 0.0  ;;  %v93_v37 = vmul.f32 %v383_v2, %v22_v22  ;;  %v226_v41 = vmax.f32 %v162_v30, 0.0  ;;  %v33_v7 = vld [vmem:[%s800_s0 + $0x98] sm:$0xff]  ;;  %v34_v12 = vld [vmem:[%s800_s0 + $0xa0] sm:$0xff]  ;;  %v35_v13 = vld [vmem:[%s800_s0 + $0xa8] sm:$0xff] }
   0x9   :  { %v284_v34 = vpack.c.bf16 %v221_v24, %v220_v23  ;;  %v224_v35 = vmax.f32 %v160_v25, 0.0  ;;  %v227_v42 = vmax.f32 %v163_v31, 0.0  ;;  %v94_v43 = vmul.f32 %v383_v2, %v23_v27  ;;  %v36_v18 = vld [vmem:[%s800_s0 + $0xb0] sm:$0xff]  ;;  %v37_v23 = vld [vmem:[%s800_s0 + $0xb8] sm:$0xff] }
   0xa   :  { %v285_v40 = vpack.c.bf16 %v223_v29, %v222_v28  ;;  %v164_v46 = vadd.f32 %v390_v5, %v93_v37  ;;  %v95_v47 = vmul.f32 %v383_v2, %v24_v32  ;;  %v96_v48 = vmul.f32 %v383_v2, %v25_v33  ;;  %v38_v28 = vld [vmem:[%s800_s0 + $0xc0] sm:$0xff]  ;;  %v39_v37 = vld [vmem:[%s800_s0 + $0xc8] sm:$0xff] }
   0xb   :  { %316 = vst [vmem:[%s803_s3] sm:$0xff] %v284_v34  ;;  %v286_v45 = vpack.c.bf16 %v225_v36, %v224_v35  ;;  %v287_v50 = vpack.c.bf16 %v227_v42, %v226_v41  ;;  %v165_v51 = vadd.f32 %v390_v5, %v94_v43  ;;  %v97_v52 = vmul.f32 %v383_v2, %v26_v38  ;;  %v40_v42 = vld [vmem:[%s800_s0 + $0xd0] sm:$0xff]  ;;  %v41_v43 = vld [vmem:[%s800_s0 + $0xd8] sm:$0xff] }
   0xc   :  { %317 = vst [vmem:[%s803_s3 + $0x8] sm:$0xff] %v285_v40  ;;  %v98_v53 = vmul.f32 %v383_v2, %v27_v39  ;;  %v228_v55 = vmax.f32 %v164_v46, 0.0  ;;  %v166_v56 = vadd.f32 %v390_v5, %v95_v47  ;;  %v167_v57 = vadd.f32 %v390_v5, %v96_v48  ;;  %v42_v48 = vld [vmem:[%s800_s0 + $0xe0] sm:$0xff] }
   0xd   :  { %318 = vst [vmem:[%s803_s3 + $0x10] sm:$0xff] %v286_v45  ;;  %v99_v58 = vmul.f32 %v383_v2, %v28_v44  ;;  %319 = vst [vmem:[%s803_s3 + $0x18] sm:$0xff] %v287_v50  ;;  %v229_v59 = vmax.f32 %v165_v51, 0.0  ;;  %v168_v60 = vadd.f32 %v390_v5, %v97_v52  ;;  %v100_v62 = vmul.f32 %v383_v2, %v29_v49  ;;  %v43_v49 = vld [vmem:[%s800_s0 + $0xe8] sm:$0xff] }
   0xe   :  { %v169_v61 = vadd.f32 %v390_v5, %v98_v53  ;;  %v230_v0 = vmax.f32 %v166_v56, 0.0  ;;  %v231_v1 = vmax.f32 %v167_v57, 0.0  ;;  %v101_v4 = vmul.f32 %v383_v2, %v30_v54  ;;  %v44_v54 = vld [vmem:[%s800_s0 + $0xf0] sm:$0xff] }
   0xf   :  { %v170_v3 = vadd.f32 %v390_v5, %v99_v58  ;;  %v288_v8 = vpack.c.bf16 %v229_v59, %v228_v55  ;;  %v232_v9 = vmax.f32 %v168_v60, 0.0  ;;  %v171_v11 = vadd.f32 %v390_v5, %v100_v62  ;;  %v45_v59 = vld [vmem:[%s800_s0 + $0xf8] sm:$0xff] }
  0x10   :  { %v233_v10 = vmax.f32 %v169_v61, 0.0  ;;  %v289_v14 = vpack.c.bf16 %v231_v1, %v230_v0  ;;  %v102_v16 = vmul.f32 %v383_v2, %v31_v63  ;;  %v172_v17 = vadd.f32 %v390_v5, %v101_v4  ;;  %v46_v0 = vld [vmem:[%s800_s0 + $0x100] sm:$0xff] }
  0x11   :  { %v234_v15 = vmax.f32 %v170_v3, 0.0  ;;  %320 = vst [vmem:[%s803_s3 + $0x20] sm:$0xff] %v288_v8  ;;  %v235_v20 = vmax.f32 %v171_v11, 0.0  ;;  %v103_v21 = vmul.f32 %v383_v2, %v32_v6  ;;  %v104_v22 = vmul.f32 %v383_v2, %v33_v7  ;;  %v47_v11 = vld [vmem:[%s800_s0 + $0x108] sm:$0xff] }
  0x12   :  { %v290_v19 = vpack.c.bf16 %v233_v10, %v232_v9  ;;  %321 = vst [vmem:[%s803_s3 + $0x28] sm:$0xff] %v289_v14  ;;  %v173_v24 = vadd.f32 %v390_v5, %v102_v16  ;;  %v236_v25 = vmax.f32 %v172_v17, 0.0  ;;  %v105_v26 = vmul.f32 %v383_v2, %v34_v12  ;;  %v48_v16 = vld [vmem:[%s800_s0 + $0x110] sm:$0xff]  ;;  %v49_v17 = vld [vmem:[%s800_s0 + $0x118] sm:$0xff] }
  0x13   :  { %v106_v27 = vmul.f32 %v383_v2, %v35_v13  ;;  %v291_v29 = vpack.c.bf16 %v235_v20, %v234_v15  ;;  %v174_v30 = vadd.f32 %v390_v5, %v103_v21  ;;  %v175_v31 = vadd.f32 %v390_v5, %v104_v22  ;;  %v50_v22 = vld [vmem:[%s800_s0 + $0x120] sm:$0xff] }
  0x14   :  { %322 = vst [vmem:[%s803_s3 + $0x30] sm:$0xff] %v290_v19  ;;  %v107_v32 = vmul.f32 %v383_v2, %v36_v18  ;;  %v237_v33 = vmax.f32 %v173_v24, 0.0  ;;  %v176_v34 = vadd.f32 %v390_v5, %v105_v26  ;;  %v108_v36 = vmul.f32 %v383_v2, %v37_v23  ;;  %v51_v23 = vld [vmem:[%s800_s0 + $0x128] sm:$0xff] }
  0x15   :  { %v177_v35 = vadd.f32 %v390_v5, %v106_v27  ;;  %323 = vst [vmem:[%s803_s3 + $0x38] sm:$0xff] %v291_v29  ;;  %v238_v38 = vmax.f32 %v174_v30, 0.0  ;;  %v239_v39 = vmax.f32 %v175_v31, 0.0  ;;  %v109_v41 = vmul.f32 %v383_v2, %v38_v28  ;;  %v52_v28 = vld [vmem:[%s800_s0 + $0x130] sm:$0xff] }
  0x16   :  { %v178_v40 = vadd.f32 %v390_v5, %v107_v32  ;;  %v292_v44 = vpack.c.bf16 %v237_v33, %v236_v25  ;;  %v240_v45 = vmax.f32 %v176_v34, 0.0  ;;  %v179_v47 = vadd.f32 %v390_v5, %v108_v36  ;;  %v53_v33 = vld [vmem:[%s800_s0 + $0x138] sm:$0xff] }
  0x17   :  { %v241_v46 = vmax.f32 %v177_v35, 0.0  ;;  %v293_v50 = vpack.c.bf16 %v239_v39, %v238_v38  ;;  %v110_v52 = vmul.f32 %v383_v2, %v39_v37  ;;  %v180_v53 = vadd.f32 %v390_v5, %v109_v41  ;;  %v54_v38 = vld [vmem:[%s800_s0 + $0x140] sm:$0xff] }
  0x18   :  { %v242_v51 = vmax.f32 %v178_v40, 0.0  ;;  %324 = vst [vmem:[%s803_s3 + $0x40] sm:$0xff] %v292_v44  ;;  %v243_v56 = vmax.f32 %v179_v47, 0.0  ;;  %v111_v57 = vmul.f32 %v383_v2, %v40_v42  ;;  %v112_v58 = vmul.f32 %v383_v2, %v41_v43  ;;  %v55_v47 = vld [vmem:[%s800_s0 + $0x148] sm:$0xff] }
  0x19   :  { %v294_v55 = vpack.c.bf16 %v241_v46, %v240_v45  ;;  %325 = vst [vmem:[%s803_s3 + $0x48] sm:$0xff] %v293_v50  ;;  %v181_v60 = vadd.f32 %v390_v5, %v110_v52  ;;  %v244_v61 = vmax.f32 %v180_v53, 0.0  ;;  %v113_v62 = vmul.f32 %v383_v2, %v42_v48  ;;  %v56_v52 = vld [vmem:[%s800_s0 + $0x150] sm:$0xff]  ;;  %v57_v53 = vld [vmem:[%s800_s0 + $0x158] sm:$0xff] }
  0x1a   :  { %v114_v63 = vmul.f32 %v383_v2, %v43_v49  ;;  %v295_v1 = vpack.c.bf16 %v243_v56, %v242_v51  ;;  %v182_v3 = vadd.f32 %v390_v5, %v111_v57  ;;  %v183_v4 = vadd.f32 %v390_v5, %v112_v58  ;;  %v58_v58 = vld [vmem:[%s800_s0 + $0x160] sm:$0xff] }
  0x1b   :  { %326 = vst [vmem:[%s803_s3 + $0x50] sm:$0xff] %v294_v55  ;;  %v115_v6 = vmul.f32 %v383_v2, %v44_v54  ;;  %v245_v7 = vmax.f32 %v181_v60, 0.0  ;;  %v184_v8 = vadd.f32 %v390_v5, %v113_v62  ;;  %v116_v10 = vmul.f32 %v383_v2, %v45_v59  ;;  %v59_v59 = vld [vmem:[%s800_s0 + $0x168] sm:$0xff] }
  0x1c   :  { %v185_v9 = vadd.f32 %v390_v5, %v114_v63  ;;  %327 = vst [vmem:[%s803_s3 + $0x58] sm:$0xff] %v295_v1  ;;  %v246_v12 = vmax.f32 %v182_v3, 0.0  ;;  %v247_v13 = vmax.f32 %v183_v4, 0.0  ;;  %v117_v15 = vmul.f32 %v383_v2, %v46_v0  ;;  %v60_v0 = vld [vmem:[%s800_s0 + $0x170] sm:$0xff] }
  0x1d   :  { %v186_v14 = vadd.f32 %v390_v5, %v115_v6  ;;  %v296_v18 = vpack.c.bf16 %v245_v7, %v244_v61  ;;  %v248_v19 = vmax.f32 %v184_v8, 0.0  ;;  %v187_v21 = vadd.f32 %v390_v5, %v116_v10  ;;  %v61_v7 = vld [vmem:[%s800_s0 + $0x178] sm:$0xff] }
  0x1e   :  { %v249_v20 = vmax.f32 %v185_v9, 0.0  ;;  %v297_v24 = vpack.c.bf16 %v247_v13, %v246_v12  ;;  %v118_v26 = vmul.f32 %v383_v2, %v47_v11  ;;  %v188_v27 = vadd.f32 %v390_v5, %v117_v15  ;;  %v62_v12 = vld [vmem:[%s800_s0 + $0x180] sm:$0xff] }
  0x1f   :  { %v250_v25 = vmax.f32 %v186_v14, 0.0  ;;  %328 = vst [vmem:[%s803_s3 + $0x60] sm:$0xff] %v296_v18  ;;  %v251_v30 = vmax.f32 %v187_v21, 0.0  ;;  %v119_v31 = vmul.f32 %v383_v2, %v48_v16  ;;  %v120_v32 = vmul.f32 %v383_v2, %v49_v17  ;;  %v63_v21 = vld [vmem:[%s800_s0 + $0x188] sm:$0xff] }
  0x20   :  { %v298_v29 = vpack.c.bf16 %v249_v20, %v248_v19  ;;  %329 = vst [vmem:[%s803_s3 + $0x68] sm:$0xff] %v297_v24  ;;  %v189_v34 = vadd.f32 %v390_v5, %v118_v26  ;;  %v252_v35 = vmax.f32 %v188_v27, 0.0  ;;  %v121_v36 = vmul.f32 %v383_v2, %v50_v22  ;;  %v64_v26 = vld [vmem:[%s800_s0 + $0x190] sm:$0xff]  ;;  %v65_v27 = vld [vmem:[%s800_s0 + $0x198] sm:$0xff] }
  0x21   :  { %v122_v37 = vmul.f32 %v383_v2, %v51_v23  ;;  %v299_v39 = vpack.c.bf16 %v251_v30, %v250_v25  ;;  %v190_v40 = vadd.f32 %v390_v5, %v119_v31  ;;  %v191_v41 = vadd.f32 %v390_v5, %v120_v32  ;;  %v66_v32 = vld [vmem:[%s800_s0 + $0x1a0] sm:$0xff] }
  0x22   :  { %330 = vst [vmem:[%s803_s3 + $0x70] sm:$0xff] %v298_v29  ;;  %v123_v42 = vmul.f32 %v383_v2, %v52_v28  ;;  %v253_v43 = vmax.f32 %v189_v34, 0.0  ;;  %v192_v44 = vadd.f32 %v390_v5, %v121_v36  ;;  %v124_v46 = vmul.f32 %v383_v2, %v53_v33  ;;  %v67_v33 = vld [vmem:[%s800_s0 + $0x1a8] sm:$0xff] }
  0x23   :  { %v193_v45 = vadd.f32 %v390_v5, %v122_v37  ;;  %331 = vst [vmem:[%s803_s3 + $0x78] sm:$0xff] %v299_v39  ;;  %v254_v48 = vmax.f32 %v190_v40, 0.0  ;;  %v255_v49 = vmax.f32 %v191_v41, 0.0  ;;  %v125_v51 = vmul.f32 %v383_v2, %v54_v38  ;;  %v68_v38 = vld [vmem:[%s800_s0 + $0x1b0] sm:$0xff] }
  0x24   :  { %v194_v50 = vadd.f32 %v390_v5, %v123_v42  ;;  %v300_v54 = vpack.c.bf16 %v253_v43, %v252_v35  ;;  %v256_v55 = vmax.f32 %v192_v44, 0.0  ;;  %v195_v57 = vadd.f32 %v390_v5, %v124_v46  ;;  %v69_v43 = vld [vmem:[%s800_s0 + $0x1b8] sm:$0xff] }
  0x25   :  { %v257_v56 = vmax.f32 %v193_v45, 0.0  ;;  %v301_v60 = vpack.c.bf16 %v255_v49, %v254_v48  ;;  %v126_v62 = vmul.f32 %v383_v2, %v55_v47  ;;  %v196_v63 = vadd.f32 %v390_v5, %v125_v51  ;;  %v70_v48 = vld [vmem:[%s800_s0 + $0x1c0] sm:$0xff] }
  0x26   :  { %v258_v61 = vmax.f32 %v194_v50, 0.0  ;;  %332 = vst [vmem:[%s803_s3 + $0x80] sm:$0xff] %v300_v54  ;;  %v259_v3 = vmax.f32 %v195_v57, 0.0  ;;  %v127_v4 = vmul.f32 %v383_v2, %v56_v52  ;;  %v128_v6 = vmul.f32 %v383_v2, %v57_v53  ;;  %v71_v57 = vld [vmem:[%s800_s0 + $0x1c8] sm:$0xff] }
  0x27   :  { %v302_v1 = vpack.c.bf16 %v257_v56, %v256_v55  ;;  %333 = vst [vmem:[%s803_s3 + $0x88] sm:$0xff] %v301_v60  ;;  %v197_v8 = vadd.f32 %v390_v5, %v126_v62  ;;  %v260_v9 = vmax.f32 %v196_v63, 0.0  ;;  %v129_v10 = vmul.f32 %v383_v2, %v58_v58  ;;  %v72_v62 = vld [vmem:[%s800_s0 + $0x1d0] sm:$0xff]  ;;  %v73_v63 = vld [vmem:[%s800_s0 + $0x1d8] sm:$0xff] }
  0x28   :  { %v130_v11 = vmul.f32 %v383_v2, %v59_v59  ;;  %v303_v13 = vpack.c.bf16 %v259_v3, %v258_v61  ;;  %v198_v14 = vadd.f32 %v390_v5, %v127_v4  ;;  %v199_v15 = vadd.f32 %v390_v5, %v128_v6  ;;  %v74_v6 = vld [vmem:[%s800_s0 + $0x1e0] sm:$0xff] }
  0x29   :  { %334 = vst [vmem:[%s803_s3 + $0x90] sm:$0xff] %v302_v1  ;;  %v131_v16 = vmul.f32 %v383_v2, %v60_v0  ;;  %v261_v17 = vmax.f32 %v197_v8, 0.0  ;;  %v200_v18 = vadd.f32 %v390_v5, %v129_v10  ;;  %v132_v20 = vmul.f32 %v383_v2, %v61_v7  ;;  %v75_v7 = vld [vmem:[%s800_s0 + $0x1e8] sm:$0xff] }
  0x2a   :  { %v201_v19 = vadd.f32 %v390_v5, %v130_v11  ;;  %335 = vst [vmem:[%s803_s3 + $0x98] sm:$0xff] %v303_v13  ;;  %v262_v22 = vmax.f32 %v198_v14, 0.0  ;;  %v263_v23 = vmax.f32 %v199_v15, 0.0  ;;  %v133_v25 = vmul.f32 %v383_v2, %v62_v12  ;;  %v76_v12 = vld [vmem:[%s800_s0 + $0x1f0] sm:$0xff] }
  0x2b   :  { %v202_v24 = vadd.f32 %v390_v5, %v131_v16  ;;  %v304_v28 = vpack.c.bf16 %v261_v17, %v260_v9  ;;  %v264_v29 = vmax.f32 %v200_v18, 0.0  ;;  %v203_v31 = vadd.f32 %v390_v5, %v132_v20  ;;  %v77_v17 = vld [vmem:[%s800_s0 + $0x1f8] sm:$0xff] }
  0x2c   :  { %v265_v30 = vmax.f32 %v201_v19, 0.0  ;;  %v305_v34 = vpack.c.bf16 %v263_v23, %v262_v22  ;;  %v134_v36 = vmul.f32 %v383_v2, %v63_v21  ;;  %v204_v37 = vadd.f32 %v390_v5, %v133_v25 }
  0x2d   :  { %v266_v35 = vmax.f32 %v202_v24, 0.0  ;;  %336 = vst [vmem:[%s803_s3 + $0xa0] sm:$0xff] %v304_v28  ;;  %v267_v40 = vmax.f32 %v203_v31, 0.0  ;;  %v135_v41 = vmul.f32 %v383_v2, %v64_v26  ;;  %v136_v42 = vmul.f32 %v383_v2, %v65_v27 }
  0x2e   :  { %v306_v39 = vpack.c.bf16 %v265_v30, %v264_v29  ;;  %337 = vst [vmem:[%s803_s3 + $0xa8] sm:$0xff] %v305_v34  ;;  %v205_v44 = vadd.f32 %v390_v5, %v134_v36  ;;  %v268_v45 = vmax.f32 %v204_v37, 0.0  ;;  %v137_v46 = vmul.f32 %v383_v2, %v66_v32 }
  0x2f   :  { %v138_v47 = vmul.f32 %v383_v2, %v67_v33  ;;  %v307_v49 = vpack.c.bf16 %v267_v40, %v266_v35  ;;  %v206_v50 = vadd.f32 %v390_v5, %v135_v41  ;;  %v207_v51 = vadd.f32 %v390_v5, %v136_v42 }
  0x30   :  { %338 = vst [vmem:[%s803_s3 + $0xb0] sm:$0xff] %v306_v39  ;;  %v139_v52 = vmul.f32 %v383_v2, %v68_v38  ;;  %v269_v53 = vmax.f32 %v205_v44, 0.0  ;;  %v208_v54 = vadd.f32 %v390_v5, %v137_v46  ;;  %v140_v56 = vmul.f32 %v383_v2, %v69_v43 }
  0x31   :  { %v209_v55 = vadd.f32 %v390_v5, %v138_v47  ;;  %339 = vst [vmem:[%s803_s3 + $0xb8] sm:$0xff] %v307_v49  ;;  %v270_v58 = vmax.f32 %v206_v50, 0.0  ;;  %v271_v59 = vmax.f32 %v207_v51, 0.0  ;;  %v141_v61 = vmul.f32 %v383_v2, %v70_v48 }
  0x32   :  { %v210_v60 = vadd.f32 %v390_v5, %v139_v52  ;;  %v308_v0 = vpack.c.bf16 %v269_v53, %v268_v45  ;;  %v272_v1 = vmax.f32 %v208_v54, 0.0  ;;  %v211_v4 = vadd.f32 %v390_v5, %v140_v56 }
  0x33   :  { %v273_v3 = vmax.f32 %v209_v55, 0.0  ;;  %v309_v8 = vpack.c.bf16 %v271_v59, %v270_v58  ;;  %v142_v10 = vmul.f32 %v383_v2, %v71_v57  ;;  %v212_v11 = vadd.f32 %v390_v5, %v141_v61 }
  0x34   :  { %v274_v9 = vmax.f32 %v210_v60, 0.0  ;;  %340 = vst [vmem:[%s803_s3 + $0xc0] sm:$0xff] %v308_v0  ;;  %v275_v14 = vmax.f32 %v211_v4, 0.0  ;;  %v143_v15 = vmul.f32 %v383_v2, %v72_v62  ;;  %v144_v16 = vmul.f32 %v383_v2, %v73_v63 }
  0x35   :  { %v310_v13 = vpack.c.bf16 %v273_v3, %v272_v1  ;;  %341 = vst [vmem:[%s803_s3 + $0xc8] sm:$0xff] %v309_v8  ;;  %v213_v18 = vadd.f32 %v390_v5, %v142_v10  ;;  %v276_v19 = vmax.f32 %v212_v11, 0.0  ;;  %v145_v20 = vmul.f32 %v383_v2, %v74_v6 }
  0x36   :  { %v146_v21 = vmul.f32 %v383_v2, %v75_v7  ;;  %v311_v22 = vpack.c.bf16 %v275_v14, %v274_v9  ;;  %v214_v23 = vadd.f32 %v390_v5, %v143_v15  ;;  %v215_v24 = vadd.f32 %v390_v5, %v144_v16 }
  0x37   :  { %342 = vst [vmem:[%s803_s3 + $0xd0] sm:$0xff] %v310_v13  ;;  %v147_v25 = vmul.f32 %v383_v2, %v76_v12  ;;  %v277_v26 = vmax.f32 %v213_v18, 0.0  ;;  %v216_v27 = vadd.f32 %v390_v5, %v145_v20  ;;  %v148_v29 = vmul.f32 %v383_v2, %v77_v17 }
  0x38   :  { %v217_v28 = vadd.f32 %v390_v5, %v146_v21  ;;  %343 = vst [vmem:[%s803_s3 + $0xd8] sm:$0xff] %v311_v22  ;;  %v278_v30 = vmax.f32 %v214_v23, 0.0  ;;  %v279_v31 = vmax.f32 %v215_v24, 0.0 }
  0x39   :  { %v218_v32 = vadd.f32 %v390_v5, %v147_v25  ;;  %v312_v33 = vpack.c.bf16 %v277_v26, %v276_v19  ;;  %v280_v34 = vmax.f32 %v216_v27, 0.0  ;;  %v219_v36 = vadd.f32 %v390_v5, %v148_v29 }
  0x3a   :  { %v281_v35 = vmax.f32 %v217_v28, 0.0  ;;  %v313_v37 = vpack.c.bf16 %v279_v31, %v278_v30 }
  0x3b   :  { %v282_v38 = vmax.f32 %v218_v32, 0.0  ;;  %344 = vst [vmem:[%s803_s3 + $0xe0] sm:$0xff] %v312_v33  ;;  %v283_v39 = vmax.f32 %v219_v36, 0.0 }
  0x3c   :  { %v314_v2 = vpack.c.bf16 %v281_v35, %v280_v34  ;;  %345 = vst [vmem:[%s803_s3 + $0xe8] sm:$0xff] %v313_v37 }
  0x3d   :  { %v315_v40 = vpack.c.bf16 %v283_v39, %v282_v38 }
  0x3e   :  { %346 = vst [vmem:[%s803_s3 + $0xf0] sm:$0xff] %v314_v2 }
  0x3f   :  { %347 = vst [vmem:[%s803_s3 + $0xf8] sm:$0xff] %v315_v40 }

// kernel: unet_hrpxp_forward.49
= control target key start
LH: loop header
LB: loop body
LE: loop exit
PB: predicated region body
PF: predicated region fallthrough
CT: control target
= control target key end

     0   :  { %s1203_s15 = smov 0   ;;  %s1205_s16 = smov 0   ;;  %s1490_s0 = inlined_call_operand.vmem [shape: bf16[2048,128], index: 0, kind: input, shape index: {}]   ;;  %s1491_s1 = inlined_call_operand.vmem [shape: bf16[128,128], index: 1, kind: input, shape index: {}]   ;;  %s1492_s2 = inlined_call_operand.vmem [shape: f32[2048,128], index: 2, kind: output, shape index: {0}]   ;;  %s1493_s3 = inlined_call_operand.vmem [shape: f32[1,128], index: 3, kind: output, shape index: {1}]   ;;  %s1494_s4 = inlined_call_operand.vmem [shape: f32[1,128], index: 4, kind: output, shape index: {2}]  }
   0x1   :  { %s1207_s17 = smov 0  }
   0x2 LB: > { %s27_s18 = sadd.s32 1, %s1170_s16  ;;  %p981_p0 = scmp.ge.s32.totalorder %s1174_s17, 1  ;;  %s1174_s17 = sphi %s1207_s17, %s15_s17   ;;  %s1170_s16 = sphi %s1205_s16, %s1496_s16   ;;  %s1166_s15 = sphi %s1203_s15, %s1495_s15  }
   0x3   : > { %p29_p1 = scmp.ge.s32.totalorder %s27_s18, 8  ;;  %p186_p2 = scmp.lt.s32.totalorder %s1174_s17, 9 }
   0x5   : > { %s1498_s18 = smov (%p29_p1, %s27_s18), 0  ;;  %p187_p3 = pnand %p981_p0, %p186_p2 }
   0x6   : > { %s982_s19 = sshll.u32 (!%p187_p3), %s1166_s15, 5  ;;  %p278_p4 = scmp.eq.s32.totalorder (!%p187_p3), %s1166_s15, 0  ;;  %v1176_v0 = vmov (!%p187_p3), 0.0  }
   0x7   : > { %190 = sbr.rel (%p187_p3) target bundleno = 362 (0x16a), region = 28  ;;  %p221_p5 = scmp.lt.s32.totalorder (!%p187_p3), %s982_s19, 255 }
   0xe   : > { %s1500_s19 = smov (!%p221_p5, %s982_s19), 255  ;;  %v1177_v1 = vmov (%p278_p4), 0.0  }
   0xf   : > { %s983_s20 = sshll.u32 %s1500_s19, 2  ;;  %s985_s21 = sshll.u32 %s1500_s19, 3  ;;  %283 = vst [vmem:[%s1493_s3] sm:$0x1] (%p278_p4), %v1177_v1  ;;  %284 = vst [vmem:[%s1494_s4] sm:$0x1] (%p278_p4), %v1177_v1 }
  0x10   : > { %s1228_s24 = scalar_lea.vmem %s1490_s0, %s983_s20  ;;  %s1233_s27 = scalar_lea.vmem %s1492_s2, %s985_s21 }
  0x11   : > { %246 = vst [vmem:[%s1233_s27] sm:$0xff] %v1176_v0  ;;  %247 = vst [vmem:[%s1233_s27 + $0x8] sm:$0xff] %v1176_v0 }
  0x12   : > { %248 = vst [vmem:[%s1233_s27 + $0x10] sm:$0xff] %v1176_v0  ;;  %249 = vst [vmem:[%s1233_s27 + $0x18] sm:$0xff] %v1176_v0 }
  0x13   : > { %250 = vst [vmem:[%s1233_s27 + $0x20] sm:$0xff] %v1176_v0  ;;  %251 = vst [vmem:[%s1233_s27 + $0x28] sm:$0xff] %v1176_v0 }
  0x14   : > { %252 = vst [vmem:[%s1233_s27 + $0x30] sm:$0xff] %v1176_v0  ;;  %253 = vst [vmem:[%s1233_s27 + $0x38] sm:$0xff] %v1176_v0 }
  0x15   : > { %254 = vst [vmem:[%s1233_s27 + $0x40] sm:$0xff] %v1176_v0  ;;  %255 = vst [vmem:[%s1233_s27 + $0x48] sm:$0xff] %v1176_v0 }
  0x16   : > { %256 = vst [vmem:[%s1233_s27 + $0x50] sm:$0xff] %v1176_v0  ;;  %257 = vst [vmem:[%s1233_s27 + $0x58] sm:$0xff] %v1176_v0 }
  0x17   : > { %258 = vst [vmem:[%s1233_s27 + $0x60] sm:$0xff] %v1176_v0  ;;  %259 = vst [vmem:[%s1233_s27 + $0x68] sm:$0xff] %v1176_v0 }
  0x18   : > { %260 = vst [vmem:[%s1233_s27 + $0x70] sm:$0xff] %v1176_v0  ;;  %261 = vst [vmem:[%s1233_s27 + $0x78] sm:$0xff] %v1176_v0 }
  0x19   : > { %262 = vst [vmem:[%s1233_s27 + $0x80] sm:$0xff] %v1176_v0  ;;  %263 = vst [vmem:[%s1233_s27 + $0x88] sm:$0xff] %v1176_v0 }
  0x1a   : > { %264 = vst [vmem:[%s1233_s27 + $0x90] sm:$0xff] %v1176_v0  ;;  %265 = vst [vmem:[%s1233_s27 + $0x98] sm:$0xff] %v1176_v0  ;;  %282 = sbr.rel (!%p278_p4) target bundleno = 33 (0x21), region = 36 }
  0x1b   : > { %266 = vst [vmem:[%s1233_s27 + $0xa0] sm:$0xff] %v1176_v0  ;;  %267 = vst [vmem:[%s1233_s27 + $0xa8] sm:$0xff] %v1176_v0 }
  0x1c   : > { %268 = vst [vmem:[%s1233_s27 + $0xb0] sm:$0xff] %v1176_v0  ;;  %269 = vst [vmem:[%s1233_s27 + $0xb8] sm:$0xff] %v1176_v0 }
  0x1d   : > { %270 = vst [vmem:[%s1233_s27 + $0xc0] sm:$0xff] %v1176_v0  ;;  %271 = vst [vmem:[%s1233_s27 + $0xc8] sm:$0xff] %v1176_v0 }
  0x1e   : > { %272 = vst [vmem:[%s1233_s27 + $0xd0] sm:$0xff] %v1176_v0  ;;  %273 = vst [vmem:[%s1233_s27 + $0xd8] sm:$0xff] %v1176_v0 }
  0x1f   : > { %274 = vst [vmem:[%s1233_s27 + $0xe0] sm:$0xff] %v1176_v0  ;;  %275 = vst [vmem:[%s1233_s27 + $0xe8] sm:$0xff] %v1176_v0 }
  0x20   : > { %276 = vst [vmem:[%s1233_s27 + $0xf0] sm:$0xff] %v1176_v0  ;;  %277 = vst [vmem:[%s1233_s27 + $0xf8] sm:$0xff] %v1176_v0 }
  0x21 PF: > { %v1128_v2 = vld [vmem:[%s1491_s1] sm:$0xff]   ;;  %v1129_v3 = vld [vmem:[%s1491_s1 + $0x8] sm:$0xff]   ;;  %v1130_v4 = vld [vmem:[%s1491_s1 + $0x10] sm:$0xff]  }
  0x22   : > { %1038 = vmatprep.subr.bf16.mxu0 %v1128_v2  ;;  %1086 = vmatprep.subr.bf16.mxu1 %v1128_v2  ;;  %v1131_v5 = vld [vmem:[%s1491_s1 + $0x18] sm:$0xff]   ;;  %v1136_v6 = vld [vmem:[%s1228_s24] sm:$0xff]   ;;  %v1133_v8 = vld [vmem:[%s1491_s1 + $0x28] sm:$0xff]  }
  0x23   : > { %1039 = vmatpush3.bf16.msra.mxu0 %v1128_v2  ;;  %1094 = vmatpush3.bf16.msra.mxu1 %v1128_v2  ;;  %v1132_v7 = vld [vmem:[%s1491_s1 + $0x20] sm:$0xff]   ;;  %v1134_v10 = vld [vmem:[%s1491_s1 + $0x30] sm:$0xff]   ;;  %v1135_v11 = vld [vmem:[%s1491_s1 + $0x38] sm:$0xff]  }
  0x24   : > { %1040 = vmatprep.subr.bf16.mxu0 %v1129_v3  ;;  %1087 = vmatprep.subr.bf16.mxu1 %v1129_v3  ;;  %v1144_v9 = vld [vmem:[%s1228_s24 + $0x40] sm:$0xff]   ;;  %v1137_v12 = vld [vmem:[%s1228_s24 + $0x8] sm:$0xff]   ;;  %v1138_v14 = vld [vmem:[%s1228_s24 + $0x10] sm:$0xff]  }
  0x25   : > { %1054 = vmatprep.mubr.bf16.mxu0 %v1136_v6  ;;  %1070 = vmatprep.mubr.bf16.mxu1 %v1144_v9  ;;  %v1145_v13 = vld [vmem:[%s1228_s24 + $0x48] sm:$0xff]   ;;  %v1146_v15 = vld [vmem:[%s1228_s24 + $0x50] sm:$0xff]   ;;  %v1139_v16 = vld [vmem:[%s1228_s24 + $0x18] sm:$0xff]  }
  0x26   : > { %v1147_v17 = vld [vmem:[%s1228_s24 + $0x58] sm:$0xff]   ;;  %v1140_v18 = vld [vmem:[%s1228_s24 + $0x20] sm:$0xff]   ;;  %v1141_v20 = vld [vmem:[%s1228_s24 + $0x28] sm:$0xff]  }
  0x27   : > { %1041 = vmatpush3.bf16.msra.mxu0 %v1129_v3  ;;  %1095 = vmatpush3.bf16.msra.mxu1 %v1129_v3  ;;  %v1148_v19 = vld [vmem:[%s1228_s24 + $0x60] sm:$0xff]   ;;  %v1149_v21 = vld [vmem:[%s1228_s24 + $0x68] sm:$0xff]   ;;  %v1142_v22 = vld [vmem:[%s1228_s24 + $0x30] sm:$0xff]  }
  0x28   : > { %1042 = vmatprep.subr.bf16.mxu0 %v1130_v4  ;;  %1088 = vmatprep.subr.bf16.mxu1 %v1130_v4  ;;  %v1150_v23 = vld [vmem:[%s1228_s24 + $0x70] sm:$0xff]   ;;  %v1143_v24 = vld [vmem:[%s1228_s24 + $0x38] sm:$0xff]   ;;  %v285_v28 = vld [vmem:[%s1233_s27] sm:$0xff] }
  0x29   : > { %v1151_v25 = vld [vmem:[%s1228_s24 + $0x78] sm:$0xff]   ;;  %v287_v26 = vld [vmem:[%s1233_s27 + $0x10] sm:$0xff]  ;;  %v301_v29 = vld [vmem:[%s1233_s27 + $0x80] sm:$0xff] }
  0x2a   : > { %v303_v27 = vld [vmem:[%s1233_s27 + $0x90] sm:$0xff]  ;;  %v288_v31 = vld [vmem:[%s1233_s27 + $0x18] sm:$0xff]  ;;  %v286_v36 = vld [vmem:[%s1233_s27 + $0x8] sm:$0xff] }
  0x2b   : > { %1043 = vmatpush3.bf16.msra.mxu0 %v1130_v4  ;;  %1096 = vmatpush3.bf16.msra.mxu1 %v1130_v4  ;;  %v304_v33 = vld [vmem:[%s1233_s27 + $0x98] sm:$0xff]  ;;  %v302_v39 = vld [vmem:[%s1233_s27 + $0x88] sm:$0xff]  ;;  %v291_v53 = vld [vmem:[%s1233_s27 + $0x30] sm:$0xff] }
  0x2c   : > { %1044 = vmatprep.subr.bf16.mxu0 %v1131_v5  ;;  %1089 = vmatprep.subr.bf16.mxu1 %v1131_v5  ;;  %v307_v54 = vld [vmem:[%s1233_s27 + $0xb0] sm:$0xff]  ;;  %v289_v55 = vld [vmem:[%s1233_s27 + $0x20] sm:$0xff]  ;;  %v292_v61 = vld [vmem:[%s1233_s27 + $0x38] sm:$0xff] }
  0x2d   : > { %v305_v56 = vld [vmem:[%s1233_s27 + $0xa0] sm:$0xff]  ;;  %v308_v63 = vld [vmem:[%s1233_s27 + $0xb8] sm:$0xff]  ;;  %v290_v3 = vld [vmem:[%s1233_s27 + $0x28] sm:$0xff] }
  0x2f   : > { %1045 = vmatpush3.bf16.msra.mxu0 %v1131_v5  ;;  %1097 = vmatpush3.bf16.msra.mxu1 %v1131_v5 }
  0x30   : > { %1046 = vmatprep.subr.bf16.mxu0 %v1132_v7  ;;  %1090 = vmatprep.subr.bf16.mxu1 %v1132_v7 }
  0x33   : > { %1047 = vmatpush3.bf16.msra.mxu0 %v1132_v7  ;;  %1098 = vmatpush3.bf16.msra.mxu1 %v1132_v7 }
  0x34   : > { %1048 = vmatprep.subr.bf16.mxu0 %v1133_v8  ;;  %1091 = vmatprep.subr.bf16.mxu1 %v1133_v8 }
  0x37   : > { %1049 = vmatpush3.bf16.msra.mxu0 %v1133_v8  ;;  %1099 = vmatpush3.bf16.msra.mxu1 %v1133_v8 }
  0x38   : > { %1050 = vmatprep.subr.bf16.mxu0 %v1134_v10  ;;  %1092 = vmatprep.subr.bf16.mxu1 %v1134_v10 }
  0x3b   : > { %1051 = vmatpush3.bf16.msra.mxu0 %v1134_v10  ;;  %1100 = vmatpush3.bf16.msra.mxu1 %v1134_v10 }
  0x3c   : > { %1052 = vmatprep.subr.bf16.mxu0 %v1135_v11  ;;  %1093 = vmatprep.subr.bf16.mxu1 %v1135_v11 }
  0x3f   : > { %1053 = vmatpush3.bf16.msra.mxu0 %v1135_v11  ;;  %1101 = vmatpush3.bf16.msra.mxu1 %v1135_v11 }
  0x42   : > { %1055 = vmatmul.mubr.bf16.vlgmr.msra.gmra.mrb[0].mxu0 %v1137_v12  ;;  %1071 = vmatmul.mubr.bf16.vlgmr.msra.gmra.mrb[0].mxu1 %v1145_v13  ;;  %v306_v12 = vld [vmem:[%s1233_s27 + $0xa8] sm:$0xff] }
  0x43   : > { %1058 = vmatprep.mubr.bf16.mxu0 %v1138_v14  ;;  %1074 = vmatprep.mubr.bf16.mxu1 %v1146_v15 }
  0x4a   : > { %1059 = vmatmul.mubr.bf16.gmra.mrb[4].mxu0 %v1139_v16  ;;  %1075 = vmatmul.mubr.bf16.gmra.mrb[4].mxu1 %v1147_v17 }
  0x4b   : > { %1062 = vmatprep.mubr.bf16.mxu0 %v1140_v18  ;;  %1078 = vmatprep.mubr.bf16.mxu1 %v1148_v19 }
  0x52   : > { %1063 = vmatmul.mubr.bf16.gmra.mrb[8].mxu0 %v1141_v20  ;;  %1079 = vmatmul.mubr.bf16.gmra.mrb[8].mxu1 %v1149_v21 }
  0x53   : > { %1066 = vmatprep.mubr.bf16.mxu0 %v1142_v22  ;;  %1082 = vmatprep.mubr.bf16.mxu1 %v1150_v23 }
  0x5a   : > { %1067 = vmatmul.mubr.bf16.gmra.mrb[12].mxu0 %v1143_v24  ;;  %1083 = vmatmul.mubr.bf16.gmra.mrb[12].mxu1 %v1151_v25  ;;  %v295_v25 = vld [vmem:[%s1233_s27 + $0x50] sm:$0xff] }
 0x115   : > { %v1056_v30 = vpop.f32.mrb[0].mxu0  ;;  %v1072_v32 = vpop.f32.mrb[0].mxu1 }
 0x116   : > { %v672_v34 = vadd.f32 %v1056_v30, %v287_v26  ;;  %v543_v35 = vpop.f32.mrb[1].mxu0  ;;  %v1322_v37 = vadd.f32 %v1072_v32, %v303_v27  ;;  %v607_v38 = vpop.f32.mrb[1].mxu1  ;;  %v311_v26 = vld [vmem:[%s1233_s27 + $0xd0] sm:$0xff]  ;;  %v293_v27 = vld [vmem:[%s1233_s27 + $0x40] sm:$0xff] }
 0x117   : > { %v670_v40 = vadd.f32 %v543_v35, %v285_v28  ;;  %v1057_v41 = vpop.f32.mrb[2].mxu0  ;;  %v1325_v42 = vadd.f32 %v607_v38, %v301_v29  ;;  %v1073_v43 = vpop.f32.mrb[2].mxu1  ;;  %v309_v28 = vld [vmem:[%s1233_s27 + $0xc0] sm:$0xff]  ;;  %v312_v35 = vld [vmem:[%s1233_s27 + $0xd8] sm:$0xff] }
 0x118   : > { %704 = vst [vmem:[%s1233_s27 + $0x10] sm:$0xff] %v672_v34  ;;  %v673_v44 = vadd.f32 %v1057_v41, %v288_v31  ;;  %v546_v45 = vpop.f32.mrb[3].mxu0  ;;  %720 = vst [vmem:[%s1233_s27 + $0x90] sm:$0xff] %v1322_v37  ;;  %v1330_v46 = vadd.f32 %v1073_v43, %v304_v33  ;;  %v610_v47 = vpop.f32.mrb[3].mxu1  ;;  %v812_v57 = vmul.f32 %v672_v34, %v672_v34  ;;  %v296_v33 = vld [vmem:[%s1233_s27 + $0x58] sm:$0xff] }
 0x119   : > { %702 = vst [vmem:[%s1233_s27] sm:$0xff] %v670_v40  ;;  %v671_v48 = vadd.f32 %v546_v45, %v286_v36  ;;  %718 = vst [vmem:[%s1233_s27 + $0x80] sm:$0xff] %v1325_v42  ;;  %v1335_v49 = vadd.f32 %v610_v47, %v302_v39  ;;  %v810_v50 = vmul.f32 %v670_v40, %v670_v40 }
 0x11a   : > { %705 = vst [vmem:[%s1233_s27 + $0x18] sm:$0xff] %v673_v44  ;;  %721 = vst [vmem:[%s1233_s27 + $0x98] sm:$0xff] %v1330_v46  ;;  %v813_v0 = vmul.f32 %v673_v44, %v673_v44 }
 0x11b   : > { %703 = vst [vmem:[%s1233_s27 + $0x8] sm:$0xff] %v671_v48  ;;  %v770_v51 = vadd.f32 %v671_v48, %v670_v40  ;;  %v811_v52 = vmul.f32 %v671_v48, %v671_v48  ;;  %719 = vst [vmem:[%s1233_s27 + $0x88] sm:$0xff] %v1335_v49  ;;  %v294_v40 = vld [vmem:[%s1233_s27 + $0x48] sm:$0xff] }
 0x11d   : > { %v771_v58 = vadd.f32 %v770_v51, %v672_v34  ;;  %v842_v59 = vadd.f32 %v811_v52, %v810_v50  ;;  %v1060_v60 = vpop.f32.mrb[4].mxu0  ;;  %v1076_v62 = vpop.f32.mrb[4].mxu1  ;;  %v310_v52 = vld [vmem:[%s1233_s27 + $0xc8] sm:$0xff] }
 0x11e   : > { %v676_v1 = vadd.f32 %v1060_v60, %v291_v53  ;;  %v559_v2 = vpop.f32.mrb[5].mxu0  ;;  %v1350_v4 = vadd.f32 %v1076_v62, %v307_v54  ;;  %v623_v5 = vpop.f32.mrb[5].mxu1 }
 0x11f   : > { %v843_v6 = vadd.f32 %v842_v59, %v812_v57  ;;  %v674_v7 = vadd.f32 %v559_v2, %v289_v55  ;;  %v772_v8 = vadd.f32 %v771_v58, %v673_v44  ;;  %v1061_v9 = vpop.f32.mrb[6].mxu0  ;;  %v1352_v10 = vadd.f32 %v623_v5, %v305_v56  ;;  %v1077_v11 = vpop.f32.mrb[6].mxu1  ;;  %v315_v2 = vld [vmem:[%s1233_s27 + $0xf0] sm:$0xff]  ;;  %v313_v5 = vld [vmem:[%s1233_s27 + $0xe0] sm:$0xff] }
 0x120   : > { %708 = vst [vmem:[%s1233_s27 + $0x30] sm:$0xff] %v676_v1  ;;  %v677_v13 = vadd.f32 %v1061_v9, %v292_v61  ;;  %v562_v14 = vpop.f32.mrb[7].mxu0  ;;  %724 = vst [vmem:[%s1233_s27 + $0xb0] sm:$0xff] %v1350_v4  ;;  %v1358_v15 = vadd.f32 %v1077_v11, %v308_v63  ;;  %v626_v16 = vpop.f32.mrb[7].mxu1  ;;  %v816_v29 = vmul.f32 %v676_v1, %v676_v1  ;;  %v300_v11 = vld [vmem:[%s1233_s27 + $0x78] sm:$0xff] }
 0x121   : > { %706 = vst [vmem:[%s1233_s27 + $0x20] sm:$0xff] %v674_v7  ;;  %v773_v17 = vadd.f32 %v772_v8, %v674_v7  ;;  %v814_v18 = vmul.f32 %v674_v7, %v674_v7  ;;  %v844_v19 = vadd.f32 %v843_v6, %v813_v0  ;;  %v675_v20 = vadd.f32 %v562_v14, %v290_v3  ;;  %v297_v3 = vld [vmem:[%s1233_s27 + $0x60] sm:$0xff] }
 0x122   : > { %722 = vst [vmem:[%s1233_s27 + $0xa0] sm:$0xff] %v1352_v10  ;;  %709 = vst [vmem:[%s1233_s27 + $0x38] sm:$0xff] %v677_v13  ;;  %v1366_v21 = vadd.f32 %v626_v16, %v306_v12  ;;  %v817_v36 = vmul.f32 %v677_v13, %v677_v13 }
 0x123   : > { %725 = vst [vmem:[%s1233_s27 + $0xb8] sm:$0xff] %v1358_v15  ;;  %v845_v22 = vadd.f32 %v844_v19, %v814_v18  ;;  %707 = vst [vmem:[%s1233_s27 + $0x28] sm:$0xff] %v675_v20  ;;  %v774_v23 = vadd.f32 %v773_v17, %v675_v20  ;;  %v815_v24 = vmul.f32 %v675_v20, %v675_v20  ;;  %v298_v18 = vld [vmem:[%s1233_s27 + $0x68] sm:$0xff] }
 0x124   : > { %723 = vst [vmem:[%s1233_s27 + $0xa8] sm:$0xff] %v1366_v21 }
 0x125   : > { %v775_v30 = vadd.f32 %v774_v23, %v676_v1  ;;  %v846_v31 = vadd.f32 %v845_v22, %v815_v24  ;;  %v1064_v32 = vpop.f32.mrb[8].mxu0  ;;  %v1080_v34 = vpop.f32.mrb[8].mxu1  ;;  %v299_v1 = vld [vmem:[%s1233_s27 + $0x70] sm:$0xff] }
 0x126   : > { %v680_v38 = vadd.f32 %v1064_v32, %v295_v25  ;;  %v575_v39 = vpop.f32.mrb[9].mxu0  ;;  %v1378_v41 = vadd.f32 %v1080_v34, %v311_v26  ;;  %v639_v43 = vpop.f32.mrb[9].mxu1 }
 0x127   : > { %v847_v44 = vadd.f32 %v846_v31, %v816_v29  ;;  %v678_v45 = vadd.f32 %v575_v39, %v293_v27  ;;  %v776_v47 = vadd.f32 %v775_v30, %v677_v13  ;;  %v1065_v48 = vpop.f32.mrb[10].mxu0  ;;  %v1380_v50 = vadd.f32 %v639_v43, %v309_v28  ;;  %v1081_v51 = vpop.f32.mrb[10].mxu1  ;;  %v316_v13 = vld [vmem:[%s1233_s27 + $0xf8] sm:$0xff]  ;;  %v314_v28 = vld [vmem:[%s1233_s27 + $0xe8] sm:$0xff] }
 0x128   : > { %712 = vst [vmem:[%s1233_s27 + $0x50] sm:$0xff] %v680_v38  ;;  %v681_v53 = vadd.f32 %v1065_v48, %v296_v33  ;;  %v578_v54 = vpop.f32.mrb[11].mxu0  ;;  %728 = vst [vmem:[%s1233_s27 + $0xd0] sm:$0xff] %v1378_v41  ;;  %v1386_v55 = vadd.f32 %v1081_v51, %v312_v35  ;;  %v642_v56 = vpop.f32.mrb[11].mxu1  ;;  %v820_v6 = vmul.f32 %v680_v38, %v680_v38 }
 0x129   : > { %710 = vst [vmem:[%s1233_s27 + $0x40] sm:$0xff] %v678_v45  ;;  %v777_v57 = vadd.f32 %v776_v47, %v678_v45  ;;  %v818_v58 = vmul.f32 %v678_v45, %v678_v45  ;;  %v848_v59 = vadd.f32 %v847_v44, %v817_v36  ;;  %v679_v60 = vadd.f32 %v578_v54, %v294_v40 }
 0x12a   : > { %726 = vst [vmem:[%s1233_s27 + $0xc0] sm:$0xff] %v1380_v50  ;;  %713 = vst [vmem:[%s1233_s27 + $0x58] sm:$0xff] %v681_v53  ;;  %v1394_v61 = vadd.f32 %v642_v56, %v310_v52  ;;  %v821_v14 = vmul.f32 %v681_v53, %v681_v53 }
 0x12b   : > { %729 = vst [vmem:[%s1233_s27 + $0xd8] sm:$0xff] %v1386_v55  ;;  %v849_v62 = vadd.f32 %v848_v59, %v818_v58  ;;  %711 = vst [vmem:[%s1233_s27 + $0x48] sm:$0xff] %v679_v60  ;;  %v778_v63 = vadd.f32 %v777_v57, %v679_v60  ;;  %v819_v0 = vmul.f32 %v679_v60, %v679_v60 }
 0x12c   : > { %727 = vst [vmem:[%s1233_s27 + $0xc8] sm:$0xff] %v1394_v61  ;;  %v827_v59 = vmul.f32 %v1335_v49, %v1335_v49  ;;  %v828_v60 = vmul.f32 %v1322_v37, %v1322_v37 }
 0x12d   : > { %v779_v7 = vadd.f32 %v778_v63, %v680_v38  ;;  %v850_v8 = vadd.f32 %v849_v62, %v819_v0  ;;  %v1068_v9 = vpop.f32.mrb[12].mxu0  ;;  %v1084_v12 = vpop.f32.mrb[12].mxu1  ;;  %v829_v0 = vmul.f32 %v1330_v46, %v1330_v46 }
 0x12e   : > { %v684_v16 = vadd.f32 %v1068_v9, %v299_v1  ;;  %v591_v17 = vpop.f32.mrb[13].mxu0  ;;  %v1406_v19 = vadd.f32 %v1084_v12, %v315_v2  ;;  %v655_v20 = vpop.f32.mrb[13].mxu1 }
 0x12f   : > { %v851_v22 = vadd.f32 %v850_v8, %v820_v6  ;;  %v682_v23 = vadd.f32 %v591_v17, %v297_v3  ;;  %v780_v24 = vadd.f32 %v779_v7, %v681_v53  ;;  %v1069_v25 = vpop.f32.mrb[14].mxu0  ;;  %v1408_v26 = vadd.f32 %v655_v20, %v313_v5  ;;  %v1085_v27 = vpop.f32.mrb[14].mxu1 }
 0x130   : > { %716 = vst [vmem:[%s1233_s27 + $0x70] sm:$0xff] %v684_v16  ;;  %v685_v29 = vadd.f32 %v1069_v25, %v300_v11  ;;  %v594_v30 = vpop.f32.mrb[15].mxu0  ;;  %732 = vst [vmem:[%s1233_s27 + $0xf0] sm:$0xff] %v1406_v19  ;;  %v1414_v31 = vadd.f32 %v1085_v27, %v316_v13  ;;  %v658_v32 = vpop.f32.mrb[15].mxu1  ;;  %v824_v44 = vmul.f32 %v684_v16, %v684_v16 }
 0x131   : > { %714 = vst [vmem:[%s1233_s27 + $0x60] sm:$0xff] %v682_v23  ;;  %v781_v33 = vadd.f32 %v780_v24, %v682_v23  ;;  %v822_v34 = vmul.f32 %v682_v23, %v682_v23  ;;  %v852_v35 = vadd.f32 %v851_v22, %v821_v14  ;;  %v683_v36 = vadd.f32 %v594_v30, %v298_v18 }
 0x132   : > { %730 = vst [vmem:[%s1233_s27 + $0xe0] sm:$0xff] %v1408_v26  ;;  %717 = vst [vmem:[%s1233_s27 + $0x78] sm:$0xff] %v685_v29  ;;  %v699_v38 = vadd.f32 %v658_v32, %v314_v28  ;;  %v825_v48 = vmul.f32 %v685_v29, %v685_v29  ;;  %v826_v53 = vmul.f32 %v1325_v42, %v1325_v42 }
 0x133   : > { %733 = vst [vmem:[%s1233_s27 + $0xf8] sm:$0xff] %v1414_v31  ;;  %v853_v39 = vadd.f32 %v852_v35, %v822_v34  ;;  %715 = vst [vmem:[%s1233_s27 + $0x68] sm:$0xff] %v683_v36  ;;  %v782_v40 = vadd.f32 %v781_v33, %v683_v36  ;;  %v823_v43 = vmul.f32 %v683_v36, %v683_v36 }
 0x134   : > { %731 = vst [vmem:[%s1233_s27 + $0xe8] sm:$0xff] %v699_v38  ;;  %v831_v7 = vmul.f32 %v1366_v21, %v1366_v21  ;;  %v835_v17 = vmul.f32 %v1394_v61, %v1394_v61  ;;  %v839_v28 = vmul.f32 %v699_v38, %v699_v38  ;;  %v841_v32 = vmul.f32 %v1414_v31, %v1414_v31 }
 0x135   : > { %v783_v45 = vadd.f32 %v782_v40, %v684_v16  ;;  %v854_v47 = vadd.f32 %v853_v39, %v823_v43 }
 0x137   : > { %v855_v51 = vadd.f32 %v854_v47, %v824_v44  ;;  %v784_v52 = vadd.f32 %v783_v45, %v685_v29  ;;  %v840_v29 = vmul.f32 %v1406_v19, %v1406_v19 }
 0x139   : > { %v785_v54 = vadd.f32 %v784_v52, %v1325_v42  ;;  %v856_v56 = vadd.f32 %v855_v51, %v825_v48  ;;  %v830_v42 = vmul.f32 %v1352_v10, %v1352_v10 }
 0x13b   : > { %v857_v57 = vadd.f32 %v856_v56, %v826_v53  ;;  %v786_v58 = vadd.f32 %v785_v54, %v1335_v49 }
 0x13d   : > { %v787_v62 = vadd.f32 %v786_v58, %v1322_v37  ;;  %v858_v63 = vadd.f32 %v857_v57, %v827_v59  ;;  %v832_v37 = vmul.f32 %v1350_v4, %v1350_v4 }
 0x13f   : > { %v859_v1 = vadd.f32 %v858_v63, %v828_v60  ;;  %v788_v2 = vadd.f32 %v787_v62, %v1330_v46  ;;  %v833_v46 = vmul.f32 %v1358_v15, %v1358_v15 }
 0x141   : > { %v789_v3 = vadd.f32 %v788_v2, %v1352_v10  ;;  %v860_v5 = vadd.f32 %v859_v1, %v829_v0  ;;  %v834_v10 = vmul.f32 %v1380_v50, %v1380_v50 }
 0x143   : > { %v861_v6 = vadd.f32 %v860_v5, %v830_v42  ;;  %v790_v49 = vadd.f32 %v789_v3, %v1366_v21 }
 0x145   : > { %v791_v8 = vadd.f32 %v790_v49, %v1350_v4  ;;  %v862_v9 = vadd.f32 %v861_v6, %v831_v7  ;;  %v836_v4 = vmul.f32 %v1378_v41, %v1378_v41 }
 0x147   : > { %v863_v11 = vadd.f32 %v862_v9, %v832_v37  ;;  %v792_v12 = vadd.f32 %v791_v8, %v1358_v15  ;;  %v837_v15 = vmul.f32 %v1386_v55, %v1386_v55 }
 0x149   : > { %v793_v13 = vadd.f32 %v792_v12, %v1380_v50  ;;  %v864_v14 = vadd.f32 %v863_v11, %v833_v46  ;;  %v838_v50 = vmul.f32 %v1408_v26, %v1408_v26 }
 0x14b   : > { %v865_v16 = vadd.f32 %v864_v14, %v834_v10  ;;  %v794_v21 = vadd.f32 %v793_v13, %v1394_v61 }
 0x14d   : > { %v795_v18 = vadd.f32 %v794_v21, %v1378_v41  ;;  %v866_v20 = vadd.f32 %v865_v16, %v835_v17 }
 0x14f   : > { %v867_v22 = vadd.f32 %v866_v20, %v836_v4  ;;  %v796_v23 = vadd.f32 %v795_v18, %v1386_v55 }
 0x151   : > { %v797_v24 = vadd.f32 %v796_v23, %v1408_v26  ;;  %v868_v25 = vadd.f32 %v867_v22, %v837_v15 }
 0x153   : > { %v869_v27 = vadd.f32 %v868_v25, %v838_v50  ;;  %v798_v61 = vadd.f32 %v797_v24, %v699_v38 }
 0x155   : > { %v799_v41 = vadd.f32 %v798_v61, %v1406_v19  ;;  %v870_v30 = vadd.f32 %v869_v27, %v839_v28  ;;  %v769_v19 = vld [vmem:[%s1493_s3] sm:$0x1] }
 0x157   : > { %v800_v55 = vadd.f32 %v799_v41, %v1414_v31  ;;  %v871_v33 = vadd.f32 %v870_v30, %v840_v29  ;;  %v809_v31 = vld [vmem:[%s1494_s4] sm:$0x1] }
 0x159   : > { %v801_v34 = vrot.slane %v800_v55, 4  ;;  %v872_v35 = vadd.f32 %v871_v33, %v841_v32 }
 0x15b   : > { %v802_v36 = vadd.f32 %v801_v34, %v800_v55  ;;  %v873_v26 = vrot.slane %v872_v35, 4 }
 0x15d   : > { %v803_v39 = vrot.slane %v802_v36, 2  ;;  %v874_v40 = vadd.f32 %v873_v26, %v872_v35 }
 0x15f   : > { %v804_v43 = vadd.f32 %v803_v39, %v802_v36  ;;  %v875_v38 = vrot.slane %v874_v40, 2 }
 0x161   : > { %v805_v44 = vrot.slane %v804_v43, 1  ;;  %v876_v45 = vadd.f32 %v875_v38, %v874_v40 }
 0x163   : > { %v806_v47 = vadd.f32 %v805_v44, %v804_v43  ;;  %v877_v48 = vrot.slane %v876_v45, 1 }
 0x165   : > { %v807_v51 = vadd.f32 %v806_v47, %v769_v19  ;;  %v878_v52 = vadd.f32 %v877_v48, %v876_v45 }
 0x167   : > { %808 = vst [vmem:[%s1493_s3] sm:$0x1] %v807_v51  ;;  %v879_v53 = vadd.f32 %v878_v52, %v809_v31 }
 0x169   : > { %880 = vst [vmem:[%s1494_s4] sm:$0x1] %v879_v53 }
 0x16a PF: > { %s15_s17 = sadd.s32 1, %s1174_s17   ;;  %s1495_s15 = smov %s1170_s16 }
 0x16b   : > { %p12_p6 = scmp.ge.s32.totalorder %s15_s17, 10   ;;  %s1496_s16 = smov %s1498_s18 }
 0x16d   :  { %14 = sbr.rel (!%p12_p6) target bundleno = 2 (0x2), region = 89 }

// kernel: unet_hrpxp_forward.50
= control target key start
LH: loop header
LB: loop body
LE: loop exit
PB: predicated region body
PF: predicated region fallthrough
CT: control target
= control target key end

     0   :  { %s1188_s12 = smov 0   ;;  %s1447_s0 = inlined_call_operand.vmem [shape: f32[2048,128], index: 0, kind: input, shape index: {}]   ;;  %s1448_s1 = inlined_call_operand.vmem [shape: f32[1,128], index: 1, kind: input, shape index: {}]   ;;  %s1449_s2 = inlined_call_operand.vmem [shape: f32[1,128], index: 2, kind: input, shape index: {}]   ;;  %s1450_s3 = inlined_call_operand.vmem [shape: bf16[2048,128], index: 3, kind: output, shape index: {}]  }
   0x1 LB: > { %s820_s13 = sadd.s32 4294967295, %s1166_s12   ;;  %p824_p0 = scmp.ge.s32.totalorder %s1166_s12, 1  ;;  %s1166_s12 = sphi %s1188_s12, %s13_s12  }
   0x2   : > { %p138_p1 = scmp.lt.s32.totalorder %s1166_s12, 5 }
   0x4   : > { %p139_p2 = pnand %p824_p0, %p138_p1 }
   0x5   : > { %s825_s14 = sshll.u32 (!%p139_p2), %s820_s13, 6  ;;  %v1202_v0 = vld [vmem:[%s1448_s1] ss:$0 sm:$0xff] (!%p139_p2) }
   0x6   : > { %142 = sbr.rel (%p139_p2) target bundleno = 79 (0x4f), region = 32  ;;  %p163_p3 = scmp.lt.s32.totalorder (!%p139_p2), %s825_s14, 255  ;;  %v1212_v1 = vld [vmem:[%s1449_s2] ss:$0 sm:$0xff] (!%p139_p2) }
   0xd   : > { %s1452_s14 = smov (!%p163_p3, %s825_s14), 255 }
   0xe   : > { %s826_s15 = sshll.u32 %s1452_s14, 3  ;;  %s828_s23 = sshll.u32 %s1452_s14, 2 }
   0xf   : > { %s1207_s20 = scalar_lea.vmem %s1447_s0, %s826_s15  ;;  %s1244_s26 = scalar_lea.vmem %s1450_s3, %s828_s23 }
  0x10   : > { %v174_v2 = vld [vmem:[%s1207_s20] sm:$0xff]  ;;  %v175_v3 = vld [vmem:[%s1207_s20 + $0x8] sm:$0xff]  ;;  %v176_v4 = vld [vmem:[%s1207_s20 + $0x10] sm:$0xff] }
  0x11   : > { %v245_v5 = vmul.f32 %v1202_v0, %v174_v2  ;;  %v246_v6 = vmul.f32 %v1202_v0, %v175_v3  ;;  %v177_v7 = vld [vmem:[%s1207_s20 + $0x18] sm:$0xff]  ;;  %v247_v8 = vmul.f32 %v1202_v0, %v176_v4  ;;  %v178_v9 = vld [vmem:[%s1207_s20 + $0x20] sm:$0xff]  ;;  %v179_v10 = vld [vmem:[%s1207_s20 + $0x28] sm:$0xff] }
  0x12   : > { %v248_v11 = vmul.f32 %v1202_v0, %v177_v7  ;;  %v249_v12 = vmul.f32 %v1202_v0, %v178_v9  ;;  %v250_v13 = vmul.f32 %v1202_v0, %v179_v10  ;;  %v180_v14 = vld [vmem:[%s1207_s20 + $0x30] sm:$0xff]  ;;  %v181_v15 = vld [vmem:[%s1207_s20 + $0x38] sm:$0xff]  ;;  %v182_v24 = vld [vmem:[%s1207_s20 + $0x40] sm:$0xff] }
  0x13   : > { %v316_v16 = vadd.f32 %v1212_v1, %v245_v5  ;;  %v317_v17 = vadd.f32 %v1212_v1, %v246_v6  ;;  %v318_v18 = vadd.f32 %v1212_v1, %v247_v8  ;;  %v251_v19 = vmul.f32 %v1202_v0, %v180_v14  ;;  %v183_v25 = vld [vmem:[%s1207_s20 + $0x48] sm:$0xff]  ;;  %v184_v30 = vld [vmem:[%s1207_s20 + $0x50] sm:$0xff]  ;;  %v185_v35 = vld [vmem:[%s1207_s20 + $0x58] sm:$0xff] }
  0x14   : > { %v319_v20 = vadd.f32 %v1212_v1, %v248_v11  ;;  %v320_v21 = vadd.f32 %v1212_v1, %v249_v12  ;;  %v321_v22 = vadd.f32 %v1212_v1, %v250_v13  ;;  %v252_v23 = vmul.f32 %v1202_v0, %v181_v15  ;;  %v186_v36 = vld [vmem:[%s1207_s20 + $0x60] sm:$0xff]  ;;  %v187_v41 = vld [vmem:[%s1207_s20 + $0x68] sm:$0xff]  ;;  %v188_v42 = vld [vmem:[%s1207_s20 + $0x70] sm:$0xff] }
  0x15   : > { %v380_v26 = vmax.f32 %v316_v16, 0.0  ;;  %v381_v27 = vmax.f32 %v317_v17, 0.0  ;;  %v382_v28 = vmax.f32 %v318_v18, 0.0  ;;  %v322_v29 = vadd.f32 %v1212_v1, %v251_v19  ;;  %v189_v51 = vld [vmem:[%s1207_s20 + $0x78] sm:$0xff]  ;;  %v190_v56 = vld [vmem:[%s1207_s20 + $0x80] sm:$0xff]  ;;  %v191_v61 = vld [vmem:[%s1207_s20 + $0x88] sm:$0xff] }
  0x16   : > { %v383_v31 = vmax.f32 %v319_v20, 0.0  ;;  %v384_v32 = vmax.f32 %v320_v21, 0.0  ;;  %v385_v33 = vmax.f32 %v321_v22, 0.0  ;;  %v323_v34 = vadd.f32 %v1212_v1, %v252_v23  ;;  %v192_v4 = vld [vmem:[%s1207_s20 + $0x90] sm:$0xff]  ;;  %v193_v5 = vld [vmem:[%s1207_s20 + $0x98] sm:$0xff]  ;;  %v194_v10 = vld [vmem:[%s1207_s20 + $0xa0] sm:$0xff] }
  0x17   : > { %v964_v37 = vpack.c.bf16 %v381_v27, %v380_v26  ;;  %v386_v38 = vmax.f32 %v322_v29, 0.0  ;;  %v253_v39 = vmul.f32 %v1202_v0, %v182_v24  ;;  %v254_v40 = vmul.f32 %v1202_v0, %v183_v25  ;;  %v195_v15 = vld [vmem:[%s1207_s20 + $0xa8] sm:$0xff]  ;;  %v196_v20 = vld [vmem:[%s1207_s20 + $0xb0] sm:$0xff]  ;;  %v197_v25 = vld [vmem:[%s1207_s20 + $0xb8] sm:$0xff] }
  0x18   : > { %v969_v43 = vpack.c.bf16 %v383_v31, %v382_v28  ;;  %v974_v44 = vpack.c.bf16 %v385_v33, %v384_v32  ;;  %v387_v45 = vmax.f32 %v323_v34, 0.0  ;;  %v255_v46 = vmul.f32 %v1202_v0, %v184_v30  ;;  %v198_v30 = vld [vmem:[%s1207_s20 + $0xc0] sm:$0xff] }
  0x19   : > { %965 = vst [vmem:[%s1244_s26] sm:$0xff] %v964_v37   ;;  %v324_v47 = vadd.f32 %v1212_v1, %v253_v39  ;;  %v325_v48 = vadd.f32 %v1212_v1, %v254_v40  ;;  %v256_v49 = vmul.f32 %v1202_v0, %v185_v35  ;;  %v257_v50 = vmul.f32 %v1202_v0, %v186_v36  ;;  %v199_v35 = vld [vmem:[%s1207_s20 + $0xc8] sm:$0xff]  ;;  %v200_v40 = vld [vmem:[%s1207_s20 + $0xd0] sm:$0xff] }
  0x1a   : > { %1121 = vst [vmem:[%s1244_s26 + $0x8] sm:$0xff] %v969_v43   ;;  %1122 = vst [vmem:[%s1244_s26 + $0x10] sm:$0xff] %v974_v44   ;;  %v979_v52 = vpack.c.bf16 %v387_v45, %v386_v38  ;;  %v326_v53 = vadd.f32 %v1212_v1, %v255_v46  ;;  %v258_v54 = vmul.f32 %v1202_v0, %v187_v41  ;;  %v201_v41 = vld [vmem:[%s1207_s20 + $0xd8] sm:$0xff]  ;;  %v202_v46 = vld [vmem:[%s1207_s20 + $0xe0] sm:$0xff] }
  0x1b   : > { %v259_v55 = vmul.f32 %v1202_v0, %v188_v42  ;;  %v388_v57 = vmax.f32 %v324_v47, 0.0  ;;  %v389_v58 = vmax.f32 %v325_v48, 0.0  ;;  %v327_v59 = vadd.f32 %v1212_v1, %v256_v49 }
  0x1c   : > { %v328_v60 = vadd.f32 %v1212_v1, %v257_v50  ;;  %1123 = vst [vmem:[%s1244_s26 + $0x18] sm:$0xff] %v979_v52   ;;  %v390_v62 = vmax.f32 %v326_v53, 0.0  ;;  %v329_v63 = vadd.f32 %v1212_v1, %v258_v54  ;;  %v260_v2 = vmul.f32 %v1202_v0, %v189_v51  ;;  %v203_v51 = vld [vmem:[%s1207_s20 + $0xe8] sm:$0xff] }
  0x1d   : > { %v330_v3 = vadd.f32 %v1212_v1, %v259_v55  ;;  %v984_v6 = vpack.c.bf16 %v389_v58, %v388_v57  ;;  %v391_v7 = vmax.f32 %v327_v59, 0.0  ;;  %v261_v9 = vmul.f32 %v1202_v0, %v190_v56  ;;  %v204_v56 = vld [vmem:[%s1207_s20 + $0xf0] sm:$0xff] }
  0x1e   : > { %v392_v8 = vmax.f32 %v328_v60, 0.0  ;;  %v393_v11 = vmax.f32 %v329_v63, 0.0  ;;  %v331_v12 = vadd.f32 %v1212_v1, %v260_v2  ;;  %v262_v14 = vmul.f32 %v1202_v0, %v191_v61  ;;  %v205_v61 = vld [vmem:[%s1207_s20 + $0xf8] sm:$0xff] }
  0x1f   : > { %v394_v13 = vmax.f32 %v330_v3, 0.0  ;;  %1124 = vst [vmem:[%s1244_s26 + $0x20] sm:$0xff] %v984_v6   ;;  %v989_v16 = vpack.c.bf16 %v391_v7, %v390_v62  ;;  %v332_v17 = vadd.f32 %v1212_v1, %v261_v9  ;;  %v263_v18 = vmul.f32 %v1202_v0, %v192_v4  ;;  %v206_v4 = vld [vmem:[%s1207_s20 + $0x100] sm:$0xff]  ;;  %v207_v9 = vld [vmem:[%s1207_s20 + $0x108] sm:$0xff] }
  0x20   : > { %v264_v19 = vmul.f32 %v1202_v0, %v193_v5  ;;  %v994_v21 = vpack.c.bf16 %v393_v11, %v392_v8  ;;  %v395_v22 = vmax.f32 %v331_v12, 0.0  ;;  %v333_v23 = vadd.f32 %v1212_v1, %v262_v14  ;;  %v208_v14 = vld [vmem:[%s1207_s20 + $0x110] sm:$0xff] }
  0x21   : > { %v265_v24 = vmul.f32 %v1202_v0, %v194_v10  ;;  %1125 = vst [vmem:[%s1244_s26 + $0x28] sm:$0xff] %v989_v16   ;;  %v396_v26 = vmax.f32 %v332_v17, 0.0  ;;  %v334_v27 = vadd.f32 %v1212_v1, %v263_v18  ;;  %v266_v29 = vmul.f32 %v1202_v0, %v195_v15  ;;  %v209_v15 = vld [vmem:[%s1207_s20 + $0x118] sm:$0xff] }
  0x22   : > { %v335_v28 = vadd.f32 %v1212_v1, %v264_v19  ;;  %1126 = vst [vmem:[%s1244_s26 + $0x30] sm:$0xff] %v994_v21   ;;  %v999_v31 = vpack.c.bf16 %v395_v22, %v394_v13  ;;  %v397_v32 = vmax.f32 %v333_v23, 0.0  ;;  %v267_v34 = vmul.f32 %v1202_v0, %v196_v20  ;;  %v210_v20 = vld [vmem:[%s1207_s20 + $0x120] sm:$0xff] }
  0x23   : > { %v336_v33 = vadd.f32 %v1212_v1, %v265_v24  ;;  %v398_v36 = vmax.f32 %v334_v27, 0.0  ;;  %v337_v38 = vadd.f32 %v1212_v1, %v266_v29  ;;  %v268_v39 = vmul.f32 %v1202_v0, %v197_v25  ;;  %v211_v25 = vld [vmem:[%s1207_s20 + $0x128] sm:$0xff] }
  0x24   : > { %v399_v37 = vmax.f32 %v335_v28, 0.0  ;;  %1127 = vst [vmem:[%s1244_s26 + $0x38] sm:$0xff] %v999_v31   ;;  %v1004_v42 = vpack.c.bf16 %v397_v32, %v396_v26  ;;  %v338_v44 = vadd.f32 %v1212_v1, %v267_v34  ;;  %v269_v45 = vmul.f32 %v1202_v0, %v198_v30  ;;  %v212_v30 = vld [vmem:[%s1207_s20 + $0x130] sm:$0xff] }
  0x25   : > { %v400_v43 = vmax.f32 %v336_v33, 0.0  ;;  %v401_v48 = vmax.f32 %v337_v38, 0.0  ;;  %v339_v49 = vadd.f32 %v1212_v1, %v268_v39  ;;  %v270_v50 = vmul.f32 %v1202_v0, %v199_v35  ;;  %v213_v35 = vld [vmem:[%s1207_s20 + $0x138] sm:$0xff] }
  0x26   : > { %v1009_v47 = vpack.c.bf16 %v399_v37, %v398_v36  ;;  %1128 = vst [vmem:[%s1244_s26 + $0x40] sm:$0xff] %v1004_v42   ;;  %v402_v52 = vmax.f32 %v338_v44, 0.0  ;;  %v340_v53 = vadd.f32 %v1212_v1, %v269_v45  ;;  %v271_v54 = vmul.f32 %v1202_v0, %v200_v40  ;;  %v214_v40 = vld [vmem:[%s1207_s20 + $0x140] sm:$0xff]  ;;  %v215_v45 = vld [vmem:[%s1207_s20 + $0x148] sm:$0xff] }
  0x27   : > { %v272_v55 = vmul.f32 %v1202_v0, %v201_v41  ;;  %v1014_v57 = vpack.c.bf16 %v401_v48, %v400_v43  ;;  %v403_v58 = vmax.f32 %v339_v49, 0.0  ;;  %v341_v59 = vadd.f32 %v1212_v1, %v270_v50  ;;  %v216_v50 = vld [vmem:[%s1207_s20 + $0x150] sm:$0xff] }
  0x28   : > { %1129 = vst [vmem:[%s1244_s26 + $0x48] sm:$0xff] %v1009_v47   ;;  %v273_v60 = vmul.f32 %v1202_v0, %v202_v46  ;;  %v404_v62 = vmax.f32 %v340_v53, 0.0  ;;  %v342_v63 = vadd.f32 %v1212_v1, %v271_v54  ;;  %v274_v3 = vmul.f32 %v1202_v0, %v203_v51  ;;  %v217_v51 = vld [vmem:[%s1207_s20 + $0x158] sm:$0xff] }
  0x29   : > { %v343_v2 = vadd.f32 %v1212_v1, %v272_v55  ;;  %1130 = vst [vmem:[%s1244_s26 + $0x50] sm:$0xff] %v1014_v57   ;;  %v1019_v5 = vpack.c.bf16 %v403_v58, %v402_v52  ;;  %v405_v6 = vmax.f32 %v341_v59, 0.0  ;;  %v275_v8 = vmul.f32 %v1202_v0, %v204_v56  ;;  %v218_v56 = vld [vmem:[%s1207_s20 + $0x160] sm:$0xff] }
  0x2a   : > { %v344_v7 = vadd.f32 %v1212_v1, %v273_v60  ;;  %v406_v10 = vmax.f32 %v342_v63, 0.0  ;;  %v345_v12 = vadd.f32 %v1212_v1, %v274_v3  ;;  %v276_v13 = vmul.f32 %v1202_v0, %v205_v61  ;;  %v219_v61 = vld [vmem:[%s1207_s20 + $0x168] sm:$0xff] }
  0x2b   : > { %v407_v11 = vmax.f32 %v343_v2, 0.0  ;;  %1131 = vst [vmem:[%s1244_s26 + $0x58] sm:$0xff] %v1019_v5   ;;  %v1024_v16 = vpack.c.bf16 %v405_v6, %v404_v62  ;;  %v346_v18 = vadd.f32 %v1212_v1, %v275_v8  ;;  %v277_v19 = vmul.f32 %v1202_v0, %v206_v4  ;;  %v220_v4 = vld [vmem:[%s1207_s20 + $0x170] sm:$0xff] }
  0x2c   : > { %v408_v17 = vmax.f32 %v344_v7, 0.0  ;;  %v409_v22 = vmax.f32 %v345_v12, 0.0  ;;  %v347_v23 = vadd.f32 %v1212_v1, %v276_v13  ;;  %v278_v24 = vmul.f32 %v1202_v0, %v207_v9  ;;  %v221_v9 = vld [vmem:[%s1207_s20 + $0x178] sm:$0xff] }
  0x2d   : > { %v1029_v21 = vpack.c.bf16 %v407_v11, %v406_v10  ;;  %1132 = vst [vmem:[%s1244_s26 + $0x60] sm:$0xff] %v1024_v16   ;;  %v410_v26 = vmax.f32 %v346_v18, 0.0  ;;  %v348_v27 = vadd.f32 %v1212_v1, %v277_v19  ;;  %v279_v28 = vmul.f32 %v1202_v0, %v208_v14  ;;  %v222_v14 = vld [vmem:[%s1207_s20 + $0x180] sm:$0xff]  ;;  %v223_v19 = vld [vmem:[%s1207_s20 + $0x188] sm:$0xff] }
  0x2e   : > { %v280_v29 = vmul.f32 %v1202_v0, %v209_v15  ;;  %v1034_v31 = vpack.c.bf16 %v409_v22, %v408_v17  ;;  %v411_v32 = vmax.f32 %v347_v23, 0.0  ;;  %v349_v33 = vadd.f32 %v1212_v1, %v278_v24  ;;  %v224_v24 = vld [vmem:[%s1207_s20 + $0x190] sm:$0xff] }
  0x2f   : > { %1133 = vst [vmem:[%s1244_s26 + $0x68] sm:$0xff] %v1029_v21   ;;  %v281_v34 = vmul.f32 %v1202_v0, %v210_v20  ;;  %v412_v36 = vmax.f32 %v348_v27, 0.0  ;;  %v350_v37 = vadd.f32 %v1212_v1, %v279_v28  ;;  %v282_v39 = vmul.f32 %v1202_v0, %v211_v25  ;;  %v225_v25 = vld [vmem:[%s1207_s20 + $0x198] sm:$0xff] }
  0x30   : > { %v351_v38 = vadd.f32 %v1212_v1, %v280_v29  ;;  %1134 = vst [vmem:[%s1244_s26 + $0x70] sm:$0xff] %v1034_v31   ;;  %v1039_v41 = vpack.c.bf16 %v411_v32, %v410_v26  ;;  %v413_v42 = vmax.f32 %v349_v33, 0.0  ;;  %v283_v44 = vmul.f32 %v1202_v0, %v212_v30  ;;  %v226_v30 = vld [vmem:[%s1207_s20 + $0x1a0] sm:$0xff] }
  0x31   : > { %v352_v43 = vadd.f32 %v1212_v1, %v281_v34  ;;  %v414_v46 = vmax.f32 %v350_v37, 0.0  ;;  %v353_v48 = vadd.f32 %v1212_v1, %v282_v39  ;;  %v284_v49 = vmul.f32 %v1202_v0, %v213_v35  ;;  %v227_v35 = vld [vmem:[%s1207_s20 + $0x1a8] sm:$0xff] }
  0x32   : > { %v415_v47 = vmax.f32 %v351_v38, 0.0  ;;  %1135 = vst [vmem:[%s1244_s26 + $0x78] sm:$0xff] %v1039_v41   ;;  %v1044_v52 = vpack.c.bf16 %v413_v42, %v412_v36  ;;  %v354_v54 = vadd.f32 %v1212_v1, %v283_v44  ;;  %v285_v55 = vmul.f32 %v1202_v0, %v214_v40  ;;  %v228_v40 = vld [vmem:[%s1207_s20 + $0x1b0] sm:$0xff] }
  0x33   : > { %v416_v53 = vmax.f32 %v352_v43, 0.0  ;;  %v417_v58 = vmax.f32 %v353_v48, 0.0  ;;  %v355_v59 = vadd.f32 %v1212_v1, %v284_v49  ;;  %v286_v60 = vmul.f32 %v1202_v0, %v215_v45  ;;  %v229_v45 = vld [vmem:[%s1207_s20 + $0x1b8] sm:$0xff] }
  0x34   : > { %v1049_v57 = vpack.c.bf16 %v415_v47, %v414_v46  ;;  %1136 = vst [vmem:[%s1244_s26 + $0x80] sm:$0xff] %v1044_v52   ;;  %v418_v62 = vmax.f32 %v354_v54, 0.0  ;;  %v356_v63 = vadd.f32 %v1212_v1, %v285_v55  ;;  %v287_v2 = vmul.f32 %v1202_v0, %v216_v50  ;;  %v230_v50 = vld [vmem:[%s1207_s20 + $0x1c0] sm:$0xff]  ;;  %v231_v55 = vld [vmem:[%s1207_s20 + $0x1c8] sm:$0xff] }
  0x35   : > { %v288_v3 = vmul.f32 %v1202_v0, %v217_v51  ;;  %v1054_v5 = vpack.c.bf16 %v417_v58, %v416_v53  ;;  %v419_v6 = vmax.f32 %v355_v59, 0.0  ;;  %v357_v7 = vadd.f32 %v1212_v1, %v286_v60  ;;  %v232_v60 = vld [vmem:[%s1207_s20 + $0x1d0] sm:$0xff] }
  0x36   : > { %1137 = vst [vmem:[%s1244_s26 + $0x88] sm:$0xff] %v1049_v57   ;;  %v289_v8 = vmul.f32 %v1202_v0, %v218_v56  ;;  %v420_v10 = vmax.f32 %v356_v63, 0.0  ;;  %v358_v11 = vadd.f32 %v1212_v1, %v287_v2  ;;  %v290_v13 = vmul.f32 %v1202_v0, %v219_v61  ;;  %v233_v61 = vld [vmem:[%s1207_s20 + $0x1d8] sm:$0xff] }
  0x37   : > { %v359_v12 = vadd.f32 %v1212_v1, %v288_v3  ;;  %1138 = vst [vmem:[%s1244_s26 + $0x90] sm:$0xff] %v1054_v5   ;;  %v1059_v15 = vpack.c.bf16 %v419_v6, %v418_v62  ;;  %v421_v16 = vmax.f32 %v357_v7, 0.0  ;;  %v291_v18 = vmul.f32 %v1202_v0, %v220_v4  ;;  %v234_v4 = vld [vmem:[%s1207_s20 + $0x1e0] sm:$0xff] }
  0x38   : > { %v360_v17 = vadd.f32 %v1212_v1, %v289_v8  ;;  %v422_v20 = vmax.f32 %v358_v11, 0.0  ;;  %v361_v22 = vadd.f32 %v1212_v1, %v290_v13  ;;  %v292_v23 = vmul.f32 %v1202_v0, %v221_v9  ;;  %v235_v9 = vld [vmem:[%s1207_s20 + $0x1e8] sm:$0xff] }
  0x39   : > { %v423_v21 = vmax.f32 %v359_v12, 0.0  ;;  %1139 = vst [vmem:[%s1244_s26 + $0x98] sm:$0xff] %v1059_v15   ;;  %v1064_v26 = vpack.c.bf16 %v421_v16, %v420_v10  ;;  %v362_v28 = vadd.f32 %v1212_v1, %v291_v18  ;;  %v293_v29 = vmul.f32 %v1202_v0, %v222_v14  ;;  %v236_v14 = vld [vmem:[%s1207_s20 + $0x1f0] sm:$0xff] }
  0x3a   : > { %v424_v27 = vmax.f32 %v360_v17, 0.0  ;;  %v425_v32 = vmax.f32 %v361_v22, 0.0  ;;  %v363_v33 = vadd.f32 %v1212_v1, %v292_v23  ;;  %v294_v34 = vmul.f32 %v1202_v0, %v223_v19  ;;  %v237_v19 = vld [vmem:[%s1207_s20 + $0x1f8] sm:$0xff] }
  0x3b   : > { %v1069_v31 = vpack.c.bf16 %v423_v21, %v422_v20  ;;  %1140 = vst [vmem:[%s1244_s26 + $0xa0] sm:$0xff] %v1064_v26   ;;  %v426_v36 = vmax.f32 %v362_v28, 0.0  ;;  %v364_v37 = vadd.f32 %v1212_v1, %v293_v29  ;;  %v295_v38 = vmul.f32 %v1202_v0, %v224_v24 }
  0x3c   : > { %v296_v39 = vmul.f32 %v1202_v0, %v225_v25  ;;  %v1074_v41 = vpack.c.bf16 %v425_v32, %v424_v27  ;;  %v427_v42 = vmax.f32 %v363_v33, 0.0  ;;  %v365_v43 = vadd.f32 %v1212_v1, %v294_v34 }
  0x3d   : > { %1141 = vst [vmem:[%s1244_s26 + $0xa8] sm:$0xff] %v1069_v31   ;;  %v297_v44 = vmul.f32 %v1202_v0, %v226_v30  ;;  %v428_v46 = vmax.f32 %v364_v37, 0.0  ;;  %v366_v47 = vadd.f32 %v1212_v1, %v295_v38  ;;  %v298_v49 = vmul.f32 %v1202_v0, %v227_v35 }
  0x3e   : > { %v367_v48 = vadd.f32 %v1212_v1, %v296_v39  ;;  %1142 = vst [vmem:[%s1244_s26 + $0xb0] sm:$0xff] %v1074_v41   ;;  %v1079_v51 = vpack.c.bf16 %v427_v42, %v426_v36  ;;  %v429_v52 = vmax.f32 %v365_v43, 0.0  ;;  %v299_v54 = vmul.f32 %v1202_v0, %v228_v40 }
  0x3f   : > { %v368_v53 = vadd.f32 %v1212_v1, %v297_v44  ;;  %v430_v56 = vmax.f32 %v366_v47, 0.0  ;;  %v369_v58 = vadd.f32 %v1212_v1, %v298_v49  ;;  %v300_v59 = vmul.f32 %v1202_v0, %v229_v45 }
  0x40   : > { %v431_v57 = vmax.f32 %v367_v48, 0.0  ;;  %1143 = vst [vmem:[%s1244_s26 + $0xb8] sm:$0xff] %v1079_v51   ;;  %v1084_v62 = vpack.c.bf16 %v429_v52, %v428_v46  ;;  %v370_v2 = vadd.f32 %v1212_v1, %v299_v54  ;;  %v301_v3 = vmul.f32 %v1202_v0, %v230_v50 }
  0x41   : > { %v432_v63 = vmax.f32 %v368_v53, 0.0  ;;  %v433_v6 = vmax.f32 %v369_v58, 0.0  ;;  %v371_v7 = vadd.f32 %v1212_v1, %v300_v59  ;;  %v302_v8 = vmul.f32 %v1202_v0, %v231_v55 }
  0x42   : > { %v1089_v5 = vpack.c.bf16 %v431_v57, %v430_v56  ;;  %1144 = vst [vmem:[%s1244_s26 + $0xc0] sm:$0xff] %v1084_v62   ;;  %v434_v10 = vmax.f32 %v370_v2, 0.0  ;;  %v372_v11 = vadd.f32 %v1212_v1, %v301_v3  ;;  %v303_v12 = vmul.f32 %v1202_v0, %v232_v60 }
  0x43   : > { %v304_v13 = vmul.f32 %v1202_v0, %v233_v61  ;;  %v1094_v15 = vpack.c.bf16 %v433_v6, %v432_v63  ;;  %v435_v16 = vmax.f32 %v371_v7, 0.0  ;;  %v373_v17 = vadd.f32 %v1212_v1, %v302_v8 }
  0x44   : > { %1145 = vst [vmem:[%s1244_s26 + $0xc8] sm:$0xff] %v1089_v5   ;;  %v305_v18 = vmul.f32 %v1202_v0, %v234_v4  ;;  %v436_v20 = vmax.f32 %v372_v11, 0.0  ;;  %v374_v21 = vadd.f32 %v1212_v1, %v303_v12  ;;  %v306_v23 = vmul.f32 %v1202_v0, %v235_v9 }
  0x45   : > { %v375_v22 = vadd.f32 %v1212_v1, %v304_v13  ;;  %1146 = vst [vmem:[%s1244_s26 + $0xd0] sm:$0xff] %v1094_v15   ;;  %v1099_v24 = vpack.c.bf16 %v435_v16, %v434_v10  ;;  %v437_v25 = vmax.f32 %v373_v17, 0.0  ;;  %v307_v27 = vmul.f32 %v1202_v0, %v236_v14 }
  0x46   : > { %v376_v26 = vadd.f32 %v1212_v1, %v305_v18  ;;  %v438_v28 = vmax.f32 %v374_v21, 0.0  ;;  %v377_v30 = vadd.f32 %v1212_v1, %v306_v23  ;;  %v308_v31 = vmul.f32 %v1202_v0, %v237_v19 }
  0x47   : > { %v439_v29 = vmax.f32 %v375_v22, 0.0  ;;  %1147 = vst [vmem:[%s1244_s26 + $0xd8] sm:$0xff] %v1099_v24   ;;  %v1104_v32 = vpack.c.bf16 %v437_v25, %v436_v20  ;;  %v378_v34 = vadd.f32 %v1212_v1, %v307_v27 }
  0x48   : > { %v440_v33 = vmax.f32 %v376_v26, 0.0  ;;  %v441_v36 = vmax.f32 %v377_v30, 0.0  ;;  %v379_v37 = vadd.f32 %v1212_v1, %v308_v31 }
  0x49   : > { %v1109_v35 = vpack.c.bf16 %v439_v29, %v438_v28  ;;  %1148 = vst [vmem:[%s1244_s26 + $0xe0] sm:$0xff] %v1104_v32   ;;  %v442_v38 = vmax.f32 %v378_v34, 0.0 }
  0x4a   : > { %v1114_v39 = vpack.c.bf16 %v441_v36, %v440_v33  ;;  %v443_v40 = vmax.f32 %v379_v37, 0.0 }
  0x4b   : > { %1149 = vst [vmem:[%s1244_s26 + $0xe8] sm:$0xff] %v1109_v35  }
  0x4c   : > { %1150 = vst [vmem:[%s1244_s26 + $0xf0] sm:$0xff] %v1114_v39   ;;  %v1119_v41 = vpack.c.bf16 %v443_v40, %v442_v38 }
  0x4e   : > { %1151 = vst [vmem:[%s1244_s26 + $0xf8] sm:$0xff] %v1119_v41  }
  0x4f PF: > { %s13_s12 = sadd.s32 1, %s1166_s12  }
  0x50   : > { %p10_p4 = scmp.ge.s32.totalorder %s13_s12, 6  }
  0x52   :  { %12 = sbr.rel (!%p10_p4) target bundleno = 1 (0x1), region = 62 }

// kernel: unet_hrpxp_forward.52
= control target key start
LH: loop header
LB: loop body
LE: loop exit
PB: predicated region body
PF: predicated region fallthrough
CT: control target
= control target key end

     0   :  { %s613_s12 = smov 0   ;;  %s871_s0 = inlined_call_operand.vmem [shape: f32[2048,128], index: 0, kind: input, shape index: {}]   ;;  %s872_s1 = inlined_call_operand.vmem [shape: f32[1,128], index: 1, kind: input, shape index: {}]   ;;  %s873_s2 = inlined_call_operand.vmem [shape: f32[1,128], index: 2, kind: input, shape index: {}]   ;;  %s874_s3 = inlined_call_operand.vmem [shape: bf16[2048,128], index: 3, kind: output, shape index: {}]  }
   0x1 LB: > { %s564_s13 = sadd.s32 4294967295, %s591_s12   ;;  %p568_p0 = scmp.ge.s32.totalorder %s591_s12, 1  ;;  %s591_s12 = sphi %s613_s12, %s13_s12  }
   0x2   : > { %p138_p1 = scmp.lt.s32.totalorder %s591_s12, 5 }
   0x4   : > { %p139_p2 = pnand %p568_p0, %p138_p1 }
   0x5   : > { %s569_s14 = sshll.u32 (!%p139_p2), %s564_s13, 6  ;;  %s571_s15 = sshll.u32 (!%p139_p2), %s564_s13, 5  ;;  %v626_v0 = vld [vmem:[%s872_s1] ss:$0 sm:$0xff] (!%p139_p2) }
   0x6   : > { %142 = sbr.rel (%p139_p2) target bundleno = 79 (0x4f), region = 32  ;;  %p163_p3 = scmp.lt.s32.totalorder (!%p139_p2), %s569_s14, 255  ;;  %v636_v1 = vld [vmem:[%s873_s2] ss:$0 sm:$0xff] (!%p139_p2) }
   0x7   : > { %p169_p4 = scmp.lt.s32.totalorder (!%p139_p2), %s571_s15, 127 }
   0xd   : > { %s876_s14 = smov (!%p163_p3, %s569_s14), 255  ;;  %s878_s15 = smov (!%p169_p4, %s571_s15), 127 }
   0xe   : > { %s570_s16 = sshll.u32 %s876_s14, 3  ;;  %s572_s24 = sshll.u32 %s878_s15, 3 }
   0xf   : > { %s631_s21 = scalar_lea.vmem %s871_s0, %s570_s16  ;;  %s668_s27 = scalar_lea.vmem %s874_s3, %s572_s24 }
  0x10   : > { %v174_v2 = vld [vmem:[%s631_s21] sm:$0xff]  ;;  %v175_v3 = vld [vmem:[%s631_s21 + $0x8] sm:$0xff]  ;;  %v176_v4 = vld [vmem:[%s631_s21 + $0x10] sm:$0xff] }
  0x11   : > { %v245_v5 = vmul.f32 %v626_v0, %v174_v2  ;;  %v246_v6 = vmul.f32 %v626_v0, %v175_v3  ;;  %v177_v7 = vld [vmem:[%s631_s21 + $0x18] sm:$0xff]  ;;  %v247_v8 = vmul.f32 %v626_v0, %v176_v4  ;;  %v178_v9 = vld [vmem:[%s631_s21 + $0x20] sm:$0xff]  ;;  %v179_v10 = vld [vmem:[%s631_s21 + $0x28] sm:$0xff] }
  0x12   : > { %v248_v11 = vmul.f32 %v626_v0, %v177_v7  ;;  %v249_v12 = vmul.f32 %v626_v0, %v178_v9  ;;  %v250_v13 = vmul.f32 %v626_v0, %v179_v10  ;;  %v180_v14 = vld [vmem:[%s631_s21 + $0x30] sm:$0xff]  ;;  %v181_v15 = vld [vmem:[%s631_s21 + $0x38] sm:$0xff]  ;;  %v182_v24 = vld [vmem:[%s631_s21 + $0x40] sm:$0xff] }
  0x13   : > { %v316_v16 = vadd.f32 %v636_v1, %v245_v5  ;;  %v317_v17 = vadd.f32 %v636_v1, %v246_v6  ;;  %v318_v18 = vadd.f32 %v636_v1, %v247_v8  ;;  %v251_v19 = vmul.f32 %v626_v0, %v180_v14  ;;  %v183_v25 = vld [vmem:[%s631_s21 + $0x48] sm:$0xff]  ;;  %v184_v30 = vld [vmem:[%s631_s21 + $0x50] sm:$0xff]  ;;  %v185_v35 = vld [vmem:[%s631_s21 + $0x58] sm:$0xff] }
  0x14   : > { %v319_v20 = vadd.f32 %v636_v1, %v248_v11  ;;  %v320_v21 = vadd.f32 %v636_v1, %v249_v12  ;;  %v321_v22 = vadd.f32 %v636_v1, %v250_v13  ;;  %v252_v23 = vmul.f32 %v626_v0, %v181_v15  ;;  %v186_v36 = vld [vmem:[%s631_s21 + $0x60] sm:$0xff]  ;;  %v187_v41 = vld [vmem:[%s631_s21 + $0x68] sm:$0xff]  ;;  %v188_v42 = vld [vmem:[%s631_s21 + $0x70] sm:$0xff] }
  0x15   : > { %v380_v26 = vmax.f32 %v316_v16, 0.0  ;;  %v381_v27 = vmax.f32 %v317_v17, 0.0  ;;  %v382_v28 = vmax.f32 %v318_v18, 0.0  ;;  %v322_v29 = vadd.f32 %v636_v1, %v251_v19  ;;  %v189_v51 = vld [vmem:[%s631_s21 + $0x78] sm:$0xff]  ;;  %v190_v56 = vld [vmem:[%s631_s21 + $0x80] sm:$0xff]  ;;  %v191_v61 = vld [vmem:[%s631_s21 + $0x88] sm:$0xff] }
  0x16   : > { %v383_v31 = vmax.f32 %v319_v20, 0.0  ;;  %v384_v32 = vmax.f32 %v320_v21, 0.0  ;;  %v385_v33 = vmax.f32 %v321_v22, 0.0  ;;  %v323_v34 = vadd.f32 %v636_v1, %v252_v23  ;;  %v192_v4 = vld [vmem:[%s631_s21 + $0x90] sm:$0xff]  ;;  %v193_v5 = vld [vmem:[%s631_s21 + $0x98] sm:$0xff]  ;;  %v194_v10 = vld [vmem:[%s631_s21 + $0xa0] sm:$0xff] }
  0x17   : > { %v444_v37 = vpack.c.bf16 %v381_v27, %v380_v26  ;;  %v386_v38 = vmax.f32 %v322_v29, 0.0  ;;  %v253_v39 = vmul.f32 %v626_v0, %v182_v24  ;;  %v254_v40 = vmul.f32 %v626_v0, %v183_v25  ;;  %v195_v15 = vld [vmem:[%s631_s21 + $0xa8] sm:$0xff]  ;;  %v196_v20 = vld [vmem:[%s631_s21 + $0xb0] sm:$0xff]  ;;  %v197_v25 = vld [vmem:[%s631_s21 + $0xb8] sm:$0xff] }
  0x18   : > { %v445_v43 = vpack.c.bf16 %v383_v31, %v382_v28  ;;  %v446_v44 = vpack.c.bf16 %v385_v33, %v384_v32  ;;  %v387_v45 = vmax.f32 %v323_v34, 0.0  ;;  %v255_v46 = vmul.f32 %v626_v0, %v184_v30  ;;  %v198_v30 = vld [vmem:[%s631_s21 + $0xc0] sm:$0xff] }
  0x19   : > { %476 = vst [vmem:[%s668_s27] sm:$0xff] %v444_v37  ;;  %v324_v47 = vadd.f32 %v636_v1, %v253_v39  ;;  %v325_v48 = vadd.f32 %v636_v1, %v254_v40  ;;  %v256_v49 = vmul.f32 %v626_v0, %v185_v35  ;;  %v257_v50 = vmul.f32 %v626_v0, %v186_v36  ;;  %v199_v35 = vld [vmem:[%s631_s21 + $0xc8] sm:$0xff]  ;;  %v200_v40 = vld [vmem:[%s631_s21 + $0xd0] sm:$0xff] }
  0x1a   : > { %477 = vst [vmem:[%s668_s27 + $0x8] sm:$0xff] %v445_v43  ;;  %478 = vst [vmem:[%s668_s27 + $0x10] sm:$0xff] %v446_v44  ;;  %v447_v52 = vpack.c.bf16 %v387_v45, %v386_v38  ;;  %v326_v53 = vadd.f32 %v636_v1, %v255_v46  ;;  %v258_v54 = vmul.f32 %v626_v0, %v187_v41  ;;  %v201_v41 = vld [vmem:[%s631_s21 + $0xd8] sm:$0xff]  ;;  %v202_v46 = vld [vmem:[%s631_s21 + $0xe0] sm:$0xff] }
  0x1b   : > { %v259_v55 = vmul.f32 %v626_v0, %v188_v42  ;;  %v388_v57 = vmax.f32 %v324_v47, 0.0  ;;  %v389_v58 = vmax.f32 %v325_v48, 0.0  ;;  %v327_v59 = vadd.f32 %v636_v1, %v256_v49 }
  0x1c   : > { %v328_v60 = vadd.f32 %v636_v1, %v257_v50  ;;  %479 = vst [vmem:[%s668_s27 + $0x18] sm:$0xff] %v447_v52  ;;  %v390_v62 = vmax.f32 %v326_v53, 0.0  ;;  %v329_v63 = vadd.f32 %v636_v1, %v258_v54  ;;  %v260_v2 = vmul.f32 %v626_v0, %v189_v51  ;;  %v203_v51 = vld [vmem:[%s631_s21 + $0xe8] sm:$0xff] }
  0x1d   : > { %v330_v3 = vadd.f32 %v636_v1, %v259_v55  ;;  %v448_v6 = vpack.c.bf16 %v389_v58, %v388_v57  ;;  %v391_v7 = vmax.f32 %v327_v59, 0.0  ;;  %v261_v9 = vmul.f32 %v626_v0, %v190_v56  ;;  %v204_v56 = vld [vmem:[%s631_s21 + $0xf0] sm:$0xff] }
  0x1e   : > { %v392_v8 = vmax.f32 %v328_v60, 0.0  ;;  %v393_v11 = vmax.f32 %v329_v63, 0.0  ;;  %v331_v12 = vadd.f32 %v636_v1, %v260_v2  ;;  %v262_v14 = vmul.f32 %v626_v0, %v191_v61  ;;  %v205_v61 = vld [vmem:[%s631_s21 + $0xf8] sm:$0xff] }
  0x1f   : > { %v394_v13 = vmax.f32 %v330_v3, 0.0  ;;  %480 = vst [vmem:[%s668_s27 + $0x20] sm:$0xff] %v448_v6  ;;  %v449_v16 = vpack.c.bf16 %v391_v7, %v390_v62  ;;  %v332_v17 = vadd.f32 %v636_v1, %v261_v9  ;;  %v263_v18 = vmul.f32 %v626_v0, %v192_v4  ;;  %v206_v4 = vld [vmem:[%s631_s21 + $0x100] sm:$0xff]  ;;  %v207_v9 = vld [vmem:[%s631_s21 + $0x108] sm:$0xff] }
  0x20   : > { %v264_v19 = vmul.f32 %v626_v0, %v193_v5  ;;  %v450_v21 = vpack.c.bf16 %v393_v11, %v392_v8  ;;  %v395_v22 = vmax.f32 %v331_v12, 0.0  ;;  %v333_v23 = vadd.f32 %v636_v1, %v262_v14  ;;  %v208_v14 = vld [vmem:[%s631_s21 + $0x110] sm:$0xff] }
  0x21   : > { %v265_v24 = vmul.f32 %v626_v0, %v194_v10  ;;  %481 = vst [vmem:[%s668_s27 + $0x28] sm:$0xff] %v449_v16  ;;  %v396_v26 = vmax.f32 %v332_v17, 0.0  ;;  %v334_v27 = vadd.f32 %v636_v1, %v263_v18  ;;  %v266_v29 = vmul.f32 %v626_v0, %v195_v15  ;;  %v209_v15 = vld [vmem:[%s631_s21 + $0x118] sm:$0xff] }
  0x22   : > { %v335_v28 = vadd.f32 %v636_v1, %v264_v19  ;;  %482 = vst [vmem:[%s668_s27 + $0x30] sm:$0xff] %v450_v21  ;;  %v451_v31 = vpack.c.bf16 %v395_v22, %v394_v13  ;;  %v397_v32 = vmax.f32 %v333_v23, 0.0  ;;  %v267_v34 = vmul.f32 %v626_v0, %v196_v20  ;;  %v210_v20 = vld [vmem:[%s631_s21 + $0x120] sm:$0xff] }
  0x23   : > { %v336_v33 = vadd.f32 %v636_v1, %v265_v24  ;;  %v398_v36 = vmax.f32 %v334_v27, 0.0  ;;  %v337_v38 = vadd.f32 %v636_v1, %v266_v29  ;;  %v268_v39 = vmul.f32 %v626_v0, %v197_v25  ;;  %v211_v25 = vld [vmem:[%s631_s21 + $0x128] sm:$0xff] }
  0x24   : > { %v399_v37 = vmax.f32 %v335_v28, 0.0  ;;  %483 = vst [vmem:[%s668_s27 + $0x38] sm:$0xff] %v451_v31  ;;  %v452_v42 = vpack.c.bf16 %v397_v32, %v396_v26  ;;  %v338_v44 = vadd.f32 %v636_v1, %v267_v34  ;;  %v269_v45 = vmul.f32 %v626_v0, %v198_v30  ;;  %v212_v30 = vld [vmem:[%s631_s21 + $0x130] sm:$0xff] }
  0x25   : > { %v400_v43 = vmax.f32 %v336_v33, 0.0  ;;  %v401_v48 = vmax.f32 %v337_v38, 0.0  ;;  %v339_v49 = vadd.f32 %v636_v1, %v268_v39  ;;  %v270_v50 = vmul.f32 %v626_v0, %v199_v35  ;;  %v213_v35 = vld [vmem:[%s631_s21 + $0x138] sm:$0xff] }
  0x26   : > { %v453_v47 = vpack.c.bf16 %v399_v37, %v398_v36  ;;  %484 = vst [vmem:[%s668_s27 + $0x40] sm:$0xff] %v452_v42  ;;  %v402_v52 = vmax.f32 %v338_v44, 0.0  ;;  %v340_v53 = vadd.f32 %v636_v1, %v269_v45  ;;  %v271_v54 = vmul.f32 %v626_v0, %v200_v40  ;;  %v214_v40 = vld [vmem:[%s631_s21 + $0x140] sm:$0xff]  ;;  %v215_v45 = vld [vmem:[%s631_s21 + $0x148] sm:$0xff] }
  0x27   : > { %v272_v55 = vmul.f32 %v626_v0, %v201_v41  ;;  %v454_v57 = vpack.c.bf16 %v401_v48, %v400_v43  ;;  %v403_v58 = vmax.f32 %v339_v49, 0.0  ;;  %v341_v59 = vadd.f32 %v636_v1, %v270_v50  ;;  %v216_v50 = vld [vmem:[%s631_s21 + $0x150] sm:$0xff] }
  0x28   : > { %485 = vst [vmem:[%s668_s27 + $0x48] sm:$0xff] %v453_v47  ;;  %v273_v60 = vmul.f32 %v626_v0, %v202_v46  ;;  %v404_v62 = vmax.f32 %v340_v53, 0.0  ;;  %v342_v63 = vadd.f32 %v636_v1, %v271_v54  ;;  %v274_v3 = vmul.f32 %v626_v0, %v203_v51  ;;  %v217_v51 = vld [vmem:[%s631_s21 + $0x158] sm:$0xff] }
  0x29   : > { %v343_v2 = vadd.f32 %v636_v1, %v272_v55  ;;  %486 = vst [vmem:[%s668_s27 + $0x50] sm:$0xff] %v454_v57  ;;  %v455_v5 = vpack.c.bf16 %v403_v58, %v402_v52  ;;  %v405_v6 = vmax.f32 %v341_v59, 0.0  ;;  %v275_v8 = vmul.f32 %v626_v0, %v204_v56  ;;  %v218_v56 = vld [vmem:[%s631_s21 + $0x160] sm:$0xff] }
  0x2a   : > { %v344_v7 = vadd.f32 %v636_v1, %v273_v60  ;;  %v406_v10 = vmax.f32 %v342_v63, 0.0  ;;  %v345_v12 = vadd.f32 %v636_v1, %v274_v3  ;;  %v276_v13 = vmul.f32 %v626_v0, %v205_v61  ;;  %v219_v61 = vld [vmem:[%s631_s21 + $0x168] sm:$0xff] }
  0x2b   : > { %v407_v11 = vmax.f32 %v343_v2, 0.0  ;;  %487 = vst [vmem:[%s668_s27 + $0x58] sm:$0xff] %v455_v5  ;;  %v456_v16 = vpack.c.bf16 %v405_v6, %v404_v62  ;;  %v346_v18 = vadd.f32 %v636_v1, %v275_v8  ;;  %v277_v19 = vmul.f32 %v626_v0, %v206_v4  ;;  %v220_v4 = vld [vmem:[%s631_s21 + $0x170] sm:$0xff] }
  0x2c   : > { %v408_v17 = vmax.f32 %v344_v7, 0.0  ;;  %v409_v22 = vmax.f32 %v345_v12, 0.0  ;;  %v347_v23 = vadd.f32 %v636_v1, %v276_v13  ;;  %v278_v24 = vmul.f32 %v626_v0, %v207_v9  ;;  %v221_v9 = vld [vmem:[%s631_s21 + $0x178] sm:$0xff] }
  0x2d   : > { %v457_v21 = vpack.c.bf16 %v407_v11, %v406_v10  ;;  %488 = vst [vmem:[%s668_s27 + $0x60] sm:$0xff] %v456_v16  ;;  %v410_v26 = vmax.f32 %v346_v18, 0.0  ;;  %v348_v27 = vadd.f32 %v636_v1, %v277_v19  ;;  %v279_v28 = vmul.f32 %v626_v0, %v208_v14  ;;  %v222_v14 = vld [vmem:[%s631_s21 + $0x180] sm:$0xff]  ;;  %v223_v19 = vld [vmem:[%s631_s21 + $0x188] sm:$0xff] }
  0x2e   : > { %v280_v29 = vmul.f32 %v626_v0, %v209_v15  ;;  %v458_v31 = vpack.c.bf16 %v409_v22, %v408_v17  ;;  %v411_v32 = vmax.f32 %v347_v23, 0.0  ;;  %v349_v33 = vadd.f32 %v636_v1, %v278_v24  ;;  %v224_v24 = vld [vmem:[%s631_s21 + $0x190] sm:$0xff] }
  0x2f   : > { %489 = vst [vmem:[%s668_s27 + $0x68] sm:$0xff] %v457_v21  ;;  %v281_v34 = vmul.f32 %v626_v0, %v210_v20  ;;  %v412_v36 = vmax.f32 %v348_v27, 0.0  ;;  %v350_v37 = vadd.f32 %v636_v1, %v279_v28  ;;  %v282_v39 = vmul.f32 %v626_v0, %v211_v25  ;;  %v225_v25 = vld [vmem:[%s631_s21 + $0x198] sm:$0xff] }
  0x30   : > { %v351_v38 = vadd.f32 %v636_v1, %v280_v29  ;;  %490 = vst [vmem:[%s668_s27 + $0x70] sm:$0xff] %v458_v31  ;;  %v459_v41 = vpack.c.bf16 %v411_v32, %v410_v26  ;;  %v413_v42 = vmax.f32 %v349_v33, 0.0  ;;  %v283_v44 = vmul.f32 %v626_v0, %v212_v30  ;;  %v226_v30 = vld [vmem:[%s631_s21 + $0x1a0] sm:$0xff] }
  0x31   : > { %v352_v43 = vadd.f32 %v636_v1, %v281_v34  ;;  %v414_v46 = vmax.f32 %v350_v37, 0.0  ;;  %v353_v48 = vadd.f32 %v636_v1, %v282_v39  ;;  %v284_v49 = vmul.f32 %v626_v0, %v213_v35  ;;  %v227_v35 = vld [vmem:[%s631_s21 + $0x1a8] sm:$0xff] }
  0x32   : > { %v415_v47 = vmax.f32 %v351_v38, 0.0  ;;  %491 = vst [vmem:[%s668_s27 + $0x78] sm:$0xff] %v459_v41  ;;  %v460_v52 = vpack.c.bf16 %v413_v42, %v412_v36  ;;  %v354_v54 = vadd.f32 %v636_v1, %v283_v44  ;;  %v285_v55 = vmul.f32 %v626_v0, %v214_v40  ;;  %v228_v40 = vld [vmem:[%s631_s21 + $0x1b0] sm:$0xff] }
  0x33   : > { %v416_v53 = vmax.f32 %v352_v43, 0.0  ;;  %v417_v58 = vmax.f32 %v353_v48, 0.0  ;;  %v355_v59 = vadd.f32 %v636_v1, %v284_v49  ;;  %v286_v60 = vmul.f32 %v626_v0, %v215_v45  ;;  %v229_v45 = vld [vmem:[%s631_s21 + $0x1b8] sm:$0xff] }
  0x34   : > { %v461_v57 = vpack.c.bf16 %v415_v47, %v414_v46  ;;  %492 = vst [vmem:[%s668_s27 + $0x80] sm:$0xff] %v460_v52  ;;  %v418_v62 = vmax.f32 %v354_v54, 0.0  ;;  %v356_v63 = vadd.f32 %v636_v1, %v285_v55  ;;  %v287_v2 = vmul.f32 %v626_v0, %v216_v50  ;;  %v230_v50 = vld [vmem:[%s631_s21 + $0x1c0] sm:$0xff]  ;;  %v231_v55 = vld [vmem:[%s631_s21 + $0x1c8] sm:$0xff] }
  0x35   : > { %v288_v3 = vmul.f32 %v626_v0, %v217_v51  ;;  %v462_v5 = vpack.c.bf16 %v417_v58, %v416_v53  ;;  %v419_v6 = vmax.f32 %v355_v59, 0.0  ;;  %v357_v7 = vadd.f32 %v636_v1, %v286_v60  ;;  %v232_v60 = vld [vmem:[%s631_s21 + $0x1d0] sm:$0xff] }
  0x36   : > { %493 = vst [vmem:[%s668_s27 + $0x88] sm:$0xff] %v461_v57  ;;  %v289_v8 = vmul.f32 %v626_v0, %v218_v56  ;;  %v420_v10 = vmax.f32 %v356_v63, 0.0  ;;  %v358_v11 = vadd.f32 %v636_v1, %v287_v2  ;;  %v290_v13 = vmul.f32 %v626_v0, %v219_v61  ;;  %v233_v61 = vld [vmem:[%s631_s21 + $0x1d8] sm:$0xff] }
  0x37   : > { %v359_v12 = vadd.f32 %v636_v1, %v288_v3  ;;  %494 = vst [vmem:[%s668_s27 + $0x90] sm:$0xff] %v462_v5  ;;  %v463_v15 = vpack.c.bf16 %v419_v6, %v418_v62  ;;  %v421_v16 = vmax.f32 %v357_v7, 0.0  ;;  %v291_v18 = vmul.f32 %v626_v0, %v220_v4  ;;  %v234_v4 = vld [vmem:[%s631_s21 + $0x1e0] sm:$0xff] }
  0x38   : > { %v360_v17 = vadd.f32 %v636_v1, %v289_v8  ;;  %v422_v20 = vmax.f32 %v358_v11, 0.0  ;;  %v361_v22 = vadd.f32 %v636_v1, %v290_v13  ;;  %v292_v23 = vmul.f32 %v626_v0, %v221_v9  ;;  %v235_v9 = vld [vmem:[%s631_s21 + $0x1e8] sm:$0xff] }
  0x39   : > { %v423_v21 = vmax.f32 %v359_v12, 0.0  ;;  %495 = vst [vmem:[%s668_s27 + $0x98] sm:$0xff] %v463_v15  ;;  %v464_v26 = vpack.c.bf16 %v421_v16, %v420_v10  ;;  %v362_v28 = vadd.f32 %v636_v1, %v291_v18  ;;  %v293_v29 = vmul.f32 %v626_v0, %v222_v14  ;;  %v236_v14 = vld [vmem:[%s631_s21 + $0x1f0] sm:$0xff] }
  0x3a   : > { %v424_v27 = vmax.f32 %v360_v17, 0.0  ;;  %v425_v32 = vmax.f32 %v361_v22, 0.0  ;;  %v363_v33 = vadd.f32 %v636_v1, %v292_v23  ;;  %v294_v34 = vmul.f32 %v626_v0, %v223_v19  ;;  %v237_v19 = vld [vmem:[%s631_s21 + $0x1f8] sm:$0xff] }
  0x3b   : > { %v465_v31 = vpack.c.bf16 %v423_v21, %v422_v20  ;;  %496 = vst [vmem:[%s668_s27 + $0xa0] sm:$0xff] %v464_v26  ;;  %v426_v36 = vmax.f32 %v362_v28, 0.0  ;;  %v364_v37 = vadd.f32 %v636_v1, %v293_v29  ;;  %v295_v38 = vmul.f32 %v626_v0, %v224_v24 }
  0x3c   : > { %v296_v39 = vmul.f32 %v626_v0, %v225_v25  ;;  %v466_v41 = vpack.c.bf16 %v425_v32, %v424_v27  ;;  %v427_v42 = vmax.f32 %v363_v33, 0.0  ;;  %v365_v43 = vadd.f32 %v636_v1, %v294_v34 }
  0x3d   : > { %497 = vst [vmem:[%s668_s27 + $0xa8] sm:$0xff] %v465_v31  ;;  %v297_v44 = vmul.f32 %v626_v0, %v226_v30  ;;  %v428_v46 = vmax.f32 %v364_v37, 0.0  ;;  %v366_v47 = vadd.f32 %v636_v1, %v295_v38  ;;  %v298_v49 = vmul.f32 %v626_v0, %v227_v35 }
  0x3e   : > { %v367_v48 = vadd.f32 %v636_v1, %v296_v39  ;;  %498 = vst [vmem:[%s668_s27 + $0xb0] sm:$0xff] %v466_v41  ;;  %v467_v51 = vpack.c.bf16 %v427_v42, %v426_v36  ;;  %v429_v52 = vmax.f32 %v365_v43, 0.0  ;;  %v299_v54 = vmul.f32 %v626_v0, %v228_v40 }
  0x3f   : > { %v368_v53 = vadd.f32 %v636_v1, %v297_v44  ;;  %v430_v56 = vmax.f32 %v366_v47, 0.0  ;;  %v369_v58 = vadd.f32 %v636_v1, %v298_v49  ;;  %v300_v59 = vmul.f32 %v626_v0, %v229_v45 }
  0x40   : > { %v431_v57 = vmax.f32 %v367_v48, 0.0  ;;  %499 = vst [vmem:[%s668_s27 + $0xb8] sm:$0xff] %v467_v51  ;;  %v468_v62 = vpack.c.bf16 %v429_v52, %v428_v46  ;;  %v370_v2 = vadd.f32 %v636_v1, %v299_v54  ;;  %v301_v3 = vmul.f32 %v626_v0, %v230_v50 }
  0x41   : > { %v432_v63 = vmax.f32 %v368_v53, 0.0  ;;  %v433_v6 = vmax.f32 %v369_v58, 0.0  ;;  %v371_v7 = vadd.f32 %v636_v1, %v300_v59  ;;  %v302_v8 = vmul.f32 %v626_v0, %v231_v55 }
  0x42   : > { %v469_v5 = vpack.c.bf16 %v431_v57, %v430_v56  ;;  %500 = vst [vmem:[%s668_s27 + $0xc0] sm:$0xff] %v468_v62  ;;  %v434_v10 = vmax.f32 %v370_v2, 0.0  ;;  %v372_v11 = vadd.f32 %v636_v1, %v301_v3  ;;  %v303_v12 = vmul.f32 %v626_v0, %v232_v60 }
  0x43   : > { %v304_v13 = vmul.f32 %v626_v0, %v233_v61  ;;  %v470_v15 = vpack.c.bf16 %v433_v6, %v432_v63  ;;  %v435_v16 = vmax.f32 %v371_v7, 0.0  ;;  %v373_v17 = vadd.f32 %v636_v1, %v302_v8 }
  0x44   : > { %501 = vst [vmem:[%s668_s27 + $0xc8] sm:$0xff] %v469_v5  ;;  %v305_v18 = vmul.f32 %v626_v0, %v234_v4  ;;  %v436_v20 = vmax.f32 %v372_v11, 0.0  ;;  %v374_v21 = vadd.f32 %v636_v1, %v303_v12  ;;  %v306_v23 = vmul.f32 %v626_v0, %v235_v9 }
  0x45   : > { %v375_v22 = vadd.f32 %v636_v1, %v304_v13  ;;  %502 = vst [vmem:[%s668_s27 + $0xd0] sm:$0xff] %v470_v15  ;;  %v471_v24 = vpack.c.bf16 %v435_v16, %v434_v10  ;;  %v437_v25 = vmax.f32 %v373_v17, 0.0  ;;  %v307_v27 = vmul.f32 %v626_v0, %v236_v14 }
  0x46   : > { %v376_v26 = vadd.f32 %v636_v1, %v305_v18  ;;  %v438_v28 = vmax.f32 %v374_v21, 0.0  ;;  %v377_v30 = vadd.f32 %v636_v1, %v306_v23  ;;  %v308_v31 = vmul.f32 %v626_v0, %v237_v19 }
  0x47   : > { %v439_v29 = vmax.f32 %v375_v22, 0.0  ;;  %503 = vst [vmem:[%s668_s27 + $0xd8] sm:$0xff] %v471_v24  ;;  %v472_v32 = vpack.c.bf16 %v437_v25, %v436_v20  ;;  %v378_v34 = vadd.f32 %v636_v1, %v307_v27 }
  0x48   : > { %v440_v33 = vmax.f32 %v376_v26, 0.0  ;;  %v441_v36 = vmax.f32 %v377_v30, 0.0  ;;  %v379_v37 = vadd.f32 %v636_v1, %v308_v31 }
  0x49   : > { %v473_v35 = vpack.c.bf16 %v439_v29, %v438_v28  ;;  %504 = vst [vmem:[%s668_s27 + $0xe0] sm:$0xff] %v472_v32  ;;  %v442_v38 = vmax.f32 %v378_v34, 0.0 }
  0x4a   : > { %v474_v39 = vpack.c.bf16 %v441_v36, %v440_v33  ;;  %v443_v40 = vmax.f32 %v379_v37, 0.0 }
  0x4b   : > { %505 = vst [vmem:[%s668_s27 + $0xe8] sm:$0xff] %v473_v35 }
  0x4c   : > { %506 = vst [vmem:[%s668_s27 + $0xf0] sm:$0xff] %v474_v39  ;;  %v475_v41 = vpack.c.bf16 %v443_v40, %v442_v38 }
  0x4e   : > { %507 = vst [vmem:[%s668_s27 + $0xf8] sm:$0xff] %v475_v41 }
  0x4f PF: > { %s13_s12 = sadd.s32 1, %s591_s12  }
  0x50   : > { %p10_p5 = scmp.ge.s32.totalorder %s13_s12, 6  }
  0x52   :  { %12 = sbr.rel (!%p10_p5) target bundleno = 1 (0x1), region = 62 }

// kernel: unet_hrpxp_forward.97
= control target key start
LH: loop header
LB: loop body
LE: loop exit
PB: predicated region body
PF: predicated region fallthrough
CT: control target
= control target key end

     0   :  { %s1111_s12 = smov 0   ;;  %s1113_s13 = smov 0   ;;  %s1261_s0 = inlined_call_operand.vmem [shape: bf16[2048,128], index: 0, kind: input, shape index: {}]   ;;  %s1262_s1 = inlined_call_operand.vmem [shape: bf16[128,128], index: 1, kind: input, shape index: {}]   ;;  %s1263_s2 = inlined_call_operand.vmem [shape: f32[1,128], index: 2, kind: input, shape index: {}]   ;;  %s1264_s3 = inlined_call_operand.vmem [shape: f32[2048,128], index: 3, kind: output, shape index: {}]  }
   0x1   :  { %s1115_s14 = smov 0  }
   0x2 LB: > { %s25_s15 = sadd.s32 1, %s1085_s13  ;;  %p899_p0 = scmp.ge.s32.totalorder %s1089_s14, 1  ;;  %s1089_s14 = sphi %s1115_s14, %s13_s14   ;;  %s1085_s13 = sphi %s1113_s13, %s1266_s13   ;;  %s1081_s12 = sphi %s1111_s12, %s1265_s12  }
   0x3   : > { %p27_p1 = scmp.ge.s32.totalorder %s25_s15, 8  ;;  %p166_p2 = scmp.lt.s32.totalorder %s1089_s14, 9 }
   0x5   : > { %s1268_s15 = smov (%p27_p1, %s25_s15), 0  ;;  %p167_p3 = pnand %p899_p0, %p166_p2 }
   0x6   : > { %v1043_v0 = vld [vmem:[%s1262_s1] sm:$0xff] (!%p167_p3)   ;;  %s900_s18 = sshll.u32 (!%p167_p3), %s1081_s12, 5  ;;  %v1044_v1 = vld [vmem:[%s1262_s1 + $0x8] sm:$0xff] (!%p167_p3)   ;;  %v1045_v2 = vld [vmem:[%s1262_s1 + $0x10] sm:$0xff] (!%p167_p3)  }
   0x7   : > { %170 = sbr.rel (%p167_p3) target bundleno = 281 (0x119), region = 32  ;;  %p199_p4 = scmp.lt.s32.totalorder (!%p167_p3), %s900_s18, 255  ;;  %955 = vmatprep.subr.bf16.mxu0 (!%p167_p3), %v1043_v0  ;;  %1003 = vmatprep.subr.bf16.mxu1 (!%p167_p3), %v1043_v0  ;;  %v1046_v3 = vld [vmem:[%s1262_s1 + $0x18] sm:$0xff] (!%p167_p3)   ;;  %v1047_v6 = vld [vmem:[%s1262_s1 + $0x20] sm:$0xff] (!%p167_p3)   ;;  %v1048_v7 = vld [vmem:[%s1262_s1 + $0x28] sm:$0xff] (!%p167_p3)  }
   0x8   : > { %956 = vmatpush3.bf16.msra.mxu0 (!%p167_p3), %v1043_v0  ;;  %1011 = vmatpush3.bf16.msra.mxu1 (!%p167_p3), %v1043_v0  ;;  %v1049_v8 = vld [vmem:[%s1262_s1 + $0x30] sm:$0xff] (!%p167_p3)   ;;  %v1050_v9 = vld [vmem:[%s1262_s1 + $0x38] sm:$0xff] (!%p167_p3)   ;;  %v1181_v24 = vld [vmem:[%s1263_s2] ss:$0 sm:$0xff] (!%p167_p3) }
   0x9   : > { %957 = vmatprep.subr.bf16.mxu0 (!%p167_p3), %v1044_v1  ;;  %1004 = vmatprep.subr.bf16.mxu1 (!%p167_p3), %v1044_v1 }
   0xc   : > { %958 = vmatpush3.bf16.msra.mxu0 (!%p167_p3), %v1044_v1  ;;  %1012 = vmatpush3.bf16.msra.mxu1 (!%p167_p3), %v1044_v1 }
   0xd   : > { %959 = vmatprep.subr.bf16.mxu0 (!%p167_p3), %v1045_v2  ;;  %1005 = vmatprep.subr.bf16.mxu1 (!%p167_p3), %v1045_v2 }
   0xe   : > { %s1270_s18 = smov (!%p199_p4, %s900_s18), 255 }
   0xf   : > { %s901_s23 = sshll.u32 %s1270_s18, 2  ;;  %s903_s10 = sshll.u32 %s1270_s18, 3 }
  0x10   : > { %s1144_s26 = scalar_lea.vmem %s1261_s0, %s901_s23  ;;  %960 = vmatpush3.bf16.msra.mxu0 %v1045_v2  ;;  %1013 = vmatpush3.bf16.msra.mxu1 %v1045_v2  ;;  %s1186_s19 = scalar_lea.vmem %s1264_s3, %s903_s10 }
  0x11   : > { %v1051_v4 = vld [vmem:[%s1144_s26] sm:$0xff]   ;;  %961 = vmatprep.subr.bf16.mxu0 %v1046_v3  ;;  %1006 = vmatprep.subr.bf16.mxu1 %v1046_v3  ;;  %v1053_v10 = vld [vmem:[%s1144_s26 + $0x8] sm:$0xff]   ;;  %v1055_v12 = vld [vmem:[%s1144_s26 + $0x10] sm:$0xff]  }
  0x12   : > { %v1052_v5 = vld [vmem:[%s1144_s26 + $0x40] sm:$0xff]   ;;  %971 = vmatprep.mubr.bf16.mxu0 %v1051_v4  ;;  %v1054_v11 = vld [vmem:[%s1144_s26 + $0x48] sm:$0xff]   ;;  %v1056_v13 = vld [vmem:[%s1144_s26 + $0x50] sm:$0xff]  }
  0x13   : > { %987 = vmatprep.mubr.bf16.mxu1 %v1052_v5  ;;  %v1057_v14 = vld [vmem:[%s1144_s26 + $0x18] sm:$0xff]   ;;  %v1059_v16 = vld [vmem:[%s1144_s26 + $0x20] sm:$0xff]   ;;  %v1061_v18 = vld [vmem:[%s1144_s26 + $0x28] sm:$0xff]  }
  0x14   : > { %962 = vmatpush3.bf16.msra.mxu0 %v1046_v3  ;;  %1014 = vmatpush3.bf16.msra.mxu1 %v1046_v3  ;;  %v1058_v15 = vld [vmem:[%s1144_s26 + $0x58] sm:$0xff]   ;;  %v1060_v17 = vld [vmem:[%s1144_s26 + $0x60] sm:$0xff]   ;;  %v1062_v19 = vld [vmem:[%s1144_s26 + $0x68] sm:$0xff]  }
  0x15   : > { %963 = vmatprep.subr.bf16.mxu0 %v1047_v6  ;;  %1007 = vmatprep.subr.bf16.mxu1 %v1047_v6  ;;  %v1063_v20 = vld [vmem:[%s1144_s26 + $0x30] sm:$0xff]   ;;  %v1065_v22 = vld [vmem:[%s1144_s26 + $0x38] sm:$0xff]  }
  0x16   : > { %v1064_v21 = vld [vmem:[%s1144_s26 + $0x70] sm:$0xff]   ;;  %v1066_v23 = vld [vmem:[%s1144_s26 + $0x78] sm:$0xff]  }
  0x18   : > { %964 = vmatpush3.bf16.msra.mxu0 %v1047_v6  ;;  %1015 = vmatpush3.bf16.msra.mxu1 %v1047_v6 }
  0x19   : > { %965 = vmatprep.subr.bf16.mxu0 %v1048_v7  ;;  %1008 = vmatprep.subr.bf16.mxu1 %v1048_v7 }
  0x1c   : > { %966 = vmatpush3.bf16.msra.mxu0 %v1048_v7  ;;  %1016 = vmatpush3.bf16.msra.mxu1 %v1048_v7 }
  0x1d   : > { %967 = vmatprep.subr.bf16.mxu0 %v1049_v8  ;;  %1009 = vmatprep.subr.bf16.mxu1 %v1049_v8 }
  0x20   : > { %968 = vmatpush3.bf16.msra.mxu0 %v1049_v8  ;;  %1017 = vmatpush3.bf16.msra.mxu1 %v1049_v8 }
  0x21   : > { %969 = vmatprep.subr.bf16.mxu0 %v1050_v9  ;;  %1010 = vmatprep.subr.bf16.mxu1 %v1050_v9 }
  0x24   : > { %970 = vmatpush3.bf16.msra.mxu0 %v1050_v9  ;;  %1018 = vmatpush3.bf16.msra.mxu1 %v1050_v9 }
  0x27   : > { %972 = vmatmul.mubr.bf16.vlgmr.msra.gmra.mrb[0].mxu0 %v1053_v10  ;;  %988 = vmatmul.mubr.bf16.vlgmr.msra.gmra.mrb[0].mxu1 %v1054_v11 }
  0x28   : > { %975 = vmatprep.mubr.bf16.mxu0 %v1055_v12  ;;  %991 = vmatprep.mubr.bf16.mxu1 %v1056_v13 }
  0x2f   : > { %976 = vmatmul.mubr.bf16.gmra.mrb[4].mxu0 %v1057_v14  ;;  %992 = vmatmul.mubr.bf16.gmra.mrb[4].mxu1 %v1058_v15 }
  0x30   : > { %979 = vmatprep.mubr.bf16.mxu0 %v1059_v16  ;;  %995 = vmatprep.mubr.bf16.mxu1 %v1060_v17 }
  0x37   : > { %980 = vmatmul.mubr.bf16.gmra.mrb[8].mxu0 %v1061_v18  ;;  %996 = vmatmul.mubr.bf16.gmra.mrb[8].mxu1 %v1062_v19 }
  0x38   : > { %983 = vmatprep.mubr.bf16.mxu0 %v1063_v20  ;;  %999 = vmatprep.mubr.bf16.mxu1 %v1064_v21 }
  0x3f   : > { %984 = vmatmul.mubr.bf16.gmra.mrb[12].mxu0 %v1065_v22  ;;  %1000 = vmatmul.mubr.bf16.gmra.mrb[12].mxu1 %v1066_v23 }
  0xfa   : > { %v973_v25 = vpop.f32.mrb[0].mxu0  ;;  %v989_v26 = vpop.f32.mrb[0].mxu1 }
  0xfb   : > { %v749_v27 = vadd.f32 %v973_v25, %v1181_v24  ;;  %v765_v28 = vadd.f32 %v989_v26, %v1181_v24  ;;  %v514_v29 = vpop.f32.mrb[1].mxu0  ;;  %v578_v30 = vpop.f32.mrb[1].mxu1 }
  0xfc   : > { %v747_v31 = vadd.f32 %v1181_v24, %v514_v29  ;;  %v763_v32 = vadd.f32 %v1181_v24, %v578_v30  ;;  %v974_v33 = vpop.f32.mrb[2].mxu0  ;;  %v990_v34 = vpop.f32.mrb[2].mxu1 }
  0xfd   : > { %781 = vst [vmem:[%s1186_s19 + $0x10] sm:$0xff] %v749_v27  ;;  %797 = vst [vmem:[%s1186_s19 + $0x90] sm:$0xff] %v765_v28  ;;  %v750_v35 = vadd.f32 %v974_v33, %v1181_v24  ;;  %v766_v36 = vadd.f32 %v990_v34, %v1181_v24  ;;  %v517_v37 = vpop.f32.mrb[3].mxu0  ;;  %v581_v38 = vpop.f32.mrb[3].mxu1 }
  0xfe   : > { %779 = vst [vmem:[%s1186_s19] sm:$0xff] %v747_v31  ;;  %795 = vst [vmem:[%s1186_s19 + $0x80] sm:$0xff] %v763_v32  ;;  %v748_v39 = vadd.f32 %v1181_v24, %v517_v37  ;;  %v764_v40 = vadd.f32 %v1181_v24, %v581_v38 }
  0xff   : > { %782 = vst [vmem:[%s1186_s19 + $0x18] sm:$0xff] %v750_v35  ;;  %798 = vst [vmem:[%s1186_s19 + $0x98] sm:$0xff] %v766_v36 }
 0x100   : > { %780 = vst [vmem:[%s1186_s19 + $0x8] sm:$0xff] %v748_v39  ;;  %796 = vst [vmem:[%s1186_s19 + $0x88] sm:$0xff] %v764_v40 }
 0x102   : > { %v977_v41 = vpop.f32.mrb[4].mxu0  ;;  %v993_v42 = vpop.f32.mrb[4].mxu1 }
 0x103   : > { %v753_v43 = vadd.f32 %v977_v41, %v1181_v24  ;;  %v769_v44 = vadd.f32 %v993_v42, %v1181_v24  ;;  %v530_v45 = vpop.f32.mrb[5].mxu0  ;;  %v594_v46 = vpop.f32.mrb[5].mxu1 }
 0x104   : > { %v751_v47 = vadd.f32 %v1181_v24, %v530_v45  ;;  %v767_v48 = vadd.f32 %v1181_v24, %v594_v46  ;;  %v978_v49 = vpop.f32.mrb[6].mxu0  ;;  %v994_v50 = vpop.f32.mrb[6].mxu1 }
 0x105   : > { %785 = vst [vmem:[%s1186_s19 + $0x30] sm:$0xff] %v753_v43  ;;  %801 = vst [vmem:[%s1186_s19 + $0xb0] sm:$0xff] %v769_v44  ;;  %v754_v51 = vadd.f32 %v978_v49, %v1181_v24  ;;  %v770_v52 = vadd.f32 %v994_v50, %v1181_v24  ;;  %v533_v53 = vpop.f32.mrb[7].mxu0  ;;  %v597_v54 = vpop.f32.mrb[7].mxu1 }
 0x106   : > { %783 = vst [vmem:[%s1186_s19 + $0x20] sm:$0xff] %v751_v47  ;;  %799 = vst [vmem:[%s1186_s19 + $0xa0] sm:$0xff] %v767_v48  ;;  %v752_v55 = vadd.f32 %v1181_v24, %v533_v53  ;;  %v768_v56 = vadd.f32 %v1181_v24, %v597_v54 }
 0x107   : > { %786 = vst [vmem:[%s1186_s19 + $0x38] sm:$0xff] %v754_v51  ;;  %802 = vst [vmem:[%s1186_s19 + $0xb8] sm:$0xff] %v770_v52 }
 0x108   : > { %784 = vst [vmem:[%s1186_s19 + $0x28] sm:$0xff] %v752_v55  ;;  %800 = vst [vmem:[%s1186_s19 + $0xa8] sm:$0xff] %v768_v56 }
 0x10a   : > { %v981_v57 = vpop.f32.mrb[8].mxu0  ;;  %v997_v58 = vpop.f32.mrb[8].mxu1 }
 0x10b   : > { %v757_v59 = vadd.f32 %v981_v57, %v1181_v24  ;;  %v773_v60 = vadd.f32 %v997_v58, %v1181_v24  ;;  %v546_v61 = vpop.f32.mrb[9].mxu0  ;;  %v610_v62 = vpop.f32.mrb[9].mxu1 }
 0x10c   : > { %v755_v63 = vadd.f32 %v1181_v24, %v546_v61  ;;  %v771_v0 = vadd.f32 %v1181_v24, %v610_v62  ;;  %v982_v1 = vpop.f32.mrb[10].mxu0  ;;  %v998_v2 = vpop.f32.mrb[10].mxu1 }
 0x10d   : > { %789 = vst [vmem:[%s1186_s19 + $0x50] sm:$0xff] %v757_v59  ;;  %805 = vst [vmem:[%s1186_s19 + $0xd0] sm:$0xff] %v773_v60  ;;  %v758_v3 = vadd.f32 %v982_v1, %v1181_v24  ;;  %v774_v4 = vadd.f32 %v998_v2, %v1181_v24  ;;  %v549_v5 = vpop.f32.mrb[11].mxu0  ;;  %v613_v6 = vpop.f32.mrb[11].mxu1 }
 0x10e   : > { %787 = vst [vmem:[%s1186_s19 + $0x40] sm:$0xff] %v755_v63  ;;  %803 = vst [vmem:[%s1186_s19 + $0xc0] sm:$0xff] %v771_v0  ;;  %v756_v7 = vadd.f32 %v1181_v24, %v549_v5  ;;  %v772_v8 = vadd.f32 %v1181_v24, %v613_v6 }
 0x10f   : > { %790 = vst [vmem:[%s1186_s19 + $0x58] sm:$0xff] %v758_v3  ;;  %806 = vst [vmem:[%s1186_s19 + $0xd8] sm:$0xff] %v774_v4 }
 0x110   : > { %788 = vst [vmem:[%s1186_s19 + $0x48] sm:$0xff] %v756_v7  ;;  %804 = vst [vmem:[%s1186_s19 + $0xc8] sm:$0xff] %v772_v8 }
 0x112   : > { %v985_v9 = vpop.f32.mrb[12].mxu0  ;;  %v1001_v10 = vpop.f32.mrb[12].mxu1 }
 0x113   : > { %v761_v11 = vadd.f32 %v985_v9, %v1181_v24  ;;  %v777_v12 = vadd.f32 %v1001_v10, %v1181_v24  ;;  %v562_v13 = vpop.f32.mrb[13].mxu0  ;;  %v626_v14 = vpop.f32.mrb[13].mxu1 }
 0x114   : > { %v759_v15 = vadd.f32 %v1181_v24, %v562_v13  ;;  %v775_v16 = vadd.f32 %v1181_v24, %v626_v14  ;;  %v986_v17 = vpop.f32.mrb[14].mxu0  ;;  %v1002_v18 = vpop.f32.mrb[14].mxu1 }
 0x115   : > { %793 = vst [vmem:[%s1186_s19 + $0x70] sm:$0xff] %v761_v11  ;;  %809 = vst [vmem:[%s1186_s19 + $0xf0] sm:$0xff] %v777_v12  ;;  %v762_v19 = vadd.f32 %v986_v17, %v1181_v24  ;;  %v778_v20 = vadd.f32 %v1002_v18, %v1181_v24  ;;  %v565_v21 = vpop.f32.mrb[15].mxu0  ;;  %v629_v22 = vpop.f32.mrb[15].mxu1 }
 0x116   : > { %791 = vst [vmem:[%s1186_s19 + $0x60] sm:$0xff] %v759_v15  ;;  %807 = vst [vmem:[%s1186_s19 + $0xe0] sm:$0xff] %v775_v16  ;;  %v760_v23 = vadd.f32 %v1181_v24, %v565_v21  ;;  %v776_v25 = vadd.f32 %v1181_v24, %v629_v22 }
 0x117   : > { %794 = vst [vmem:[%s1186_s19 + $0x78] sm:$0xff] %v762_v19  ;;  %810 = vst [vmem:[%s1186_s19 + $0xf8] sm:$0xff] %v778_v20 }
 0x118   : > { %792 = vst [vmem:[%s1186_s19 + $0x68] sm:$0xff] %v760_v23  ;;  %808 = vst [vmem:[%s1186_s19 + $0xe8] sm:$0xff] %v776_v25 }
 0x119 PF: > { %s13_s14 = sadd.s32 1, %s1089_s14   ;;  %s1265_s12 = smov %s1085_s13 }
 0x11a   : > { %p10_p5 = scmp.ge.s32.totalorder %s13_s14, 10   ;;  %s1266_s13 = smov %s1268_s15 }
 0x11c   :  { %12 = sbr.rel (!%p10_p5) target bundleno = 2 (0x2), region = 73 }

</bundles_post_ra>
